<compile_context>
chip_gen: v7x
topology: tpu7x:2x2x1
jax: 0.10.0
libtpu: 0.0.40
codegen_flags: <defaults>
</compile_context>

<pallas_src>
import functools
import math

import jax
import jax.numpy as jnp
from jax.experimental import pallas as pl
from jax.experimental.pallas import tpu as pltpu


LANE = 128


def _round_up(x, m):
    return ((x + m - 1) // m) * m


# ----------------------------------------------------------------------------
# Pallas kernels: GEMM + bias (BN scale pre-folded into W) (+ residual) (+ReLU)
# ----------------------------------------------------------------------------

def _gemm_bias_act_kernel(a_ref, w_ref, bias_ref, o_ref, *, relu):
    acc = jnp.dot(a_ref[...], w_ref[...], preferred_element_type=jnp.float32)
    y = acc + bias_ref[...]
    if relu:
        y = jnp.maximum(y, 0.0)
    o_ref[...] = y.astype(o_ref.dtype)


def _gemm_bias_res_act_kernel(a_ref, w_ref, bias_ref, r_ref, o_ref, *, relu):
    acc = jnp.dot(a_ref[...], w_ref[...], preferred_element_type=jnp.float32)
    y = acc + bias_ref[...] + r_ref[...].astype(jnp.float32)
    if relu:
        y = jnp.maximum(y, 0.0)
    o_ref[...] = y.astype(o_ref.dtype)


# ----------------------------------------------------------------------------
# Generation-aware M tiling
# ----------------------------------------------------------------------------

_NUM_TC = None


def _num_tc():
    """Best-effort TensorCore-per-chip count (2 on v7x, else 1)."""
    global _NUM_TC
    if _NUM_TC is None:
        n = 1
        try:
            kind = jax.devices()[0].device_kind.lower()
            if "v7" in kind:
                n = 2
        except Exception:
            n = 1
        _NUM_TC = n
    return _NUM_TC


def _choose_tiling(m):
    """Adaptive M tile (multiple of 16, capped at 512).

    On single-TC chips (v5e/v6e) the grid is a serial loop, so use as few
    tiles as possible; on 2-TC v7x force >=2 tiles so both cores get work.
    """
    if m <= 16:
        tile_m = 16
    elif _num_tc() > 1:
        ntiles = max(2, -(-m // 512))
        tile_m = _round_up(-(-m // ntiles), 16)
    else:
        ntiles = -(-m // 512)
        tile_m = _round_up(-(-m // ntiles), 16)
    return tile_m, _round_up(m, tile_m)


def matmul_bias_act(a, p, relu, residual=None, out_dtype=jnp.bfloat16):
    """a:(M,K) @ packed weight (Kp,Np) bf16, fused bias/residual/ReLU.

    Returns (M, cout) of `out_dtype`; Np is a 128-multiple so all stores are
    lane-dense (unmasked vst).  Padded lanes are exactly zero end-to-end
    (weights, bias, residual pads are zero) and sliced off outside.
    """
    M, K = a.shape
    Kp, Np = p["wm"].shape
    cout = p["cout"]
    tile_m, Mp = _choose_tiling(M)

    a = a.astype(jnp.bfloat16)
    if Mp != M or Kp != K:
        a = jnp.pad(a, ((0, Mp - M), (0, Kp - K)))

    args = [a, p["wm"], p["bias"]]
    in_specs = [
        pl.BlockSpec((tile_m, Kp), lambda i: (i, 0)),
        pl.BlockSpec((Kp, Np), lambda i: (0, 0)),
        pl.BlockSpec((1, Np), lambda i: (0, 0)),
    ]
    out_itemsize = jnp.dtype(out_dtype).itemsize
    bytes_accessed = Mp * Kp * 2 + Kp * Np * 2 + Np * 4 + Mp * Np * out_itemsize

    if residual is not None:
        r = residual.astype(jnp.bfloat16)
        r = jnp.pad(r, ((0, Mp - M), (0, Np - r.shape[1])))
        args.append(r)
        in_specs.append(pl.BlockSpec((tile_m, Np), lambda i: (i, 0)))
        bytes_accessed += Mp * Np * 2
        kernel = functools.partial(_gemm_bias_res_act_kernel, relu=relu)
    else:
        kernel = functools.partial(_gemm_bias_act_kernel, relu=relu)

    out = pl.pallas_call(
        kernel,
        out_shape=jax.ShapeDtypeStruct((Mp, Np), out_dtype),
        grid=(Mp // tile_m,),
        in_specs=in_specs,
        out_specs=pl.BlockSpec((tile_m, Np), lambda i: (i, 0)),
        compiler_params=pltpu.CompilerParams(dimension_semantics=("parallel",)),
        cost_estimate=pl.CostEstimate(
            flops=2 * Mp * Kp * Np, transcendentals=0,
            bytes_accessed=bytes_accessed),
    )(*args)
    return out[:M, :cout]


# ----------------------------------------------------------------------------
# Conv-as-matmul glue (im2col in plain JAX/bf16, GEMM in Pallas)
# ----------------------------------------------------------------------------

def _im2col(x, kh, kw, stride, padding, dilation):
    B, H, W, C = x.shape
    xp = jnp.pad(x, ((0, 0), (padding, padding), (padding, padding), (0, 0)))
    Ho = (H + 2 * padding - dilation * (kh - 1) - 1) // stride + 1
    Wo = (W + 2 * padding - dilation * (kw - 1) - 1) // stride + 1
    cols = []
    for i in range(kh):
        for j in range(kw):
            hs, ws = i * dilation, j * dilation
            cols.append(jax.lax.slice(
                xp, (0, hs, ws, 0),
                (B, hs + (Ho - 1) * stride + 1, ws + (Wo - 1) * stride + 1, C),
                (1, stride, stride, 1)))
    return jnp.concatenate(cols, axis=-1), Ho, Wo


def conv_bn_act(x, p, stride=1, padding=0, dilation=1, relu=True, residual=None,
                out_dtype=jnp.bfloat16):
    """Conv2d + folded eval-mode BN + optional fused residual + optional ReLU."""
    B = x.shape[0]
    kh, kw, cin, cout = p["kh"], p["kw"], p["cin"], p["cout"]
    xb = x.astype(jnp.bfloat16)          # bf16 glue: halves im2col HBM traffic
    if kh == 1 and kw == 1 and stride == 1 and padding == 0 and dilation == 1:
        Ho, Wo = x.shape[1], x.shape[2]
        a = xb.reshape(B * Ho * Wo, cin)
    else:
        patches, Ho, Wo = _im2col(xb, kh, kw, stride, padding, dilation)
        a = patches.reshape(B * Ho * Wo, kh * kw * cin)
    res = None
    if residual is not None:
        res = residual.reshape(B * Ho * Wo, residual.shape[-1])
    out = matmul_bias_act(a, p, relu, residual=res, out_dtype=out_dtype)
    return out.reshape(B, Ho, Wo, cout)


def maxpool3x3_s2(x):
    """ResNet stem maxpool (k=3, s=2, p=1) as a pairwise max tree (no 9x stack)."""
    B, H, W, C = x.shape
    xp = jnp.pad(x, ((0, 0), (1, 1), (1, 1), (0, 0)), constant_values=-jnp.inf)
    Ho = (H + 2 - 3) // 2 + 1
    Wo = (W + 2 - 3) // 2 + 1
    out = None
    for i in range(3):
        for j in range(3):
            win = jax.lax.slice(
                xp, (0, i, j, 0),
                (B, i + (Ho - 1) * 2 + 1, j + (Wo - 1) * 2 + 1, C),
                (1, 2, 2, 1))
            out = win if out is None else jnp.maximum(out, win)
    return out


def bilinear_resize(x, h, w):
    # TODO(synk): jax.image.resize 'bilinear' (half-pixel) matches
    # F.interpolate(align_corners=False); align_corners=True parity not done.
    B, H, W, C = x.shape
    return jax.image.resize(x, (B, h, w, C), method="bilinear")


# ----------------------------------------------------------------------------
# Deterministic parameter construction (pre-padded, BN-scale-folded bf16 W)
# ----------------------------------------------------------------------------

class KeyGen:
    def __init__(self, key):
        self.key = key

    def __call__(self):
        self.key, k = jax.random.split(self.key)
        return k


def _pack_conv(w, scale, bias):
    """Fold BN scale into W, zero-pad K to 16 and N to 128, cast W to bf16."""
    kh, kw, cin, cout = w.shape
    K = kh * kw * cin
    Kp = _round_up(K, 16)                 # bf16 sublane-friendly K
    Np = _round_up(cout, LANE)            # lane-dense N (unmasked stores)
    wm = w.reshape(K, cout) * scale[None, :]
    wm = jnp.pad(wm, ((0, Kp - K), (0, Np - cout)))
    return {
        "wm": wm.astype(jnp.bfloat16),
        "bias": jnp.pad(bias, (0, Np - cout)).reshape(1, Np).astype(jnp.float32),
        "kh": kh, "kw": kw, "cin": cin, "cout": cout,
    }


def _raw_conv_bn(kg, kh, kw, cin, cout):
    fan_in = kh * kw * cin
    w = jax.random.normal(kg(), (kh, kw, cin, cout), jnp.float32) / math.sqrt(fan_in)
    scale = 1.0 + 0.1 * jax.random.normal(kg(), (cout,), jnp.float32)   # BN folded
    bias = 0.1 * jax.random.normal(kg(), (cout,), jnp.float32)
    return w, scale, bias


def init_conv_bn(kg, kh, kw, cin, cout):
    return _pack_conv(*_raw_conv_bn(kg, kh, kw, cin, cout))


def init_conv_bias(kg, kh, kw, cin, cout):
    """Plain conv with bias (classifier): no BN, scale == 1."""
    fan_in = kh * kw * cin
    w = jax.random.normal(kg(), (kh, kw, cin, cout), jnp.float32) / math.sqrt(fan_in)
    bias = 0.1 * jax.random.normal(kg(), (cout,), jnp.float32)
    return _pack_conv(w, jnp.ones((cout,), jnp.float32), bias)


def init_basic_block(kg, cin, cout, stride):
    p = {"conv1": init_conv_bn(kg, 3, 3, cin, cout),
         "conv2": init_conv_bn(kg, 3, 3, cout, cout)}
    if stride != 1 or cin != cout:
        p["down"] = init_conv_bn(kg, 1, 1, cin, cout)
    return p


def init_backbone(kg, widths):
    w1, w2, w3, w4 = widths
    return {
        "stem": init_conv_bn(kg, 7, 7, 3, w1),
        "layer1": [init_basic_block(kg, w1, w1, 1), init_basic_block(kg, w1, w1, 1)],
        "layer2": [init_basic_block(kg, w1, w2, 2), init_basic_block(kg, w2, w2, 1)],
        "layer3": [init_basic_block(kg, w2, w3, 2), init_basic_block(kg, w3, w3, 1)],
        "layer4": [init_basic_block(kg, w3, w4, 2), init_basic_block(kg, w4, w4, 1)],
    }


ASPP_RATES = (6, 12, 18)


def init_segment(kg, aspp_in, aspp_out, low_in, low_red, num_classes):
    # Raw ASPP branch weights so the degenerate-dilation fused 1x1 GEMM shares
    # the exact same underlying parameters as the per-branch path.
    b0 = _raw_conv_bn(kg, 1, 1, aspp_in, aspp_out)
    b1 = _raw_conv_bn(kg, 3, 3, aspp_in, aspp_out)
    b2 = _raw_conv_bn(kg, 3, 3, aspp_in, aspp_out)
    b3 = _raw_conv_bn(kg, 3, 3, aspp_in, aspp_out)
    # Fused degenerate form: 1x1 weights = [b0 | center-tap(b1) | ... ] along N.
    fused_w = jnp.concatenate(
        [b0[0], b1[0][1:2, 1:2], b2[0][1:2, 1:2], b3[0][1:2, 1:2]], axis=-1)
    fused_scale = jnp.concatenate([b0[1], b1[1], b2[1], b3[1]])
    fused_bias = jnp.concatenate([b0[2], b1[2], b2[2], b3[2]])
    return {
        "aspp_b0": _pack_conv(*b0),
        "aspp_b1": _pack_conv(*b1),
        "aspp_b2": _pack_conv(*b2),
        "aspp_b3": _pack_conv(*b3),
        "aspp_fused": _pack_conv(fused_w, fused_scale, fused_bias),
        "aspp_pool": init_conv_bn(kg, 1, 1, aspp_in, aspp_out),
        "aspp_proj": init_conv_bn(kg, 1, 1, 5 * aspp_out, aspp_out),
        "low_proj": init_conv_bn(kg, 1, 1, low_in, low_red),
        "dec1": init_conv_bn(kg, 3, 3, aspp_out + low_red, aspp_out),
        "dec2": init_conv_bn(kg, 3, 3, aspp_out, aspp_out),
        "cls": init_conv_bias(kg, 1, 1, aspp_out, num_classes),
    }


# ----------------------------------------------------------------------------
# Forward passes: VisualNet(resnet18) backbone and DeepLabV3Plus head
# ----------------------------------------------------------------------------

def basic_block(x, p, stride):
    out = conv_bn_act(x, p["conv1"], stride=stride, padding=1, relu=True)
    if "down" in p:
        identity = conv_bn_act(x, p["down"], stride=stride, relu=False)
    else:
        identity = x
    # conv2 + BN + residual-add + ReLU fused in one Pallas GEMM epilogue.
    return conv_bn_act(out, p["conv2"], stride=1, padding=1, relu=True,
                       residual=identity)


def backbone_forward(x, p):
    x = conv_bn_act(x, p["stem"], stride=2, padding=3, relu=True)
    x = maxpool3x3_s2(x)
    for blk in p["layer1"]:
        x = basic_block(x, blk, 1)
    low = x                                        # low-level feature (stride 4)
    x = basic_block(x, p["layer2"][0], 2)
    x = basic_block(x, p["layer2"][1], 1)
    x = basic_block(x, p["layer3"][0], 2)
    x = basic_block(x, p["layer3"][1], 1)
    x = basic_block(x, p["layer4"][0], 2)
    x = basic_block(x, p["layer4"][1], 1)
    return low, x                                  # high-level feature (stride 32)


def segment_forward(low, high, p, out_hw):
    B, Hh, Wh, _ = high.shape
    # ASPP.  When every dilation rate exceeds the feature-map extent, all
    # off-center taps of the dilated 3x3 convs land in zero padding, so the
    # four non-pool branches are exactly one fused 1x1 GEMM (lane-dense N=256).
    if ASPP_RATES[0] >= Hh and ASPP_RATES[0] >= Wh:
        x_aspp = conv_bn_act(high, p["aspp_fused"], relu=True)
    else:
        b0 = conv_bn_act(high, p["aspp_b0"], relu=True)
        b1 = conv_bn_act(high, p["aspp_b1"], padding=ASPP_RATES[0], dilation=ASPP_RATES[0])
        b2 = conv_bn_act(high, p["aspp_b2"], padding=ASPP_RATES[1], dilation=ASPP_RATES[1])
        b3 = conv_bn_act(high, p["aspp_b3"], padding=ASPP_RATES[2], dilation=ASPP_RATES[2])
        x_aspp = jnp.concatenate([b0, b1, b2, b3], axis=-1)
    # Global-average-pool branch: (B,1,1,C) -- let XLA fuse the mean, keep
    # only the 1x1 conv in Pallas.
    pooled = jnp.mean(high.astype(jnp.float32), axis=(1, 2), keepdims=True)
    pooled = conv_bn_act(pooled, p["aspp_pool"], relu=True)
    pooled = jnp.broadcast_to(pooled, (B, Hh, Wh, pooled.shape[-1]))
    x = jnp.concatenate([x_aspp, pooled], axis=-1)
    x = conv_bn_act(x, p["aspp_proj"], relu=True)   # dropout = identity (eval)
    # Decoder
    lowp = conv_bn_act(low, p["low_proj"], relu=True)
    x = bilinear_resize(x, lowp.shape[1], lowp.shape[2])
    x = jnp.concatenate([x, lowp], axis=-1)
    x = conv_bn_act(x, p["dec1"], padding=1, relu=True)
    x = conv_bn_act(x, p["dec2"], padding=1, relu=True)
    # 1x1 classifier (bias, no BN): keep logits in f32.
    logits = conv_bn_act(x, p["cls"], relu=False, out_dtype=jnp.float32)
    return bilinear_resize(logits, out_hw[0], out_hw[1])


def visual_model_forward(image_nchw, params):
    """VisualModel.forward: backbone -> segment head. NCHW in, NCHW out."""
    x = jnp.transpose(image_nchw, (0, 2, 3, 1))     # NCHW -> NHWC
    low, high = backbone_forward(x, params["backbone"])
    out = segment_forward(low, high, params["segment"], (x.shape[1], x.shape[2]))
    return jnp.transpose(out, (0, 3, 1, 2))         # NHWC -> NCHW


# ----------------------------------------------------------------------------

if __name__ == "__main__":
    # ResNet18 widths / 8, dim(=aspp_out) 512/8, low-level reduction 48/8.
    WIDTHS = (8, 16, 32, 64)
    DIM = 64
    LOW_RED = 6
    NUM_CLASSES = 2

    kg = KeyGen(jax.random.PRNGKey(0))
    params = {
        "backbone": init_backbone(kg, WIDTHS),
        "segment": init_segment(kg, aspp_in=WIDTHS[3], aspp_out=DIM,
                                low_in=WIDTHS[0], low_red=LOW_RED,
                                num_classes=NUM_CLASSES),
    }

    image = jax.random.normal(jax.random.PRNGKey(0), (2, 3, 64, 64), jnp.float32)

    fwd = jax.jit(lambda img: visual_model_forward(img, params))
    out = jax.block_until_ready(fwd(image))
    assert out.shape == (2, NUM_CLASSES, 64, 64), out.shape
    assert out.dtype == jnp.float32
    print("KERNEL_OK")
</pallas_src>

<mosaic_0001>
module attributes {stable_mosaic.version = 11 : i64} {
  func.func @_gemm_bias_act_kernel(%arg0: i32, %arg1: memref<512x160xbf16, #tpu.memory_space<vmem>>, %arg2: memref<160x128xbf16, #tpu.memory_space<vmem>>, %arg3: memref<1x128xf32, #tpu.memory_space<vmem>>, %arg4: memref<512x128xbf16, #tpu.memory_space<vmem>>) attributes {dimension_semantics = [#tpu.dimension_semantics<parallel>], iteration_bounds = array<i64: 4>, scalar_prefetch = 0 : i64, scratch_operands = 0 : i64, tpu.core_type = #tpu.core_type<tc>, window_params = [{transform_indices = @transform_0, window_bounds = array<i64: 512, 160>}, {pipeline_mode = #tpu.pipeline_mode<synchronous>, transform_indices = @transform_1, window_bounds = array<i64: 160, 128>}, {pipeline_mode = #tpu.pipeline_mode<synchronous>, transform_indices = @transform_2, window_bounds = array<i64: 1, 128>}, {transform_indices = @transform_3, window_bounds = array<i64: 512, 128>}]} {
    %c0 = arith.constant 0 : index
    %c0_0 = arith.constant 0 : index
    %0 = vector.load %arg1[%c0, %c0_0] : memref<512x160xbf16, #tpu.memory_space<vmem>>, vector<512x160xbf16>
    %c0_1 = arith.constant 0 : index
    %c0_2 = arith.constant 0 : index
    %1 = vector.load %arg2[%c0_1, %c0_2] : memref<160x128xbf16, #tpu.memory_space<vmem>>, vector<160x128xbf16>
    %cst = arith.constant dense<0.000000e+00> : vector<512x128xf32>
    %2 = tpu.matmul %0, %1, %cst {dimension_numbers = #tpu.dot_dimension_numbers<[1], [0], [0], [1], [0, 0, 1, 1], [], []>} : vector<512x160xbf16>, vector<160x128xbf16>, vector<512x128xf32> -> vector<512x128xf32>
    %c0_3 = arith.constant 0 : index
    %c0_4 = arith.constant 0 : index
    %3 = vector.load %arg3[%c0_3, %c0_4] : memref<1x128xf32, #tpu.memory_space<vmem>>, vector<1x128xf32>
    %4 = vector.broadcast %3 : vector<1x128xf32> to vector<512x128xf32>
    %5 = arith.addf %2, %4 : vector<512x128xf32>
    %cst_5 = arith.constant 0.000000e+00 : f32
    %6 = vector.broadcast %cst_5 : f32 to vector<512x128xf32>
    %7 = arith.maximumf %5, %6 : vector<512x128xf32>
    %8 = arith.truncf %7 : vector<512x128xf32> to vector<512x128xbf16>
    %c0_6 = arith.constant 0 : index
    %c0_7 = arith.constant 0 : index
    %9 = vector.load %arg4[%c0_6, %c0_7] : memref<512x128xbf16, #tpu.memory_space<vmem>>, vector<512x128xbf16>
    tpu.vector_store %arg4[%c0_6, %c0_7], %8 {strides = array<i32>} : memref<512x128xbf16, #tpu.memory_space<vmem>>, vector<512x128xbf16>,
    return
  }
  func.func @transform_0(%arg0: i32) -> (i32, i32) {
    %c0_i32 = arith.constant 0 : i32
    %c0_i32_0 = arith.constant 0 : i32
    return %arg0, %c0_i32 : i32, i32
  }
  func.func @transform_1(%arg0: i32) -> (i32, i32) {
    %c0_i32 = arith.constant 0 : i32
    %c0_i32_0 = arith.constant 0 : i32
    %c0_i32_1 = arith.constant 0 : i32
    return %c0_i32, %c0_i32_0 : i32, i32
  }
  func.func @transform_2(%arg0: i32) -> (i32, i32) {
    %c0_i32 = arith.constant 0 : i32
    %c0_i32_0 = arith.constant 0 : i32
    %c0_i32_1 = arith.constant 0 : i32
    return %c0_i32, %c0_i32_0 : i32, i32
  }
  func.func @transform_3(%arg0: i32) -> (i32, i32) {
    %c0_i32 = arith.constant 0 : i32
    %c0_i32_0 = arith.constant 0 : i32
    return %arg0, %c0_i32 : i32, i32
  }
}

module attributes {stable_mosaic.version = 11 : i64} {
  func.func @_gemm_bias_act_kernel(%arg0: i32, %arg1: memref<512x80xbf16, #tpu.memory_space<vmem>>, %arg2: memref<80x128xbf16, #tpu.memory_space<vmem>>, %arg3: memref<1x128xf32, #tpu.memory_space<vmem>>, %arg4: memref<512x128xbf16, #tpu.memory_space<vmem>>) attributes {dimension_semantics = [#tpu.dimension_semantics<parallel>], iteration_bounds = array<i64: 1>, scalar_prefetch = 0 : i64, scratch_operands = 0 : i64, tpu.core_type = #tpu.core_type<tc>, window_params = [{transform_indices = @transform_0, window_bounds = array<i64: 512, 80>}, {pipeline_mode = #tpu.pipeline_mode<synchronous>, transform_indices = @transform_1, window_bounds = array<i64: 80, 128>}, {pipeline_mode = #tpu.pipeline_mode<synchronous>, transform_indices = @transform_2, window_bounds = array<i64: 1, 128>}, {transform_indices = @transform_3, window_bounds = array<i64: 512, 128>}]} {
    %c0 = arith.constant 0 : index
    %c0_0 = arith.constant 0 : index
    %0 = vector.load %arg1[%c0, %c0_0] : memref<512x80xbf16, #tpu.memory_space<vmem>>, vector<512x80xbf16>
    %c0_1 = arith.constant 0 : index
    %c0_2 = arith.constant 0 : index
    %1 = vector.load %arg2[%c0_1, %c0_2] : memref<80x128xbf16, #tpu.memory_space<vmem>>, vector<80x128xbf16>
    %cst = arith.constant dense<0.000000e+00> : vector<512x128xf32>
    %2 = tpu.matmul %0, %1, %cst {dimension_numbers = #tpu.dot_dimension_numbers<[1], [0], [0], [1], [0, 0, 1, 1], [], []>} : vector<512x80xbf16>, vector<80x128xbf16>, vector<512x128xf32> -> vector<512x128xf32>
    %c0_3 = arith.constant 0 : index
    %c0_4 = arith.constant 0 : index
    %3 = vector.load %arg3[%c0_3, %c0_4] : memref<1x128xf32, #tpu.memory_space<vmem>>, vector<1x128xf32>
    %4 = vector.broadcast %3 : vector<1x128xf32> to vector<512x128xf32>
    %5 = arith.addf %2, %4 : vector<512x128xf32>
    %cst_5 = arith.constant 0.000000e+00 : f32
    %6 = vector.broadcast %cst_5 : f32 to vector<512x128xf32>
    %7 = arith.maximumf %5, %6 : vector<512x128xf32>
    %8 = arith.truncf %7 : vector<512x128xf32> to vector<512x128xbf16>
    %c0_6 = arith.constant 0 : index
    %c0_7 = arith.constant 0 : index
    %9 = vector.load %arg4[%c0_6, %c0_7] : memref<512x128xbf16, #tpu.memory_space<vmem>>, vector<512x128xbf16>
    tpu.vector_store %arg4[%c0_6, %c0_7], %8 {strides = array<i32>} : memref<512x128xbf16, #tpu.memory_space<vmem>>, vector<512x128xbf16>,
    return
  }
  func.func @transform_0(%arg0: i32) -> (i32, i32) {
    %c0_i32 = arith.constant 0 : i32
    %c0_i32_0 = arith.constant 0 : i32
    return %arg0, %c0_i32 : i32, i32
  }
  func.func @transform_1(%arg0: i32) -> (i32, i32) {
    %c0_i32 = arith.constant 0 : i32
    %c0_i32_0 = arith.constant 0 : i32
    %c0_i32_1 = arith.constant 0 : i32
    return %c0_i32, %c0_i32_0 : i32, i32
  }
  func.func @transform_2(%arg0: i32) -> (i32, i32) {
    %c0_i32 = arith.constant 0 : i32
    %c0_i32_0 = arith.constant 0 : i32
    %c0_i32_1 = arith.constant 0 : i32
    return %c0_i32, %c0_i32_0 : i32, i32
  }
  func.func @transform_3(%arg0: i32) -> (i32, i32) {
    %c0_i32 = arith.constant 0 : i32
    %c0_i32_0 = arith.constant 0 : i32
    return %arg0, %c0_i32 : i32, i32
  }
}

module attributes {stable_mosaic.version = 11 : i64} {
  func.func @_gemm_bias_res_act_kernel(%arg0: i32, %arg1: memref<512x80xbf16, #tpu.memory_space<vmem>>, %arg2: memref<80x128xbf16, #tpu.memory_space<vmem>>, %arg3: memref<1x128xf32, #tpu.memory_space<vmem>>, %arg4: memref<512x128xbf16, #tpu.memory_space<vmem>>, %arg5: memref<512x128xbf16, #tpu.memory_space<vmem>>) attributes {dimension_semantics = [#tpu.dimension_semantics<parallel>], iteration_bounds = array<i64: 1>, scalar_prefetch = 0 : i64, scratch_operands = 0 : i64, tpu.core_type = #tpu.core_type<tc>, window_params = [{transform_indices = @transform_0, window_bounds = array<i64: 512, 80>}, {pipeline_mode = #tpu.pipeline_mode<synchronous>, transform_indices = @transform_1, window_bounds = array<i64: 80, 128>}, {pipeline_mode = #tpu.pipeline_mode<synchronous>, transform_indices = @transform_2, window_bounds = array<i64: 1, 128>}, {transform_indices = @transform_3, window_bounds = array<i64: 512, 128>}, {transform_indices = @transform_4, window_bounds = array<i64: 512, 128>}]} {
    %c0 = arith.constant 0 : index
    %c0_0 = arith.constant 0 : index
    %0 = vector.load %arg1[%c0, %c0_0] : memref<512x80xbf16, #tpu.memory_space<vmem>>, vector<512x80xbf16>
    %c0_1 = arith.constant 0 : index
    %c0_2 = arith.constant 0 : index
    %1 = vector.load %arg2[%c0_1, %c0_2] : memref<80x128xbf16, #tpu.memory_space<vmem>>, vector<80x128xbf16>
    %cst = arith.constant dense<0.000000e+00> : vector<512x128xf32>
    %2 = tpu.matmul %0, %1, %cst {dimension_numbers = #tpu.dot_dimension_numbers<[1], [0], [0], [1], [0, 0, 1, 1], [], []>} : vector<512x80xbf16>, vector<80x128xbf16>, vector<512x128xf32> -> vector<512x128xf32>
    %c0_3 = arith.constant 0 : index
    %c0_4 = arith.constant 0 : index
    %3 = vector.load %arg3[%c0_3, %c0_4] : memref<1x128xf32, #tpu.memory_space<vmem>>, vector<1x128xf32>
    %4 = vector.broadcast %3 : vector<1x128xf32> to vector<512x128xf32>
    %5 = arith.addf %2, %4 : vector<512x128xf32>
    %c0_5 = arith.constant 0 : index
    %c0_6 = arith.constant 0 : index
    %6 = vector.load %arg4[%c0_5, %c0_6] : memref<512x128xbf16, #tpu.memory_space<vmem>>, vector<512x128xbf16>
    %7 = arith.extf %6 : vector<512x128xbf16> to vector<512x128xf32>
    %8 = arith.addf %5, %7 : vector<512x128xf32>
    %cst_7 = arith.constant 0.000000e+00 : f32
    %9 = vector.broadcast %cst_7 : f32 to vector<512x128xf32>
    %10 = arith.maximumf %8, %9 : vector<512x128xf32>
    %11 = arith.truncf %10 : vector<512x128xf32> to vector<512x128xbf16>
    %c0_8 = arith.constant 0 : index
    %c0_9 = arith.constant 0 : index
    %12 = vector.load %arg5[%c0_8, %c0_9] : memref<512x128xbf16, #tpu.memory_space<vmem>>, vector<512x128xbf16>
    tpu.vector_store %arg5[%c0_8, %c0_9], %11 {strides = array<i32>} : memref<512x128xbf16, #tpu.memory_space<vmem>>, vector<512x128xbf16>,
    return
  }
  func.func @transform_0(%arg0: i32) -> (i32, i32) {
    %c0_i32 = arith.constant 0 : i32
    %c0_i32_0 = arith.constant 0 : i32
    return %arg0, %c0_i32 : i32, i32
  }
  func.func @transform_1(%arg0: i32) -> (i32, i32) {
    %c0_i32 = arith.constant 0 : i32
    %c0_i32_0 = arith.constant 0 : i32
    %c0_i32_1 = arith.constant 0 : i32
    return %c0_i32, %c0_i32_0 : i32, i32
  }
  func.func @transform_2(%arg0: i32) -> (i32, i32) {
    %c0_i32 = arith.constant 0 : i32
    %c0_i32_0 = arith.constant 0 : i32
    %c0_i32_1 = arith.constant 0 : i32
    return %c0_i32, %c0_i32_0 : i32, i32
  }
  func.func @transform_3(%arg0: i32) -> (i32, i32) {
    %c0_i32 = arith.constant 0 : i32
    %c0_i32_0 = arith.constant 0 : i32
    return %arg0, %c0_i32 : i32, i32
  }
  func.func @transform_4(%arg0: i32) -> (i32, i32) {
    %c0_i32 = arith.constant 0 : i32
    %c0_i32_0 = arith.constant 0 : i32
    return %arg0, %c0_i32 : i32, i32
  }
}

module attributes {stable_mosaic.version = 11 : i64} {
  func.func @_gemm_bias_act_kernel(%arg0: i32, %arg1: memref<128x80xbf16, #tpu.memory_space<vmem>>, %arg2: memref<80x128xbf16, #tpu.memory_space<vmem>>, %arg3: memref<1x128xf32, #tpu.memory_space<vmem>>, %arg4: memref<128x128xbf16, #tpu.memory_space<vmem>>) attributes {dimension_semantics = [#tpu.dimension_semantics<parallel>], iteration_bounds = array<i64: 1>, scalar_prefetch = 0 : i64, scratch_operands = 0 : i64, tpu.core_type = #tpu.core_type<tc>, window_params = [{transform_indices = @transform_0, window_bounds = array<i64: 128, 80>}, {pipeline_mode = #tpu.pipeline_mode<synchronous>, transform_indices = @transform_1, window_bounds = array<i64: 80, 128>}, {pipeline_mode = #tpu.pipeline_mode<synchronous>, transform_indices = @transform_2, window_bounds = array<i64: 1, 128>}, {transform_indices = @transform_3, window_bounds = array<i64: 128, 128>}]} {
    %c0 = arith.constant 0 : index
    %c0_0 = arith.constant 0 : index
    %0 = vector.load %arg1[%c0, %c0_0] : memref<128x80xbf16, #tpu.memory_space<vmem>>, vector<128x80xbf16>
    %c0_1 = arith.constant 0 : index
    %c0_2 = arith.constant 0 : index
    %1 = vector.load %arg2[%c0_1, %c0_2] : memref<80x128xbf16, #tpu.memory_space<vmem>>, vector<80x128xbf16>
    %cst = arith.constant dense<0.000000e+00> : vector<128x128xf32>
    %2 = tpu.matmul %0, %1, %cst {dimension_numbers = #tpu.dot_dimension_numbers<[1], [0], [0], [1], [0, 0, 1, 1], [], []>} : vector<128x80xbf16>, vector<80x128xbf16>, vector<128x128xf32> -> vector<128x128xf32>
    %c0_3 = arith.constant 0 : index
    %c0_4 = arith.constant 0 : index
    %3 = vector.load %arg3[%c0_3, %c0_4] : memref<1x128xf32, #tpu.memory_space<vmem>>, vector<1x128xf32>
    %4 = vector.broadcast %3 : vector<1x128xf32> to vector<128x128xf32>
    %5 = arith.addf %2, %4 : vector<128x128xf32>
    %cst_5 = arith.constant 0.000000e+00 : f32
    %6 = vector.broadcast %cst_5 : f32 to vector<128x128xf32>
    %7 = arith.maximumf %5, %6 : vector<128x128xf32>
    %8 = arith.truncf %7 : vector<128x128xf32> to vector<128x128xbf16>
    %c0_6 = arith.constant 0 : index
    %c0_7 = arith.constant 0 : index
    %9 = vector.load %arg4[%c0_6, %c0_7] : memref<128x128xbf16, #tpu.memory_space<vmem>>, vector<128x128xbf16>
    tpu.vector_store %arg4[%c0_6, %c0_7], %8 {strides = array<i32>} : memref<128x128xbf16, #tpu.memory_space<vmem>>, vector<128x128xbf16>,
    return
  }
  func.func @transform_0(%arg0: i32) -> (i32, i32) {
    %c0_i32 = arith.constant 0 : i32
    %c0_i32_0 = arith.constant 0 : i32
    return %arg0, %c0_i32 : i32, i32
  }
  func.func @transform_1(%arg0: i32) -> (i32, i32) {
    %c0_i32 = arith.constant 0 : i32
    %c0_i32_0 = arith.constant 0 : i32
    %c0_i32_1 = arith.constant 0 : i32
    return %c0_i32, %c0_i32_0 : i32, i32
  }
  func.func @transform_2(%arg0: i32) -> (i32, i32) {
    %c0_i32 = arith.constant 0 : i32
    %c0_i32_0 = arith.constant 0 : i32
    %c0_i32_1 = arith.constant 0 : i32
    return %c0_i32, %c0_i32_0 : i32, i32
  }
  func.func @transform_3(%arg0: i32) -> (i32, i32) {
    %c0_i32 = arith.constant 0 : i32
    %c0_i32_0 = arith.constant 0 : i32
    return %arg0, %c0_i32 : i32, i32
  }
}

module attributes {stable_mosaic.version = 11 : i64} {
  func.func @_gemm_bias_act_kernel(%arg0: i32, %arg1: memref<128x16xbf16, #tpu.memory_space<vmem>>, %arg2: memref<16x128xbf16, #tpu.memory_space<vmem>>, %arg3: memref<1x128xf32, #tpu.memory_space<vmem>>, %arg4: memref<128x128xbf16, #tpu.memory_space<vmem>>) attributes {dimension_semantics = [#tpu.dimension_semantics<parallel>], iteration_bounds = array<i64: 1>, scalar_prefetch = 0 : i64, scratch_operands = 0 : i64, tpu.core_type = #tpu.core_type<tc>, window_params = [{transform_indices = @transform_0, window_bounds = array<i64: 128, 16>}, {pipeline_mode = #tpu.pipeline_mode<synchronous>, transform_indices = @transform_1, window_bounds = array<i64: 16, 128>}, {pipeline_mode = #tpu.pipeline_mode<synchronous>, transform_indices = @transform_2, window_bounds = array<i64: 1, 128>}, {transform_indices = @transform_3, window_bounds = array<i64: 128, 128>}]} {
    %c0 = arith.constant 0 : index
    %c0_0 = arith.constant 0 : index
    %0 = vector.load %arg1[%c0, %c0_0] : memref<128x16xbf16, #tpu.memory_space<vmem>>, vector<128x16xbf16>
    %c0_1 = arith.constant 0 : index
    %c0_2 = arith.constant 0 : index
    %1 = vector.load %arg2[%c0_1, %c0_2] : memref<16x128xbf16, #tpu.memory_space<vmem>>, vector<16x128xbf16>
    %cst = arith.constant dense<0.000000e+00> : vector<128x128xf32>
    %2 = tpu.matmul %0, %1, %cst {dimension_numbers = #tpu.dot_dimension_numbers<[1], [0], [0], [1], [0, 0, 1, 1], [], []>} : vector<128x16xbf16>, vector<16x128xbf16>, vector<128x128xf32> -> vector<128x128xf32>
    %c0_3 = arith.constant 0 : index
    %c0_4 = arith.constant 0 : index
    %3 = vector.load %arg3[%c0_3, %c0_4] : memref<1x128xf32, #tpu.memory_space<vmem>>, vector<1x128xf32>
    %4 = vector.broadcast %3 : vector<1x128xf32> to vector<128x128xf32>
    %5 = arith.addf %2, %4 : vector<128x128xf32>
    %6 = arith.truncf %5 : vector<128x128xf32> to vector<128x128xbf16>
    %c0_5 = arith.constant 0 : index
    %c0_6 = arith.constant 0 : index
    %7 = vector.load %arg4[%c0_5, %c0_6] : memref<128x128xbf16, #tpu.memory_space<vmem>>, vector<128x128xbf16>
    tpu.vector_store %arg4[%c0_5, %c0_6], %6 {strides = array<i32>} : memref<128x128xbf16, #tpu.memory_space<vmem>>, vector<128x128xbf16>,
    return
  }
  func.func @transform_0(%arg0: i32) -> (i32, i32) {
    %c0_i32 = arith.constant 0 : i32
    %c0_i32_0 = arith.constant 0 : i32
    return %arg0, %c0_i32 : i32, i32
  }
  func.func @transform_1(%arg0: i32) -> (i32, i32) {
    %c0_i32 = arith.constant 0 : i32
    %c0_i32_0 = arith.constant 0 : i32
    %c0_i32_1 = arith.constant 0 : i32
    return %c0_i32, %c0_i32_0 : i32, i32
  }
  func.func @transform_2(%arg0: i32) -> (i32, i32) {
    %c0_i32 = arith.constant 0 : i32
    %c0_i32_0 = arith.constant 0 : i32
    %c0_i32_1 = arith.constant 0 : i32
    return %c0_i32, %c0_i32_0 : i32, i32
  }
  func.func @transform_3(%arg0: i32) -> (i32, i32) {
    %c0_i32 = arith.constant 0 : i32
    %c0_i32_0 = arith.constant 0 : i32
    return %arg0, %c0_i32 : i32, i32
  }
}

module attributes {stable_mosaic.version = 11 : i64} {
  func.func @_gemm_bias_res_act_kernel(%arg0: i32, %arg1: memref<128x144xbf16, #tpu.memory_space<vmem>>, %arg2: memref<144x128xbf16, #tpu.memory_space<vmem>>, %arg3: memref<1x128xf32, #tpu.memory_space<vmem>>, %arg4: memref<128x128xbf16, #tpu.memory_space<vmem>>, %arg5: memref<128x128xbf16, #tpu.memory_space<vmem>>) attributes {dimension_semantics = [#tpu.dimension_semantics<parallel>], iteration_bounds = array<i64: 1>, scalar_prefetch = 0 : i64, scratch_operands = 0 : i64, tpu.core_type = #tpu.core_type<tc>, window_params = [{transform_indices = @transform_0, window_bounds = array<i64: 128, 144>}, {pipeline_mode = #tpu.pipeline_mode<synchronous>, transform_indices = @transform_1, window_bounds = array<i64: 144, 128>}, {pipeline_mode = #tpu.pipeline_mode<synchronous>, transform_indices = @transform_2, window_bounds = array<i64: 1, 128>}, {transform_indices = @transform_3, window_bounds = array<i64: 128, 128>}, {transform_indices = @transform_4, window_bounds = array<i64: 128, 128>}]} {
    %c0 = arith.constant 0 : index
    %c0_0 = arith.constant 0 : index
    %0 = vector.load %arg1[%c0, %c0_0] : memref<128x144xbf16, #tpu.memory_space<vmem>>, vector<128x144xbf16>
    %c0_1 = arith.constant 0 : index
    %c0_2 = arith.constant 0 : index
    %1 = vector.load %arg2[%c0_1, %c0_2] : memref<144x128xbf16, #tpu.memory_space<vmem>>, vector<144x128xbf16>
    %cst = arith.constant dense<0.000000e+00> : vector<128x128xf32>
    %2 = tpu.matmul %0, %1, %cst {dimension_numbers = #tpu.dot_dimension_numbers<[1], [0], [0], [1], [0, 0, 1, 1], [], []>} : vector<128x144xbf16>, vector<144x128xbf16>, vector<128x128xf32> -> vector<128x128xf32>
    %c0_3 = arith.constant 0 : index
    %c0_4 = arith.constant 0 : index
    %3 = vector.load %arg3[%c0_3, %c0_4] : memref<1x128xf32, #tpu.memory_space<vmem>>, vector<1x128xf32>
    %4 = vector.broadcast %3 : vector<1x128xf32> to vector<128x128xf32>
    %5 = arith.addf %2, %4 : vector<128x128xf32>
    %c0_5 = arith.constant 0 : index
    %c0_6 = arith.constant 0 : index
    %6 = vector.load %arg4[%c0_5, %c0_6] : memref<128x128xbf16, #tpu.memory_space<vmem>>, vector<128x128xbf16>
    %7 = arith.extf %6 : vector<128x128xbf16> to vector<128x128xf32>
    %8 = arith.addf %5, %7 : vector<128x128xf32>
    %cst_7 = arith.constant 0.000000e+00 : f32
    %9 = vector.broadcast %cst_7 : f32 to vector<128x128xf32>
    %10 = arith.maximumf %8, %9 : vector<128x128xf32>
    %11 = arith.truncf %10 : vector<128x128xf32> to vector<128x128xbf16>
    %c0_8 = arith.constant 0 : index
    %c0_9 = arith.constant 0 : index
    %12 = vector.load %arg5[%c0_8, %c0_9] : memref<128x128xbf16, #tpu.memory_space<vmem>>, vector<128x128xbf16>
    tpu.vector_store %arg5[%c0_8, %c0_9], %11 {strides = array<i32>} : memref<128x128xbf16, #tpu.memory_space<vmem>>, vector<128x128xbf16>,
    return
  }
  func.func @transform_0(%arg0: i32) -> (i32, i32) {
    %c0_i32 = arith.constant 0 : i32
    %c0_i32_0 = arith.constant 0 : i32
    return %arg0, %c0_i32 : i32, i32
  }
  func.func @transform_1(%arg0: i32) -> (i32, i32) {
    %c0_i32 = arith.constant 0 : i32
    %c0_i32_0 = arith.constant 0 : i32
    %c0_i32_1 = arith.constant 0 : i32
    return %c0_i32, %c0_i32_0 : i32, i32
  }
  func.func @transform_2(%arg0: i32) -> (i32, i32) {
    %c0_i32 = arith.constant 0 : i32
    %c0_i32_0 = arith.constant 0 : i32
    %c0_i32_1 = arith.constant 0 : i32
    return %c0_i32, %c0_i32_0 : i32, i32
  }
  func.func @transform_3(%arg0: i32) -> (i32, i32) {
    %c0_i32 = arith.constant 0 : i32
    %c0_i32_0 = arith.constant 0 : i32
    return %arg0, %c0_i32 : i32, i32
  }
  func.func @transform_4(%arg0: i32) -> (i32, i32) {
    %c0_i32 = arith.constant 0 : i32
    %c0_i32_0 = arith.constant 0 : i32
    return %arg0, %c0_i32 : i32, i32
  }
}

module attributes {stable_mosaic.version = 11 : i64} {
  func.func @_gemm_bias_act_kernel(%arg0: i32, %arg1: memref<128x144xbf16, #tpu.memory_space<vmem>>, %arg2: memref<144x128xbf16, #tpu.memory_space<vmem>>, %arg3: memref<1x128xf32, #tpu.memory_space<vmem>>, %arg4: memref<128x128xbf16, #tpu.memory_space<vmem>>) attributes {dimension_semantics = [#tpu.dimension_semantics<parallel>], iteration_bounds = array<i64: 1>, scalar_prefetch = 0 : i64, scratch_operands = 0 : i64, tpu.core_type = #tpu.core_type<tc>, window_params = [{transform_indices = @transform_0, window_bounds = array<i64: 128, 144>}, {pipeline_mode = #tpu.pipeline_mode<synchronous>, transform_indices = @transform_1, window_bounds = array<i64: 144, 128>}, {pipeline_mode = #tpu.pipeline_mode<synchronous>, transform_indices = @transform_2, window_bounds = array<i64: 1, 128>}, {transform_indices = @transform_3, window_bounds = array<i64: 128, 128>}]} {
    %c0 = arith.constant 0 : index
    %c0_0 = arith.constant 0 : index
    %0 = vector.load %arg1[%c0, %c0_0] : memref<128x144xbf16, #tpu.memory_space<vmem>>, vector<128x144xbf16>
    %c0_1 = arith.constant 0 : index
    %c0_2 = arith.constant 0 : index
    %1 = vector.load %arg2[%c0_1, %c0_2] : memref<144x128xbf16, #tpu.memory_space<vmem>>, vector<144x128xbf16>
    %cst = arith.constant dense<0.000000e+00> : vector<128x128xf32>
    %2 = tpu.matmul %0, %1, %cst {dimension_numbers = #tpu.dot_dimension_numbers<[1], [0], [0], [1], [0, 0, 1, 1], [], []>} : vector<128x144xbf16>, vector<144x128xbf16>, vector<128x128xf32> -> vector<128x128xf32>
    %c0_3 = arith.constant 0 : index
    %c0_4 = arith.constant 0 : index
    %3 = vector.load %arg3[%c0_3, %c0_4] : memref<1x128xf32, #tpu.memory_space<vmem>>, vector<1x128xf32>
    %4 = vector.broadcast %3 : vector<1x128xf32> to vector<128x128xf32>
    %5 = arith.addf %2, %4 : vector<128x128xf32>
    %cst_5 = arith.constant 0.000000e+00 : f32
    %6 = vector.broadcast %cst_5 : f32 to vector<128x128xf32>
    %7 = arith.maximumf %5, %6 : vector<128x128xf32>
    %8 = arith.truncf %7 : vector<128x128xf32> to vector<128x128xbf16>
    %c0_6 = arith.constant 0 : index
    %c0_7 = arith.constant 0 : index
    %9 = vector.load %arg4[%c0_6, %c0_7] : memref<128x128xbf16, #tpu.memory_space<vmem>>, vector<128x128xbf16>
    tpu.vector_store %arg4[%c0_6, %c0_7], %8 {strides = array<i32>} : memref<128x128xbf16, #tpu.memory_space<vmem>>, vector<128x128xbf16>,
    return
  }
  func.func @transform_0(%arg0: i32) -> (i32, i32) {
    %c0_i32 = arith.constant 0 : i32
    %c0_i32_0 = arith.constant 0 : i32
    return %arg0, %c0_i32 : i32, i32
  }
  func.func @transform_1(%arg0: i32) -> (i32, i32) {
    %c0_i32 = arith.constant 0 : i32
    %c0_i32_0 = arith.constant 0 : i32
    %c0_i32_1 = arith.constant 0 : i32
    return %c0_i32, %c0_i32_0 : i32, i32
  }
  func.func @transform_2(%arg0: i32) -> (i32, i32) {
    %c0_i32 = arith.constant 0 : i32
    %c0_i32_0 = arith.constant 0 : i32
    %c0_i32_1 = arith.constant 0 : i32
    return %c0_i32, %c0_i32_0 : i32, i32
  }
  func.func @transform_3(%arg0: i32) -> (i32, i32) {
    %c0_i32 = arith.constant 0 : i32
    %c0_i32_0 = arith.constant 0 : i32
    return %arg0, %c0_i32 : i32, i32
  }
}

module attributes {stable_mosaic.version = 11 : i64} {
  func.func @_gemm_bias_act_kernel(%arg0: i32, %arg1: memref<32x144xbf16, #tpu.memory_space<vmem>>, %arg2: memref<144x128xbf16, #tpu.memory_space<vmem>>, %arg3: memref<1x128xf32, #tpu.memory_space<vmem>>, %arg4: memref<32x128xbf16, #tpu.memory_space<vmem>>) attributes {dimension_semantics = [#tpu.dimension_semantics<parallel>], iteration_bounds = array<i64: 1>, scalar_prefetch = 0 : i64, scratch_operands = 0 : i64, tpu.core_type = #tpu.core_type<tc>, window_params = [{transform_indices = @transform_0, window_bounds = array<i64: 32, 144>}, {pipeline_mode = #tpu.pipeline_mode<synchronous>, transform_indices = @transform_1, window_bounds = array<i64: 144, 128>}, {pipeline_mode = #tpu.pipeline_mode<synchronous>, transform_indices = @transform_2, window_bounds = array<i64: 1, 128>}, {transform_indices = @transform_3, window_bounds = array<i64: 32, 128>}]} {
    %c0 = arith.constant 0 : index
    %c0_0 = arith.constant 0 : index
    %0 = vector.load %arg1[%c0, %c0_0] : memref<32x144xbf16, #tpu.memory_space<vmem>>, vector<32x144xbf16>
    %c0_1 = arith.constant 0 : index
    %c0_2 = arith.constant 0 : index
    %1 = vector.load %arg2[%c0_1, %c0_2] : memref<144x128xbf16, #tpu.memory_space<vmem>>, vector<144x128xbf16>
    %cst = arith.constant dense<0.000000e+00> : vector<32x128xf32>
    %2 = tpu.matmul %0, %1, %cst {dimension_numbers = #tpu.dot_dimension_numbers<[1], [0], [0], [1], [0, 0, 1, 1], [], []>} : vector<32x144xbf16>, vector<144x128xbf16>, vector<32x128xf32> -> vector<32x128xf32>
    %c0_3 = arith.constant 0 : index
    %c0_4 = arith.constant 0 : index
    %3 = vector.load %arg3[%c0_3, %c0_4] : memref<1x128xf32, #tpu.memory_space<vmem>>, vector<1x128xf32>
    %4 = vector.broadcast %3 : vector<1x128xf32> to vector<32x128xf32>
    %5 = arith.addf %2, %4 : vector<32x128xf32>
    %cst_5 = arith.constant 0.000000e+00 : f32
    %6 = vector.broadcast %cst_5 : f32 to vector<32x128xf32>
    %7 = arith.maximumf %5, %6 : vector<32x128xf32>
    %8 = arith.truncf %7 : vector<32x128xf32> to vector<32x128xbf16>
    %c0_6 = arith.constant 0 : index
    %c0_7 = arith.constant 0 : index
    %9 = vector.load %arg4[%c0_6, %c0_7] : memref<32x128xbf16, #tpu.memory_space<vmem>>, vector<32x128xbf16>
    tpu.vector_store %arg4[%c0_6, %c0_7], %8 {strides = array<i32>} : memref<32x128xbf16, #tpu.memory_space<vmem>>, vector<32x128xbf16>,
    return
  }
  func.func @transform_0(%arg0: i32) -> (i32, i32) {
    %c0_i32 = arith.constant 0 : i32
    %c0_i32_0 = arith.constant 0 : i32
    return %arg0, %c0_i32 : i32, i32
  }
  func.func @transform_1(%arg0: i32) -> (i32, i32) {
    %c0_i32 = arith.constant 0 : i32
    %c0_i32_0 = arith.constant 0 : i32
    %c0_i32_1 = arith.constant 0 : i32
    return %c0_i32, %c0_i32_0 : i32, i32
  }
  func.func @transform_2(%arg0: i32) -> (i32, i32) {
    %c0_i32 = arith.constant 0 : i32
    %c0_i32_0 = arith.constant 0 : i32
    %c0_i32_1 = arith.constant 0 : i32
    return %c0_i32, %c0_i32_0 : i32, i32
  }
  func.func @transform_3(%arg0: i32) -> (i32, i32) {
    %c0_i32 = arith.constant 0 : i32
    %c0_i32_0 = arith.constant 0 : i32
    return %arg0, %c0_i32 : i32, i32
  }
}

module attributes {stable_mosaic.version = 11 : i64} {
  func.func @_gemm_bias_act_kernel(%arg0: i32, %arg1: memref<32x16xbf16, #tpu.memory_space<vmem>>, %arg2: memref<16x128xbf16, #tpu.memory_space<vmem>>, %arg3: memref<1x128xf32, #tpu.memory_space<vmem>>, %arg4: memref<32x128xbf16, #tpu.memory_space<vmem>>) attributes {dimension_semantics = [#tpu.dimension_semantics<parallel>], iteration_bounds = array<i64: 1>, scalar_prefetch = 0 : i64, scratch_operands = 0 : i64, tpu.core_type = #tpu.core_type<tc>, window_params = [{transform_indices = @transform_0, window_bounds = array<i64: 32, 16>}, {pipeline_mode = #tpu.pipeline_mode<synchronous>, transform_indices = @transform_1, window_bounds = array<i64: 16, 128>}, {pipeline_mode = #tpu.pipeline_mode<synchronous>, transform_indices = @transform_2, window_bounds = array<i64: 1, 128>}, {transform_indices = @transform_3, window_bounds = array<i64: 32, 128>}]} {
    %c0 = arith.constant 0 : index
    %c0_0 = arith.constant 0 : index
    %0 = vector.load %arg1[%c0, %c0_0] : memref<32x16xbf16, #tpu.memory_space<vmem>>, vector<32x16xbf16>
    %c0_1 = arith.constant 0 : index
    %c0_2 = arith.constant 0 : index
    %1 = vector.load %arg2[%c0_1, %c0_2] : memref<16x128xbf16, #tpu.memory_space<vmem>>, vector<16x128xbf16>
    %cst = arith.constant dense<0.000000e+00> : vector<32x128xf32>
    %2 = tpu.matmul %0, %1, %cst {dimension_numbers = #tpu.dot_dimension_numbers<[1], [0], [0], [1], [0, 0, 1, 1], [], []>} : vector<32x16xbf16>, vector<16x128xbf16>, vector<32x128xf32> -> vector<32x128xf32>
    %c0_3 = arith.constant 0 : index
    %c0_4 = arith.constant 0 : index
    %3 = vector.load %arg3[%c0_3, %c0_4] : memref<1x128xf32, #tpu.memory_space<vmem>>, vector<1x128xf32>
    %4 = vector.broadcast %3 : vector<1x128xf32> to vector<32x128xf32>
    %5 = arith.addf %2, %4 : vector<32x128xf32>
    %6 = arith.truncf %5 : vector<32x128xf32> to vector<32x128xbf16>
    %c0_5 = arith.constant 0 : index
    %c0_6 = arith.constant 0 : index
    %7 = vector.load %arg4[%c0_5, %c0_6] : memref<32x128xbf16, #tpu.memory_space<vmem>>, vector<32x128xbf16>
    tpu.vector_store %arg4[%c0_5, %c0_6], %6 {strides = array<i32>} : memref<32x128xbf16, #tpu.memory_space<vmem>>, vector<32x128xbf16>,
    return
  }
  func.func @transform_0(%arg0: i32) -> (i32, i32) {
    %c0_i32 = arith.constant 0 : i32
    %c0_i32_0 = arith.constant 0 : i32
    return %arg0, %c0_i32 : i32, i32
  }
  func.func @transform_1(%arg0: i32) -> (i32, i32) {
    %c0_i32 = arith.constant 0 : i32
    %c0_i32_0 = arith.constant 0 : i32
    %c0_i32_1 = arith.constant 0 : i32
    return %c0_i32, %c0_i32_0 : i32, i32
  }
  func.func @transform_2(%arg0: i32) -> (i32, i32) {
    %c0_i32 = arith.constant 0 : i32
    %c0_i32_0 = arith.constant 0 : i32
    %c0_i32_1 = arith.constant 0 : i32
    return %c0_i32, %c0_i32_0 : i32, i32
  }
  func.func @transform_3(%arg0: i32) -> (i32, i32) {
    %c0_i32 = arith.constant 0 : i32
    %c0_i32_0 = arith.constant 0 : i32
    return %arg0, %c0_i32 : i32, i32
  }
}

module attributes {stable_mosaic.version = 11 : i64} {
  func.func @_gemm_bias_res_act_kernel(%arg0: i32, %arg1: memref<32x288xbf16, #tpu.memory_space<vmem>>, %arg2: memref<288x128xbf16, #tpu.memory_space<vmem>>, %arg3: memref<1x128xf32, #tpu.memory_space<vmem>>, %arg4: memref<32x128xbf16, #tpu.memory_space<vmem>>, %arg5: memref<32x128xbf16, #tpu.memory_space<vmem>>) attributes {dimension_semantics = [#tpu.dimension_semantics<parallel>], iteration_bounds = array<i64: 1>, scalar_prefetch = 0 : i64, scratch_operands = 0 : i64, tpu.core_type = #tpu.core_type<tc>, window_params = [{transform_indices = @transform_0, window_bounds = array<i64: 32, 288>}, {pipeline_mode = #tpu.pipeline_mode<synchronous>, transform_indices = @transform_1, window_bounds = array<i64: 288, 128>}, {pipeline_mode = #tpu.pipeline_mode<synchronous>, transform_indices = @transform_2, window_bounds = array<i64: 1, 128>}, {transform_indices = @transform_3, window_bounds = array<i64: 32, 128>}, {transform_indices = @transform_4, window_bounds = array<i64: 32, 128>}]} {
    %c0 = arith.constant 0 : index
    %c0_0 = arith.constant 0 : index
    %0 = vector.load %arg1[%c0, %c0_0] : memref<32x288xbf16, #tpu.memory_space<vmem>>, vector<32x288xbf16>
    %c0_1 = arith.constant 0 : index
    %c0_2 = arith.constant 0 : index
    %1 = vector.load %arg2[%c0_1, %c0_2] : memref<288x128xbf16, #tpu.memory_space<vmem>>, vector<288x128xbf16>
    %cst = arith.constant dense<0.000000e+00> : vector<32x128xf32>
    %2 = tpu.matmul %0, %1, %cst {dimension_numbers = #tpu.dot_dimension_numbers<[1], [0], [0], [1], [0, 0, 1, 1], [], []>} : vector<32x288xbf16>, vector<288x128xbf16>, vector<32x128xf32> -> vector<32x128xf32>
    %c0_3 = arith.constant 0 : index
    %c0_4 = arith.constant 0 : index
    %3 = vector.load %arg3[%c0_3, %c0_4] : memref<1x128xf32, #tpu.memory_space<vmem>>, vector<1x128xf32>
    %4 = vector.broadcast %3 : vector<1x128xf32> to vector<32x128xf32>
    %5 = arith.addf %2, %4 : vector<32x128xf32>
    %c0_5 = arith.constant 0 : index
    %c0_6 = arith.constant 0 : index
    %6 = vector.load %arg4[%c0_5, %c0_6] : memref<32x128xbf16, #tpu.memory_space<vmem>>, vector<32x128xbf16>
    %7 = arith.extf %6 : vector<32x128xbf16> to vector<32x128xf32>
    %8 = arith.addf %5, %7 : vector<32x128xf32>
    %cst_7 = arith.constant 0.000000e+00 : f32
    %9 = vector.broadcast %cst_7 : f32 to vector<32x128xf32>
    %10 = arith.maximumf %8, %9 : vector<32x128xf32>
    %11 = arith.truncf %10 : vector<32x128xf32> to vector<32x128xbf16>
    %c0_8 = arith.constant 0 : index
    %c0_9 = arith.constant 0 : index
    %12 = vector.load %arg5[%c0_8, %c0_9] : memref<32x128xbf16, #tpu.memory_space<vmem>>, vector<32x128xbf16>
    tpu.vector_store %arg5[%c0_8, %c0_9], %11 {strides = array<i32>} : memref<32x128xbf16, #tpu.memory_space<vmem>>, vector<32x128xbf16>,
    return
  }
  func.func @transform_0(%arg0: i32) -> (i32, i32) {
    %c0_i32 = arith.constant 0 : i32
    %c0_i32_0 = arith.constant 0 : i32
    return %arg0, %c0_i32 : i32, i32
  }
  func.func @transform_1(%arg0: i32) -> (i32, i32) {
    %c0_i32 = arith.constant 0 : i32
    %c0_i32_0 = arith.constant 0 : i32
    %c0_i32_1 = arith.constant 0 : i32
    return %c0_i32, %c0_i32_0 : i32, i32
  }
  func.func @transform_2(%arg0: i32) -> (i32, i32) {
    %c0_i32 = arith.constant 0 : i32
    %c0_i32_0 = arith.constant 0 : i32
    %c0_i32_1 = arith.constant 0 : i32
    return %c0_i32, %c0_i32_0 : i32, i32
  }
  func.func @transform_3(%arg0: i32) -> (i32, i32) {
    %c0_i32 = arith.constant 0 : i32
    %c0_i32_0 = arith.constant 0 : i32
    return %arg0, %c0_i32 : i32, i32
  }
  func.func @transform_4(%arg0: i32) -> (i32, i32) {
    %c0_i32 = arith.constant 0 : i32
    %c0_i32_0 = arith.constant 0 : i32
    return %arg0, %c0_i32 : i32, i32
  }
}

module attributes {stable_mosaic.version = 11 : i64} {
  func.func @_gemm_bias_act_kernel(%arg0: i32, %arg1: memref<32x288xbf16, #tpu.memory_space<vmem>>, %arg2: memref<288x128xbf16, #tpu.memory_space<vmem>>, %arg3: memref<1x128xf32, #tpu.memory_space<vmem>>, %arg4: memref<32x128xbf16, #tpu.memory_space<vmem>>) attributes {dimension_semantics = [#tpu.dimension_semantics<parallel>], iteration_bounds = array<i64: 1>, scalar_prefetch = 0 : i64, scratch_operands = 0 : i64, tpu.core_type = #tpu.core_type<tc>, window_params = [{transform_indices = @transform_0, window_bounds = array<i64: 32, 288>}, {pipeline_mode = #tpu.pipeline_mode<synchronous>, transform_indices = @transform_1, window_bounds = array<i64: 288, 128>}, {pipeline_mode = #tpu.pipeline_mode<synchronous>, transform_indices = @transform_2, window_bounds = array<i64: 1, 128>}, {transform_indices = @transform_3, window_bounds = array<i64: 32, 128>}]} {
    %c0 = arith.constant 0 : index
    %c0_0 = arith.constant 0 : index
    %0 = vector.load %arg1[%c0, %c0_0] : memref<32x288xbf16, #tpu.memory_space<vmem>>, vector<32x288xbf16>
    %c0_1 = arith.constant 0 : index
    %c0_2 = arith.constant 0 : index
    %1 = vector.load %arg2[%c0_1, %c0_2] : memref<288x128xbf16, #tpu.memory_space<vmem>>, vector<288x128xbf16>
    %cst = arith.constant dense<0.000000e+00> : vector<32x128xf32>
    %2 = tpu.matmul %0, %1, %cst {dimension_numbers = #tpu.dot_dimension_numbers<[1], [0], [0], [1], [0, 0, 1, 1], [], []>} : vector<32x288xbf16>, vector<288x128xbf16>, vector<32x128xf32> -> vector<32x128xf32>
    %c0_3 = arith.constant 0 : index
    %c0_4 = arith.constant 0 : index
    %3 = vector.load %arg3[%c0_3, %c0_4] : memref<1x128xf32, #tpu.memory_space<vmem>>, vector<1x128xf32>
    %4 = vector.broadcast %3 : vector<1x128xf32> to vector<32x128xf32>
    %5 = arith.addf %2, %4 : vector<32x128xf32>
    %cst_5 = arith.constant 0.000000e+00 : f32
    %6 = vector.broadcast %cst_5 : f32 to vector<32x128xf32>
    %7 = arith.maximumf %5, %6 : vector<32x128xf32>
    %8 = arith.truncf %7 : vector<32x128xf32> to vector<32x128xbf16>
    %c0_6 = arith.constant 0 : index
    %c0_7 = arith.constant 0 : index
    %9 = vector.load %arg4[%c0_6, %c0_7] : memref<32x128xbf16, #tpu.memory_space<vmem>>, vector<32x128xbf16>
    tpu.vector_store %arg4[%c0_6, %c0_7], %8 {strides = array<i32>} : memref<32x128xbf16, #tpu.memory_space<vmem>>, vector<32x128xbf16>,
    return
  }
  func.func @transform_0(%arg0: i32) -> (i32, i32) {
    %c0_i32 = arith.constant 0 : i32
    %c0_i32_0 = arith.constant 0 : i32
    return %arg0, %c0_i32 : i32, i32
  }
  func.func @transform_1(%arg0: i32) -> (i32, i32) {
    %c0_i32 = arith.constant 0 : i32
    %c0_i32_0 = arith.constant 0 : i32
    %c0_i32_1 = arith.constant 0 : i32
    return %c0_i32, %c0_i32_0 : i32, i32
  }
  func.func @transform_2(%arg0: i32) -> (i32, i32) {
    %c0_i32 = arith.constant 0 : i32
    %c0_i32_0 = arith.constant 0 : i32
    %c0_i32_1 = arith.constant 0 : i32
    return %c0_i32, %c0_i32_0 : i32, i32
  }
  func.func @transform_3(%arg0: i32) -> (i32, i32) {
    %c0_i32 = arith.constant 0 : i32
    %c0_i32_0 = arith.constant 0 : i32
    return %arg0, %c0_i32 : i32, i32
  }
}

module attributes {stable_mosaic.version = 11 : i64} {
  func.func @_gemm_bias_act_kernel(%arg0: i32, %arg1: memref<16x288xbf16, #tpu.memory_space<vmem>>, %arg2: memref<288x128xbf16, #tpu.memory_space<vmem>>, %arg3: memref<1x128xf32, #tpu.memory_space<vmem>>, %arg4: memref<16x128xbf16, #tpu.memory_space<vmem>>) attributes {dimension_semantics = [#tpu.dimension_semantics<parallel>], iteration_bounds = array<i64: 1>, scalar_prefetch = 0 : i64, scratch_operands = 0 : i64, tpu.core_type = #tpu.core_type<tc>, window_params = [{transform_indices = @transform_0, window_bounds = array<i64: 16, 288>}, {pipeline_mode = #tpu.pipeline_mode<synchronous>, transform_indices = @transform_1, window_bounds = array<i64: 288, 128>}, {pipeline_mode = #tpu.pipeline_mode<synchronous>, transform_indices = @transform_2, window_bounds = array<i64: 1, 128>}, {transform_indices = @transform_3, window_bounds = array<i64: 16, 128>}]} {
    %c0 = arith.constant 0 : index
    %c0_0 = arith.constant 0 : index
    %0 = vector.load %arg1[%c0, %c0_0] : memref<16x288xbf16, #tpu.memory_space<vmem>>, vector<16x288xbf16>
    %c0_1 = arith.constant 0 : index
    %c0_2 = arith.constant 0 : index
    %1 = vector.load %arg2[%c0_1, %c0_2] : memref<288x128xbf16, #tpu.memory_space<vmem>>, vector<288x128xbf16>
    %cst = arith.constant dense<0.000000e+00> : vector<16x128xf32>
    %2 = tpu.matmul %0, %1, %cst {dimension_numbers = #tpu.dot_dimension_numbers<[1], [0], [0], [1], [0, 0, 1, 1], [], []>} : vector<16x288xbf16>, vector<288x128xbf16>, vector<16x128xf32> -> vector<16x128xf32>
    %c0_3 = arith.constant 0 : index
    %c0_4 = arith.constant 0 : index
    %3 = vector.load %arg3[%c0_3, %c0_4] : memref<1x128xf32, #tpu.memory_space<vmem>>, vector<1x128xf32>
    %4 = vector.broadcast %3 : vector<1x128xf32> to vector<16x128xf32>
    %5 = arith.addf %2, %4 : vector<16x128xf32>
    %cst_5 = arith.constant 0.000000e+00 : f32
    %6 = vector.broadcast %cst_5 : f32 to vector<16x128xf32>
    %7 = arith.maximumf %5, %6 : vector<16x128xf32>
    %8 = arith.truncf %7 : vector<16x128xf32> to vector<16x128xbf16>
    %c0_6 = arith.constant 0 : index
    %c0_7 = arith.constant 0 : index
    %9 = vector.load %arg4[%c0_6, %c0_7] : memref<16x128xbf16, #tpu.memory_space<vmem>>, vector<16x128xbf16>
    tpu.vector_store %arg4[%c0_6, %c0_7], %8 {strides = array<i32>} : memref<16x128xbf16, #tpu.memory_space<vmem>>, vector<16x128xbf16>,
    return
  }
  func.func @transform_0(%arg0: i32) -> (i32, i32) {
    %c0_i32 = arith.constant 0 : i32
    %c0_i32_0 = arith.constant 0 : i32
    return %arg0, %c0_i32 : i32, i32
  }
  func.func @transform_1(%arg0: i32) -> (i32, i32) {
    %c0_i32 = arith.constant 0 : i32
    %c0_i32_0 = arith.constant 0 : i32
    %c0_i32_1 = arith.constant 0 : i32
    return %c0_i32, %c0_i32_0 : i32, i32
  }
  func.func @transform_2(%arg0: i32) -> (i32, i32) {
    %c0_i32 = arith.constant 0 : i32
    %c0_i32_0 = arith.constant 0 : i32
    %c0_i32_1 = arith.constant 0 : i32
    return %c0_i32, %c0_i32_0 : i32, i32
  }
  func.func @transform_3(%arg0: i32) -> (i32, i32) {
    %c0_i32 = arith.constant 0 : i32
    %c0_i32_0 = arith.constant 0 : i32
    return %arg0, %c0_i32 : i32, i32
  }
}

module attributes {stable_mosaic.version = 11 : i64} {
  func.func @_gemm_bias_act_kernel(%arg0: i32, %arg1: memref<16x32xbf16, #tpu.memory_space<vmem>>, %arg2: memref<32x128xbf16, #tpu.memory_space<vmem>>, %arg3: memref<1x128xf32, #tpu.memory_space<vmem>>, %arg4: memref<16x128xbf16, #tpu.memory_space<vmem>>) attributes {dimension_semantics = [#tpu.dimension_semantics<parallel>], iteration_bounds = array<i64: 1>, scalar_prefetch = 0 : i64, scratch_operands = 0 : i64, tpu.core_type = #tpu.core_type<tc>, window_params = [{transform_indices = @transform_0, window_bounds = array<i64: 16, 32>}, {pipeline_mode = #tpu.pipeline_mode<synchronous>, transform_indices = @transform_1, window_bounds = array<i64: 32, 128>}, {pipeline_mode = #tpu.pipeline_mode<synchronous>, transform_indices = @transform_2, window_bounds = array<i64: 1, 128>}, {transform_indices = @transform_3, window_bounds = array<i64: 16, 128>}]} {
    %c0 = arith.constant 0 : index
    %c0_0 = arith.constant 0 : index
    %0 = vector.load %arg1[%c0, %c0_0] : memref<16x32xbf16, #tpu.memory_space<vmem>>, vector<16x32xbf16>
    %c0_1 = arith.constant 0 : index
    %c0_2 = arith.constant 0 : index
    %1 = vector.load %arg2[%c0_1, %c0_2] : memref<32x128xbf16, #tpu.memory_space<vmem>>, vector<32x128xbf16>
    %cst = arith.constant dense<0.000000e+00> : vector<16x128xf32>
    %2 = tpu.matmul %0, %1, %cst {dimension_numbers = #tpu.dot_dimension_numbers<[1], [0], [0], [1], [0, 0, 1, 1], [], []>} : vector<16x32xbf16>, vector<32x128xbf16>, vector<16x128xf32> -> vector<16x128xf32>
    %c0_3 = arith.constant 0 : index
    %c0_4 = arith.constant 0 : index
    %3 = vector.load %arg3[%c0_3, %c0_4] : memref<1x128xf32, #tpu.memory_space<vmem>>, vector<1x128xf32>
    %4 = vector.broadcast %3 : vector<1x128xf32> to vector<16x128xf32>
    %5 = arith.addf %2, %4 : vector<16x128xf32>
    %6 = arith.truncf %5 : vector<16x128xf32> to vector<16x128xbf16>
    %c0_5 = arith.constant 0 : index
    %c0_6 = arith.constant 0 : index
    %7 = vector.load %arg4[%c0_5, %c0_6] : memref<16x128xbf16, #tpu.memory_space<vmem>>, vector<16x128xbf16>
    tpu.vector_store %arg4[%c0_5, %c0_6], %6 {strides = array<i32>} : memref<16x128xbf16, #tpu.memory_space<vmem>>, vector<16x128xbf16>,
    return
  }
  func.func @transform_0(%arg0: i32) -> (i32, i32) {
    %c0_i32 = arith.constant 0 : i32
    %c0_i32_0 = arith.constant 0 : i32
    return %arg0, %c0_i32 : i32, i32
  }
  func.func @transform_1(%arg0: i32) -> (i32, i32) {
    %c0_i32 = arith.constant 0 : i32
    %c0_i32_0 = arith.constant 0 : i32
    %c0_i32_1 = arith.constant 0 : i32
    return %c0_i32, %c0_i32_0 : i32, i32
  }
  func.func @transform_2(%arg0: i32) -> (i32, i32) {
    %c0_i32 = arith.constant 0 : i32
    %c0_i32_0 = arith.constant 0 : i32
    %c0_i32_1 = arith.constant 0 : i32
    return %c0_i32, %c0_i32_0 : i32, i32
  }
  func.func @transform_3(%arg0: i32) -> (i32, i32) {
    %c0_i32 = arith.constant 0 : i32
    %c0_i32_0 = arith.constant 0 : i32
    return %arg0, %c0_i32 : i32, i32
  }
}

module attributes {stable_mosaic.version = 11 : i64} {
  func.func @_gemm_bias_res_act_kernel(%arg0: i32, %arg1: memref<16x576xbf16, #tpu.memory_space<vmem>>, %arg2: memref<576x128xbf16, #tpu.memory_space<vmem>>, %arg3: memref<1x128xf32, #tpu.memory_space<vmem>>, %arg4: memref<16x128xbf16, #tpu.memory_space<vmem>>, %arg5: memref<16x128xbf16, #tpu.memory_space<vmem>>) attributes {dimension_semantics = [#tpu.dimension_semantics<parallel>], iteration_bounds = array<i64: 1>, scalar_prefetch = 0 : i64, scratch_operands = 0 : i64, tpu.core_type = #tpu.core_type<tc>, window_params = [{transform_indices = @transform_0, window_bounds = array<i64: 16, 576>}, {pipeline_mode = #tpu.pipeline_mode<synchronous>, transform_indices = @transform_1, window_bounds = array<i64: 576, 128>}, {pipeline_mode = #tpu.pipeline_mode<synchronous>, transform_indices = @transform_2, window_bounds = array<i64: 1, 128>}, {transform_indices = @transform_3, window_bounds = array<i64: 16, 128>}, {transform_indices = @transform_4, window_bounds = array<i64: 16, 128>}]} {
    %c0 = arith.constant 0 : index
    %c0_0 = arith.constant 0 : index
    %0 = vector.load %arg1[%c0, %c0_0] : memref<16x576xbf16, #tpu.memory_space<vmem>>, vector<16x576xbf16>
    %c0_1 = arith.constant 0 : index
    %c0_2 = arith.constant 0 : index
    %1 = vector.load %arg2[%c0_1, %c0_2] : memref<576x128xbf16, #tpu.memory_space<vmem>>, vector<576x128xbf16>
    %cst = arith.constant dense<0.000000e+00> : vector<16x128xf32>
    %2 = tpu.matmul %0, %1, %cst {dimension_numbers = #tpu.dot_dimension_numbers<[1], [0], [0], [1], [0, 0, 1, 1], [], []>} : vector<16x576xbf16>, vector<576x128xbf16>, vector<16x128xf32> -> vector<16x128xf32>
    %c0_3 = arith.constant 0 : index
    %c0_4 = arith.constant 0 : index
    %3 = vector.load %arg3[%c0_3, %c0_4] : memref<1x128xf32, #tpu.memory_space<vmem>>, vector<1x128xf32>
    %4 = vector.broadcast %3 : vector<1x128xf32> to vector<16x128xf32>
    %5 = arith.addf %2, %4 : vector<16x128xf32>
    %c0_5 = arith.constant 0 : index
    %c0_6 = arith.constant 0 : index
    %6 = vector.load %arg4[%c0_5, %c0_6] : memref<16x128xbf16, #tpu.memory_space<vmem>>, vector<16x128xbf16>
    %7 = arith.extf %6 : vector<16x128xbf16> to vector<16x128xf32>
    %8 = arith.addf %5, %7 : vector<16x128xf32>
    %cst_7 = arith.constant 0.000000e+00 : f32
    %9 = vector.broadcast %cst_7 : f32 to vector<16x128xf32>
    %10 = arith.maximumf %8, %9 : vector<16x128xf32>
    %11 = arith.truncf %10 : vector<16x128xf32> to vector<16x128xbf16>
    %c0_8 = arith.constant 0 : index
    %c0_9 = arith.constant 0 : index
    %12 = vector.load %arg5[%c0_8, %c0_9] : memref<16x128xbf16, #tpu.memory_space<vmem>>, vector<16x128xbf16>
    tpu.vector_store %arg5[%c0_8, %c0_9], %11 {strides = array<i32>} : memref<16x128xbf16, #tpu.memory_space<vmem>>, vector<16x128xbf16>,
    return
  }
  func.func @transform_0(%arg0: i32) -> (i32, i32) {
    %c0_i32 = arith.constant 0 : i32
    %c0_i32_0 = arith.constant 0 : i32
    return %arg0, %c0_i32 : i32, i32
  }
  func.func @transform_1(%arg0: i32) -> (i32, i32) {
    %c0_i32 = arith.constant 0 : i32
    %c0_i32_0 = arith.constant 0 : i32
    %c0_i32_1 = arith.constant 0 : i32
    return %c0_i32, %c0_i32_0 : i32, i32
  }
  func.func @transform_2(%arg0: i32) -> (i32, i32) {
    %c0_i32 = arith.constant 0 : i32
    %c0_i32_0 = arith.constant 0 : i32
    %c0_i32_1 = arith.constant 0 : i32
    return %c0_i32, %c0_i32_0 : i32, i32
  }
  func.func @transform_3(%arg0: i32) -> (i32, i32) {
    %c0_i32 = arith.constant 0 : i32
    %c0_i32_0 = arith.constant 0 : i32
    return %arg0, %c0_i32 : i32, i32
  }
  func.func @transform_4(%arg0: i32) -> (i32, i32) {
    %c0_i32 = arith.constant 0 : i32
    %c0_i32_0 = arith.constant 0 : i32
    return %arg0, %c0_i32 : i32, i32
  }
}

module attributes {stable_mosaic.version = 11 : i64} {
  func.func @_gemm_bias_act_kernel(%arg0: i32, %arg1: memref<16x576xbf16, #tpu.memory_space<vmem>>, %arg2: memref<576x128xbf16, #tpu.memory_space<vmem>>, %arg3: memref<1x128xf32, #tpu.memory_space<vmem>>, %arg4: memref<16x128xbf16, #tpu.memory_space<vmem>>) attributes {dimension_semantics = [#tpu.dimension_semantics<parallel>], iteration_bounds = array<i64: 1>, scalar_prefetch = 0 : i64, scratch_operands = 0 : i64, tpu.core_type = #tpu.core_type<tc>, window_params = [{transform_indices = @transform_0, window_bounds = array<i64: 16, 576>}, {pipeline_mode = #tpu.pipeline_mode<synchronous>, transform_indices = @transform_1, window_bounds = array<i64: 576, 128>}, {pipeline_mode = #tpu.pipeline_mode<synchronous>, transform_indices = @transform_2, window_bounds = array<i64: 1, 128>}, {transform_indices = @transform_3, window_bounds = array<i64: 16, 128>}]} {
    %c0 = arith.constant 0 : index
    %c0_0 = arith.constant 0 : index
    %0 = vector.load %arg1[%c0, %c0_0] : memref<16x576xbf16, #tpu.memory_space<vmem>>, vector<16x576xbf16>
    %c0_1 = arith.constant 0 : index
    %c0_2 = arith.constant 0 : index
    %1 = vector.load %arg2[%c0_1, %c0_2] : memref<576x128xbf16, #tpu.memory_space<vmem>>, vector<576x128xbf16>
    %cst = arith.constant dense<0.000000e+00> : vector<16x128xf32>
    %2 = tpu.matmul %0, %1, %cst {dimension_numbers = #tpu.dot_dimension_numbers<[1], [0], [0], [1], [0, 0, 1, 1], [], []>} : vector<16x576xbf16>, vector<576x128xbf16>, vector<16x128xf32> -> vector<16x128xf32>
    %c0_3 = arith.constant 0 : index
    %c0_4 = arith.constant 0 : index
    %3 = vector.load %arg3[%c0_3, %c0_4] : memref<1x128xf32, #tpu.memory_space<vmem>>, vector<1x128xf32>
    %4 = vector.broadcast %3 : vector<1x128xf32> to vector<16x128xf32>
    %5 = arith.addf %2, %4 : vector<16x128xf32>
    %cst_5 = arith.constant 0.000000e+00 : f32
    %6 = vector.broadcast %cst_5 : f32 to vector<16x128xf32>
    %7 = arith.maximumf %5, %6 : vector<16x128xf32>
    %8 = arith.truncf %7 : vector<16x128xf32> to vector<16x128xbf16>
    %c0_6 = arith.constant 0 : index
    %c0_7 = arith.constant 0 : index
    %9 = vector.load %arg4[%c0_6, %c0_7] : memref<16x128xbf16, #tpu.memory_space<vmem>>, vector<16x128xbf16>
    tpu.vector_store %arg4[%c0_6, %c0_7], %8 {strides = array<i32>} : memref<16x128xbf16, #tpu.memory_space<vmem>>, vector<16x128xbf16>,
    return
  }
  func.func @transform_0(%arg0: i32) -> (i32, i32) {
    %c0_i32 = arith.constant 0 : i32
    %c0_i32_0 = arith.constant 0 : i32
    return %arg0, %c0_i32 : i32, i32
  }
  func.func @transform_1(%arg0: i32) -> (i32, i32) {
    %c0_i32 = arith.constant 0 : i32
    %c0_i32_0 = arith.constant 0 : i32
    %c0_i32_1 = arith.constant 0 : i32
    return %c0_i32, %c0_i32_0 : i32, i32
  }
  func.func @transform_2(%arg0: i32) -> (i32, i32) {
    %c0_i32 = arith.constant 0 : i32
    %c0_i32_0 = arith.constant 0 : i32
    %c0_i32_1 = arith.constant 0 : i32
    return %c0_i32, %c0_i32_0 : i32, i32
  }
  func.func @transform_3(%arg0: i32) -> (i32, i32) {
    %c0_i32 = arith.constant 0 : i32
    %c0_i32_0 = arith.constant 0 : i32
    return %arg0, %c0_i32 : i32, i32
  }
}

module attributes {stable_mosaic.version = 11 : i64} {
  func.func @_gemm_bias_act_kernel(%arg0: i32, %arg1: memref<16x64xbf16, #tpu.memory_space<vmem>>, %arg2: memref<64x256xbf16, #tpu.memory_space<vmem>>, %arg3: memref<1x256xf32, #tpu.memory_space<vmem>>, %arg4: memref<16x256xbf16, #tpu.memory_space<vmem>>) attributes {dimension_semantics = [#tpu.dimension_semantics<parallel>], iteration_bounds = array<i64: 1>, scalar_prefetch = 0 : i64, scratch_operands = 0 : i64, tpu.core_type = #tpu.core_type<tc>, window_params = [{transform_indices = @transform_0, window_bounds = array<i64: 16, 64>}, {pipeline_mode = #tpu.pipeline_mode<synchronous>, transform_indices = @transform_1, window_bounds = array<i64: 64, 256>}, {pipeline_mode = #tpu.pipeline_mode<synchronous>, transform_indices = @transform_2, window_bounds = array<i64: 1, 256>}, {transform_indices = @transform_3, window_bounds = array<i64: 16, 256>}]} {
    %c0 = arith.constant 0 : index
    %c0_0 = arith.constant 0 : index
    %0 = vector.load %arg1[%c0, %c0_0] : memref<16x64xbf16, #tpu.memory_space<vmem>>, vector<16x64xbf16>
    %c0_1 = arith.constant 0 : index
    %c0_2 = arith.constant 0 : index
    %1 = vector.load %arg2[%c0_1, %c0_2] : memref<64x256xbf16, #tpu.memory_space<vmem>>, vector<64x256xbf16>
    %cst = arith.constant dense<0.000000e+00> : vector<16x256xf32>
    %2 = tpu.matmul %0, %1, %cst {dimension_numbers = #tpu.dot_dimension_numbers<[1], [0], [0], [1], [0, 0, 1, 1], [], []>} : vector<16x64xbf16>, vector<64x256xbf16>, vector<16x256xf32> -> vector<16x256xf32>
    %c0_3 = arith.constant 0 : index
    %c0_4 = arith.constant 0 : index
    %3 = vector.load %arg3[%c0_3, %c0_4] : memref<1x256xf32, #tpu.memory_space<vmem>>, vector<1x256xf32>
    %4 = vector.broadcast %3 : vector<1x256xf32> to vector<16x256xf32>
    %5 = arith.addf %2, %4 : vector<16x256xf32>
    %cst_5 = arith.constant 0.000000e+00 : f32
    %6 = vector.broadcast %cst_5 : f32 to vector<16x256xf32>
    %7 = arith.maximumf %5, %6 : vector<16x256xf32>
    %8 = arith.truncf %7 : vector<16x256xf32> to vector<16x256xbf16>
    %c0_6 = arith.constant 0 : index
    %c0_7 = arith.constant 0 : index
    %9 = vector.load %arg4[%c0_6, %c0_7] : memref<16x256xbf16, #tpu.memory_space<vmem>>, vector<16x256xbf16>
    tpu.vector_store %arg4[%c0_6, %c0_7], %8 {strides = array<i32>} : memref<16x256xbf16, #tpu.memory_space<vmem>>, vector<16x256xbf16>,
    return
  }
  func.func @transform_0(%arg0: i32) -> (i32, i32) {
    %c0_i32 = arith.constant 0 : i32
    %c0_i32_0 = arith.constant 0 : i32
    return %arg0, %c0_i32 : i32, i32
  }
  func.func @transform_1(%arg0: i32) -> (i32, i32) {
    %c0_i32 = arith.constant 0 : i32
    %c0_i32_0 = arith.constant 0 : i32
    %c0_i32_1 = arith.constant 0 : i32
    return %c0_i32, %c0_i32_0 : i32, i32
  }
  func.func @transform_2(%arg0: i32) -> (i32, i32) {
    %c0_i32 = arith.constant 0 : i32
    %c0_i32_0 = arith.constant 0 : i32
    %c0_i32_1 = arith.constant 0 : i32
    return %c0_i32, %c0_i32_0 : i32, i32
  }
  func.func @transform_3(%arg0: i32) -> (i32, i32) {
    %c0_i32 = arith.constant 0 : i32
    %c0_i32_0 = arith.constant 0 : i32
    return %arg0, %c0_i32 : i32, i32
  }
}

module attributes {stable_mosaic.version = 11 : i64} {
  func.func @_gemm_bias_act_kernel(%arg0: i32, %arg1: memref<16x64xbf16, #tpu.memory_space<vmem>>, %arg2: memref<64x128xbf16, #tpu.memory_space<vmem>>, %arg3: memref<1x128xf32, #tpu.memory_space<vmem>>, %arg4: memref<16x128xbf16, #tpu.memory_space<vmem>>) attributes {dimension_semantics = [#tpu.dimension_semantics<parallel>], iteration_bounds = array<i64: 1>, scalar_prefetch = 0 : i64, scratch_operands = 0 : i64, tpu.core_type = #tpu.core_type<tc>, window_params = [{transform_indices = @transform_0, window_bounds = array<i64: 16, 64>}, {pipeline_mode = #tpu.pipeline_mode<synchronous>, transform_indices = @transform_1, window_bounds = array<i64: 64, 128>}, {pipeline_mode = #tpu.pipeline_mode<synchronous>, transform_indices = @transform_2, window_bounds = array<i64: 1, 128>}, {transform_indices = @transform_3, window_bounds = array<i64: 16, 128>}]} {
    %c0 = arith.constant 0 : index
    %c0_0 = arith.constant 0 : index
    %0 = vector.load %arg1[%c0, %c0_0] : memref<16x64xbf16, #tpu.memory_space<vmem>>, vector<16x64xbf16>
    %c0_1 = arith.constant 0 : index
    %c0_2 = arith.constant 0 : index
    %1 = vector.load %arg2[%c0_1, %c0_2] : memref<64x128xbf16, #tpu.memory_space<vmem>>, vector<64x128xbf16>
    %cst = arith.constant dense<0.000000e+00> : vector<16x128xf32>
    %2 = tpu.matmul %0, %1, %cst {dimension_numbers = #tpu.dot_dimension_numbers<[1], [0], [0], [1], [0, 0, 1, 1], [], []>} : vector<16x64xbf16>, vector<64x128xbf16>, vector<16x128xf32> -> vector<16x128xf32>
    %c0_3 = arith.constant 0 : index
    %c0_4 = arith.constant 0 : index
    %3 = vector.load %arg3[%c0_3, %c0_4] : memref<1x128xf32, #tpu.memory_space<vmem>>, vector<1x128xf32>
    %4 = vector.broadcast %3 : vector<1x128xf32> to vector<16x128xf32>
    %5 = arith.addf %2, %4 : vector<16x128xf32>
    %cst_5 = arith.constant 0.000000e+00 : f32
    %6 = vector.broadcast %cst_5 : f32 to vector<16x128xf32>
    %7 = arith.maximumf %5, %6 : vector<16x128xf32>
    %8 = arith.truncf %7 : vector<16x128xf32> to vector<16x128xbf16>
    %c0_6 = arith.constant 0 : index
    %c0_7 = arith.constant 0 : index
    %9 = vector.load %arg4[%c0_6, %c0_7] : memref<16x128xbf16, #tpu.memory_space<vmem>>, vector<16x128xbf16>
    tpu.vector_store %arg4[%c0_6, %c0_7], %8 {strides = array<i32>} : memref<16x128xbf16, #tpu.memory_space<vmem>>, vector<16x128xbf16>,
    return
  }
  func.func @transform_0(%arg0: i32) -> (i32, i32) {
    %c0_i32 = arith.constant 0 : i32
    %c0_i32_0 = arith.constant 0 : i32
    return %arg0, %c0_i32 : i32, i32
  }
  func.func @transform_1(%arg0: i32) -> (i32, i32) {
    %c0_i32 = arith.constant 0 : i32
    %c0_i32_0 = arith.constant 0 : i32
    %c0_i32_1 = arith.constant 0 : i32
    return %c0_i32, %c0_i32_0 : i32, i32
  }
  func.func @transform_2(%arg0: i32) -> (i32, i32) {
    %c0_i32 = arith.constant 0 : i32
    %c0_i32_0 = arith.constant 0 : i32
    %c0_i32_1 = arith.constant 0 : i32
    return %c0_i32, %c0_i32_0 : i32, i32
  }
  func.func @transform_3(%arg0: i32) -> (i32, i32) {
    %c0_i32 = arith.constant 0 : i32
    %c0_i32_0 = arith.constant 0 : i32
    return %arg0, %c0_i32 : i32, i32
  }
}

module attributes {stable_mosaic.version = 11 : i64} {
  func.func @_gemm_bias_act_kernel(%arg0: i32, %arg1: memref<16x320xbf16, #tpu.memory_space<vmem>>, %arg2: memref<320x128xbf16, #tpu.memory_space<vmem>>, %arg3: memref<1x128xf32, #tpu.memory_space<vmem>>, %arg4: memref<16x128xbf16, #tpu.memory_space<vmem>>) attributes {dimension_semantics = [#tpu.dimension_semantics<parallel>], iteration_bounds = array<i64: 1>, scalar_prefetch = 0 : i64, scratch_operands = 0 : i64, tpu.core_type = #tpu.core_type<tc>, window_params = [{transform_indices = @transform_0, window_bounds = array<i64: 16, 320>}, {pipeline_mode = #tpu.pipeline_mode<synchronous>, transform_indices = @transform_1, window_bounds = array<i64: 320, 128>}, {pipeline_mode = #tpu.pipeline_mode<synchronous>, transform_indices = @transform_2, window_bounds = array<i64: 1, 128>}, {transform_indices = @transform_3, window_bounds = array<i64: 16, 128>}]} {
    %c0 = arith.constant 0 : index
    %c0_0 = arith.constant 0 : index
    %0 = vector.load %arg1[%c0, %c0_0] : memref<16x320xbf16, #tpu.memory_space<vmem>>, vector<16x320xbf16>
    %c0_1 = arith.constant 0 : index
    %c0_2 = arith.constant 0 : index
    %1 = vector.load %arg2[%c0_1, %c0_2] : memref<320x128xbf16, #tpu.memory_space<vmem>>, vector<320x128xbf16>
    %cst = arith.constant dense<0.000000e+00> : vector<16x128xf32>
    %2 = tpu.matmul %0, %1, %cst {dimension_numbers = #tpu.dot_dimension_numbers<[1], [0], [0], [1], [0, 0, 1, 1], [], []>} : vector<16x320xbf16>, vector<320x128xbf16>, vector<16x128xf32> -> vector<16x128xf32>
    %c0_3 = arith.constant 0 : index
    %c0_4 = arith.constant 0 : index
    %3 = vector.load %arg3[%c0_3, %c0_4] : memref<1x128xf32, #tpu.memory_space<vmem>>, vector<1x128xf32>
    %4 = vector.broadcast %3 : vector<1x128xf32> to vector<16x128xf32>
    %5 = arith.addf %2, %4 : vector<16x128xf32>
    %cst_5 = arith.constant 0.000000e+00 : f32
    %6 = vector.broadcast %cst_5 : f32 to vector<16x128xf32>
    %7 = arith.maximumf %5, %6 : vector<16x128xf32>
    %8 = arith.truncf %7 : vector<16x128xf32> to vector<16x128xbf16>
    %c0_6 = arith.constant 0 : index
    %c0_7 = arith.constant 0 : index
    %9 = vector.load %arg4[%c0_6, %c0_7] : memref<16x128xbf16, #tpu.memory_space<vmem>>, vector<16x128xbf16>
    tpu.vector_store %arg4[%c0_6, %c0_7], %8 {strides = array<i32>} : memref<16x128xbf16, #tpu.memory_space<vmem>>, vector<16x128xbf16>,
    return
  }
  func.func @transform_0(%arg0: i32) -> (i32, i32) {
    %c0_i32 = arith.constant 0 : i32
    %c0_i32_0 = arith.constant 0 : i32
    return %arg0, %c0_i32 : i32, i32
  }
  func.func @transform_1(%arg0: i32) -> (i32, i32) {
    %c0_i32 = arith.constant 0 : i32
    %c0_i32_0 = arith.constant 0 : i32
    %c0_i32_1 = arith.constant 0 : i32
    return %c0_i32, %c0_i32_0 : i32, i32
  }
  func.func @transform_2(%arg0: i32) -> (i32, i32) {
    %c0_i32 = arith.constant 0 : i32
    %c0_i32_0 = arith.constant 0 : i32
    %c0_i32_1 = arith.constant 0 : i32
    return %c0_i32, %c0_i32_0 : i32, i32
  }
  func.func @transform_3(%arg0: i32) -> (i32, i32) {
    %c0_i32 = arith.constant 0 : i32
    %c0_i32_0 = arith.constant 0 : i32
    return %arg0, %c0_i32 : i32, i32
  }
}

module attributes {stable_mosaic.version = 11 : i64} {
  func.func @_gemm_bias_act_kernel(%arg0: i32, %arg1: memref<512x16xbf16, #tpu.memory_space<vmem>>, %arg2: memref<16x128xbf16, #tpu.memory_space<vmem>>, %arg3: memref<1x128xf32, #tpu.memory_space<vmem>>, %arg4: memref<512x128xbf16, #tpu.memory_space<vmem>>) attributes {dimension_semantics = [#tpu.dimension_semantics<parallel>], iteration_bounds = array<i64: 1>, scalar_prefetch = 0 : i64, scratch_operands = 0 : i64, tpu.core_type = #tpu.core_type<tc>, window_params = [{transform_indices = @transform_0, window_bounds = array<i64: 512, 16>}, {pipeline_mode = #tpu.pipeline_mode<synchronous>, transform_indices = @transform_1, window_bounds = array<i64: 16, 128>}, {pipeline_mode = #tpu.pipeline_mode<synchronous>, transform_indices = @transform_2, window_bounds = array<i64: 1, 128>}, {transform_indices = @transform_3, window_bounds = array<i64: 512, 128>}]} {
    %c0 = arith.constant 0 : index
    %c0_0 = arith.constant 0 : index
    %0 = vector.load %arg1[%c0, %c0_0] : memref<512x16xbf16, #tpu.memory_space<vmem>>, vector<512x16xbf16>
    %c0_1 = arith.constant 0 : index
    %c0_2 = arith.constant 0 : index
    %1 = vector.load %arg2[%c0_1, %c0_2] : memref<16x128xbf16, #tpu.memory_space<vmem>>, vector<16x128xbf16>
    %cst = arith.constant dense<0.000000e+00> : vector<512x128xf32>
    %2 = tpu.matmul %0, %1, %cst {dimension_numbers = #tpu.dot_dimension_numbers<[1], [0], [0], [1], [0, 0, 1, 1], [], []>} : vector<512x16xbf16>, vector<16x128xbf16>, vector<512x128xf32> -> vector<512x128xf32>
    %c0_3 = arith.constant 0 : index
    %c0_4 = arith.constant 0 : index
    %3 = vector.load %arg3[%c0_3, %c0_4] : memref<1x128xf32, #tpu.memory_space<vmem>>, vector<1x128xf32>
    %4 = vector.broadcast %3 : vector<1x128xf32> to vector<512x128xf32>
    %5 = arith.addf %2, %4 : vector<512x128xf32>
    %cst_5 = arith.constant 0.000000e+00 : f32
    %6 = vector.broadcast %cst_5 : f32 to vector<512x128xf32>
    %7 = arith.maximumf %5, %6 : vector<512x128xf32>
    %8 = arith.truncf %7 : vector<512x128xf32> to vector<512x128xbf16>
    %c0_6 = arith.constant 0 : index
    %c0_7 = arith.constant 0 : index
    %9 = vector.load %arg4[%c0_6, %c0_7] : memref<512x128xbf16, #tpu.memory_space<vmem>>, vector<512x128xbf16>
    tpu.vector_store %arg4[%c0_6, %c0_7], %8 {strides = array<i32>} : memref<512x128xbf16, #tpu.memory_space<vmem>>, vector<512x128xbf16>,
    return
  }
  func.func @transform_0(%arg0: i32) -> (i32, i32) {
    %c0_i32 = arith.constant 0 : i32
    %c0_i32_0 = arith.constant 0 : i32
    return %arg0, %c0_i32 : i32, i32
  }
  func.func @transform_1(%arg0: i32) -> (i32, i32) {
    %c0_i32 = arith.constant 0 : i32
    %c0_i32_0 = arith.constant 0 : i32
    %c0_i32_1 = arith.constant 0 : i32
    return %c0_i32, %c0_i32_0 : i32, i32
  }
  func.func @transform_2(%arg0: i32) -> (i32, i32) {
    %c0_i32 = arith.constant 0 : i32
    %c0_i32_0 = arith.constant 0 : i32
    %c0_i32_1 = arith.constant 0 : i32
    return %c0_i32, %c0_i32_0 : i32, i32
  }
  func.func @transform_3(%arg0: i32) -> (i32, i32) {
    %c0_i32 = arith.constant 0 : i32
    %c0_i32_0 = arith.constant 0 : i32
    return %arg0, %c0_i32 : i32, i32
  }
}

module attributes {stable_mosaic.version = 11 : i64} {
  func.func @_gemm_bias_act_kernel(%arg0: i32, %arg1: memref<512x640xbf16, #tpu.memory_space<vmem>>, %arg2: memref<640x128xbf16, #tpu.memory_space<vmem>>, %arg3: memref<1x128xf32, #tpu.memory_space<vmem>>, %arg4: memref<512x128xbf16, #tpu.memory_space<vmem>>) attributes {dimension_semantics = [#tpu.dimension_semantics<parallel>], iteration_bounds = array<i64: 1>, scalar_prefetch = 0 : i64, scratch_operands = 0 : i64, tpu.core_type = #tpu.core_type<tc>, window_params = [{transform_indices = @transform_0, window_bounds = array<i64: 512, 640>}, {pipeline_mode = #tpu.pipeline_mode<synchronous>, transform_indices = @transform_1, window_bounds = array<i64: 640, 128>}, {pipeline_mode = #tpu.pipeline_mode<synchronous>, transform_indices = @transform_2, window_bounds = array<i64: 1, 128>}, {transform_indices = @transform_3, window_bounds = array<i64: 512, 128>}]} {
    %c0 = arith.constant 0 : index
    %c0_0 = arith.constant 0 : index
    %0 = vector.load %arg1[%c0, %c0_0] : memref<512x640xbf16, #tpu.memory_space<vmem>>, vector<512x640xbf16>
    %c0_1 = arith.constant 0 : index
    %c0_2 = arith.constant 0 : index
    %1 = vector.load %arg2[%c0_1, %c0_2] : memref<640x128xbf16, #tpu.memory_space<vmem>>, vector<640x128xbf16>
    %cst = arith.constant dense<0.000000e+00> : vector<512x128xf32>
    %2 = tpu.matmul %0, %1, %cst {dimension_numbers = #tpu.dot_dimension_numbers<[1], [0], [0], [1], [0, 0, 1, 1], [], []>} : vector<512x640xbf16>, vector<640x128xbf16>, vector<512x128xf32> -> vector<512x128xf32>
    %c0_3 = arith.constant 0 : index
    %c0_4 = arith.constant 0 : index
    %3 = vector.load %arg3[%c0_3, %c0_4] : memref<1x128xf32, #tpu.memory_space<vmem>>, vector<1x128xf32>
    %4 = vector.broadcast %3 : vector<1x128xf32> to vector<512x128xf32>
    %5 = arith.addf %2, %4 : vector<512x128xf32>
    %cst_5 = arith.constant 0.000000e+00 : f32
    %6 = vector.broadcast %cst_5 : f32 to vector<512x128xf32>
    %7 = arith.maximumf %5, %6 : vector<512x128xf32>
    %8 = arith.truncf %7 : vector<512x128xf32> to vector<512x128xbf16>
    %c0_6 = arith.constant 0 : index
    %c0_7 = arith.constant 0 : index
    %9 = vector.load %arg4[%c0_6, %c0_7] : memref<512x128xbf16, #tpu.memory_space<vmem>>, vector<512x128xbf16>
    tpu.vector_store %arg4[%c0_6, %c0_7], %8 {strides = array<i32>} : memref<512x128xbf16, #tpu.memory_space<vmem>>, vector<512x128xbf16>,
    return
  }
  func.func @transform_0(%arg0: i32) -> (i32, i32) {
    %c0_i32 = arith.constant 0 : i32
    %c0_i32_0 = arith.constant 0 : i32
    return %arg0, %c0_i32 : i32, i32
  }
  func.func @transform_1(%arg0: i32) -> (i32, i32) {
    %c0_i32 = arith.constant 0 : i32
    %c0_i32_0 = arith.constant 0 : i32
    %c0_i32_1 = arith.constant 0 : i32
    return %c0_i32, %c0_i32_0 : i32, i32
  }
  func.func @transform_2(%arg0: i32) -> (i32, i32) {
    %c0_i32 = arith.constant 0 : i32
    %c0_i32_0 = arith.constant 0 : i32
    %c0_i32_1 = arith.constant 0 : i32
    return %c0_i32, %c0_i32_0 : i32, i32
  }
  func.func @transform_3(%arg0: i32) -> (i32, i32) {
    %c0_i32 = arith.constant 0 : i32
    %c0_i32_0 = arith.constant 0 : i32
    return %arg0, %c0_i32 : i32, i32
  }
}

module attributes {stable_mosaic.version = 11 : i64} {
  func.func @_gemm_bias_act_kernel(%arg0: i32, %arg1: memref<512x576xbf16, #tpu.memory_space<vmem>>, %arg2: memref<576x128xbf16, #tpu.memory_space<vmem>>, %arg3: memref<1x128xf32, #tpu.memory_space<vmem>>, %arg4: memref<512x128xbf16, #tpu.memory_space<vmem>>) attributes {dimension_semantics = [#tpu.dimension_semantics<parallel>], iteration_bounds = array<i64: 1>, scalar_prefetch = 0 : i64, scratch_operands = 0 : i64, tpu.core_type = #tpu.core_type<tc>, window_params = [{transform_indices = @transform_0, window_bounds = array<i64: 512, 576>}, {pipeline_mode = #tpu.pipeline_mode<synchronous>, transform_indices = @transform_1, window_bounds = array<i64: 576, 128>}, {pipeline_mode = #tpu.pipeline_mode<synchronous>, transform_indices = @transform_2, window_bounds = array<i64: 1, 128>}, {transform_indices = @transform_3, window_bounds = array<i64: 512, 128>}]} {
    %c0 = arith.constant 0 : index
    %c0_0 = arith.constant 0 : index
    %0 = vector.load %arg1[%c0, %c0_0] : memref<512x576xbf16, #tpu.memory_space<vmem>>, vector<512x576xbf16>
    %c0_1 = arith.constant 0 : index
    %c0_2 = arith.constant 0 : index
    %1 = vector.load %arg2[%c0_1, %c0_2] : memref<576x128xbf16, #tpu.memory_space<vmem>>, vector<576x128xbf16>
    %cst = arith.constant dense<0.000000e+00> : vector<512x128xf32>
    %2 = tpu.matmul %0, %1, %cst {dimension_numbers = #tpu.dot_dimension_numbers<[1], [0], [0], [1], [0, 0, 1, 1], [], []>} : vector<512x576xbf16>, vector<576x128xbf16>, vector<512x128xf32> -> vector<512x128xf32>
    %c0_3 = arith.constant 0 : index
    %c0_4 = arith.constant 0 : index
    %3 = vector.load %arg3[%c0_3, %c0_4] : memref<1x128xf32, #tpu.memory_space<vmem>>, vector<1x128xf32>
    %4 = vector.broadcast %3 : vector<1x128xf32> to vector<512x128xf32>
    %5 = arith.addf %2, %4 : vector<512x128xf32>
    %cst_5 = arith.constant 0.000000e+00 : f32
    %6 = vector.broadcast %cst_5 : f32 to vector<512x128xf32>
    %7 = arith.maximumf %5, %6 : vector<512x128xf32>
    %8 = arith.truncf %7 : vector<512x128xf32> to vector<512x128xbf16>
    %c0_6 = arith.constant 0 : index
    %c0_7 = arith.constant 0 : index
    %9 = vector.load %arg4[%c0_6, %c0_7] : memref<512x128xbf16, #tpu.memory_space<vmem>>, vector<512x128xbf16>
    tpu.vector_store %arg4[%c0_6, %c0_7], %8 {strides = array<i32>} : memref<512x128xbf16, #tpu.memory_space<vmem>>, vector<512x128xbf16>,
    return
  }
  func.func @transform_0(%arg0: i32) -> (i32, i32) {
    %c0_i32 = arith.constant 0 : i32
    %c0_i32_0 = arith.constant 0 : i32
    return %arg0, %c0_i32 : i32, i32
  }
  func.func @transform_1(%arg0: i32) -> (i32, i32) {
    %c0_i32 = arith.constant 0 : i32
    %c0_i32_0 = arith.constant 0 : i32
    %c0_i32_1 = arith.constant 0 : i32
    return %c0_i32, %c0_i32_0 : i32, i32
  }
  func.func @transform_2(%arg0: i32) -> (i32, i32) {
    %c0_i32 = arith.constant 0 : i32
    %c0_i32_0 = arith.constant 0 : i32
    %c0_i32_1 = arith.constant 0 : i32
    return %c0_i32, %c0_i32_0 : i32, i32
  }
  func.func @transform_3(%arg0: i32) -> (i32, i32) {
    %c0_i32 = arith.constant 0 : i32
    %c0_i32_0 = arith.constant 0 : i32
    return %arg0, %c0_i32 : i32, i32
  }
}

module attributes {stable_mosaic.version = 11 : i64} {
  func.func @_gemm_bias_act_kernel(%arg0: i32, %arg1: memref<512x64xbf16, #tpu.memory_space<vmem>>, %arg2: memref<64x128xbf16, #tpu.memory_space<vmem>>, %arg3: memref<1x128xf32, #tpu.memory_space<vmem>>, %arg4: memref<512x128xf32, #tpu.memory_space<vmem>>) attributes {dimension_semantics = [#tpu.dimension_semantics<parallel>], iteration_bounds = array<i64: 1>, scalar_prefetch = 0 : i64, scratch_operands = 0 : i64, tpu.core_type = #tpu.core_type<tc>, window_params = [{transform_indices = @transform_0, window_bounds = array<i64: 512, 64>}, {pipeline_mode = #tpu.pipeline_mode<synchronous>, transform_indices = @transform_1, window_bounds = array<i64: 64, 128>}, {pipeline_mode = #tpu.pipeline_mode<synchronous>, transform_indices = @transform_2, window_bounds = array<i64: 1, 128>}, {transform_indices = @transform_3, window_bounds = array<i64: 512, 128>}]} {
    %c0 = arith.constant 0 : index
    %c0_0 = arith.constant 0 : index
    %0 = vector.load %arg1[%c0, %c0_0] : memref<512x64xbf16, #tpu.memory_space<vmem>>, vector<512x64xbf16>
    %c0_1 = arith.constant 0 : index
    %c0_2 = arith.constant 0 : index
    %1 = vector.load %arg2[%c0_1, %c0_2] : memref<64x128xbf16, #tpu.memory_space<vmem>>, vector<64x128xbf16>
    %cst = arith.constant dense<0.000000e+00> : vector<512x128xf32>
    %2 = tpu.matmul %0, %1, %cst {dimension_numbers = #tpu.dot_dimension_numbers<[1], [0], [0], [1], [0, 0, 1, 1], [], []>} : vector<512x64xbf16>, vector<64x128xbf16>, vector<512x128xf32> -> vector<512x128xf32>
    %c0_3 = arith.constant 0 : index
    %c0_4 = arith.constant 0 : index
    %3 = vector.load %arg3[%c0_3, %c0_4] : memref<1x128xf32, #tpu.memory_space<vmem>>, vector<1x128xf32>
    %4 = vector.broadcast %3 : vector<1x128xf32> to vector<512x128xf32>
    %5 = arith.addf %2, %4 : vector<512x128xf32>
    %c0_5 = arith.constant 0 : index
    %c0_6 = arith.constant 0 : index
    %6 = vector.load %arg4[%c0_5, %c0_6] : memref<512x128xf32, #tpu.memory_space<vmem>>, vector<512x128xf32>
    tpu.vector_store %arg4[%c0_5, %c0_6], %5 {strides = array<i32>} : memref<512x128xf32, #tpu.memory_space<vmem>>, vector<512x128xf32>,
    return
  }
  func.func @transform_0(%arg0: i32) -> (i32, i32) {
    %c0_i32 = arith.constant 0 : i32
    %c0_i32_0 = arith.constant 0 : i32
    return %arg0, %c0_i32 : i32, i32
  }
  func.func @transform_1(%arg0: i32) -> (i32, i32) {
    %c0_i32 = arith.constant 0 : i32
    %c0_i32_0 = arith.constant 0 : i32
    %c0_i32_1 = arith.constant 0 : i32
    return %c0_i32, %c0_i32_0 : i32, i32
  }
  func.func @transform_2(%arg0: i32) -> (i32, i32) {
    %c0_i32 = arith.constant 0 : i32
    %c0_i32_0 = arith.constant 0 : i32
    %c0_i32_1 = arith.constant 0 : i32
    return %c0_i32, %c0_i32_0 : i32, i32
  }
  func.func @transform_3(%arg0: i32) -> (i32, i32) {
    %c0_i32 = arith.constant 0 : i32
    %c0_i32_0 = arith.constant 0 : i32
    return %arg0, %c0_i32 : i32, i32
  }
}

</mosaic_0001>

<bundles_post_ra>
// kernel: _lambda_.27
= control target key start
LH: loop header
LB: loop body
LE: loop exit
PB: predicated region body
PF: predicated region fallthrough
CT: control target
= control target key end

     0   :  { %s2046_s12 = smov 0   ;;  %s2298_s0 = inlined_call_operand.vmem [shape: bf16[2048,160], index: 0, kind: input, shape index: {}]   ;;  %s2299_s1 = inlined_call_operand.vmem [shape: bf16[160,128], index: 1, kind: input, shape index: {}]   ;;  %s2300_s2 = inlined_call_operand.vmem [shape: f32[1,128], index: 2, kind: input, shape index: {}]   ;;  %s2301_s3 = inlined_call_operand.vmem [shape: bf16[2048,128], index: 3, kind: output, shape index: {}]  }
   0x1 LB: > { %s1443_s13 = sadd.s32 4294967295, %s2023_s12   ;;  %p1447_p0 = scmp.ge.s32.totalorder %s2023_s12, 1  ;;  %s2023_s12 = sphi %s2046_s12, %s13_s12  }
   0x2   : > { %p139_p1 = scmp.lt.s32.totalorder %s2023_s12, 5 }
   0x4   : > { %p140_p2 = pnand %p1447_p0, %p139_p1 }
   0x5   : > { %v1911_v0 = vld [vmem:[%s2299_s1] sm:$0xff] (!%p140_p2)   ;;  %v2025_v1 = vmov (!%p140_p2), 0   ;;  %s1448_s16 = sshll.u32 (!%p140_p2), %s1443_s13, 6  ;;  %v1912_v2 = vld [vmem:[%s2299_s1 + $0x8] sm:$0xff] (!%p140_p2)   ;;  %v1913_v3 = vld [vmem:[%s2299_s1 + $0x10] sm:$0xff] (!%p140_p2)   ;;  %vm617_vm0 = vcmask (!%p140_p2), 261120  }
   0x6   : > { %143 = sbr.rel (%p140_p2) target bundleno = 387 (0x183), region = 32  ;;  %714 = vmatprep.subr.bf16.mxu0 (!%p140_p2), %v2025_v1  ;;  %1882 = vmatprep.subr.bf16.mxu1 (!%p140_p2), %v2025_v1  ;;  %p165_p3 = scmp.lt.s32.totalorder (!%p140_p2), %s1448_s16, 255  ;;  %v1914_v4 = vld [vmem:[%s2299_s1 + $0x18] sm:$0xff] (!%p140_p2)   ;;  %v1915_v7 = vld [vmem:[%s2299_s1 + $0x20] sm:$0xff] (!%p140_p2)   ;;  %v1916_v8 = vld [vmem:[%s2299_s1 + $0x28] sm:$0xff] (!%p140_p2)  }
   0x7   : > { %715 = vmatpush1.bf16.msra.mxu0 (!%p140_p2), %v1911_v0  ;;  %1892 = vmatpush1.bf16.msra.mxu1 (!%p140_p2), %v1911_v0  ;;  %v1917_v9 = vld [vmem:[%s2299_s1 + $0x30] sm:$0xff] (!%p140_p2)   ;;  %v1918_v10 = vld [vmem:[%s2299_s1 + $0x38] sm:$0xff] (!%p140_p2)   ;;  %v1919_v11 = vld [vmem:[%s2299_s1 + $0x40] sm:$0xff] (!%p140_p2)  }
   0x8   : > { %716 = vmatprep.subr.bf16.mxu0 (!%p140_p2), %v2025_v1  ;;  %1883 = vmatprep.subr.bf16.mxu1 (!%p140_p2), %v2025_v1  ;;  %v1920_v12 = vld [vmem:[%s2299_s1 + $0x48] sm:$0xff] (!%p140_p2)  }
   0xb   : > { %717 = vmatpush1.bf16.msra.mxu0 (!%p140_p2), %v1912_v2  ;;  %1893 = vmatpush1.bf16.msra.mxu1 (!%p140_p2), %v1912_v2 }
   0xc   : > { %718 = vmatprep.subr.bf16.mxu0 (!%p140_p2), %v2025_v1  ;;  %1884 = vmatprep.subr.bf16.mxu1 (!%p140_p2), %v2025_v1 }
   0xd   : > { %s2303_s16 = smov (!%p165_p3, %s1448_s16), 255 }
   0xe   : > { %s1626_s21 = sshll.u32 %s2303_s16, 3  ;;  %s1452_s15 = sshll.u32 %s2303_s16, 2 }
   0xf   : > { %s2069_s24 = scalar_lea.vmem %s2298_s0, %s1626_s21  ;;  %719 = vmatpush1.bf16.msra.mxu0 %v1913_v3  ;;  %1894 = vmatpush1.bf16.msra.mxu1 %v1913_v3  ;;  %s2201_s19 = scalar_lea.vmem %s2301_s3, %s1452_s15 }
  0x10   : > { %720 = vmatprep.subr.bf16.mxu0 %v2025_v1  ;;  %1885 = vmatprep.subr.bf16.mxu1 %v2025_v1  ;;  %v1923_v5 = vld [vmem:[%s2069_s24 + $0x4] ss:$8 sps:$4 sm:$0xff]   ;;  %v1921_v13 = vld [vmem:[%s2069_s24] ss:$8 sps:$4 sm:$0xff]   ;;  %v1927_v15 = vld [vmem:[%s2069_s24 + $0x14] ss:$8 sps:$4 sm:$0xff]  }
  0x11   : > { %v1926_v6 = vld [vmem:[%s2069_s24 + $0x104] ss:$8 sps:$4 sm:$0xff]   ;;  %1528 = vmatprep.mubr.msk.bf16.mxu0 %vm617_vm0, %v1923_v5  ;;  %v1924_v14 = vld [vmem:[%s2069_s24 + $0x100] ss:$8 sps:$4 sm:$0xff]   ;;  %v1929_v16 = vld [vmem:[%s2069_s24 + $0x114] ss:$8 sps:$4 sm:$0xff]  }
  0x12   : > { %1544 = vmatprep.mubr.msk.bf16.mxu1 %vm617_vm0, %v1926_v6  ;;  %v1931_v17 = vld [vmem:[%s2069_s24 + $0x10] ss:$8 sps:$4 sm:$0xff]   ;;  %v1933_v19 = vld [vmem:[%s2069_s24 + $0x24] ss:$8 sps:$4 sm:$0xff]   ;;  %v1937_v21 = vld [vmem:[%s2069_s24 + $0x20] ss:$8 sps:$4 sm:$0xff]  }
  0x13   : > { %721 = vmatpush1.bf16.msra.mxu0 %v1914_v4  ;;  %1895 = vmatpush1.bf16.msra.mxu1 %v1914_v4  ;;  %v1932_v18 = vld [vmem:[%s2069_s24 + $0x110] ss:$8 sps:$4 sm:$0xff]   ;;  %v1935_v20 = vld [vmem:[%s2069_s24 + $0x124] ss:$8 sps:$4 sm:$0xff]   ;;  %v1938_v22 = vld [vmem:[%s2069_s24 + $0x120] ss:$8 sps:$4 sm:$0xff]  }
  0x14   : > { %722 = vmatprep.subr.bf16.mxu0 %v2025_v1  ;;  %1886 = vmatprep.subr.bf16.mxu1 %v2025_v1  ;;  %v1939_v23 = vld [vmem:[%s2069_s24 + $0x34] ss:$8 sps:$4 sm:$0xff]   ;;  %v1943_v25 = vld [vmem:[%s2069_s24 + $0x30] ss:$8 sps:$4 sm:$0xff]   ;;  %v1945_v27 = vld [vmem:[%s2069_s24 + $0x44] ss:$8 sps:$4 sm:$0xff]  }
  0x15   : > { %v1941_v24 = vld [vmem:[%s2069_s24 + $0x134] ss:$8 sps:$4 sm:$0xff]   ;;  %v1944_v26 = vld [vmem:[%s2069_s24 + $0x130] ss:$8 sps:$4 sm:$0xff]   ;;  %v1947_v28 = vld [vmem:[%s2069_s24 + $0x144] ss:$8 sps:$4 sm:$0xff]  }
  0x16   : > { %v1949_v29 = vld [vmem:[%s2069_s24 + $0x40] ss:$8 sps:$4 sm:$0xff]   ;;  %v1951_v31 = vld [vmem:[%s2069_s24 + $0x54] ss:$8 sps:$4 sm:$0xff]   ;;  %v1955_v33 = vld [vmem:[%s2069_s24 + $0x50] ss:$8 sps:$4 sm:$0xff]  }
  0x17   : > { %723 = vmatpush1.bf16.msra.mxu0 %v1915_v7  ;;  %1896 = vmatpush1.bf16.msra.mxu1 %v1915_v7  ;;  %v1950_v30 = vld [vmem:[%s2069_s24 + $0x140] ss:$8 sps:$4 sm:$0xff]   ;;  %v1953_v32 = vld [vmem:[%s2069_s24 + $0x154] ss:$8 sps:$4 sm:$0xff]   ;;  %v1956_v34 = vld [vmem:[%s2069_s24 + $0x150] ss:$8 sps:$4 sm:$0xff]  }
  0x18   : > { %724 = vmatprep.subr.bf16.mxu0 %v2025_v1  ;;  %1887 = vmatprep.subr.bf16.mxu1 %v2025_v1  ;;  %v1957_v35 = vld [vmem:[%s2069_s24 + $0x64] ss:$8 sps:$4 sm:$0xff]   ;;  %v1961_v37 = vld [vmem:[%s2069_s24 + $0x60] ss:$8 sps:$4 sm:$0xff]   ;;  %v1963_v39 = vld [vmem:[%s2069_s24 + $0x74] ss:$8 sps:$4 sm:$0xff]  }
  0x19   : > { %v1959_v36 = vld [vmem:[%s2069_s24 + $0x164] ss:$8 sps:$4 sm:$0xff]   ;;  %v1962_v38 = vld [vmem:[%s2069_s24 + $0x160] ss:$8 sps:$4 sm:$0xff]   ;;  %v1965_v40 = vld [vmem:[%s2069_s24 + $0x174] ss:$8 sps:$4 sm:$0xff]  }
  0x1a   : > { %v1967_v41 = vld [vmem:[%s2069_s24 + $0x70] ss:$8 sps:$4 sm:$0xff]   ;;  %v1969_v43 = vld [vmem:[%s2069_s24 + $0x84] ss:$8 sps:$4 sm:$0xff]   ;;  %v1973_v45 = vld [vmem:[%s2069_s24 + $0x80] ss:$8 sps:$4 sm:$0xff]  }
  0x1b   : > { %725 = vmatpush1.bf16.msra.mxu0 %v1916_v8  ;;  %1897 = vmatpush1.bf16.msra.mxu1 %v1916_v8  ;;  %v1968_v42 = vld [vmem:[%s2069_s24 + $0x170] ss:$8 sps:$4 sm:$0xff]   ;;  %v1971_v44 = vld [vmem:[%s2069_s24 + $0x184] ss:$8 sps:$4 sm:$0xff]   ;;  %v1974_v46 = vld [vmem:[%s2069_s24 + $0x180] ss:$8 sps:$4 sm:$0xff]  }
  0x1c   : > { %726 = vmatprep.subr.bf16.mxu0 %v2025_v1  ;;  %1888 = vmatprep.subr.bf16.mxu1 %v2025_v1  ;;  %v1975_v47 = vld [vmem:[%s2069_s24 + $0x94] ss:$8 sps:$4 sm:$0xff]   ;;  %v1979_v49 = vld [vmem:[%s2069_s24 + $0x90] ss:$8 sps:$4 sm:$0xff]   ;;  %v1981_v51 = vld [vmem:[%s2069_s24 + $0xa4] ss:$8 sps:$4 sm:$0xff]  }
  0x1d   : > { %v1977_v48 = vld [vmem:[%s2069_s24 + $0x194] ss:$8 sps:$4 sm:$0xff]   ;;  %v1980_v50 = vld [vmem:[%s2069_s24 + $0x190] ss:$8 sps:$4 sm:$0xff]   ;;  %v1983_v52 = vld [vmem:[%s2069_s24 + $0x1a4] ss:$8 sps:$4 sm:$0xff]  }
  0x1e   : > { %v1985_v53 = vld [vmem:[%s2069_s24 + $0xa0] ss:$8 sps:$4 sm:$0xff]   ;;  %v1987_v55 = vld [vmem:[%s2069_s24 + $0xb4] ss:$8 sps:$4 sm:$0xff]   ;;  %v1991_v57 = vld [vmem:[%s2069_s24 + $0xb0] ss:$8 sps:$4 sm:$0xff]  }
  0x1f   : > { %727 = vmatpush1.bf16.msra.mxu0 %v1917_v9  ;;  %1898 = vmatpush1.bf16.msra.mxu1 %v1917_v9  ;;  %v1986_v54 = vld [vmem:[%s2069_s24 + $0x1a0] ss:$8 sps:$4 sm:$0xff]   ;;  %v1989_v56 = vld [vmem:[%s2069_s24 + $0x1b4] ss:$8 sps:$4 sm:$0xff]   ;;  %v1992_v58 = vld [vmem:[%s2069_s24 + $0x1b0] ss:$8 sps:$4 sm:$0xff]  }
  0x20   : > { %728 = vmatprep.subr.bf16.mxu0 %v2025_v1  ;;  %1889 = vmatprep.subr.bf16.mxu1 %v2025_v1  ;;  %v1993_v59 = vld [vmem:[%s2069_s24 + $0xc4] ss:$8 sps:$4 sm:$0xff]   ;;  %v1997_v61 = vld [vmem:[%s2069_s24 + $0xc0] ss:$8 sps:$4 sm:$0xff]   ;;  %v1999_v63 = vld [vmem:[%s2069_s24 + $0xd4] ss:$8 sps:$4 sm:$0xff]  }
  0x21   : > { %v1995_v60 = vld [vmem:[%s2069_s24 + $0x1c4] ss:$8 sps:$4 sm:$0xff]   ;;  %v1998_v62 = vld [vmem:[%s2069_s24 + $0x1c0] ss:$8 sps:$4 sm:$0xff]   ;;  %v2001_v0 = vld [vmem:[%s2069_s24 + $0x1d4] ss:$8 sps:$4 sm:$0xff]  }
  0x22   : > { %v2004_v2 = vld [vmem:[%s2069_s24 + $0x1d0] ss:$8 sps:$4 sm:$0xff]   ;;  %v2005_v3 = vld [vmem:[%s2069_s24 + $0xe4] ss:$8 sps:$4 sm:$0xff]   ;;  %v2009_v5 = vld [vmem:[%s2069_s24 + $0xe0] ss:$8 sps:$4 sm:$0xff]  }
  0x23   : > { %729 = vmatpush1.bf16.msra.mxu0 %v1918_v10  ;;  %1899 = vmatpush1.bf16.msra.mxu1 %v1918_v10  ;;  %v2007_v4 = vld [vmem:[%s2069_s24 + $0x1e4] ss:$8 sps:$4 sm:$0xff]   ;;  %v2010_v6 = vld [vmem:[%s2069_s24 + $0x1e0] ss:$8 sps:$4 sm:$0xff]   ;;  %v2011_v7 = vld [vmem:[%s2069_s24 + $0xf4] ss:$8 sps:$4 sm:$0xff]  }
  0x24   : > { %730 = vmatprep.subr.bf16.mxu0 %v2025_v1  ;;  %1890 = vmatprep.subr.bf16.mxu1 %v2025_v1  ;;  %v2013_v8 = vld [vmem:[%s2069_s24 + $0x1f4] ss:$8 sps:$4 sm:$0xff]   ;;  %v2015_v9 = vld [vmem:[%s2069_s24 + $0xf0] ss:$8 sps:$4 sm:$0xff]  }
  0x25   : > { %v2016_v10 = vld [vmem:[%s2069_s24 + $0x1f0] ss:$8 sps:$4 sm:$0xff]  }
  0x27   : > { %731 = vmatpush1.bf16.msra.mxu0 %v1919_v11  ;;  %1900 = vmatpush1.bf16.msra.mxu1 %v1919_v11  ;;  %v2191_v11 = vld [vmem:[%s2300_s2] ss:$0 sm:$0xff] }
  0x28   : > { %732 = vmatprep.subr.bf16.mxu0 %v2025_v1  ;;  %1891 = vmatprep.subr.bf16.mxu1 %v2025_v1  ;;  %v2003_v1 = vld [vmem:[%s2069_s24 + $0xd0] ss:$8 sps:$4 sm:$0xff]  }
  0x2b   : > { %733 = vmatpush1.bf16.msra.mxu0 %v1920_v12  ;;  %1901 = vmatpush1.bf16.msra.mxu1 %v1920_v12 }
  0x2e   : > { %747 = vmatmul.mubr.bf16.vlgmr.msra.gmra.mrb[0].mxu0 %v1921_v13  ;;  %875 = vmatmul.mubr.bf16.vlgmr.msra.gmra.mrb[0].mxu1 %v1924_v14 }
  0x2f   : > { %1529 = vmatprep.mubr.msk.bf16.mxu0 %vm617_vm0, %v1927_v15  ;;  %1545 = vmatprep.mubr.msk.bf16.mxu1 %vm617_vm0, %v1929_v16 }
  0x36   : > { %755 = vmatmul.mubr.bf16.gmra.mrb[4].mxu0 %v1931_v17  ;;  %883 = vmatmul.mubr.bf16.gmra.mrb[4].mxu1 %v1932_v18 }
  0x37   : > { %1530 = vmatprep.mubr.msk.bf16.mxu0 %vm617_vm0, %v1933_v19  ;;  %1546 = vmatprep.mubr.msk.bf16.mxu1 %vm617_vm0, %v1935_v20 }
  0x3e   : > { %763 = vmatmul.mubr.bf16.gmra.mrb[8].mxu0 %v1937_v21  ;;  %891 = vmatmul.mubr.bf16.gmra.mrb[8].mxu1 %v1938_v22 }
  0x3f   : > { %1531 = vmatprep.mubr.msk.bf16.mxu0 %vm617_vm0, %v1939_v23  ;;  %1547 = vmatprep.mubr.msk.bf16.mxu1 %vm617_vm0, %v1941_v24 }
  0x46   : > { %771 = vmatmul.mubr.bf16.gmra.mrb[12].mxu0 %v1943_v25  ;;  %899 = vmatmul.mubr.bf16.gmra.mrb[12].mxu1 %v1944_v26 }
  0x47   : > { %1532 = vmatprep.mubr.msk.bf16.mxu0 %vm617_vm0, %v1945_v27  ;;  %1548 = vmatprep.mubr.msk.bf16.mxu1 %vm617_vm0, %v1947_v28 }
  0x4e   : > { %779 = vmatmul.mubr.bf16.gmra.mrb[16].mxu0 %v1949_v29  ;;  %907 = vmatmul.mubr.bf16.gmra.mrb[16].mxu1 %v1950_v30 }
  0x4f   : > { %1533 = vmatprep.mubr.msk.bf16.mxu0 %vm617_vm0, %v1951_v31  ;;  %1549 = vmatprep.mubr.msk.bf16.mxu1 %vm617_vm0, %v1953_v32 }
  0x56   : > { %787 = vmatmul.mubr.bf16.gmra.mrb[20].mxu0 %v1955_v33  ;;  %915 = vmatmul.mubr.bf16.gmra.mrb[20].mxu1 %v1956_v34 }
  0x57   : > { %1534 = vmatprep.mubr.msk.bf16.mxu0 %vm617_vm0, %v1957_v35  ;;  %1550 = vmatprep.mubr.msk.bf16.mxu1 %vm617_vm0, %v1959_v36 }
  0x5e   : > { %795 = vmatmul.mubr.bf16.gmra.mrb[24].mxu0 %v1961_v37  ;;  %923 = vmatmul.mubr.bf16.gmra.mrb[24].mxu1 %v1962_v38 }
  0x5f   : > { %1535 = vmatprep.mubr.msk.bf16.mxu0 %vm617_vm0, %v1963_v39  ;;  %1551 = vmatprep.mubr.msk.bf16.mxu1 %vm617_vm0, %v1965_v40 }
  0x66   : > { %803 = vmatmul.mubr.bf16.gmra.mrb[28].mxu0 %v1967_v41  ;;  %931 = vmatmul.mubr.bf16.gmra.mrb[28].mxu1 %v1968_v42 }
  0x67   : > { %1536 = vmatprep.mubr.msk.bf16.mxu0 %vm617_vm0, %v1969_v43  ;;  %1552 = vmatprep.mubr.msk.bf16.mxu1 %vm617_vm0, %v1971_v44 }
  0x6e   : > { %811 = vmatmul.mubr.bf16.gmra.mrb[32].mxu0 %v1973_v45  ;;  %939 = vmatmul.mubr.bf16.gmra.mrb[32].mxu1 %v1974_v46 }
  0x6f   : > { %1537 = vmatprep.mubr.msk.bf16.mxu0 %vm617_vm0, %v1975_v47  ;;  %1553 = vmatprep.mubr.msk.bf16.mxu1 %vm617_vm0, %v1977_v48 }
  0x76   : > { %819 = vmatmul.mubr.bf16.gmra.mrb[36].mxu0 %v1979_v49  ;;  %947 = vmatmul.mubr.bf16.gmra.mrb[36].mxu1 %v1980_v50 }
  0x77   : > { %1538 = vmatprep.mubr.msk.bf16.mxu0 %vm617_vm0, %v1981_v51  ;;  %1554 = vmatprep.mubr.msk.bf16.mxu1 %vm617_vm0, %v1983_v52 }
  0x7e   : > { %827 = vmatmul.mubr.bf16.gmra.mrb[40].mxu0 %v1985_v53  ;;  %955 = vmatmul.mubr.bf16.gmra.mrb[40].mxu1 %v1986_v54 }
  0x7f   : > { %1539 = vmatprep.mubr.msk.bf16.mxu0 %vm617_vm0, %v1987_v55  ;;  %1555 = vmatprep.mubr.msk.bf16.mxu1 %vm617_vm0, %v1989_v56 }
  0x86   : > { %835 = vmatmul.mubr.bf16.gmra.mrb[44].mxu0 %v1991_v57  ;;  %963 = vmatmul.mubr.bf16.gmra.mrb[44].mxu1 %v1992_v58 }
  0x87   : > { %1540 = vmatprep.mubr.msk.bf16.mxu0 %vm617_vm0, %v1993_v59  ;;  %1556 = vmatprep.mubr.msk.bf16.mxu1 %vm617_vm0, %v1995_v60 }
  0x8e   : > { %843 = vmatmul.mubr.bf16.gmra.mrb[48].mxu0 %v1997_v61  ;;  %971 = vmatmul.mubr.bf16.gmra.mrb[48].mxu1 %v1998_v62 }
  0x8f   : > { %1541 = vmatprep.mubr.msk.bf16.mxu0 %vm617_vm0, %v1999_v63  ;;  %1557 = vmatprep.mubr.msk.bf16.mxu1 %vm617_vm0, %v2001_v0 }
  0x96   : > { %851 = vmatmul.mubr.bf16.gmra.mrb[52].mxu0 %v2003_v1  ;;  %979 = vmatmul.mubr.bf16.gmra.mrb[52].mxu1 %v2004_v2 }
  0x97   : > { %1542 = vmatprep.mubr.msk.bf16.mxu0 %vm617_vm0, %v2005_v3  ;;  %1558 = vmatprep.mubr.msk.bf16.mxu1 %vm617_vm0, %v2007_v4 }
  0x9e   : > { %859 = vmatmul.mubr.bf16.gmra.mrb[56].mxu0 %v2009_v5  ;;  %987 = vmatmul.mubr.bf16.gmra.mrb[56].mxu1 %v2010_v6 }
  0x9f   : > { %1543 = vmatprep.mubr.msk.bf16.mxu0 %vm617_vm0, %v2011_v7  ;;  %1559 = vmatprep.mubr.msk.bf16.mxu1 %vm617_vm0, %v2013_v8 }
  0xa6   : > { %867 = vmatmul.mubr.bf16.gmra.mrb[60].mxu0 %v2015_v9  ;;  %995 = vmatmul.mubr.bf16.gmra.mrb[60].mxu1 %v2016_v10 }
 0x101   : > { %v748_v12 = vpop.f32.mrb[0].mxu0  ;;  %v876_v13 = vpop.f32.mrb[0].mxu1 }
 0x102   : > { %v749_v14 = vadd.f32 %v2191_v11, %v748_v12  ;;  %v877_v15 = vadd.f32 %v2191_v11, %v876_v13  ;;  %v750_v16 = vpop.f32.mrb[1].mxu0  ;;  %v878_v17 = vpop.f32.mrb[1].mxu1 }
 0x103   : > { %v751_v18 = vpop.f32.mrb[2].mxu0  ;;  %v879_v19 = vpop.f32.mrb[2].mxu1 }
 0x104   : > { %v752_v20 = vadd.f32 %v2191_v11, %v751_v18  ;;  %v880_v21 = vadd.f32 %v2191_v11, %v879_v19  ;;  %v753_v22 = vpop.f32.mrb[3].mxu0  ;;  %v881_v23 = vpop.f32.mrb[3].mxu1  ;;  %v1003_v24 = vmax.f32 %v749_v14, 0.0  ;;  %v1035_v25 = vmax.f32 %v877_v15, 0.0 }
 0x106   : > { %v1004_v26 = vmax.f32 %v752_v20, 0.0  ;;  %v1036_v27 = vmax.f32 %v880_v21, 0.0 }
 0x108   : > { %v1694_v28 = vpack.c.bf16 %v1004_v26, %v1003_v24  ;;  %v1774_v29 = vpack.c.bf16 %v1036_v27, %v1035_v25 }
 0x109   : > { %v756_v30 = vpop.f32.mrb[4].mxu0  ;;  %v884_v31 = vpop.f32.mrb[4].mxu1 }
 0x10a   : > { %1695 = vst [vmem:[%s2201_s19] sm:$0xff] %v1694_v28   ;;  %1866 = vst [vmem:[%s2201_s19 + $0x80] sm:$0xff] %v1774_v29   ;;  %v757_v32 = vadd.f32 %v2191_v11, %v756_v30  ;;  %v885_v33 = vadd.f32 %v2191_v11, %v884_v31  ;;  %v758_v34 = vpop.f32.mrb[5].mxu0  ;;  %v886_v35 = vpop.f32.mrb[5].mxu1 }
 0x10b   : > { %v759_v36 = vpop.f32.mrb[6].mxu0  ;;  %v887_v37 = vpop.f32.mrb[6].mxu1 }
 0x10c   : > { %v760_v38 = vadd.f32 %v2191_v11, %v759_v36  ;;  %v888_v39 = vadd.f32 %v2191_v11, %v887_v37  ;;  %v761_v40 = vpop.f32.mrb[7].mxu0  ;;  %v889_v41 = vpop.f32.mrb[7].mxu1  ;;  %v1005_v42 = vmax.f32 %v757_v32, 0.0  ;;  %v1037_v43 = vmax.f32 %v885_v33, 0.0 }
 0x10e   : > { %v1006_v44 = vmax.f32 %v760_v38, 0.0  ;;  %v1038_v45 = vmax.f32 %v888_v39, 0.0 }
 0x110   : > { %v1699_v46 = vpack.c.bf16 %v1006_v44, %v1005_v42  ;;  %v1779_v47 = vpack.c.bf16 %v1038_v45, %v1037_v43 }
 0x111   : > { %v764_v48 = vpop.f32.mrb[8].mxu0  ;;  %v892_v49 = vpop.f32.mrb[8].mxu1 }
 0x112   : > { %1851 = vst [vmem:[%s2201_s19 + $0x8] sm:$0xff] %v1699_v46   ;;  %1867 = vst [vmem:[%s2201_s19 + $0x88] sm:$0xff] %v1779_v47   ;;  %v765_v50 = vadd.f32 %v2191_v11, %v764_v48  ;;  %v893_v51 = vadd.f32 %v2191_v11, %v892_v49  ;;  %v766_v52 = vpop.f32.mrb[9].mxu0  ;;  %v894_v53 = vpop.f32.mrb[9].mxu1 }
 0x113   : > { %v767_v54 = vpop.f32.mrb[10].mxu0  ;;  %v895_v55 = vpop.f32.mrb[10].mxu1 }
 0x114   : > { %v768_v56 = vadd.f32 %v2191_v11, %v767_v54  ;;  %v896_v57 = vadd.f32 %v2191_v11, %v895_v55  ;;  %v769_v58 = vpop.f32.mrb[11].mxu0  ;;  %v897_v59 = vpop.f32.mrb[11].mxu1  ;;  %v1007_v60 = vmax.f32 %v765_v50, 0.0  ;;  %v1039_v61 = vmax.f32 %v893_v51, 0.0 }
 0x116   : > { %v1008_v62 = vmax.f32 %v768_v56, 0.0  ;;  %v1040_v63 = vmax.f32 %v896_v57, 0.0 }
 0x118   : > { %v1704_v0 = vpack.c.bf16 %v1008_v62, %v1007_v60  ;;  %v1784_v1 = vpack.c.bf16 %v1040_v63, %v1039_v61 }
 0x119   : > { %v772_v2 = vpop.f32.mrb[12].mxu0  ;;  %v900_v3 = vpop.f32.mrb[12].mxu1 }
 0x11a   : > { %1852 = vst [vmem:[%s2201_s19 + $0x10] sm:$0xff] %v1704_v0   ;;  %1868 = vst [vmem:[%s2201_s19 + $0x90] sm:$0xff] %v1784_v1   ;;  %v773_v4 = vadd.f32 %v2191_v11, %v772_v2  ;;  %v901_v5 = vadd.f32 %v2191_v11, %v900_v3  ;;  %v774_v6 = vpop.f32.mrb[13].mxu0  ;;  %v902_v7 = vpop.f32.mrb[13].mxu1 }
 0x11b   : > { %v775_v8 = vpop.f32.mrb[14].mxu0  ;;  %v903_v9 = vpop.f32.mrb[14].mxu1 }
 0x11c   : > { %v776_v10 = vadd.f32 %v2191_v11, %v775_v8  ;;  %v904_v12 = vadd.f32 %v2191_v11, %v903_v9  ;;  %v777_v13 = vpop.f32.mrb[15].mxu0  ;;  %v905_v14 = vpop.f32.mrb[15].mxu1  ;;  %v1009_v15 = vmax.f32 %v773_v4, 0.0  ;;  %v1041_v16 = vmax.f32 %v901_v5, 0.0 }
 0x11e   : > { %v1010_v17 = vmax.f32 %v776_v10, 0.0  ;;  %v1042_v18 = vmax.f32 %v904_v12, 0.0 }
 0x120   : > { %v1709_v19 = vpack.c.bf16 %v1010_v17, %v1009_v15  ;;  %v1789_v20 = vpack.c.bf16 %v1042_v18, %v1041_v16 }
 0x121   : > { %v780_v21 = vpop.f32.mrb[16].mxu0  ;;  %v908_v22 = vpop.f32.mrb[16].mxu1 }
 0x122   : > { %1853 = vst [vmem:[%s2201_s19 + $0x18] sm:$0xff] %v1709_v19   ;;  %1869 = vst [vmem:[%s2201_s19 + $0x98] sm:$0xff] %v1789_v20   ;;  %v781_v23 = vadd.f32 %v2191_v11, %v780_v21  ;;  %v909_v24 = vadd.f32 %v2191_v11, %v908_v22  ;;  %v782_v25 = vpop.f32.mrb[17].mxu0  ;;  %v910_v26 = vpop.f32.mrb[17].mxu1 }
 0x123   : > { %v783_v27 = vpop.f32.mrb[18].mxu0  ;;  %v911_v28 = vpop.f32.mrb[18].mxu1 }
 0x124   : > { %v784_v29 = vadd.f32 %v2191_v11, %v783_v27  ;;  %v912_v30 = vadd.f32 %v2191_v11, %v911_v28  ;;  %v785_v31 = vpop.f32.mrb[19].mxu0  ;;  %v913_v32 = vpop.f32.mrb[19].mxu1  ;;  %v1011_v33 = vmax.f32 %v781_v23, 0.0  ;;  %v1043_v34 = vmax.f32 %v909_v24, 0.0 }
 0x126   : > { %v1012_v35 = vmax.f32 %v784_v29, 0.0  ;;  %v1044_v36 = vmax.f32 %v912_v30, 0.0 }
 0x128   : > { %v1714_v37 = vpack.c.bf16 %v1012_v35, %v1011_v33  ;;  %v1794_v38 = vpack.c.bf16 %v1044_v36, %v1043_v34 }
 0x129   : > { %v788_v39 = vpop.f32.mrb[20].mxu0  ;;  %v916_v40 = vpop.f32.mrb[20].mxu1 }
 0x12a   : > { %1854 = vst [vmem:[%s2201_s19 + $0x20] sm:$0xff] %v1714_v37   ;;  %1870 = vst [vmem:[%s2201_s19 + $0xa0] sm:$0xff] %v1794_v38   ;;  %v789_v41 = vadd.f32 %v2191_v11, %v788_v39  ;;  %v917_v42 = vadd.f32 %v2191_v11, %v916_v40  ;;  %v790_v43 = vpop.f32.mrb[21].mxu0  ;;  %v918_v44 = vpop.f32.mrb[21].mxu1 }
 0x12b   : > { %v791_v45 = vpop.f32.mrb[22].mxu0  ;;  %v919_v46 = vpop.f32.mrb[22].mxu1 }
 0x12c   : > { %v792_v47 = vadd.f32 %v2191_v11, %v791_v45  ;;  %v920_v48 = vadd.f32 %v2191_v11, %v919_v46  ;;  %v793_v49 = vpop.f32.mrb[23].mxu0  ;;  %v921_v50 = vpop.f32.mrb[23].mxu1  ;;  %v1013_v51 = vmax.f32 %v789_v41, 0.0  ;;  %v1045_v52 = vmax.f32 %v917_v42, 0.0 }
 0x12e   : > { %v1014_v53 = vmax.f32 %v792_v47, 0.0  ;;  %v1046_v54 = vmax.f32 %v920_v48, 0.0 }
 0x130   : > { %v1719_v55 = vpack.c.bf16 %v1014_v53, %v1013_v51  ;;  %v1799_v56 = vpack.c.bf16 %v1046_v54, %v1045_v52 }
 0x131   : > { %v796_v57 = vpop.f32.mrb[24].mxu0  ;;  %v924_v58 = vpop.f32.mrb[24].mxu1 }
 0x132   : > { %1855 = vst [vmem:[%s2201_s19 + $0x28] sm:$0xff] %v1719_v55   ;;  %1871 = vst [vmem:[%s2201_s19 + $0xa8] sm:$0xff] %v1799_v56   ;;  %v797_v59 = vadd.f32 %v2191_v11, %v796_v57  ;;  %v925_v60 = vadd.f32 %v2191_v11, %v924_v58  ;;  %v798_v61 = vpop.f32.mrb[25].mxu0  ;;  %v926_v62 = vpop.f32.mrb[25].mxu1 }
 0x133   : > { %v799_v63 = vpop.f32.mrb[26].mxu0  ;;  %v927_v0 = vpop.f32.mrb[26].mxu1 }
 0x134   : > { %v800_v1 = vadd.f32 %v2191_v11, %v799_v63  ;;  %v928_v2 = vadd.f32 %v2191_v11, %v927_v0  ;;  %v801_v3 = vpop.f32.mrb[27].mxu0  ;;  %v929_v4 = vpop.f32.mrb[27].mxu1  ;;  %v1015_v5 = vmax.f32 %v797_v59, 0.0  ;;  %v1047_v6 = vmax.f32 %v925_v60, 0.0 }
 0x136   : > { %v1016_v7 = vmax.f32 %v800_v1, 0.0  ;;  %v1048_v8 = vmax.f32 %v928_v2, 0.0 }
 0x138   : > { %v1724_v9 = vpack.c.bf16 %v1016_v7, %v1015_v5  ;;  %v1804_v10 = vpack.c.bf16 %v1048_v8, %v1047_v6 }
 0x139   : > { %v804_v12 = vpop.f32.mrb[28].mxu0  ;;  %v932_v13 = vpop.f32.mrb[28].mxu1 }
 0x13a   : > { %1856 = vst [vmem:[%s2201_s19 + $0x30] sm:$0xff] %v1724_v9   ;;  %1872 = vst [vmem:[%s2201_s19 + $0xb0] sm:$0xff] %v1804_v10   ;;  %v805_v14 = vadd.f32 %v2191_v11, %v804_v12  ;;  %v933_v15 = vadd.f32 %v2191_v11, %v932_v13  ;;  %v806_v16 = vpop.f32.mrb[29].mxu0  ;;  %v934_v17 = vpop.f32.mrb[29].mxu1 }
 0x13b   : > { %v807_v18 = vpop.f32.mrb[30].mxu0  ;;  %v935_v19 = vpop.f32.mrb[30].mxu1 }
 0x13c   : > { %v808_v20 = vadd.f32 %v2191_v11, %v807_v18  ;;  %v936_v21 = vadd.f32 %v2191_v11, %v935_v19  ;;  %v809_v22 = vpop.f32.mrb[31].mxu0  ;;  %v937_v23 = vpop.f32.mrb[31].mxu1  ;;  %v1017_v24 = vmax.f32 %v805_v14, 0.0  ;;  %v1049_v25 = vmax.f32 %v933_v15, 0.0 }
 0x13e   : > { %v1018_v26 = vmax.f32 %v808_v20, 0.0  ;;  %v1050_v27 = vmax.f32 %v936_v21, 0.0 }
 0x140   : > { %v1729_v28 = vpack.c.bf16 %v1018_v26, %v1017_v24  ;;  %v1809_v29 = vpack.c.bf16 %v1050_v27, %v1049_v25 }
 0x141   : > { %v812_v30 = vpop.f32.mrb[32].mxu0  ;;  %v940_v31 = vpop.f32.mrb[32].mxu1 }
 0x142   : > { %1857 = vst [vmem:[%s2201_s19 + $0x38] sm:$0xff] %v1729_v28   ;;  %1873 = vst [vmem:[%s2201_s19 + $0xb8] sm:$0xff] %v1809_v29   ;;  %v813_v32 = vadd.f32 %v2191_v11, %v812_v30  ;;  %v941_v33 = vadd.f32 %v2191_v11, %v940_v31  ;;  %v814_v34 = vpop.f32.mrb[33].mxu0  ;;  %v942_v35 = vpop.f32.mrb[33].mxu1 }
 0x143   : > { %v815_v36 = vpop.f32.mrb[34].mxu0  ;;  %v943_v37 = vpop.f32.mrb[34].mxu1 }
 0x144   : > { %v816_v38 = vadd.f32 %v2191_v11, %v815_v36  ;;  %v944_v39 = vadd.f32 %v2191_v11, %v943_v37  ;;  %v817_v40 = vpop.f32.mrb[35].mxu0  ;;  %v945_v41 = vpop.f32.mrb[35].mxu1  ;;  %v1019_v42 = vmax.f32 %v813_v32, 0.0  ;;  %v1051_v43 = vmax.f32 %v941_v33, 0.0 }
 0x146   : > { %v1020_v44 = vmax.f32 %v816_v38, 0.0  ;;  %v1052_v45 = vmax.f32 %v944_v39, 0.0 }
 0x148   : > { %v1734_v46 = vpack.c.bf16 %v1020_v44, %v1019_v42  ;;  %v1814_v47 = vpack.c.bf16 %v1052_v45, %v1051_v43 }
 0x149   : > { %v820_v48 = vpop.f32.mrb[36].mxu0  ;;  %v948_v49 = vpop.f32.mrb[36].mxu1 }
 0x14a   : > { %1858 = vst [vmem:[%s2201_s19 + $0x40] sm:$0xff] %v1734_v46   ;;  %1874 = vst [vmem:[%s2201_s19 + $0xc0] sm:$0xff] %v1814_v47   ;;  %v821_v50 = vadd.f32 %v2191_v11, %v820_v48  ;;  %v949_v51 = vadd.f32 %v2191_v11, %v948_v49  ;;  %v822_v52 = vpop.f32.mrb[37].mxu0  ;;  %v950_v53 = vpop.f32.mrb[37].mxu1 }
 0x14b   : > { %v823_v54 = vpop.f32.mrb[38].mxu0  ;;  %v951_v55 = vpop.f32.mrb[38].mxu1 }
 0x14c   : > { %v824_v56 = vadd.f32 %v2191_v11, %v823_v54  ;;  %v952_v57 = vadd.f32 %v2191_v11, %v951_v55  ;;  %v825_v58 = vpop.f32.mrb[39].mxu0  ;;  %v953_v59 = vpop.f32.mrb[39].mxu1  ;;  %v1021_v60 = vmax.f32 %v821_v50, 0.0  ;;  %v1053_v61 = vmax.f32 %v949_v51, 0.0 }
 0x14e   : > { %v1022_v62 = vmax.f32 %v824_v56, 0.0  ;;  %v1054_v63 = vmax.f32 %v952_v57, 0.0 }
 0x150   : > { %v1739_v0 = vpack.c.bf16 %v1022_v62, %v1021_v60  ;;  %v1819_v1 = vpack.c.bf16 %v1054_v63, %v1053_v61 }
 0x151   : > { %v828_v2 = vpop.f32.mrb[40].mxu0  ;;  %v956_v3 = vpop.f32.mrb[40].mxu1 }
 0x152   : > { %1859 = vst [vmem:[%s2201_s19 + $0x48] sm:$0xff] %v1739_v0   ;;  %1875 = vst [vmem:[%s2201_s19 + $0xc8] sm:$0xff] %v1819_v1   ;;  %v829_v4 = vadd.f32 %v2191_v11, %v828_v2  ;;  %v957_v5 = vadd.f32 %v2191_v11, %v956_v3  ;;  %v830_v6 = vpop.f32.mrb[41].mxu0  ;;  %v958_v7 = vpop.f32.mrb[41].mxu1 }
 0x153   : > { %v831_v8 = vpop.f32.mrb[42].mxu0  ;;  %v959_v9 = vpop.f32.mrb[42].mxu1 }
 0x154   : > { %v832_v10 = vadd.f32 %v2191_v11, %v831_v8  ;;  %v960_v12 = vadd.f32 %v2191_v11, %v959_v9  ;;  %v833_v13 = vpop.f32.mrb[43].mxu0  ;;  %v961_v14 = vpop.f32.mrb[43].mxu1  ;;  %v1023_v15 = vmax.f32 %v829_v4, 0.0  ;;  %v1055_v16 = vmax.f32 %v957_v5, 0.0 }
 0x156   : > { %v1024_v17 = vmax.f32 %v832_v10, 0.0  ;;  %v1056_v18 = vmax.f32 %v960_v12, 0.0 }
 0x158   : > { %v1744_v19 = vpack.c.bf16 %v1024_v17, %v1023_v15  ;;  %v1824_v20 = vpack.c.bf16 %v1056_v18, %v1055_v16 }
 0x159   : > { %v836_v21 = vpop.f32.mrb[44].mxu0  ;;  %v964_v22 = vpop.f32.mrb[44].mxu1 }
 0x15a   : > { %1860 = vst [vmem:[%s2201_s19 + $0x50] sm:$0xff] %v1744_v19   ;;  %1876 = vst [vmem:[%s2201_s19 + $0xd0] sm:$0xff] %v1824_v20   ;;  %v837_v23 = vadd.f32 %v2191_v11, %v836_v21  ;;  %v965_v24 = vadd.f32 %v2191_v11, %v964_v22  ;;  %v838_v25 = vpop.f32.mrb[45].mxu0  ;;  %v966_v26 = vpop.f32.mrb[45].mxu1 }
 0x15b   : > { %v839_v27 = vpop.f32.mrb[46].mxu0  ;;  %v967_v28 = vpop.f32.mrb[46].mxu1 }
 0x15c   : > { %v840_v29 = vadd.f32 %v2191_v11, %v839_v27  ;;  %v968_v30 = vadd.f32 %v2191_v11, %v967_v28  ;;  %v841_v31 = vpop.f32.mrb[47].mxu0  ;;  %v969_v32 = vpop.f32.mrb[47].mxu1  ;;  %v1025_v33 = vmax.f32 %v837_v23, 0.0  ;;  %v1057_v34 = vmax.f32 %v965_v24, 0.0 }
 0x15e   : > { %v1026_v35 = vmax.f32 %v840_v29, 0.0  ;;  %v1058_v36 = vmax.f32 %v968_v30, 0.0 }
 0x160   : > { %v1749_v37 = vpack.c.bf16 %v1026_v35, %v1025_v33  ;;  %v1829_v38 = vpack.c.bf16 %v1058_v36, %v1057_v34 }
 0x161   : > { %v844_v39 = vpop.f32.mrb[48].mxu0  ;;  %v972_v40 = vpop.f32.mrb[48].mxu1 }
 0x162   : > { %1861 = vst [vmem:[%s2201_s19 + $0x58] sm:$0xff] %v1749_v37   ;;  %1877 = vst [vmem:[%s2201_s19 + $0xd8] sm:$0xff] %v1829_v38   ;;  %v845_v41 = vadd.f32 %v2191_v11, %v844_v39  ;;  %v973_v42 = vadd.f32 %v2191_v11, %v972_v40  ;;  %v846_v43 = vpop.f32.mrb[49].mxu0  ;;  %v974_v44 = vpop.f32.mrb[49].mxu1 }
 0x163   : > { %v847_v45 = vpop.f32.mrb[50].mxu0  ;;  %v975_v46 = vpop.f32.mrb[50].mxu1 }
 0x164   : > { %v848_v47 = vadd.f32 %v2191_v11, %v847_v45  ;;  %v976_v48 = vadd.f32 %v2191_v11, %v975_v46  ;;  %v849_v49 = vpop.f32.mrb[51].mxu0  ;;  %v977_v50 = vpop.f32.mrb[51].mxu1  ;;  %v1027_v51 = vmax.f32 %v845_v41, 0.0  ;;  %v1059_v52 = vmax.f32 %v973_v42, 0.0 }
 0x166   : > { %v1028_v53 = vmax.f32 %v848_v47, 0.0  ;;  %v1060_v54 = vmax.f32 %v976_v48, 0.0 }
 0x168   : > { %v1754_v55 = vpack.c.bf16 %v1028_v53, %v1027_v51  ;;  %v1834_v56 = vpack.c.bf16 %v1060_v54, %v1059_v52 }
 0x169   : > { %v852_v57 = vpop.f32.mrb[52].mxu0  ;;  %v980_v58 = vpop.f32.mrb[52].mxu1 }
 0x16a   : > { %1862 = vst [vmem:[%s2201_s19 + $0x60] sm:$0xff] %v1754_v55   ;;  %1878 = vst [vmem:[%s2201_s19 + $0xe0] sm:$0xff] %v1834_v56   ;;  %v853_v59 = vadd.f32 %v2191_v11, %v852_v57  ;;  %v981_v60 = vadd.f32 %v2191_v11, %v980_v58  ;;  %v854_v61 = vpop.f32.mrb[53].mxu0  ;;  %v982_v62 = vpop.f32.mrb[53].mxu1 }
 0x16b   : > { %v855_v63 = vpop.f32.mrb[54].mxu0  ;;  %v983_v0 = vpop.f32.mrb[54].mxu1 }
 0x16c   : > { %v856_v1 = vadd.f32 %v2191_v11, %v855_v63  ;;  %v984_v2 = vadd.f32 %v2191_v11, %v983_v0  ;;  %v857_v3 = vpop.f32.mrb[55].mxu0  ;;  %v985_v4 = vpop.f32.mrb[55].mxu1  ;;  %v1029_v5 = vmax.f32 %v853_v59, 0.0  ;;  %v1061_v6 = vmax.f32 %v981_v60, 0.0 }
 0x16e   : > { %v1030_v7 = vmax.f32 %v856_v1, 0.0  ;;  %v1062_v8 = vmax.f32 %v984_v2, 0.0 }
 0x170   : > { %v1759_v9 = vpack.c.bf16 %v1030_v7, %v1029_v5  ;;  %v1839_v10 = vpack.c.bf16 %v1062_v8, %v1061_v6 }
 0x171   : > { %v860_v12 = vpop.f32.mrb[56].mxu0  ;;  %v988_v13 = vpop.f32.mrb[56].mxu1 }
 0x172   : > { %1863 = vst [vmem:[%s2201_s19 + $0x68] sm:$0xff] %v1759_v9   ;;  %1879 = vst [vmem:[%s2201_s19 + $0xe8] sm:$0xff] %v1839_v10   ;;  %v861_v14 = vadd.f32 %v2191_v11, %v860_v12  ;;  %v989_v15 = vadd.f32 %v2191_v11, %v988_v13  ;;  %v862_v16 = vpop.f32.mrb[57].mxu0  ;;  %v990_v17 = vpop.f32.mrb[57].mxu1 }
 0x173   : > { %v863_v18 = vpop.f32.mrb[58].mxu0  ;;  %v991_v19 = vpop.f32.mrb[58].mxu1 }
 0x174   : > { %v864_v20 = vadd.f32 %v2191_v11, %v863_v18  ;;  %v992_v21 = vadd.f32 %v2191_v11, %v991_v19  ;;  %v865_v22 = vpop.f32.mrb[59].mxu0  ;;  %v993_v23 = vpop.f32.mrb[59].mxu1  ;;  %v1031_v24 = vmax.f32 %v861_v14, 0.0  ;;  %v1063_v25 = vmax.f32 %v989_v15, 0.0 }
 0x176   : > { %v1032_v26 = vmax.f32 %v864_v20, 0.0  ;;  %v1064_v27 = vmax.f32 %v992_v21, 0.0 }
 0x178   : > { %v1764_v28 = vpack.c.bf16 %v1032_v26, %v1031_v24  ;;  %v1844_v29 = vpack.c.bf16 %v1064_v27, %v1063_v25 }
 0x179   : > { %v868_v30 = vpop.f32.mrb[60].mxu0  ;;  %v996_v31 = vpop.f32.mrb[60].mxu1 }
 0x17a   : > { %1864 = vst [vmem:[%s2201_s19 + $0x70] sm:$0xff] %v1764_v28   ;;  %1880 = vst [vmem:[%s2201_s19 + $0xf0] sm:$0xff] %v1844_v29   ;;  %v869_v32 = vadd.f32 %v2191_v11, %v868_v30  ;;  %v997_v33 = vadd.f32 %v2191_v11, %v996_v31  ;;  %v870_v34 = vpop.f32.mrb[61].mxu0  ;;  %v998_v35 = vpop.f32.mrb[61].mxu1 }
 0x17b   : > { %v871_v36 = vpop.f32.mrb[62].mxu0  ;;  %v999_v37 = vpop.f32.mrb[62].mxu1 }
 0x17c   : > { %v872_v38 = vadd.f32 %v2191_v11, %v871_v36  ;;  %v1000_v39 = vadd.f32 %v2191_v11, %v999_v37  ;;  %v873_v40 = vpop.f32.mrb[63].mxu0  ;;  %v1001_v41 = vpop.f32.mrb[63].mxu1  ;;  %v1033_v42 = vmax.f32 %v869_v32, 0.0  ;;  %v1065_v43 = vmax.f32 %v997_v33, 0.0 }
 0x17e   : > { %v1034_v44 = vmax.f32 %v872_v38, 0.0  ;;  %v1066_v45 = vmax.f32 %v1000_v39, 0.0 }
 0x180   : > { %v1769_v46 = vpack.c.bf16 %v1034_v44, %v1033_v42  ;;  %v1849_v47 = vpack.c.bf16 %v1066_v45, %v1065_v43 }
 0x182   : > { %1865 = vst [vmem:[%s2201_s19 + $0x78] sm:$0xff] %v1769_v46   ;;  %1881 = vst [vmem:[%s2201_s19 + $0xf8] sm:$0xff] %v1849_v47  }
 0x183 PF: > { %s13_s12 = sadd.s32 1, %s2023_s12  }
 0x184   : > { %p10_p4 = scmp.ge.s32.totalorder %s13_s12, 6  }
 0x186   :  { %12 = sbr.rel (!%p10_p4) target bundleno = 1 (0x1), region = 62 }

// kernel: _lambda_.28
= control target key start
LH: loop header
LB: loop body
LE: loop exit
PB: predicated region body
PF: predicated region fallthrough
CT: control target
= control target key end

     0   :  { %vm286_vm0 = vcmask 654336   ;;  %s1935_s1 = inlined_call_operand.vmem [shape: bf16[80,128], index: 1, kind: input, shape index: {}]   ;;  %s1936_s0 = inlined_call_operand.vmem [shape: bf16[512,80], index: 0, kind: input, shape index: {}]   ;;  %s1937_s2 = inlined_call_operand.vmem [shape: f32[1,128], index: 2, kind: input, shape index: {}]   ;;  %s1938_s3 = inlined_call_operand.vmem [shape: bf16[512,128], index: 3, kind: output, shape index: {}]  }
   0x1   :  { %v1570_v0 = vld [vmem:[%s1935_s1] sm:$0xff]   ;;  %v1571_v1 = vld [vmem:[%s1935_s1 + $0x8] sm:$0xff]   ;;  %v1572_v2 = vld [vmem:[%s1935_s1 + $0x10] sm:$0xff]  }
   0x2   :  { %1486 = vmatprep.subr.bf16.mxu0 %v1570_v0  ;;  %1560 = vmatprep.subr.bf16.mxu1 %v1570_v0  ;;  %v1575_v3 = vld [vmem:[%s1936_s0] sm:$0xff]   ;;  %v1573_v5 = vld [vmem:[%s1935_s1 + $0x18] sm:$0xff]   ;;  %v1577_v7 = vld [vmem:[%s1936_s0 + $0x8] sm:$0xff]  }
   0x3   :  { %1487 = vmatpush3.bf16.msra.mxu0 %v1570_v0  ;;  %1565 = vmatpush3.bf16.msra.mxu1 %v1570_v0  ;;  %v1576_v4 = vld [vmem:[%s1936_s0 + $0x80] sm:$0xff]   ;;  %v1578_v8 = vld [vmem:[%s1936_s0 + $0x88] sm:$0xff]   ;;  %v1579_v9 = vld [vmem:[%s1936_s0 + $0x10] sm:$0xff]  }
   0x4   :  { %1488 = vmatprep.subr.bf16.mxu0 %v1571_v1  ;;  %1561 = vmatprep.subr.bf16.mxu1 %v1571_v1  ;;  %v1574_v6 = vld [vmem:[%s1935_s1 + $0x20] sm:$0xff]   ;;  %v1580_v10 = vld [vmem:[%s1936_s0 + $0x90] sm:$0xff]   ;;  %v1581_v11 = vld [vmem:[%s1936_s0 + $0x18] sm:$0xff]  }
   0x5   :  { %1496 = vmatprep.mubr.msk.bf16.mxu0 %vm286_vm0, %v1575_v3  ;;  %1528 = vmatprep.mubr.msk.bf16.mxu1 %vm286_vm0, %v1576_v4  ;;  %v1582_v12 = vld [vmem:[%s1936_s0 + $0x98] sm:$0xff]   ;;  %v1583_v13 = vld [vmem:[%s1936_s0 + $0x20] sm:$0xff]   ;;  %v1585_v15 = vld [vmem:[%s1936_s0 + $0x28] sm:$0xff]  }
   0x6   :  { %v1584_v14 = vld [vmem:[%s1936_s0 + $0xa0] sm:$0xff]   ;;  %v1586_v16 = vld [vmem:[%s1936_s0 + $0xa8] sm:$0xff]   ;;  %v1587_v17 = vld [vmem:[%s1936_s0 + $0x30] sm:$0xff]  }
   0x7   :  { %1489 = vmatpush3.bf16.msra.mxu0 %v1571_v1  ;;  %1566 = vmatpush3.bf16.msra.mxu1 %v1571_v1  ;;  %v1588_v18 = vld [vmem:[%s1936_s0 + $0xb0] sm:$0xff]   ;;  %v1589_v19 = vld [vmem:[%s1936_s0 + $0x38] sm:$0xff]   ;;  %v1591_v21 = vld [vmem:[%s1936_s0 + $0x40] sm:$0xff]  }
   0x8   :  { %1490 = vmatprep.subr.bf16.mxu0 %v1572_v2  ;;  %1562 = vmatprep.subr.bf16.mxu1 %v1572_v2  ;;  %v1590_v20 = vld [vmem:[%s1936_s0 + $0xb8] sm:$0xff]   ;;  %v1592_v22 = vld [vmem:[%s1936_s0 + $0xc0] sm:$0xff]   ;;  %v1593_v23 = vld [vmem:[%s1936_s0 + $0x48] sm:$0xff]  }
   0x9   :  { %v1594_v24 = vld [vmem:[%s1936_s0 + $0xc8] sm:$0xff]   ;;  %v1595_v25 = vld [vmem:[%s1936_s0 + $0x50] sm:$0xff]   ;;  %v1597_v27 = vld [vmem:[%s1936_s0 + $0x58] sm:$0xff]  }
   0xa   :  { %v1596_v26 = vld [vmem:[%s1936_s0 + $0xd0] sm:$0xff]   ;;  %v1598_v28 = vld [vmem:[%s1936_s0 + $0xd8] sm:$0xff]   ;;  %v1599_v29 = vld [vmem:[%s1936_s0 + $0x60] sm:$0xff]  }
   0xb   :  { %1491 = vmatpush3.bf16.msra.mxu0 %v1572_v2  ;;  %1567 = vmatpush3.bf16.msra.mxu1 %v1572_v2  ;;  %v1600_v30 = vld [vmem:[%s1936_s0 + $0xe0] sm:$0xff]   ;;  %v1601_v31 = vld [vmem:[%s1936_s0 + $0x68] sm:$0xff]   ;;  %v1603_v33 = vld [vmem:[%s1936_s0 + $0x70] sm:$0xff]  }
   0xc   :  { %1492 = vmatprep.subr.bf16.mxu0 %v1573_v5  ;;  %1563 = vmatprep.subr.bf16.mxu1 %v1573_v5  ;;  %v1602_v32 = vld [vmem:[%s1936_s0 + $0xe8] sm:$0xff]   ;;  %v1604_v34 = vld [vmem:[%s1936_s0 + $0xf0] sm:$0xff]   ;;  %v1605_v35 = vld [vmem:[%s1936_s0 + $0x78] sm:$0xff]  }
   0xd   :  { %v1606_v36 = vld [vmem:[%s1936_s0 + $0xf8] sm:$0xff]   ;;  %v1773_v37 = vld [vmem:[%s1937_s2] ss:$0 sm:$0xff] }
   0xf   :  { %1493 = vmatpush3.bf16.msra.mxu0 %v1573_v5  ;;  %1568 = vmatpush3.bf16.msra.mxu1 %v1573_v5 }
  0x10   :  { %1494 = vmatprep.subr.bf16.mxu0 %v1574_v6  ;;  %1564 = vmatprep.subr.bf16.mxu1 %v1574_v6 }
  0x13   :  { %1495 = vmatpush3.bf16.msra.mxu0 %v1574_v6  ;;  %1569 = vmatpush3.bf16.msra.mxu1 %v1574_v6 }
  0x16   :  { %1497 = vmatmul.mubr.msk.bf16.vlgmr.msra.gmra.mrb[0].mxu0 %vm286_vm0, %v1577_v7  ;;  %1529 = vmatmul.mubr.msk.bf16.vlgmr.msra.gmra.mrb[0].mxu1 %vm286_vm0, %v1578_v8 }
  0x17   :  { %1500 = vmatprep.mubr.msk.bf16.mxu0 %vm286_vm0, %v1579_v9  ;;  %1532 = vmatprep.mubr.msk.bf16.mxu1 %vm286_vm0, %v1580_v10 }
  0x1e   :  { %1501 = vmatmul.mubr.msk.bf16.gmra.mrb[4].mxu0 %vm286_vm0, %v1581_v11  ;;  %1533 = vmatmul.mubr.msk.bf16.gmra.mrb[4].mxu1 %vm286_vm0, %v1582_v12 }
  0x1f   :  { %1504 = vmatprep.mubr.msk.bf16.mxu0 %vm286_vm0, %v1583_v13  ;;  %1536 = vmatprep.mubr.msk.bf16.mxu1 %vm286_vm0, %v1584_v14 }
  0x26   :  { %1505 = vmatmul.mubr.msk.bf16.gmra.mrb[8].mxu0 %vm286_vm0, %v1585_v15  ;;  %1537 = vmatmul.mubr.msk.bf16.gmra.mrb[8].mxu1 %vm286_vm0, %v1586_v16 }
  0x27   :  { %1508 = vmatprep.mubr.msk.bf16.mxu0 %vm286_vm0, %v1587_v17  ;;  %1540 = vmatprep.mubr.msk.bf16.mxu1 %vm286_vm0, %v1588_v18 }
  0x2e   :  { %1509 = vmatmul.mubr.msk.bf16.gmra.mrb[12].mxu0 %vm286_vm0, %v1589_v19  ;;  %1541 = vmatmul.mubr.msk.bf16.gmra.mrb[12].mxu1 %vm286_vm0, %v1590_v20 }
  0x2f   :  { %1512 = vmatprep.mubr.msk.bf16.mxu0 %vm286_vm0, %v1591_v21  ;;  %1544 = vmatprep.mubr.msk.bf16.mxu1 %vm286_vm0, %v1592_v22 }
  0x36   :  { %1513 = vmatmul.mubr.msk.bf16.gmra.mrb[16].mxu0 %vm286_vm0, %v1593_v23  ;;  %1545 = vmatmul.mubr.msk.bf16.gmra.mrb[16].mxu1 %vm286_vm0, %v1594_v24 }
  0x37   :  { %1516 = vmatprep.mubr.msk.bf16.mxu0 %vm286_vm0, %v1595_v25  ;;  %1548 = vmatprep.mubr.msk.bf16.mxu1 %vm286_vm0, %v1596_v26 }
  0x3e   :  { %1517 = vmatmul.mubr.msk.bf16.gmra.mrb[20].mxu0 %vm286_vm0, %v1597_v27  ;;  %1549 = vmatmul.mubr.msk.bf16.gmra.mrb[20].mxu1 %vm286_vm0, %v1598_v28 }
  0x3f   :  { %1520 = vmatprep.mubr.msk.bf16.mxu0 %vm286_vm0, %v1599_v29  ;;  %1552 = vmatprep.mubr.msk.bf16.mxu1 %vm286_vm0, %v1600_v30 }
  0x46   :  { %1521 = vmatmul.mubr.msk.bf16.gmra.mrb[24].mxu0 %vm286_vm0, %v1601_v31  ;;  %1553 = vmatmul.mubr.msk.bf16.gmra.mrb[24].mxu1 %vm286_vm0, %v1602_v32 }
  0x47   :  { %1524 = vmatprep.mubr.msk.bf16.mxu0 %vm286_vm0, %v1603_v33  ;;  %1556 = vmatprep.mubr.msk.bf16.mxu1 %vm286_vm0, %v1604_v34 }
  0x4e   :  { %1525 = vmatmul.mubr.msk.bf16.gmra.mrb[28].mxu0 %vm286_vm0, %v1605_v35  ;;  %1557 = vmatmul.mubr.msk.bf16.gmra.mrb[28].mxu1 %vm286_vm0, %v1606_v36 }
  0xe9   :  { %v1498_v38 = vpop.f32.mrb[0].mxu0  ;;  %v1530_v39 = vpop.f32.mrb[0].mxu1 }
  0xea   :  { %v426_v40 = vadd.f32 %v1498_v38, %v1773_v37  ;;  %v554_v41 = vadd.f32 %v1530_v39, %v1773_v37  ;;  %v417_v42 = vpop.f32.mrb[1].mxu0  ;;  %v545_v43 = vpop.f32.mrb[1].mxu1 }
  0xeb   :  { %v418_v44 = vadd.f32 %v1773_v37, %v417_v42  ;;  %v546_v45 = vadd.f32 %v1773_v37, %v545_v43  ;;  %v1499_v46 = vpop.f32.mrb[2].mxu0  ;;  %v1531_v47 = vpop.f32.mrb[2].mxu1 }
  0xec   :  { %v429_v48 = vadd.f32 %v1499_v46, %v1773_v37  ;;  %v557_v49 = vadd.f32 %v1531_v47, %v1773_v37  ;;  %v420_v50 = vpop.f32.mrb[3].mxu0  ;;  %v548_v51 = vpop.f32.mrb[3].mxu1  ;;  %v674_v54 = vmax.f32 %v426_v40, 0.0  ;;  %v706_v55 = vmax.f32 %v554_v41, 0.0 }
  0xed   :  { %v421_v52 = vadd.f32 %v1773_v37, %v420_v50  ;;  %v549_v53 = vadd.f32 %v1773_v37, %v548_v51  ;;  %v672_v58 = vmax.f32 %v418_v44, 0.0  ;;  %v704_v59 = vmax.f32 %v546_v45, 0.0 }
  0xee   :  { %v675_v56 = vmax.f32 %v429_v48, 0.0  ;;  %v707_v57 = vmax.f32 %v557_v49, 0.0 }
  0xef   :  { %v673_v60 = vmax.f32 %v421_v52, 0.0  ;;  %v705_v61 = vmax.f32 %v549_v53, 0.0 }
  0xf0   :  { %v1266_v62 = vpack.c.bf16 %v675_v56, %v674_v54  ;;  %v1346_v63 = vpack.c.bf16 %v707_v57, %v706_v55 }
  0xf1   :  { %v1261_v0 = vpack.c.bf16 %v673_v60, %v672_v58  ;;  %v1341_v1 = vpack.c.bf16 %v705_v61, %v704_v59  ;;  %v1502_v2 = vpop.f32.mrb[4].mxu0  ;;  %v1534_v3 = vpop.f32.mrb[4].mxu1 }
  0xf2   :  { %1418 = vst [vmem:[%s1938_s3 + $0x8] sm:$0xff] %v1266_v62   ;;  %1434 = vst [vmem:[%s1938_s3 + $0x88] sm:$0xff] %v1346_v63   ;;  %v442_v4 = vadd.f32 %v1502_v2, %v1773_v37  ;;  %v570_v5 = vadd.f32 %v1534_v3, %v1773_v37  ;;  %v433_v6 = vpop.f32.mrb[5].mxu0  ;;  %v561_v7 = vpop.f32.mrb[5].mxu1 }
  0xf3   :  { %1262 = vst [vmem:[%s1938_s3] sm:$0xff] %v1261_v0   ;;  %1433 = vst [vmem:[%s1938_s3 + $0x80] sm:$0xff] %v1341_v1   ;;  %v434_v8 = vadd.f32 %v1773_v37, %v433_v6  ;;  %v562_v9 = vadd.f32 %v1773_v37, %v561_v7  ;;  %v1503_v10 = vpop.f32.mrb[6].mxu0  ;;  %v1535_v11 = vpop.f32.mrb[6].mxu1 }
  0xf4   :  { %v445_v12 = vadd.f32 %v1503_v10, %v1773_v37  ;;  %v573_v13 = vadd.f32 %v1535_v11, %v1773_v37  ;;  %v436_v14 = vpop.f32.mrb[7].mxu0  ;;  %v564_v15 = vpop.f32.mrb[7].mxu1  ;;  %v678_v18 = vmax.f32 %v442_v4, 0.0  ;;  %v710_v19 = vmax.f32 %v570_v5, 0.0 }
  0xf5   :  { %v437_v16 = vadd.f32 %v1773_v37, %v436_v14  ;;  %v565_v17 = vadd.f32 %v1773_v37, %v564_v15  ;;  %v676_v22 = vmax.f32 %v434_v8, 0.0  ;;  %v708_v23 = vmax.f32 %v562_v9, 0.0 }
  0xf6   :  { %v679_v20 = vmax.f32 %v445_v12, 0.0  ;;  %v711_v21 = vmax.f32 %v573_v13, 0.0 }
  0xf7   :  { %v677_v24 = vmax.f32 %v437_v16, 0.0  ;;  %v709_v25 = vmax.f32 %v565_v17, 0.0 }
  0xf8   :  { %v1276_v26 = vpack.c.bf16 %v679_v20, %v678_v18  ;;  %v1356_v27 = vpack.c.bf16 %v711_v21, %v710_v19 }
  0xf9   :  { %v1271_v28 = vpack.c.bf16 %v677_v24, %v676_v22  ;;  %v1351_v29 = vpack.c.bf16 %v709_v25, %v708_v23  ;;  %v1506_v30 = vpop.f32.mrb[8].mxu0  ;;  %v1538_v31 = vpop.f32.mrb[8].mxu1 }
  0xfa   :  { %1420 = vst [vmem:[%s1938_s3 + $0x18] sm:$0xff] %v1276_v26   ;;  %1436 = vst [vmem:[%s1938_s3 + $0x98] sm:$0xff] %v1356_v27   ;;  %v458_v32 = vadd.f32 %v1506_v30, %v1773_v37  ;;  %v586_v33 = vadd.f32 %v1538_v31, %v1773_v37  ;;  %v449_v34 = vpop.f32.mrb[9].mxu0  ;;  %v577_v35 = vpop.f32.mrb[9].mxu1 }
  0xfb   :  { %1419 = vst [vmem:[%s1938_s3 + $0x10] sm:$0xff] %v1271_v28   ;;  %1435 = vst [vmem:[%s1938_s3 + $0x90] sm:$0xff] %v1351_v29   ;;  %v450_v36 = vadd.f32 %v1773_v37, %v449_v34  ;;  %v578_v38 = vadd.f32 %v1773_v37, %v577_v35  ;;  %v1507_v39 = vpop.f32.mrb[10].mxu0  ;;  %v1539_v40 = vpop.f32.mrb[10].mxu1 }
  0xfc   :  { %v461_v41 = vadd.f32 %v1507_v39, %v1773_v37  ;;  %v589_v42 = vadd.f32 %v1539_v40, %v1773_v37  ;;  %v452_v43 = vpop.f32.mrb[11].mxu0  ;;  %v580_v44 = vpop.f32.mrb[11].mxu1  ;;  %v682_v47 = vmax.f32 %v458_v32, 0.0  ;;  %v714_v48 = vmax.f32 %v586_v33, 0.0 }
  0xfd   :  { %v453_v45 = vadd.f32 %v1773_v37, %v452_v43  ;;  %v581_v46 = vadd.f32 %v1773_v37, %v580_v44  ;;  %v680_v51 = vmax.f32 %v450_v36, 0.0  ;;  %v712_v52 = vmax.f32 %v578_v38, 0.0 }
  0xfe   :  { %v683_v49 = vmax.f32 %v461_v41, 0.0  ;;  %v715_v50 = vmax.f32 %v589_v42, 0.0 }
  0xff   :  { %v681_v53 = vmax.f32 %v453_v45, 0.0  ;;  %v713_v54 = vmax.f32 %v581_v46, 0.0 }
 0x100   :  { %v1286_v55 = vpack.c.bf16 %v683_v49, %v682_v47  ;;  %v1366_v56 = vpack.c.bf16 %v715_v50, %v714_v48 }
 0x101   :  { %v1281_v57 = vpack.c.bf16 %v681_v53, %v680_v51  ;;  %v1361_v58 = vpack.c.bf16 %v713_v54, %v712_v52  ;;  %v1510_v59 = vpop.f32.mrb[12].mxu0  ;;  %v1542_v60 = vpop.f32.mrb[12].mxu1 }
 0x102   :  { %1422 = vst [vmem:[%s1938_s3 + $0x28] sm:$0xff] %v1286_v55   ;;  %1438 = vst [vmem:[%s1938_s3 + $0xa8] sm:$0xff] %v1366_v56   ;;  %v474_v61 = vadd.f32 %v1510_v59, %v1773_v37  ;;  %v602_v62 = vadd.f32 %v1542_v60, %v1773_v37  ;;  %v465_v63 = vpop.f32.mrb[13].mxu0  ;;  %v593_v0 = vpop.f32.mrb[13].mxu1 }
 0x103   :  { %1421 = vst [vmem:[%s1938_s3 + $0x20] sm:$0xff] %v1281_v57   ;;  %1437 = vst [vmem:[%s1938_s3 + $0xa0] sm:$0xff] %v1361_v58   ;;  %v466_v1 = vadd.f32 %v1773_v37, %v465_v63  ;;  %v594_v2 = vadd.f32 %v1773_v37, %v593_v0  ;;  %v1511_v3 = vpop.f32.mrb[14].mxu0  ;;  %v1543_v4 = vpop.f32.mrb[14].mxu1 }
 0x104   :  { %v477_v5 = vadd.f32 %v1511_v3, %v1773_v37  ;;  %v605_v6 = vadd.f32 %v1543_v4, %v1773_v37  ;;  %v468_v7 = vpop.f32.mrb[15].mxu0  ;;  %v596_v8 = vpop.f32.mrb[15].mxu1  ;;  %v686_v11 = vmax.f32 %v474_v61, 0.0  ;;  %v718_v12 = vmax.f32 %v602_v62, 0.0 }
 0x105   :  { %v469_v9 = vadd.f32 %v1773_v37, %v468_v7  ;;  %v597_v10 = vadd.f32 %v1773_v37, %v596_v8  ;;  %v684_v15 = vmax.f32 %v466_v1, 0.0  ;;  %v716_v16 = vmax.f32 %v594_v2, 0.0 }
 0x106   :  { %v687_v13 = vmax.f32 %v477_v5, 0.0  ;;  %v719_v14 = vmax.f32 %v605_v6, 0.0 }
 0x107   :  { %v685_v17 = vmax.f32 %v469_v9, 0.0  ;;  %v717_v18 = vmax.f32 %v597_v10, 0.0 }
 0x108   :  { %v1296_v19 = vpack.c.bf16 %v687_v13, %v686_v11  ;;  %v1376_v20 = vpack.c.bf16 %v719_v14, %v718_v12 }
 0x109   :  { %v1291_v21 = vpack.c.bf16 %v685_v17, %v684_v15  ;;  %v1371_v22 = vpack.c.bf16 %v717_v18, %v716_v16  ;;  %v1514_v23 = vpop.f32.mrb[16].mxu0  ;;  %v1546_v24 = vpop.f32.mrb[16].mxu1 }
 0x10a   :  { %1424 = vst [vmem:[%s1938_s3 + $0x38] sm:$0xff] %v1296_v19   ;;  %1440 = vst [vmem:[%s1938_s3 + $0xb8] sm:$0xff] %v1376_v20   ;;  %v490_v25 = vadd.f32 %v1514_v23, %v1773_v37  ;;  %v618_v26 = vadd.f32 %v1546_v24, %v1773_v37  ;;  %v481_v27 = vpop.f32.mrb[17].mxu0  ;;  %v609_v28 = vpop.f32.mrb[17].mxu1 }
 0x10b   :  { %1423 = vst [vmem:[%s1938_s3 + $0x30] sm:$0xff] %v1291_v21   ;;  %1439 = vst [vmem:[%s1938_s3 + $0xb0] sm:$0xff] %v1371_v22   ;;  %v482_v29 = vadd.f32 %v1773_v37, %v481_v27  ;;  %v610_v30 = vadd.f32 %v1773_v37, %v609_v28  ;;  %v1515_v31 = vpop.f32.mrb[18].mxu0  ;;  %v1547_v32 = vpop.f32.mrb[18].mxu1 }
 0x10c   :  { %v493_v33 = vadd.f32 %v1515_v31, %v1773_v37  ;;  %v621_v34 = vadd.f32 %v1547_v32, %v1773_v37  ;;  %v484_v35 = vpop.f32.mrb[19].mxu0  ;;  %v612_v36 = vpop.f32.mrb[19].mxu1  ;;  %v690_v40 = vmax.f32 %v490_v25, 0.0  ;;  %v722_v41 = vmax.f32 %v618_v26, 0.0 }
 0x10d   :  { %v485_v38 = vadd.f32 %v1773_v37, %v484_v35  ;;  %v613_v39 = vadd.f32 %v1773_v37, %v612_v36  ;;  %v688_v44 = vmax.f32 %v482_v29, 0.0  ;;  %v720_v45 = vmax.f32 %v610_v30, 0.0 }
 0x10e   :  { %v691_v42 = vmax.f32 %v493_v33, 0.0  ;;  %v723_v43 = vmax.f32 %v621_v34, 0.0 }
 0x10f   :  { %v689_v46 = vmax.f32 %v485_v38, 0.0  ;;  %v721_v47 = vmax.f32 %v613_v39, 0.0 }
 0x110   :  { %v1306_v48 = vpack.c.bf16 %v691_v42, %v690_v40  ;;  %v1386_v49 = vpack.c.bf16 %v723_v43, %v722_v41 }
 0x111   :  { %v1301_v50 = vpack.c.bf16 %v689_v46, %v688_v44  ;;  %v1381_v51 = vpack.c.bf16 %v721_v47, %v720_v45  ;;  %v1518_v52 = vpop.f32.mrb[20].mxu0  ;;  %v1550_v53 = vpop.f32.mrb[20].mxu1 }
 0x112   :  { %1426 = vst [vmem:[%s1938_s3 + $0x48] sm:$0xff] %v1306_v48   ;;  %1442 = vst [vmem:[%s1938_s3 + $0xc8] sm:$0xff] %v1386_v49   ;;  %v506_v54 = vadd.f32 %v1518_v52, %v1773_v37  ;;  %v634_v55 = vadd.f32 %v1550_v53, %v1773_v37  ;;  %v497_v56 = vpop.f32.mrb[21].mxu0  ;;  %v625_v57 = vpop.f32.mrb[21].mxu1 }
 0x113   :  { %1425 = vst [vmem:[%s1938_s3 + $0x40] sm:$0xff] %v1301_v50   ;;  %1441 = vst [vmem:[%s1938_s3 + $0xc0] sm:$0xff] %v1381_v51   ;;  %v498_v58 = vadd.f32 %v1773_v37, %v497_v56  ;;  %v626_v59 = vadd.f32 %v1773_v37, %v625_v57  ;;  %v1519_v60 = vpop.f32.mrb[22].mxu0  ;;  %v1551_v61 = vpop.f32.mrb[22].mxu1 }
 0x114   :  { %v509_v62 = vadd.f32 %v1519_v60, %v1773_v37  ;;  %v637_v63 = vadd.f32 %v1551_v61, %v1773_v37  ;;  %v500_v0 = vpop.f32.mrb[23].mxu0  ;;  %v628_v1 = vpop.f32.mrb[23].mxu1  ;;  %v694_v4 = vmax.f32 %v506_v54, 0.0  ;;  %v726_v5 = vmax.f32 %v634_v55, 0.0 }
 0x115   :  { %v501_v2 = vadd.f32 %v1773_v37, %v500_v0  ;;  %v629_v3 = vadd.f32 %v1773_v37, %v628_v1  ;;  %v692_v8 = vmax.f32 %v498_v58, 0.0  ;;  %v724_v9 = vmax.f32 %v626_v59, 0.0 }
 0x116   :  { %v695_v6 = vmax.f32 %v509_v62, 0.0  ;;  %v727_v7 = vmax.f32 %v637_v63, 0.0 }
 0x117   :  { %v693_v10 = vmax.f32 %v501_v2, 0.0  ;;  %v725_v11 = vmax.f32 %v629_v3, 0.0 }
 0x118   :  { %v1316_v12 = vpack.c.bf16 %v695_v6, %v694_v4  ;;  %v1396_v13 = vpack.c.bf16 %v727_v7, %v726_v5 }
 0x119   :  { %v1311_v14 = vpack.c.bf16 %v693_v10, %v692_v8  ;;  %v1391_v15 = vpack.c.bf16 %v725_v11, %v724_v9  ;;  %v1522_v16 = vpop.f32.mrb[24].mxu0  ;;  %v1554_v17 = vpop.f32.mrb[24].mxu1 }
 0x11a   :  { %1428 = vst [vmem:[%s1938_s3 + $0x58] sm:$0xff] %v1316_v12   ;;  %1444 = vst [vmem:[%s1938_s3 + $0xd8] sm:$0xff] %v1396_v13   ;;  %v522_v18 = vadd.f32 %v1522_v16, %v1773_v37  ;;  %v650_v19 = vadd.f32 %v1554_v17, %v1773_v37  ;;  %v513_v20 = vpop.f32.mrb[25].mxu0  ;;  %v641_v21 = vpop.f32.mrb[25].mxu1 }
 0x11b   :  { %1427 = vst [vmem:[%s1938_s3 + $0x50] sm:$0xff] %v1311_v14   ;;  %1443 = vst [vmem:[%s1938_s3 + $0xd0] sm:$0xff] %v1391_v15   ;;  %v514_v22 = vadd.f32 %v1773_v37, %v513_v20  ;;  %v642_v23 = vadd.f32 %v1773_v37, %v641_v21  ;;  %v1523_v24 = vpop.f32.mrb[26].mxu0  ;;  %v1555_v25 = vpop.f32.mrb[26].mxu1 }
 0x11c   :  { %v525_v26 = vadd.f32 %v1523_v24, %v1773_v37  ;;  %v653_v27 = vadd.f32 %v1555_v25, %v1773_v37  ;;  %v516_v28 = vpop.f32.mrb[27].mxu0  ;;  %v644_v29 = vpop.f32.mrb[27].mxu1  ;;  %v698_v32 = vmax.f32 %v522_v18, 0.0  ;;  %v730_v33 = vmax.f32 %v650_v19, 0.0 }
 0x11d   :  { %v517_v30 = vadd.f32 %v1773_v37, %v516_v28  ;;  %v645_v31 = vadd.f32 %v1773_v37, %v644_v29  ;;  %v696_v36 = vmax.f32 %v514_v22, 0.0  ;;  %v728_v38 = vmax.f32 %v642_v23, 0.0 }
 0x11e   :  { %v699_v34 = vmax.f32 %v525_v26, 0.0  ;;  %v731_v35 = vmax.f32 %v653_v27, 0.0 }
 0x11f   :  { %v697_v39 = vmax.f32 %v517_v30, 0.0  ;;  %v729_v40 = vmax.f32 %v645_v31, 0.0 }
 0x120   :  { %v1326_v41 = vpack.c.bf16 %v699_v34, %v698_v32  ;;  %v1406_v42 = vpack.c.bf16 %v731_v35, %v730_v33 }
 0x121   :  { %v1321_v43 = vpack.c.bf16 %v697_v39, %v696_v36  ;;  %v1401_v44 = vpack.c.bf16 %v729_v40, %v728_v38  ;;  %v1526_v45 = vpop.f32.mrb[28].mxu0  ;;  %v1558_v46 = vpop.f32.mrb[28].mxu1 }
 0x122   :  { %1430 = vst [vmem:[%s1938_s3 + $0x68] sm:$0xff] %v1326_v41   ;;  %1446 = vst [vmem:[%s1938_s3 + $0xe8] sm:$0xff] %v1406_v42   ;;  %v538_v47 = vadd.f32 %v1526_v45, %v1773_v37  ;;  %v666_v48 = vadd.f32 %v1558_v46, %v1773_v37  ;;  %v529_v49 = vpop.f32.mrb[29].mxu0  ;;  %v657_v50 = vpop.f32.mrb[29].mxu1 }
 0x123   :  { %1429 = vst [vmem:[%s1938_s3 + $0x60] sm:$0xff] %v1321_v43   ;;  %1445 = vst [vmem:[%s1938_s3 + $0xe0] sm:$0xff] %v1401_v44   ;;  %v530_v51 = vadd.f32 %v1773_v37, %v529_v49  ;;  %v658_v52 = vadd.f32 %v1773_v37, %v657_v50  ;;  %v1527_v53 = vpop.f32.mrb[30].mxu0  ;;  %v1559_v54 = vpop.f32.mrb[30].mxu1 }
 0x124   :  { %v541_v55 = vadd.f32 %v1527_v53, %v1773_v37  ;;  %v669_v56 = vadd.f32 %v1559_v54, %v1773_v37  ;;  %v532_v57 = vpop.f32.mrb[31].mxu0  ;;  %v660_v58 = vpop.f32.mrb[31].mxu1  ;;  %v702_v61 = vmax.f32 %v538_v47, 0.0  ;;  %v734_v62 = vmax.f32 %v666_v48, 0.0 }
 0x125   :  { %v533_v59 = vadd.f32 %v1773_v37, %v532_v57  ;;  %v661_v60 = vadd.f32 %v1773_v37, %v660_v58  ;;  %v700_v1 = vmax.f32 %v530_v51, 0.0  ;;  %v732_v2 = vmax.f32 %v658_v52, 0.0 }
 0x126   :  { %v703_v63 = vmax.f32 %v541_v55, 0.0  ;;  %v735_v0 = vmax.f32 %v669_v56, 0.0 }
 0x127   :  { %v701_v3 = vmax.f32 %v533_v59, 0.0  ;;  %v733_v4 = vmax.f32 %v661_v60, 0.0 }
 0x128   :  { %v1336_v5 = vpack.c.bf16 %v703_v63, %v702_v61  ;;  %v1416_v6 = vpack.c.bf16 %v735_v0, %v734_v62 }
 0x129   :  { %v1331_v7 = vpack.c.bf16 %v701_v3, %v700_v1  ;;  %v1411_v8 = vpack.c.bf16 %v733_v4, %v732_v2 }
 0x12a   :  { %1432 = vst [vmem:[%s1938_s3 + $0x78] sm:$0xff] %v1336_v5   ;;  %1448 = vst [vmem:[%s1938_s3 + $0xf8] sm:$0xff] %v1416_v6  }
 0x12b   :  { %1431 = vst [vmem:[%s1938_s3 + $0x70] sm:$0xff] %v1331_v7   ;;  %1447 = vst [vmem:[%s1938_s3 + $0xf0] sm:$0xff] %v1411_v8  }

// kernel: _lambda_.29
= control target key start
LH: loop header
LB: loop body
LE: loop exit
PB: predicated region body
PF: predicated region fallthrough
CT: control target
= control target key end

     0   :  { %vm289_vm0 = vcmask 654336   ;;  %s2634_s1 = inlined_call_operand.vmem [shape: bf16[80,128], index: 1, kind: input, shape index: {}]   ;;  %s2635_s0 = inlined_call_operand.vmem [shape: bf16[512,80], index: 0, kind: input, shape index: {}]   ;;  %s2636_s3 = inlined_call_operand.vmem [shape: bf16[512,128], index: 3, kind: input, shape index: {}]   ;;  %s2637_s2 = inlined_call_operand.vmem [shape: f32[1,128], index: 2, kind: input, shape index: {}]   ;;  %s2638_s4 = inlined_call_operand.vmem [shape: bf16[512,128], index: 4, kind: output, shape index: {}]  }
   0x1   :  { %v1924_v0 = vld [vmem:[%s2634_s1] sm:$0xff]   ;;  %v1925_v1 = vld [vmem:[%s2634_s1 + $0x8] sm:$0xff]   ;;  %v1926_v2 = vld [vmem:[%s2634_s1 + $0x10] sm:$0xff]  }
   0x2   :  { %1840 = vmatprep.subr.bf16.mxu0 %v1924_v0  ;;  %1914 = vmatprep.subr.bf16.mxu1 %v1924_v0  ;;  %v1929_v3 = vld [vmem:[%s2635_s0] sm:$0xff]   ;;  %v1927_v5 = vld [vmem:[%s2634_s1 + $0x18] sm:$0xff]   ;;  %v1931_v7 = vld [vmem:[%s2635_s0 + $0x8] sm:$0xff]  }
   0x3   :  { %1841 = vmatpush3.bf16.msra.mxu0 %v1924_v0  ;;  %1919 = vmatpush3.bf16.msra.mxu1 %v1924_v0  ;;  %v1930_v4 = vld [vmem:[%s2635_s0 + $0x80] sm:$0xff]   ;;  %v1932_v8 = vld [vmem:[%s2635_s0 + $0x88] sm:$0xff]   ;;  %v1933_v9 = vld [vmem:[%s2635_s0 + $0x10] sm:$0xff]  }
   0x4   :  { %1842 = vmatprep.subr.bf16.mxu0 %v1925_v1  ;;  %1915 = vmatprep.subr.bf16.mxu1 %v1925_v1  ;;  %v1928_v6 = vld [vmem:[%s2634_s1 + $0x20] sm:$0xff]   ;;  %v1934_v10 = vld [vmem:[%s2635_s0 + $0x90] sm:$0xff]   ;;  %v1935_v11 = vld [vmem:[%s2635_s0 + $0x18] sm:$0xff]  }
   0x5   :  { %1850 = vmatprep.mubr.msk.bf16.mxu0 %vm289_vm0, %v1929_v3  ;;  %1882 = vmatprep.mubr.msk.bf16.mxu1 %vm289_vm0, %v1930_v4  ;;  %v1936_v12 = vld [vmem:[%s2635_s0 + $0x98] sm:$0xff]   ;;  %v1937_v13 = vld [vmem:[%s2635_s0 + $0x20] sm:$0xff]   ;;  %v1939_v15 = vld [vmem:[%s2635_s0 + $0x28] sm:$0xff]  }
   0x6   :  { %v1938_v14 = vld [vmem:[%s2635_s0 + $0xa0] sm:$0xff]   ;;  %v1940_v16 = vld [vmem:[%s2635_s0 + $0xa8] sm:$0xff]   ;;  %v1941_v17 = vld [vmem:[%s2635_s0 + $0x30] sm:$0xff]  }
   0x7   :  { %1843 = vmatpush3.bf16.msra.mxu0 %v1925_v1  ;;  %1920 = vmatpush3.bf16.msra.mxu1 %v1925_v1  ;;  %v1942_v18 = vld [vmem:[%s2635_s0 + $0xb0] sm:$0xff]   ;;  %v1943_v19 = vld [vmem:[%s2635_s0 + $0x38] sm:$0xff]   ;;  %v1945_v21 = vld [vmem:[%s2635_s0 + $0x40] sm:$0xff]  }
   0x8   :  { %1844 = vmatprep.subr.bf16.mxu0 %v1926_v2  ;;  %1916 = vmatprep.subr.bf16.mxu1 %v1926_v2  ;;  %v1944_v20 = vld [vmem:[%s2635_s0 + $0xb8] sm:$0xff]   ;;  %v1946_v22 = vld [vmem:[%s2635_s0 + $0xc0] sm:$0xff]   ;;  %v1947_v23 = vld [vmem:[%s2635_s0 + $0x48] sm:$0xff]  }
   0x9   :  { %v1948_v24 = vld [vmem:[%s2635_s0 + $0xc8] sm:$0xff]   ;;  %v1949_v25 = vld [vmem:[%s2635_s0 + $0x50] sm:$0xff]   ;;  %v1951_v27 = vld [vmem:[%s2635_s0 + $0x58] sm:$0xff]  }
   0xa   :  { %v1950_v26 = vld [vmem:[%s2635_s0 + $0xd0] sm:$0xff]   ;;  %v1952_v28 = vld [vmem:[%s2635_s0 + $0xd8] sm:$0xff]   ;;  %v1953_v29 = vld [vmem:[%s2635_s0 + $0x60] sm:$0xff]  }
   0xb   :  { %1845 = vmatpush3.bf16.msra.mxu0 %v1926_v2  ;;  %1921 = vmatpush3.bf16.msra.mxu1 %v1926_v2  ;;  %v1954_v30 = vld [vmem:[%s2635_s0 + $0xe0] sm:$0xff]   ;;  %v1955_v31 = vld [vmem:[%s2635_s0 + $0x68] sm:$0xff]   ;;  %v1957_v33 = vld [vmem:[%s2635_s0 + $0x70] sm:$0xff]  }
   0xc   :  { %1846 = vmatprep.subr.bf16.mxu0 %v1927_v5  ;;  %1917 = vmatprep.subr.bf16.mxu1 %v1927_v5  ;;  %v1956_v32 = vld [vmem:[%s2635_s0 + $0xe8] sm:$0xff]   ;;  %v1958_v34 = vld [vmem:[%s2635_s0 + $0xf0] sm:$0xff]   ;;  %v1959_v35 = vld [vmem:[%s2635_s0 + $0x78] sm:$0xff]  }
   0xd   :  { %v1960_v36 = vld [vmem:[%s2635_s0 + $0xf8] sm:$0xff]   ;;  %v2132_v37 = vld [vmem:[%s2636_s3 + $0x8] sm:$0xff]   ;;  %v2142_v39 = vld [vmem:[%s2636_s3] sm:$0xff]  }
   0xe   :  { %v2137_v38 = vld [vmem:[%s2636_s3 + $0x88] sm:$0xff]   ;;  %v2147_v40 = vld [vmem:[%s2636_s3 + $0x80] sm:$0xff]   ;;  %v2152_v41 = vld [vmem:[%s2636_s3 + $0x18] sm:$0xff]   ;;  %v1459_v45 = vunpack.c.l.bf16 %v2132_v37  ;;  %v1455_v47 = vunpack.c.l.bf16 %v2142_v39  ;;  %v1460_v50 = vunpack.c.h.bf16 %v2132_v37  ;;  %v1456_v52 = vunpack.c.h.bf16 %v2142_v39 }
   0xf   :  { %1847 = vmatpush3.bf16.msra.mxu0 %v1927_v5  ;;  %1922 = vmatpush3.bf16.msra.mxu1 %v1927_v5  ;;  %v2157_v42 = vld [vmem:[%s2636_s3 + $0x98] sm:$0xff]   ;;  %v2162_v43 = vld [vmem:[%s2636_s3 + $0x10] sm:$0xff]   ;;  %v1523_v46 = vunpack.c.l.bf16 %v2137_v38  ;;  %v1519_v48 = vunpack.c.l.bf16 %v2147_v40  ;;  %v2176_v49 = vld [vmem:[%s2636_s3 + $0x28] sm:$0xff]   ;;  %v1524_v51 = vunpack.c.h.bf16 %v2137_v38  ;;  %v1520_v53 = vunpack.c.h.bf16 %v2147_v40 }
  0x10   :  { %1848 = vmatprep.subr.bf16.mxu0 %v1928_v6  ;;  %1918 = vmatprep.subr.bf16.mxu1 %v1928_v6  ;;  %v2167_v44 = vld [vmem:[%s2636_s3 + $0x90] sm:$0xff]   ;;  %v2185_v54 = vld [vmem:[%s2636_s3 + $0xa8] sm:$0xff]   ;;  %v2190_v55 = vld [vmem:[%s2636_s3 + $0x20] sm:$0xff]   ;;  %v1467_v57 = vunpack.c.l.bf16 %v2152_v41  ;;  %v1531_v58 = vunpack.c.l.bf16 %v2157_v42  ;;  %v1463_v59 = vunpack.c.l.bf16 %v2162_v43  ;;  %v1468_v62 = vunpack.c.h.bf16 %v2152_v41 }
  0x11   :  { %v2195_v56 = vld [vmem:[%s2636_s3 + $0xa0] sm:$0xff]   ;;  %v1527_v60 = vunpack.c.l.bf16 %v2167_v44  ;;  %v2204_v61 = vld [vmem:[%s2636_s3 + $0x38] sm:$0xff]   ;;  %v1532_v63 = vunpack.c.h.bf16 %v2157_v42  ;;  %v1464_v0 = vunpack.c.h.bf16 %v2162_v43  ;;  %v1528_v1 = vunpack.c.h.bf16 %v2167_v44  ;;  %v2218_v3 = vld [vmem:[%s2636_s3 + $0x30] sm:$0xff]  }
  0x12   :  { %v2213_v2 = vld [vmem:[%s2636_s3 + $0xb8] sm:$0xff]   ;;  %v2223_v4 = vld [vmem:[%s2636_s3 + $0xb0] sm:$0xff]   ;;  %v1475_v5 = vunpack.c.l.bf16 %v2176_v49 }
  0x13   :  { %1849 = vmatpush3.bf16.msra.mxu0 %v1928_v6  ;;  %1923 = vmatpush3.bf16.msra.mxu1 %v1928_v6  ;;  %v1539_v6 = vunpack.c.l.bf16 %v2185_v54 }
  0x16   :  { %1851 = vmatmul.mubr.msk.bf16.vlgmr.msra.gmra.mrb[0].mxu0 %vm289_vm0, %v1931_v7  ;;  %1883 = vmatmul.mubr.msk.bf16.vlgmr.msra.gmra.mrb[0].mxu1 %vm289_vm0, %v1932_v8  ;;  %v1471_v7 = vunpack.c.l.bf16 %v2190_v55  ;;  %v1535_v8 = vunpack.c.l.bf16 %v2195_v56 }
  0x17   :  { %1854 = vmatprep.mubr.msk.bf16.mxu0 %vm289_vm0, %v1933_v9  ;;  %1886 = vmatprep.mubr.msk.bf16.mxu1 %vm289_vm0, %v1934_v10  ;;  %v2232_v9 = vld [vmem:[%s2637_s2] ss:$0 sm:$0xff]  ;;  %v1476_v10 = vunpack.c.h.bf16 %v2176_v49 }
  0x1e   :  { %1855 = vmatmul.mubr.msk.bf16.gmra.mrb[4].mxu0 %vm289_vm0, %v1935_v11  ;;  %1887 = vmatmul.mubr.msk.bf16.gmra.mrb[4].mxu1 %vm289_vm0, %v1936_v12  ;;  %v1540_v11 = vunpack.c.h.bf16 %v2185_v54  ;;  %v1472_v12 = vunpack.c.h.bf16 %v2190_v55 }
  0x1f   :  { %1858 = vmatprep.mubr.msk.bf16.mxu0 %vm289_vm0, %v1937_v13  ;;  %1890 = vmatprep.mubr.msk.bf16.mxu1 %vm289_vm0, %v1938_v14  ;;  %v1536_v13 = vunpack.c.h.bf16 %v2195_v56  ;;  %v2241_v14 = vld [vmem:[%s2636_s3 + $0x48] sm:$0xff]  }
  0x26   :  { %1859 = vmatmul.mubr.msk.bf16.gmra.mrb[8].mxu0 %vm289_vm0, %v1939_v15  ;;  %1891 = vmatmul.mubr.msk.bf16.gmra.mrb[8].mxu1 %vm289_vm0, %v1940_v16  ;;  %v2246_v15 = vld [vmem:[%s2636_s3 + $0xc8] sm:$0xff]   ;;  %v1483_v16 = vunpack.c.l.bf16 %v2204_v61 }
  0x27   :  { %1862 = vmatprep.mubr.msk.bf16.mxu0 %vm289_vm0, %v1941_v17  ;;  %1894 = vmatprep.mubr.msk.bf16.mxu1 %vm289_vm0, %v1942_v18  ;;  %v1547_v17 = vunpack.c.l.bf16 %v2213_v2 }
  0x2e   :  { %1863 = vmatmul.mubr.msk.bf16.gmra.mrb[12].mxu0 %vm289_vm0, %v1943_v19  ;;  %1895 = vmatmul.mubr.msk.bf16.gmra.mrb[12].mxu1 %vm289_vm0, %v1944_v20  ;;  %v2255_v20 = vld [vmem:[%s2636_s3 + $0x40] sm:$0xff]  }
  0x2f   :  { %1866 = vmatprep.mubr.msk.bf16.mxu0 %vm289_vm0, %v1945_v21  ;;  %1898 = vmatprep.mubr.msk.bf16.mxu1 %vm289_vm0, %v1946_v22  ;;  %v2260_v21 = vld [vmem:[%s2636_s3 + $0xc0] sm:$0xff]  }
  0x36   :  { %1867 = vmatmul.mubr.msk.bf16.gmra.mrb[16].mxu0 %vm289_vm0, %v1947_v23  ;;  %1899 = vmatmul.mubr.msk.bf16.gmra.mrb[16].mxu1 %vm289_vm0, %v1948_v24 }
  0x37   :  { %1870 = vmatprep.mubr.msk.bf16.mxu0 %vm289_vm0, %v1949_v25  ;;  %1902 = vmatprep.mubr.msk.bf16.mxu1 %vm289_vm0, %v1950_v26 }
  0x3e   :  { %1871 = vmatmul.mubr.msk.bf16.gmra.mrb[20].mxu0 %vm289_vm0, %v1951_v27  ;;  %1903 = vmatmul.mubr.msk.bf16.gmra.mrb[20].mxu1 %vm289_vm0, %v1952_v28  ;;  %v1551_v27 = vunpack.c.l.bf16 %v2260_v21 }
  0x3f   :  { %1874 = vmatprep.mubr.msk.bf16.mxu0 %vm289_vm0, %v1953_v29  ;;  %1906 = vmatprep.mubr.msk.bf16.mxu1 %vm289_vm0, %v1954_v30 }
  0x46   :  { %1875 = vmatmul.mubr.msk.bf16.gmra.mrb[24].mxu0 %vm289_vm0, %v1955_v31  ;;  %1907 = vmatmul.mubr.msk.bf16.gmra.mrb[24].mxu1 %vm289_vm0, %v1956_v32 }
  0x47   :  { %1878 = vmatprep.mubr.msk.bf16.mxu0 %vm289_vm0, %v1957_v33  ;;  %1910 = vmatprep.mubr.msk.bf16.mxu1 %vm289_vm0, %v1958_v34 }
  0x4e   :  { %1879 = vmatmul.mubr.msk.bf16.gmra.mrb[28].mxu0 %vm289_vm0, %v1959_v35  ;;  %1911 = vmatmul.mubr.msk.bf16.gmra.mrb[28].mxu1 %vm289_vm0, %v1960_v36 }
  0xe9   :  { %v1852_v22 = vpop.f32.mrb[0].mxu0  ;;  %v1884_v23 = vpop.f32.mrb[0].mxu1 }
  0xea   :  { %v429_v28 = vadd.f32 %v1852_v22, %v2232_v9  ;;  %v557_v29 = vadd.f32 %v1884_v23, %v2232_v9  ;;  %v420_v30 = vpop.f32.mrb[1].mxu0  ;;  %v548_v31 = vpop.f32.mrb[1].mxu1 }
  0xeb   :  { %v421_v34 = vadd.f32 %v2232_v9, %v420_v30  ;;  %v549_v35 = vadd.f32 %v2232_v9, %v548_v31  ;;  %v1853_v36 = vpop.f32.mrb[2].mxu0  ;;  %v1885_v25 = vpop.f32.mrb[2].mxu1 }
  0xec   :  { %v805_v24 = vadd.f32 %v1459_v45, %v429_v28  ;;  %v837_v22 = vadd.f32 %v1523_v46, %v557_v29  ;;  %v432_v23 = vadd.f32 %v1853_v36, %v2232_v9  ;;  %v560_v19 = vadd.f32 %v1885_v25, %v2232_v9  ;;  %v423_v18 = vpop.f32.mrb[3].mxu0  ;;  %v551_v32 = vpop.f32.mrb[3].mxu1 }
  0xed   :  { %v803_v33 = vadd.f32 %v1455_v47, %v421_v34  ;;  %v835_v30 = vadd.f32 %v1519_v48, %v549_v35  ;;  %v424_v31 = vadd.f32 %v2232_v9, %v423_v18  ;;  %v552_v26 = vadd.f32 %v2232_v9, %v551_v32 }
  0xee   :  { %v806_v45 = vadd.f32 %v1460_v50, %v432_v23  ;;  %v838_v46 = vadd.f32 %v1524_v51, %v560_v19  ;;  %v1492_v25 = vunpack.c.h.bf16 %v2241_v14  ;;  %v1488_v18 = vunpack.c.h.bf16 %v2255_v20 }
  0xef   :  { %v804_v47 = vadd.f32 %v1456_v52, %v424_v31  ;;  %v836_v48 = vadd.f32 %v1520_v53, %v552_v26  ;;  %v869_v32 = vmax.f32 %v805_v24, 0.0  ;;  %v901_v37 = vmax.f32 %v837_v22, 0.0 }
  0xf0   :  { %v870_v50 = vmax.f32 %v806_v45, 0.0  ;;  %v902_v34 = vmax.f32 %v838_v46, 0.0  ;;  %v867_v38 = vmax.f32 %v803_v33, 0.0  ;;  %v899_v51 = vmax.f32 %v835_v30, 0.0  ;;  %v2301_v45 = vld [vmem:[%s2636_s3 + $0x58] sm:$0xff]  }
  0xf1   :  { %v868_v19 = vmax.f32 %v804_v47, 0.0  ;;  %v900_v35 = vmax.f32 %v836_v48, 0.0  ;;  %v1856_v36 = vpop.f32.mrb[4].mxu0  ;;  %v1888_v23 = vpop.f32.mrb[4].mxu1  ;;  %v2306_v46 = vld [vmem:[%s2636_s3 + $0xd8] sm:$0xff]  }
  0xf2   :  { %v1589_v28 = vpack.c.bf16 %v870_v50, %v869_v32  ;;  %v1669_v39 = vpack.c.bf16 %v902_v34, %v901_v37  ;;  %v445_v52 = vadd.f32 %v1856_v36, %v2232_v9  ;;  %v573_v40 = vadd.f32 %v1888_v23, %v2232_v9  ;;  %v436_v53 = vpop.f32.mrb[5].mxu0  ;;  %v564_v26 = vpop.f32.mrb[5].mxu1 }
  0xf3   :  { %v1584_v31 = vpack.c.bf16 %v868_v19, %v867_v38  ;;  %v1664_v29 = vpack.c.bf16 %v900_v35, %v899_v51  ;;  %v437_v24 = vadd.f32 %v2232_v9, %v436_v53  ;;  %v565_v22 = vadd.f32 %v2232_v9, %v564_v26  ;;  %v1857_v33 = vpop.f32.mrb[6].mxu0  ;;  %v1889_v30 = vpop.f32.mrb[6].mxu1  ;;  %v2328_v38 = vld [vmem:[%s2636_s3 + $0xd0] sm:$0xff]  }
  0xf4   :  { %1772 = vst [vmem:[%s2638_s4 + $0x8] sm:$0xff] %v1589_v28   ;;  %1788 = vst [vmem:[%s2638_s4 + $0x88] sm:$0xff] %v1669_v39   ;;  %v809_v47 = vadd.f32 %v1467_v57, %v445_v52  ;;  %v841_v48 = vadd.f32 %v1531_v58, %v573_v40  ;;  %v448_v32 = vadd.f32 %v1857_v33, %v2232_v9  ;;  %v439_v50 = vpop.f32.mrb[7].mxu0  ;;  %v567_v34 = vpop.f32.mrb[7].mxu1  ;;  %v2323_v28 = vld [vmem:[%s2636_s3 + $0x50] sm:$0xff]   ;;  %v1499_v23 = vunpack.c.l.bf16 %v2301_v45 }
  0xf5   :  { %v576_v37 = vadd.f32 %v1889_v30, %v2232_v9  ;;  %1585 = vst [vmem:[%s2638_s4] sm:$0xff] %v1584_v31   ;;  %1787 = vst [vmem:[%s2638_s4 + $0x80] sm:$0xff] %v1664_v29   ;;  %v807_v57 = vadd.f32 %v1463_v59, %v437_v24  ;;  %v839_v58 = vadd.f32 %v1527_v60, %v565_v22  ;;  %v1563_v29 = vunpack.c.l.bf16 %v2306_v46 }
  0xf6   :  { %v440_v51 = vadd.f32 %v2232_v9, %v439_v50  ;;  %v568_v19 = vadd.f32 %v2232_v9, %v567_v34  ;;  %v810_v35 = vadd.f32 %v1468_v62, %v448_v32  ;;  %v1495_v39 = vunpack.c.l.bf16 %v2323_v28 }
  0xf7   :  { %v842_v36 = vadd.f32 %v1532_v63, %v576_v37  ;;  %v1559_v52 = vunpack.c.l.bf16 %v2328_v38  ;;  %v873_v40 = vmax.f32 %v809_v47, 0.0  ;;  %v905_v41 = vmax.f32 %v841_v48, 0.0 }
  0xf8   :  { %v808_v59 = vadd.f32 %v1464_v0, %v440_v51  ;;  %v840_v60 = vadd.f32 %v1528_v1, %v568_v19  ;;  %v874_v62 = vmax.f32 %v810_v35, 0.0  ;;  %v871_v42 = vmax.f32 %v807_v57, 0.0 }
  0xf9   :  { %v906_v53 = vmax.f32 %v842_v36, 0.0  ;;  %v903_v63 = vmax.f32 %v839_v58, 0.0  ;;  %v1860_v24 = vpop.f32.mrb[8].mxu0  ;;  %v1892_v22 = vpop.f32.mrb[8].mxu1 }
  0xfa   :  { %v872_v26 = vmax.f32 %v808_v59, 0.0  ;;  %v904_v31 = vmax.f32 %v840_v60, 0.0  ;;  %v1599_v33 = vpack.c.bf16 %v874_v62, %v873_v40  ;;  %v461_v0 = vadd.f32 %v1860_v24, %v2232_v9  ;;  %v452_v1 = vpop.f32.mrb[9].mxu0  ;;  %v580_v30 = vpop.f32.mrb[9].mxu1 }
  0xfb   :  { %v1679_v43 = vpack.c.bf16 %v906_v53, %v905_v41  ;;  %v589_v44 = vadd.f32 %v1892_v22, %v2232_v9  ;;  %v453_v47 = vadd.f32 %v2232_v9, %v452_v1  ;;  %v581_v48 = vadd.f32 %v2232_v9, %v580_v30  ;;  %v1861_v50 = vpop.f32.mrb[10].mxu0  ;;  %v1893_v34 = vpop.f32.mrb[10].mxu1 }
  0xfc   :  { %v1594_v32 = vpack.c.bf16 %v872_v26, %v871_v42  ;;  %v1674_v37 = vpack.c.bf16 %v904_v31, %v903_v63  ;;  %1774 = vst [vmem:[%s2638_s4 + $0x18] sm:$0xff] %v1599_v33   ;;  %v813_v57 = vadd.f32 %v1475_v5, %v461_v0  ;;  %v464_v51 = vadd.f32 %v1861_v50, %v2232_v9  ;;  %v455_v35 = vpop.f32.mrb[11].mxu0  ;;  %v583_v36 = vpop.f32.mrb[11].mxu1  ;;  %v2401_v50 = vld [vmem:[%s2636_s3 + $0x68] sm:$0xff]  }
  0xfd   :  { %1790 = vst [vmem:[%s2638_s4 + $0x98] sm:$0xff] %v1679_v43   ;;  %v845_v58 = vadd.f32 %v1539_v6, %v589_v44  ;;  %v592_v19 = vadd.f32 %v1893_v34, %v2232_v9  ;;  %v811_v5 = vadd.f32 %v1471_v7, %v453_v47  ;;  %v843_v6 = vadd.f32 %v1535_v8, %v581_v48  ;;  %v2406_v34 = vld [vmem:[%s2636_s3 + $0xe8] sm:$0xff]  }
  0xfe   :  { %1773 = vst [vmem:[%s2638_s4 + $0x10] sm:$0xff] %v1594_v32   ;;  %1789 = vst [vmem:[%s2638_s4 + $0x90] sm:$0xff] %v1674_v37   ;;  %v456_v59 = vadd.f32 %v2232_v9, %v455_v35  ;;  %v584_v60 = vadd.f32 %v2232_v9, %v583_v36  ;;  %v814_v40 = vadd.f32 %v1476_v10, %v464_v51  ;;  %v1500_v62 = vunpack.c.h.bf16 %v2301_v45 }
  0xff   :  { %v846_v41 = vadd.f32 %v1540_v11, %v592_v19  ;;  %v1564_v53 = vunpack.c.h.bf16 %v2306_v46  ;;  %v1496_v42 = vunpack.c.h.bf16 %v2323_v28  ;;  %v1560_v63 = vunpack.c.h.bf16 %v2328_v38 }
 0x100   :  { %v812_v7 = vadd.f32 %v1472_v12, %v456_v59  ;;  %v844_v8 = vadd.f32 %v1536_v13, %v584_v60  ;;  %v877_v26 = vmax.f32 %v813_v57, 0.0  ;;  %v909_v49 = vmax.f32 %v845_v58, 0.0 }
 0x101   :  { %v878_v10 = vmax.f32 %v814_v40, 0.0  ;;  %v910_v31 = vmax.f32 %v846_v41, 0.0  ;;  %v875_v54 = vmax.f32 %v811_v5, 0.0  ;;  %v907_v11 = vmax.f32 %v843_v6, 0.0  ;;  %v1864_v33 = vpop.f32.mrb[12].mxu0  ;;  %v1896_v43 = vpop.f32.mrb[12].mxu1 }
 0x102   :  { %v876_v24 = vmax.f32 %v812_v7, 0.0  ;;  %v908_v22 = vmax.f32 %v844_v8, 0.0  ;;  %v477_v12 = vadd.f32 %v1864_v33, %v2232_v9  ;;  %v605_v56 = vadd.f32 %v1896_v43, %v2232_v9  ;;  %v468_v13 = vpop.f32.mrb[13].mxu0  ;;  %v596_v44 = vpop.f32.mrb[13].mxu1  ;;  %v2423_v5 = vld [vmem:[%s2636_s3 + $0x60] sm:$0xff]  }
 0x103   :  { %v1609_v0 = vpack.c.bf16 %v878_v10, %v877_v26  ;;  %v1689_v55 = vpack.c.bf16 %v910_v31, %v909_v49  ;;  %v469_v32 = vadd.f32 %v2232_v9, %v468_v13  ;;  %v597_v37 = vadd.f32 %v2232_v9, %v596_v44  ;;  %v1865_v47 = vpop.f32.mrb[14].mxu0  ;;  %v1897_v48 = vpop.f32.mrb[14].mxu1  ;;  %v2428_v6 = vld [vmem:[%s2636_s3 + $0xe0] sm:$0xff]  }
 0x104   :  { %v1604_v1 = vpack.c.bf16 %v876_v24, %v875_v54  ;;  %v1684_v30 = vpack.c.bf16 %v908_v22, %v907_v11  ;;  %v817_v57 = vadd.f32 %v1483_v16, %v477_v12  ;;  %v849_v58 = vadd.f32 %v1547_v17, %v605_v56  ;;  %v471_v35 = vpop.f32.mrb[15].mxu0  ;;  %v599_v36 = vpop.f32.mrb[15].mxu1 }
 0x105   :  { %1776 = vst [vmem:[%s2638_s4 + $0x28] sm:$0xff] %v1609_v0   ;;  %1792 = vst [vmem:[%s2638_s4 + $0xa8] sm:$0xff] %v1689_v55   ;;  %v480_v51 = vadd.f32 %v1865_v47, %v2232_v9  ;;  %v608_v19 = vadd.f32 %v1897_v48, %v2232_v9  ;;  %v2639_v16 = vunpack.c.l.bf16 %v2218_v3  ;;  %v2640_v59 = vunpack.c.l.bf16 %v2223_v4 }
 0x106   :  { %1775 = vst [vmem:[%s2638_s4 + $0x20] sm:$0xff] %v1604_v1   ;;  %1791 = vst [vmem:[%s2638_s4 + $0xa0] sm:$0xff] %v1684_v30   ;;  %v472_v40 = vadd.f32 %v2232_v9, %v471_v35  ;;  %v600_v41 = vadd.f32 %v2232_v9, %v599_v36  ;;  %v2641_v7 = vunpack.c.h.bf16 %v2204_v61  ;;  %v2642_v26 = vunpack.c.h.bf16 %v2213_v2 }
 0x107   :  { %v815_v17 = vadd.f32 %v2639_v16, %v469_v32  ;;  %v847_v60 = vadd.f32 %v2640_v59, %v597_v37  ;;  %v1507_v10 = vunpack.c.l.bf16 %v2401_v50  ;;  %v1571_v31 = vunpack.c.l.bf16 %v2406_v34 }
 0x108   :  { %v818_v8 = vadd.f32 %v2641_v7, %v480_v51  ;;  %v850_v49 = vadd.f32 %v2642_v26, %v608_v19  ;;  %v2643_v54 = vunpack.c.h.bf16 %v2218_v3  ;;  %v2644_v24 = vunpack.c.h.bf16 %v2223_v4 }
 0x109   :  { %v1503_v33 = vunpack.c.l.bf16 %v2423_v5  ;;  %v1567_v43 = vunpack.c.l.bf16 %v2428_v6  ;;  %v881_v0 = vmax.f32 %v817_v57, 0.0  ;;  %v913_v61 = vmax.f32 %v849_v58, 0.0  ;;  %v1868_v1 = vpop.f32.mrb[16].mxu0  ;;  %v1900_v30 = vpop.f32.mrb[16].mxu1 }
 0x10a   :  { %v816_v11 = vadd.f32 %v2643_v54, %v472_v40  ;;  %v848_v22 = vadd.f32 %v2644_v24, %v600_v41  ;;  %v882_v55 = vmax.f32 %v818_v8, 0.0  ;;  %v914_v12 = vmax.f32 %v850_v49, 0.0  ;;  %v484_v47 = vpop.f32.mrb[17].mxu0  ;;  %v612_v48 = vpop.f32.mrb[17].mxu1 }
 0x10b   :  { %v879_v2 = vmax.f32 %v815_v17, 0.0  ;;  %v911_v56 = vmax.f32 %v847_v60, 0.0  ;;  %v493_v37 = vadd.f32 %v1868_v1, %v2232_v9  ;;  %v621_v4 = vadd.f32 %v1900_v30, %v2232_v9  ;;  %v1869_v35 = vpop.f32.mrb[18].mxu0  ;;  %v1901_v36 = vpop.f32.mrb[18].mxu1 }
 0x10c   :  { %v880_v13 = vmax.f32 %v816_v11, 0.0  ;;  %v912_v44 = vmax.f32 %v848_v22, 0.0  ;;  %v1619_v32 = vpack.c.bf16 %v882_v55, %v881_v0  ;;  %v1699_v3 = vpack.c.bf16 %v914_v12, %v913_v61  ;;  %v487_v7 = vpop.f32.mrb[19].mxu0  ;;  %v615_v8 = vpop.f32.mrb[19].mxu1 }
 0x10d   :  { %v485_v57 = vadd.f32 %v2232_v9, %v484_v47  ;;  %v613_v58 = vadd.f32 %v2232_v9, %v612_v48  ;;  %v2645_v16 = vunpack.c.l.bf16 %v2241_v14  ;;  %v2646_v59 = vunpack.c.l.bf16 %v2246_v15 }
 0x10e   :  { %v1614_v51 = vpack.c.bf16 %v880_v13, %v879_v2  ;;  %v1694_v19 = vpack.c.bf16 %v912_v44, %v911_v56  ;;  %1778 = vst [vmem:[%s2638_s4 + $0x38] sm:$0xff] %v1619_v32   ;;  %1794 = vst [vmem:[%s2638_s4 + $0xb8] sm:$0xff] %v1699_v3   ;;  %v496_v40 = vadd.f32 %v1869_v35, %v2232_v9  ;;  %v2647_v26 = vunpack.c.l.bf16 %v2255_v20 }
 0x10f   :  { %v821_v17 = vadd.f32 %v2645_v16, %v493_v37  ;;  %v853_v60 = vadd.f32 %v2646_v59, %v621_v4  ;;  %v624_v41 = vadd.f32 %v1901_v36, %v2232_v9  ;;  %v851_v54 = vadd.f32 %v1551_v27, %v613_v58  ;;  %v2501_v59 = vld [vmem:[%s2636_s3 + $0x78] sm:$0xff]  }
 0x110   :  { %1777 = vst [vmem:[%s2638_s4 + $0x30] sm:$0xff] %v1614_v51   ;;  %1793 = vst [vmem:[%s2638_s4 + $0xb0] sm:$0xff] %v1694_v19   ;;  %v819_v49 = vadd.f32 %v2647_v26, %v485_v57  ;;  %v488_v11 = vadd.f32 %v2232_v9, %v487_v7  ;;  %v616_v24 = vadd.f32 %v2232_v9, %v615_v8  ;;  %v2648_v0 = vunpack.c.h.bf16 %v2246_v15 }
 0x111   :  { %v822_v22 = vadd.f32 %v1492_v25, %v496_v40  ;;  %v1508_v55 = vunpack.c.h.bf16 %v2401_v50  ;;  %v1572_v12 = vunpack.c.h.bf16 %v2406_v34  ;;  %v2649_v56 = vunpack.c.h.bf16 %v2260_v21  ;;  %v1872_v4 = vpop.f32.mrb[20].mxu0  ;;  %v1904_v47 = vpop.f32.mrb[20].mxu1 }
 0x112   :  { %v854_v61 = vadd.f32 %v2648_v0, %v624_v41  ;;  %v820_v2 = vadd.f32 %v1488_v18, %v488_v11  ;;  %v1504_v13 = vunpack.c.h.bf16 %v2423_v5  ;;  %v1568_v44 = vunpack.c.h.bf16 %v2428_v6  ;;  %v500_v51 = vpop.f32.mrb[21].mxu0  ;;  %v628_v19 = vpop.f32.mrb[21].mxu1  ;;  %v2528_v11 = vld [vmem:[%s2636_s3 + $0xf0] sm:$0xff]  }
 0x113   :  { %v852_v27 = vadd.f32 %v2649_v56, %v616_v24  ;;  %v885_v1 = vmax.f32 %v821_v17, 0.0  ;;  %v917_v14 = vmax.f32 %v853_v60, 0.0  ;;  %v886_v25 = vmax.f32 %v822_v22, 0.0  ;;  %v1873_v16 = vpop.f32.mrb[22].mxu0  ;;  %v1905_v17 = vpop.f32.mrb[22].mxu1  ;;  %v2506_v60 = vld [vmem:[%s2636_s3 + $0xf8] sm:$0xff]  }
 0x114   :  { %v918_v30 = vmax.f32 %v854_v61, 0.0  ;;  %v883_v15 = vmax.f32 %v819_v49, 0.0  ;;  %v915_v32 = vmax.f32 %v851_v54, 0.0  ;;  %v884_v3 = vmax.f32 %v820_v2, 0.0  ;;  %v503_v26 = vpop.f32.mrb[23].mxu0  ;;  %v631_v49 = vpop.f32.mrb[23].mxu1 }
 0x115   :  { %v916_v37 = vmax.f32 %v852_v27, 0.0  ;;  %v1629_v48 = vpack.c.bf16 %v886_v25, %v885_v1  ;;  %v509_v18 = vadd.f32 %v1872_v4, %v2232_v9  ;;  %v637_v21 = vadd.f32 %v1904_v47, %v2232_v9  ;;  %v2523_v54 = vld [vmem:[%s2636_s3 + $0x70] sm:$0xff]  }
 0x116   :  { %v1709_v20 = vpack.c.bf16 %v918_v30, %v917_v14  ;;  %v1624_v57 = vpack.c.bf16 %v884_v3, %v883_v15  ;;  %v501_v35 = vadd.f32 %v2232_v9, %v500_v51  ;;  %v629_v36 = vadd.f32 %v2232_v9, %v628_v19 }
 0x117   :  { %v1704_v58 = vpack.c.bf16 %v916_v37, %v915_v32  ;;  %1780 = vst [vmem:[%s2638_s4 + $0x48] sm:$0xff] %v1629_v48   ;;  %v825_v40 = vadd.f32 %v1499_v23, %v509_v18  ;;  %v857_v41 = vadd.f32 %v1563_v29, %v637_v21  ;;  %v512_v7 = vadd.f32 %v1873_v16, %v2232_v9 }
 0x118   :  { %1796 = vst [vmem:[%s2638_s4 + $0xc8] sm:$0xff] %v1709_v20   ;;  %v640_v8 = vadd.f32 %v1905_v17, %v2232_v9  ;;  %1779 = vst [vmem:[%s2638_s4 + $0x40] sm:$0xff] %v1624_v57   ;;  %v823_v23 = vadd.f32 %v1495_v39, %v501_v35  ;;  %v855_v29 = vadd.f32 %v1559_v52, %v629_v36  ;;  %v1515_v2 = vunpack.c.l.bf16 %v2501_v59 }
 0x119   :  { %1795 = vst [vmem:[%s2638_s4 + $0xc0] sm:$0xff] %v1704_v58   ;;  %v504_v24 = vadd.f32 %v2232_v9, %v503_v26  ;;  %v632_v22 = vadd.f32 %v2232_v9, %v631_v49  ;;  %v826_v0 = vadd.f32 %v1500_v62, %v512_v7  ;;  %v1579_v56 = vunpack.c.l.bf16 %v2506_v60  ;;  %v1876_v32 = vpop.f32.mrb[24].mxu0  ;;  %v1908_v3 = vpop.f32.mrb[24].mxu1 }
 0x11a   :  { %v858_v61 = vadd.f32 %v1564_v53, %v640_v8  ;;  %v1511_v27 = vunpack.c.l.bf16 %v2523_v54  ;;  %v1575_v1 = vunpack.c.l.bf16 %v2528_v11  ;;  %v889_v14 = vmax.f32 %v825_v40, 0.0  ;;  %v644_v4 = vpop.f32.mrb[25].mxu1 }
 0x11b   :  { %v824_v39 = vadd.f32 %v1496_v42, %v504_v24  ;;  %v856_v52 = vadd.f32 %v1560_v63, %v632_v22  ;;  %v921_v45 = vmax.f32 %v857_v41, 0.0  ;;  %v890_v62 = vmax.f32 %v826_v0, 0.0  ;;  %v516_v63 = vpop.f32.mrb[25].mxu0  ;;  %v1909_v51 = vpop.f32.mrb[26].mxu1 }
 0x11c   :  { %v922_v25 = vmax.f32 %v858_v61, 0.0  ;;  %v887_v46 = vmax.f32 %v823_v23, 0.0  ;;  %v919_v53 = vmax.f32 %v855_v29, 0.0  ;;  %v525_v42 = vadd.f32 %v1876_v32, %v2232_v9  ;;  %v1877_v21 = vpop.f32.mrb[26].mxu0  ;;  %v647_v16 = vpop.f32.mrb[27].mxu1 }
 0x11d   :  { %v888_v30 = vmax.f32 %v824_v39, 0.0  ;;  %v920_v15 = vmax.f32 %v856_v52, 0.0  ;;  %v1639_v37 = vpack.c.bf16 %v890_v62, %v889_v14  ;;  %v653_v38 = vadd.f32 %v1908_v3, %v2232_v9  ;;  %v519_v36 = vpop.f32.mrb[27].mxu0 }
 0x11e   :  { %v1719_v28 = vpack.c.bf16 %v922_v25, %v921_v45  ;;  %v517_v20 = vadd.f32 %v2232_v9, %v516_v63  ;;  %v645_v18 = vadd.f32 %v2232_v9, %v644_v4  ;;  %v829_v19 = vadd.f32 %v1507_v10, %v525_v42 }
 0x11f   :  { %v1634_v47 = vpack.c.bf16 %v888_v30, %v887_v46  ;;  %v1714_v48 = vpack.c.bf16 %v920_v15, %v919_v53  ;;  %1782 = vst [vmem:[%s2638_s4 + $0x58] sm:$0xff] %v1639_v37   ;;  %v861_v57 = vadd.f32 %v1571_v31, %v653_v38  ;;  %v528_v58 = vadd.f32 %v1877_v21, %v2232_v9 }
 0x120   :  { %1798 = vst [vmem:[%s2638_s4 + $0xd8] sm:$0xff] %v1719_v28   ;;  %v656_v35 = vadd.f32 %v1909_v51, %v2232_v9  ;;  %v827_v10 = vadd.f32 %v1503_v33, %v517_v20  ;;  %v859_v31 = vadd.f32 %v1567_v43, %v645_v18  ;;  %v520_v17 = vadd.f32 %v2232_v9, %v519_v36 }
 0x121   :  { %1781 = vst [vmem:[%s2638_s4 + $0x50] sm:$0xff] %v1634_v47   ;;  %1797 = vst [vmem:[%s2638_s4 + $0xd0] sm:$0xff] %v1714_v48   ;;  %v648_v40 = vadd.f32 %v2232_v9, %v647_v16  ;;  %v830_v41 = vadd.f32 %v1508_v55, %v528_v58  ;;  %v1516_v8 = vunpack.c.h.bf16 %v2501_v59  ;;  %v1580_v26 = vunpack.c.h.bf16 %v2506_v60  ;;  %v1880_v61 = vpop.f32.mrb[28].mxu0  ;;  %v1912_v39 = vpop.f32.mrb[28].mxu1 }
 0x122   :  { %v862_v7 = vadd.f32 %v1572_v12, %v656_v35  ;;  %v828_v33 = vadd.f32 %v1504_v13, %v520_v17  ;;  %v1512_v49 = vunpack.c.h.bf16 %v2523_v54  ;;  %v1576_v23 = vunpack.c.h.bf16 %v2528_v11  ;;  %v660_v14 = vpop.f32.mrb[29].mxu1 }
 0x123   :  { %v860_v43 = vadd.f32 %v1568_v44, %v648_v40  ;;  %v893_v29 = vmax.f32 %v829_v19, 0.0  ;;  %v925_v50 = vmax.f32 %v861_v57, 0.0  ;;  %v894_v55 = vmax.f32 %v830_v41, 0.0  ;;  %v532_v44 = vpop.f32.mrb[29].mxu0  ;;  %v1913_v30 = vpop.f32.mrb[30].mxu1 }
 0x124   :  { %v926_v24 = vmax.f32 %v862_v7, 0.0  ;;  %v891_v34 = vmax.f32 %v827_v10, 0.0  ;;  %v923_v12 = vmax.f32 %v859_v31, 0.0  ;;  %v892_v22 = vmax.f32 %v828_v33, 0.0  ;;  %v1881_v53 = vpop.f32.mrb[30].mxu0  ;;  %v663_v42 = vpop.f32.mrb[31].mxu1 }
 0x125   :  { %v924_v0 = vmax.f32 %v860_v43, 0.0  ;;  %v1649_v52 = vpack.c.bf16 %v894_v55, %v893_v29  ;;  %v541_v13 = vadd.f32 %v1880_v61, %v2232_v9  ;;  %v669_v6 = vadd.f32 %v1912_v39, %v2232_v9  ;;  %v535_v28 = vpop.f32.mrb[31].mxu0 }
 0x126   :  { %v1729_v5 = vpack.c.bf16 %v926_v24, %v925_v50  ;;  %v1644_v45 = vpack.c.bf16 %v892_v22, %v891_v34  ;;  %v533_v25 = vadd.f32 %v2232_v9, %v532_v44  ;;  %v661_v46 = vadd.f32 %v2232_v9, %v660_v14 }
 0x127   :  { %v1724_v62 = vpack.c.bf16 %v924_v0, %v923_v12  ;;  %1784 = vst [vmem:[%s2638_s4 + $0x68] sm:$0xff] %v1649_v52   ;;  %v833_v15 = vadd.f32 %v1515_v2, %v541_v13  ;;  %v865_v32 = vadd.f32 %v1579_v56, %v669_v6  ;;  %v544_v3 = vadd.f32 %v1881_v53, %v2232_v9 }
 0x128   :  { %1800 = vst [vmem:[%s2638_s4 + $0xe8] sm:$0xff] %v1729_v5   ;;  %v672_v37 = vadd.f32 %v1913_v30, %v2232_v9  ;;  %1783 = vst [vmem:[%s2638_s4 + $0x60] sm:$0xff] %v1644_v45   ;;  %v831_v59 = vadd.f32 %v1511_v27, %v533_v25  ;;  %v863_v60 = vadd.f32 %v1575_v1, %v661_v46 }
 0x129   :  { %1799 = vst [vmem:[%s2638_s4 + $0xe0] sm:$0xff] %v1724_v62   ;;  %v536_v2 = vadd.f32 %v2232_v9, %v535_v28  ;;  %v664_v56 = vadd.f32 %v2232_v9, %v663_v42  ;;  %v834_v38 = vadd.f32 %v1516_v8, %v544_v3  ;;  %v897_v48 = vmax.f32 %v833_v15, 0.0 }
 0x12a   :  { %v866_v63 = vadd.f32 %v1580_v26, %v672_v37  ;;  %v929_v20 = vmax.f32 %v865_v32, 0.0  ;;  %v895_v51 = vmax.f32 %v831_v59, 0.0  ;;  %v927_v19 = vmax.f32 %v863_v60, 0.0 }
 0x12b   :  { %v832_v4 = vadd.f32 %v1512_v49, %v536_v2  ;;  %v864_v47 = vadd.f32 %v1576_v23, %v664_v56  ;;  %v898_v18 = vmax.f32 %v834_v38, 0.0 }
 0x12c   :  { %v930_v21 = vmax.f32 %v866_v63, 0.0 }
 0x12d   :  { %v896_v57 = vmax.f32 %v832_v4, 0.0  ;;  %v928_v54 = vmax.f32 %v864_v47, 0.0  ;;  %v1659_v27 = vpack.c.bf16 %v898_v18, %v897_v48 }
 0x12e   :  { %v1739_v58 = vpack.c.bf16 %v930_v21, %v929_v20 }
 0x12f   :  { %v1654_v11 = vpack.c.bf16 %v896_v57, %v895_v51  ;;  %v1734_v1 = vpack.c.bf16 %v928_v54, %v927_v19  ;;  %1786 = vst [vmem:[%s2638_s4 + $0x78] sm:$0xff] %v1659_v27  }
 0x130   :  { %1802 = vst [vmem:[%s2638_s4 + $0xf8] sm:$0xff] %v1739_v58  }
 0x131   :  { %1785 = vst [vmem:[%s2638_s4 + $0x70] sm:$0xff] %v1654_v11   ;;  %1801 = vst [vmem:[%s2638_s4 + $0xf0] sm:$0xff] %v1734_v1  }

// kernel: _lambda_.32
= control target key start
LH: loop header
LB: loop body
LE: loop exit
PB: predicated region body
PF: predicated region fallthrough
CT: control target
= control target key end

     0   :  { %vm118_vm0 = vcmask 654336   ;;  %s597_s1 = inlined_call_operand.vmem [shape: bf16[80,128], index: 1, kind: input, shape index: {}]   ;;  %s598_s0 = inlined_call_operand.vmem [shape: bf16[128,80], index: 0, kind: input, shape index: {}]   ;;  %s599_s2 = inlined_call_operand.vmem [shape: f32[1,128], index: 2, kind: input, shape index: {}]   ;;  %s600_s3 = inlined_call_operand.vmem [shape: bf16[128,128], index: 3, kind: output, shape index: {}]  }
   0x1   :  { %v490_v0 = vld [vmem:[%s597_s1] sm:$0xff]   ;;  %v491_v1 = vld [vmem:[%s597_s1 + $0x8] sm:$0xff]   ;;  %v492_v2 = vld [vmem:[%s597_s1 + $0x10] sm:$0xff]  }
   0x2   :  { %454 = vmatprep.subr.bf16.mxu0 %v490_v0  ;;  %480 = vmatprep.subr.bf16.mxu1 %v490_v0  ;;  %v495_v3 = vld [vmem:[%s598_s0] sm:$0xff]   ;;  %v493_v5 = vld [vmem:[%s597_s1 + $0x18] sm:$0xff]   ;;  %v497_v7 = vld [vmem:[%s598_s0 + $0x8] sm:$0xff]  }
   0x3   :  { %455 = vmatpush3.bf16.msra.mxu0 %v490_v0  ;;  %485 = vmatpush3.bf16.msra.mxu1 %v490_v0  ;;  %v496_v4 = vld [vmem:[%s598_s0 + $0x20] sm:$0xff]   ;;  %v498_v8 = vld [vmem:[%s598_s0 + $0x28] sm:$0xff]   ;;  %v499_v9 = vld [vmem:[%s598_s0 + $0x10] sm:$0xff]  }
   0x4   :  { %456 = vmatprep.subr.bf16.mxu0 %v491_v1  ;;  %481 = vmatprep.subr.bf16.mxu1 %v491_v1  ;;  %v494_v6 = vld [vmem:[%s597_s1 + $0x20] sm:$0xff]   ;;  %v500_v10 = vld [vmem:[%s598_s0 + $0x30] sm:$0xff]   ;;  %v501_v11 = vld [vmem:[%s598_s0 + $0x18] sm:$0xff]  }
   0x5   :  { %464 = vmatprep.mubr.msk.bf16.mxu0 %vm118_vm0, %v495_v3  ;;  %472 = vmatprep.mubr.msk.bf16.mxu1 %vm118_vm0, %v496_v4  ;;  %v502_v12 = vld [vmem:[%s598_s0 + $0x38] sm:$0xff]   ;;  %v340_v13 = vld [vmem:[%s599_s2] ss:$0 sm:$0xff] }
   0x7   :  { %457 = vmatpush3.bf16.msra.mxu0 %v491_v1  ;;  %486 = vmatpush3.bf16.msra.mxu1 %v491_v1 }
   0x8   :  { %458 = vmatprep.subr.bf16.mxu0 %v492_v2  ;;  %482 = vmatprep.subr.bf16.mxu1 %v492_v2 }
   0xb   :  { %459 = vmatpush3.bf16.msra.mxu0 %v492_v2  ;;  %487 = vmatpush3.bf16.msra.mxu1 %v492_v2 }
   0xc   :  { %460 = vmatprep.subr.bf16.mxu0 %v493_v5  ;;  %483 = vmatprep.subr.bf16.mxu1 %v493_v5 }
   0xf   :  { %461 = vmatpush3.bf16.msra.mxu0 %v493_v5  ;;  %488 = vmatpush3.bf16.msra.mxu1 %v493_v5 }
  0x10   :  { %462 = vmatprep.subr.bf16.mxu0 %v494_v6  ;;  %484 = vmatprep.subr.bf16.mxu1 %v494_v6 }
  0x13   :  { %463 = vmatpush3.bf16.msra.mxu0 %v494_v6  ;;  %489 = vmatpush3.bf16.msra.mxu1 %v494_v6 }
  0x16   :  { %465 = vmatmul.mubr.msk.bf16.vlgmr.msra.gmra.mrb[0].mxu0 %vm118_vm0, %v497_v7  ;;  %473 = vmatmul.mubr.msk.bf16.vlgmr.msra.gmra.mrb[0].mxu1 %vm118_vm0, %v498_v8 }
  0x17   :  { %468 = vmatprep.mubr.msk.bf16.mxu0 %vm118_vm0, %v499_v9  ;;  %476 = vmatprep.mubr.msk.bf16.mxu1 %vm118_vm0, %v500_v10 }
  0x1e   :  { %469 = vmatmul.mubr.msk.bf16.gmra.mrb[4].mxu0 %vm118_vm0, %v501_v11  ;;  %477 = vmatmul.mubr.msk.bf16.gmra.mrb[4].mxu1 %vm118_vm0, %v502_v12 }
  0xe9   :  { %v466_v14 = vpop.f32.mrb[0].mxu0  ;;  %v474_v15 = vpop.f32.mrb[0].mxu1 }
  0xea   :  { %v186_v16 = vadd.f32 %v466_v14, %v340_v13  ;;  %v218_v17 = vadd.f32 %v474_v15, %v340_v13  ;;  %v177_v18 = vpop.f32.mrb[1].mxu0  ;;  %v209_v19 = vpop.f32.mrb[1].mxu1 }
  0xeb   :  { %v178_v20 = vadd.f32 %v340_v13, %v177_v18  ;;  %v210_v21 = vadd.f32 %v340_v13, %v209_v19  ;;  %v467_v22 = vpop.f32.mrb[2].mxu0  ;;  %v475_v23 = vpop.f32.mrb[2].mxu1 }
  0xec   :  { %v189_v24 = vadd.f32 %v467_v22, %v340_v13  ;;  %v221_v25 = vadd.f32 %v475_v23, %v340_v13  ;;  %v180_v26 = vpop.f32.mrb[3].mxu0  ;;  %v212_v27 = vpop.f32.mrb[3].mxu1  ;;  %v242_v30 = vmax.f32 %v186_v16, 0.0  ;;  %v250_v31 = vmax.f32 %v218_v17, 0.0 }
  0xed   :  { %v181_v28 = vadd.f32 %v340_v13, %v180_v26  ;;  %v213_v29 = vadd.f32 %v340_v13, %v212_v27  ;;  %v240_v34 = vmax.f32 %v178_v20, 0.0  ;;  %v248_v35 = vmax.f32 %v210_v21, 0.0 }
  0xee   :  { %v243_v32 = vmax.f32 %v189_v24, 0.0  ;;  %v251_v33 = vmax.f32 %v221_v25, 0.0 }
  0xef   :  { %v241_v36 = vmax.f32 %v181_v28, 0.0  ;;  %v249_v37 = vmax.f32 %v213_v29, 0.0 }
  0xf0   :  { %v402_v38 = vpack.c.bf16 %v243_v32, %v242_v30  ;;  %v422_v39 = vpack.c.bf16 %v251_v33, %v250_v31 }
  0xf1   :  { %v397_v40 = vpack.c.bf16 %v241_v36, %v240_v34  ;;  %v417_v41 = vpack.c.bf16 %v249_v37, %v248_v35  ;;  %v470_v42 = vpop.f32.mrb[4].mxu0  ;;  %v478_v43 = vpop.f32.mrb[4].mxu1 }
  0xf2   :  { %434 = vst [vmem:[%s600_s3 + $0x8] sm:$0xff] %v402_v38   ;;  %438 = vst [vmem:[%s600_s3 + $0x28] sm:$0xff] %v422_v39   ;;  %v202_v44 = vadd.f32 %v470_v42, %v340_v13  ;;  %v234_v45 = vadd.f32 %v478_v43, %v340_v13  ;;  %v193_v46 = vpop.f32.mrb[5].mxu0  ;;  %v225_v47 = vpop.f32.mrb[5].mxu1 }
  0xf3   :  { %398 = vst [vmem:[%s600_s3] sm:$0xff] %v397_v40   ;;  %437 = vst [vmem:[%s600_s3 + $0x20] sm:$0xff] %v417_v41   ;;  %v194_v48 = vadd.f32 %v340_v13, %v193_v46  ;;  %v226_v49 = vadd.f32 %v340_v13, %v225_v47  ;;  %v471_v50 = vpop.f32.mrb[6].mxu0  ;;  %v479_v51 = vpop.f32.mrb[6].mxu1 }
  0xf4   :  { %v205_v52 = vadd.f32 %v471_v50, %v340_v13  ;;  %v237_v53 = vadd.f32 %v479_v51, %v340_v13  ;;  %v196_v54 = vpop.f32.mrb[7].mxu0  ;;  %v228_v55 = vpop.f32.mrb[7].mxu1  ;;  %v246_v58 = vmax.f32 %v202_v44, 0.0  ;;  %v254_v59 = vmax.f32 %v234_v45, 0.0 }
  0xf5   :  { %v197_v56 = vadd.f32 %v340_v13, %v196_v54  ;;  %v229_v57 = vadd.f32 %v340_v13, %v228_v55  ;;  %v244_v62 = vmax.f32 %v194_v48, 0.0  ;;  %v252_v63 = vmax.f32 %v226_v49, 0.0 }
  0xf6   :  { %v247_v60 = vmax.f32 %v205_v52, 0.0  ;;  %v255_v61 = vmax.f32 %v237_v53, 0.0 }
  0xf7   :  { %v245_v0 = vmax.f32 %v197_v56, 0.0  ;;  %v253_v1 = vmax.f32 %v229_v57, 0.0 }
  0xf8   :  { %v412_v2 = vpack.c.bf16 %v247_v60, %v246_v58  ;;  %v432_v3 = vpack.c.bf16 %v255_v61, %v254_v59 }
  0xf9   :  { %v407_v4 = vpack.c.bf16 %v245_v0, %v244_v62  ;;  %v427_v5 = vpack.c.bf16 %v253_v1, %v252_v63 }
  0xfa   :  { %436 = vst [vmem:[%s600_s3 + $0x18] sm:$0xff] %v412_v2   ;;  %440 = vst [vmem:[%s600_s3 + $0x38] sm:$0xff] %v432_v3  }
  0xfb   :  { %435 = vst [vmem:[%s600_s3 + $0x10] sm:$0xff] %v407_v4   ;;  %439 = vst [vmem:[%s600_s3 + $0x30] sm:$0xff] %v427_v5  }

// kernel: _lambda_.33
= control target key start
LH: loop header
LB: loop body
LE: loop exit
PB: predicated region body
PF: predicated region fallthrough
CT: control target
= control target key end

     0   :  { %vm86_vm0 = vcmask 130048   ;;  %s509_s1 = inlined_call_operand.vmem [shape: bf16[16,128], index: 1, kind: input, shape index: {}]   ;;  %s510_s0 = inlined_call_operand.vmem [shape: bf16[128,16], index: 0, kind: input, shape index: {}]   ;;  %s511_s2 = inlined_call_operand.vmem [shape: f32[1,128], index: 2, kind: input, shape index: {}]   ;;  %s512_s3 = inlined_call_operand.vmem [shape: bf16[128,128], index: 3, kind: output, shape index: {}]  }
   0x1   :  { %v418_v0 = vld [vmem:[%s509_s1] sm:$0xff]   ;;  %v421_v3 = vld [vmem:[%s510_s0 + $0x8] sm:$0xff]   ;;  %v423_v5 = vld [vmem:[%s510_s0 + $0x10] sm:$0xff]  }
   0x2   :  { %v419_v1 = vld [vmem:[%s510_s0] sm:$0xff]   ;;  %398 = vmatprep.subr.bf16.mxu0 %v418_v0  ;;  %416 = vmatprep.subr.bf16.mxu1 %v418_v0  ;;  %v422_v4 = vld [vmem:[%s510_s0 + $0x28] sm:$0xff]   ;;  %v424_v6 = vld [vmem:[%s510_s0 + $0x30] sm:$0xff]  }
   0x3   :  { %v420_v2 = vld [vmem:[%s510_s0 + $0x20] sm:$0xff]   ;;  %399 = vmatpush3.bf16.msra.mxu0 %v418_v0  ;;  %417 = vmatpush3.bf16.msra.mxu1 %v418_v0  ;;  %v425_v7 = vld [vmem:[%s510_s0 + $0x18] sm:$0xff]  }
   0x4   :  { %400 = vmatprep.mubr.msk.bf16.mxu0 %vm86_vm0, %v419_v1  ;;  %408 = vmatprep.mubr.msk.bf16.mxu1 %vm86_vm0, %v420_v2  ;;  %v426_v8 = vld [vmem:[%s510_s0 + $0x38] sm:$0xff]   ;;  %v292_v10 = vld [vmem:[%s511_s2] ss:$0 sm:$0xff] }
   0x6   :  { %401 = vmatmul.mubr.msk.bf16.vlgmr.msra.gmra.mrb[0].mxu0 %vm86_vm0, %v421_v3  ;;  %409 = vmatmul.mubr.msk.bf16.vlgmr.msra.gmra.mrb[0].mxu1 %vm86_vm0, %v422_v4 }
   0x7   :  { %404 = vmatprep.mubr.msk.bf16.mxu0 %vm86_vm0, %v423_v5  ;;  %412 = vmatprep.mubr.msk.bf16.mxu1 %vm86_vm0, %v424_v6 }
   0xe   :  { %405 = vmatmul.mubr.msk.bf16.gmra.mrb[4].mxu0 %vm86_vm0, %v425_v7  ;;  %413 = vmatmul.mubr.msk.bf16.gmra.mrb[4].mxu1 %vm86_vm0, %v426_v8 }
  0xd9   :  { %v402_v9 = vpop.f32.mrb[0].mxu0  ;;  %v410_v11 = vpop.f32.mrb[0].mxu1 }
  0xda   :  { %v145_v12 = vpop.f32.mrb[1].mxu0  ;;  %v177_v13 = vpop.f32.mrb[1].mxu1  ;;  %v154_v16 = vadd.f32 %v402_v9, %v292_v10  ;;  %v186_v17 = vadd.f32 %v410_v11, %v292_v10 }
  0xdb   :  { %v403_v14 = vpop.f32.mrb[2].mxu0  ;;  %v411_v15 = vpop.f32.mrb[2].mxu1  ;;  %v146_v22 = vadd.f32 %v292_v10, %v145_v12  ;;  %v178_v23 = vadd.f32 %v292_v10, %v177_v13 }
  0xdc   :  { %v157_v18 = vadd.f32 %v403_v14, %v292_v10  ;;  %v189_v19 = vadd.f32 %v411_v15, %v292_v10  ;;  %v148_v20 = vpop.f32.mrb[3].mxu0  ;;  %v180_v21 = vpop.f32.mrb[3].mxu1 }
  0xdd   :  { %v149_v24 = vadd.f32 %v292_v10, %v148_v20  ;;  %v181_v25 = vadd.f32 %v292_v10, %v180_v21 }
  0xde   :  { %v350_v26 = vpack.c.bf16 %v157_v18, %v154_v16  ;;  %v370_v27 = vpack.c.bf16 %v189_v19, %v186_v17 }
  0xdf   :  { %v345_v28 = vpack.c.bf16 %v149_v24, %v146_v22  ;;  %v365_v29 = vpack.c.bf16 %v181_v25, %v178_v23 }
  0xe0   :  { %382 = vst [vmem:[%s512_s3 + $0x8] sm:$0xff] %v350_v26   ;;  %386 = vst [vmem:[%s512_s3 + $0x28] sm:$0xff] %v370_v27  }
  0xe1   :  { %346 = vst [vmem:[%s512_s3] sm:$0xff] %v345_v28   ;;  %385 = vst [vmem:[%s512_s3 + $0x20] sm:$0xff] %v365_v29   ;;  %v406_v30 = vpop.f32.mrb[4].mxu0  ;;  %v414_v31 = vpop.f32.mrb[4].mxu1 }
  0xe2   :  { %v161_v32 = vpop.f32.mrb[5].mxu0  ;;  %v193_v33 = vpop.f32.mrb[5].mxu1  ;;  %v170_v36 = vadd.f32 %v406_v30, %v292_v10  ;;  %v202_v37 = vadd.f32 %v414_v31, %v292_v10 }
  0xe3   :  { %v407_v34 = vpop.f32.mrb[6].mxu0  ;;  %v415_v35 = vpop.f32.mrb[6].mxu1  ;;  %v162_v42 = vadd.f32 %v292_v10, %v161_v32  ;;  %v194_v43 = vadd.f32 %v292_v10, %v193_v33 }
  0xe4   :  { %v173_v38 = vadd.f32 %v407_v34, %v292_v10  ;;  %v205_v39 = vadd.f32 %v415_v35, %v292_v10  ;;  %v164_v40 = vpop.f32.mrb[7].mxu0  ;;  %v196_v41 = vpop.f32.mrb[7].mxu1 }
  0xe5   :  { %v165_v44 = vadd.f32 %v292_v10, %v164_v40  ;;  %v197_v45 = vadd.f32 %v292_v10, %v196_v41 }
  0xe6   :  { %v360_v46 = vpack.c.bf16 %v173_v38, %v170_v36  ;;  %v380_v47 = vpack.c.bf16 %v205_v39, %v202_v37 }
  0xe7   :  { %v355_v48 = vpack.c.bf16 %v165_v44, %v162_v42  ;;  %v375_v49 = vpack.c.bf16 %v197_v45, %v194_v43 }
  0xe8   :  { %384 = vst [vmem:[%s512_s3 + $0x18] sm:$0xff] %v360_v46   ;;  %388 = vst [vmem:[%s512_s3 + $0x38] sm:$0xff] %v380_v47  }
  0xe9   :  { %383 = vst [vmem:[%s512_s3 + $0x10] sm:$0xff] %v355_v48   ;;  %387 = vst [vmem:[%s512_s3 + $0x30] sm:$0xff] %v375_v49  }

// kernel: _lambda_.34
= control target key start
LH: loop header
LB: loop body
LE: loop exit
PB: predicated region body
PF: predicated region fallthrough
CT: control target
= control target key end

     0   :  { %v659_v0 = vmov 0   ;;  %vm185_vm0 = vcmask 130048   ;;  %s837_s1 = inlined_call_operand.vmem [shape: bf16[144,128], index: 1, kind: input, shape index: {}]   ;;  %s838_s0 = inlined_call_operand.vmem [shape: bf16[128,144], index: 0, kind: input, shape index: {}]   ;;  %s839_s3 = inlined_call_operand.vmem [shape: bf16[128,128], index: 3, kind: input, shape index: {}]   ;;  %s840_s2 = inlined_call_operand.vmem [shape: f32[1,128], index: 2, kind: input, shape index: {}]   ;;  %s841_s4 = inlined_call_operand.vmem [shape: bf16[128,128], index: 4, kind: output, shape index: {}]  }
   0x1   :  { %210 = vmatprep.subr.bf16.mxu0 %v659_v0  ;;  %607 = vmatprep.subr.bf16.mxu1 %v659_v0  ;;  %v626_v1 = vld [vmem:[%s837_s1] sm:$0xff]   ;;  %v627_v2 = vld [vmem:[%s837_s1 + $0x8] sm:$0xff]   ;;  %v628_v3 = vld [vmem:[%s837_s1 + $0x10] sm:$0xff]  }
   0x2   :  { %211 = vmatpush1.bf16.msra.mxu0 %v626_v1  ;;  %616 = vmatpush1.bf16.msra.mxu1 %v626_v1  ;;  %v629_v4 = vld [vmem:[%s837_s1 + $0x18] sm:$0xff]   ;;  %v637_v5 = vld [vmem:[%s838_s0 + $0x4] ss:$8 sps:$4 sm:$0xff]   ;;  %v632_v9 = vld [vmem:[%s837_s1 + $0x30] sm:$0xff]  }
   0x3   :  { %212 = vmatprep.subr.bf16.mxu0 %v659_v0  ;;  %608 = vmatprep.subr.bf16.mxu1 %v659_v0  ;;  %v640_v6 = vld [vmem:[%s838_s0 + $0x44] ss:$8 sps:$4 sm:$0xff]   ;;  %v633_v10 = vld [vmem:[%s837_s1 + $0x38] sm:$0xff]   ;;  %v635_v12 = vld [vmem:[%s838_s0] ss:$8 sps:$4 sm:$0xff]  }
   0x4   :  { %481 = vmatprep.mubr.msk.bf16.mxu0 %vm185_vm0, %v637_v5  ;;  %485 = vmatprep.mubr.msk.bf16.mxu1 %vm185_vm0, %v640_v6  ;;  %v630_v7 = vld [vmem:[%s837_s1 + $0x20] sm:$0xff]   ;;  %v631_v8 = vld [vmem:[%s837_s1 + $0x28] sm:$0xff]   ;;  %v641_v14 = vld [vmem:[%s838_s0 + $0x14] ss:$8 sps:$4 sm:$0xff]  }
   0x5   :  { %v634_v11 = vld [vmem:[%s837_s1 + $0x40] sm:$0xff]   ;;  %v643_v15 = vld [vmem:[%s838_s0 + $0x54] ss:$8 sps:$4 sm:$0xff]   ;;  %v645_v16 = vld [vmem:[%s838_s0 + $0x10] ss:$8 sps:$4 sm:$0xff]  }
   0x6   :  { %213 = vmatpush1.bf16.msra.mxu0 %v627_v2  ;;  %617 = vmatpush1.bf16.msra.mxu1 %v627_v2  ;;  %v638_v13 = vld [vmem:[%s838_s0 + $0x40] ss:$8 sps:$4 sm:$0xff]   ;;  %v646_v17 = vld [vmem:[%s838_s0 + $0x50] ss:$8 sps:$4 sm:$0xff]   ;;  %v647_v18 = vld [vmem:[%s838_s0 + $0x24] ss:$8 sps:$4 sm:$0xff]  }
   0x7   :  { %214 = vmatprep.subr.bf16.mxu0 %v659_v0  ;;  %609 = vmatprep.subr.bf16.mxu1 %v659_v0  ;;  %v649_v19 = vld [vmem:[%s838_s0 + $0x64] ss:$8 sps:$4 sm:$0xff]   ;;  %v651_v20 = vld [vmem:[%s838_s0 + $0x20] ss:$8 sps:$4 sm:$0xff]   ;;  %v653_v22 = vld [vmem:[%s838_s0 + $0x34] ss:$8 sps:$4 sm:$0xff]  }
   0x8   :  { %v652_v21 = vld [vmem:[%s838_s0 + $0x60] ss:$8 sps:$4 sm:$0xff]   ;;  %v655_v23 = vld [vmem:[%s838_s0 + $0x74] ss:$8 sps:$4 sm:$0xff]   ;;  %v657_v24 = vld [vmem:[%s838_s0 + $0x30] ss:$8 sps:$4 sm:$0xff]  }
   0x9   :  { %v658_v25 = vld [vmem:[%s838_s0 + $0x70] ss:$8 sps:$4 sm:$0xff]   ;;  %v522_v26 = vld [vmem:[%s839_s3] sm:$0xff]   ;;  %v593_v47 = vld [vmem:[%s839_s3 + $0x8] sm:$0xff]  }
   0xa   :  { %215 = vmatpush1.bf16.msra.mxu0 %v628_v3  ;;  %618 = vmatpush1.bf16.msra.mxu1 %v628_v3  ;;  %v596_v27 = vld [vmem:[%s839_s3 + $0x20] sm:$0xff]   ;;  %v523_v29 = vunpack.c.l.bf16 %v522_v26  ;;  %v524_v37 = vunpack.c.h.bf16 %v522_v26  ;;  %v597_v48 = vld [vmem:[%s839_s3 + $0x28] sm:$0xff]   ;;  %v527_v51 = vunpack.c.l.bf16 %v593_v47  ;;  %v528_v59 = vunpack.c.h.bf16 %v593_v47 }
   0xb   :  { %216 = vmatprep.subr.bf16.mxu0 %v659_v0  ;;  %610 = vmatprep.subr.bf16.mxu1 %v659_v0  ;;  %v777_v28 = vld [vmem:[%s840_s2] ss:$0 sm:$0xff]  ;;  %v539_v30 = vunpack.c.l.bf16 %v596_v27  ;;  %v540_v38 = vunpack.c.h.bf16 %v596_v27  ;;  %v543_v52 = vunpack.c.l.bf16 %v597_v48  ;;  %v544_v60 = vunpack.c.h.bf16 %v597_v48 }
   0xe   :  { %217 = vmatpush1.bf16.msra.mxu0 %v629_v4  ;;  %619 = vmatpush1.bf16.msra.mxu1 %v629_v4 }
   0xf   :  { %218 = vmatprep.subr.bf16.mxu0 %v659_v0  ;;  %611 = vmatprep.subr.bf16.mxu1 %v659_v0 }
  0x12   :  { %219 = vmatpush1.bf16.msra.mxu0 %v630_v7  ;;  %620 = vmatpush1.bf16.msra.mxu1 %v630_v7 }
  0x13   :  { %220 = vmatprep.subr.bf16.mxu0 %v659_v0  ;;  %612 = vmatprep.subr.bf16.mxu1 %v659_v0 }
  0x16   :  { %221 = vmatpush1.bf16.msra.mxu0 %v631_v8  ;;  %621 = vmatpush1.bf16.msra.mxu1 %v631_v8 }
  0x17   :  { %222 = vmatprep.subr.bf16.mxu0 %v659_v0  ;;  %613 = vmatprep.subr.bf16.mxu1 %v659_v0 }
  0x1a   :  { %223 = vmatpush1.bf16.msra.mxu0 %v632_v9  ;;  %622 = vmatpush1.bf16.msra.mxu1 %v632_v9 }
  0x1b   :  { %224 = vmatprep.subr.bf16.mxu0 %v659_v0  ;;  %614 = vmatprep.subr.bf16.mxu1 %v659_v0 }
  0x1e   :  { %225 = vmatpush1.bf16.msra.mxu0 %v633_v10  ;;  %623 = vmatpush1.bf16.msra.mxu1 %v633_v10 }
  0x1f   :  { %226 = vmatprep.subr.bf16.mxu0 %v659_v0  ;;  %615 = vmatprep.subr.bf16.mxu1 %v659_v0 }
  0x22   :  { %227 = vmatpush1.bf16.msra.mxu0 %v634_v11  ;;  %624 = vmatpush1.bf16.msra.mxu1 %v634_v11  ;;  %v594_v11 = vld [vmem:[%s839_s3 + $0x10] sm:$0xff]  }
  0x25   :  { %243 = vmatmul.mubr.bf16.vlgmr.msra.gmra.mrb[0].mxu0 %v635_v12  ;;  %275 = vmatmul.mubr.bf16.vlgmr.msra.gmra.mrb[0].mxu1 %v638_v13  ;;  %v598_v12 = vld [vmem:[%s839_s3 + $0x30] sm:$0xff]  }
  0x26   :  { %482 = vmatprep.mubr.msk.bf16.mxu0 %vm185_vm0, %v641_v14  ;;  %486 = vmatprep.mubr.msk.bf16.mxu1 %vm185_vm0, %v643_v15  ;;  %v531_v15 = vunpack.c.l.bf16 %v594_v11 }
  0x2d   :  { %251 = vmatmul.mubr.bf16.gmra.mrb[4].mxu0 %v645_v16  ;;  %283 = vmatmul.mubr.bf16.gmra.mrb[4].mxu1 %v646_v17  ;;  %v547_v16 = vunpack.c.l.bf16 %v598_v12 }
  0x2e   :  { %483 = vmatprep.mubr.msk.bf16.mxu0 %vm185_vm0, %v647_v18  ;;  %487 = vmatprep.mubr.msk.bf16.mxu1 %vm185_vm0, %v649_v19 }
  0x35   :  { %259 = vmatmul.mubr.bf16.gmra.mrb[8].mxu0 %v651_v20  ;;  %291 = vmatmul.mubr.bf16.gmra.mrb[8].mxu1 %v652_v21 }
  0x36   :  { %484 = vmatprep.mubr.msk.bf16.mxu0 %vm185_vm0, %v653_v22  ;;  %488 = vmatprep.mubr.msk.bf16.mxu1 %vm185_vm0, %v655_v23  ;;  %v532_v23 = vunpack.c.h.bf16 %v594_v11 }
  0x3d   :  { %267 = vmatmul.mubr.bf16.gmra.mrb[12].mxu0 %v657_v24  ;;  %299 = vmatmul.mubr.bf16.gmra.mrb[12].mxu1 %v658_v25  ;;  %v548_v24 = vunpack.c.h.bf16 %v598_v12 }
  0xf8   :  { %v244_v31 = vpop.f32.mrb[0].mxu0  ;;  %v276_v32 = vpop.f32.mrb[0].mxu1 }
  0xf9   :  { %v245_v33 = vadd.f32 %v777_v28, %v244_v31  ;;  %v277_v34 = vadd.f32 %v777_v28, %v276_v32  ;;  %v246_v35 = vpop.f32.mrb[1].mxu0  ;;  %v278_v36 = vpop.f32.mrb[1].mxu1 }
  0xfa   :  { %v247_v39 = vpop.f32.mrb[2].mxu0  ;;  %v279_v40 = vpop.f32.mrb[2].mxu1 }
  0xfb   :  { %v339_v41 = vadd.f32 %v523_v29, %v245_v33  ;;  %v347_v42 = vadd.f32 %v539_v30, %v277_v34  ;;  %v248_v43 = vadd.f32 %v777_v28, %v247_v39  ;;  %v280_v44 = vadd.f32 %v777_v28, %v279_v40  ;;  %v249_v45 = vpop.f32.mrb[3].mxu0  ;;  %v281_v46 = vpop.f32.mrb[3].mxu1  ;;  %v595_v40 = vld [vmem:[%s839_s3 + $0x18] sm:$0xff]  }
  0xfd   :  { %v340_v49 = vadd.f32 %v524_v37, %v248_v43  ;;  %v348_v50 = vadd.f32 %v540_v38, %v280_v44  ;;  %v355_v53 = vmax.f32 %v339_v41, 0.0  ;;  %v363_v54 = vmax.f32 %v347_v42, 0.0  ;;  %v599_v41 = vld [vmem:[%s839_s3 + $0x38] sm:$0xff]  }
  0xfe   :  { %v535_v44 = vunpack.c.l.bf16 %v595_v40  ;;  %v551_v45 = vunpack.c.l.bf16 %v599_v41 }
  0xff   :  { %v356_v55 = vmax.f32 %v340_v49, 0.0  ;;  %v364_v56 = vmax.f32 %v348_v50, 0.0 }
 0x100   :  { %v252_v57 = vpop.f32.mrb[4].mxu0  ;;  %v284_v58 = vpop.f32.mrb[4].mxu1 }
 0x101   :  { %v556_v61 = vpack.c.bf16 %v356_v55, %v355_v53  ;;  %v576_v62 = vpack.c.bf16 %v364_v56, %v363_v54  ;;  %v253_v63 = vadd.f32 %v777_v28, %v252_v57  ;;  %v285_v0 = vadd.f32 %v777_v28, %v284_v58  ;;  %v254_v1 = vpop.f32.mrb[5].mxu0  ;;  %v286_v2 = vpop.f32.mrb[5].mxu1 }
 0x102   :  { %v255_v3 = vpop.f32.mrb[6].mxu0  ;;  %v287_v4 = vpop.f32.mrb[6].mxu1  ;;  %v552_v53 = vunpack.c.h.bf16 %v599_v41 }
 0x103   :  { %557 = vst [vmem:[%s841_s4] sm:$0xff] %v556_v61   ;;  %603 = vst [vmem:[%s841_s4 + $0x20] sm:$0xff] %v576_v62   ;;  %v341_v5 = vadd.f32 %v527_v51, %v253_v63  ;;  %v349_v6 = vadd.f32 %v543_v52, %v285_v0  ;;  %v256_v7 = vadd.f32 %v777_v28, %v255_v3  ;;  %v257_v9 = vpop.f32.mrb[7].mxu0  ;;  %v289_v10 = vpop.f32.mrb[7].mxu1  ;;  %v536_v52 = vunpack.c.h.bf16 %v595_v40 }
 0x104   :  { %v288_v8 = vadd.f32 %v777_v28, %v287_v4 }
 0x105   :  { %v342_v13 = vadd.f32 %v528_v59, %v256_v7  ;;  %v357_v17 = vmax.f32 %v341_v5, 0.0  ;;  %v365_v18 = vmax.f32 %v349_v6, 0.0 }
 0x106   :  { %v350_v14 = vadd.f32 %v544_v60, %v288_v8 }
 0x107   :  { %v358_v19 = vmax.f32 %v342_v13, 0.0 }
 0x108   :  { %v366_v20 = vmax.f32 %v350_v14, 0.0  ;;  %v260_v21 = vpop.f32.mrb[8].mxu0  ;;  %v292_v22 = vpop.f32.mrb[8].mxu1 }
 0x109   :  { %v561_v25 = vpack.c.bf16 %v358_v19, %v357_v17  ;;  %v261_v27 = vadd.f32 %v777_v28, %v260_v21  ;;  %v293_v29 = vadd.f32 %v777_v28, %v292_v22  ;;  %v262_v30 = vpop.f32.mrb[9].mxu0  ;;  %v294_v31 = vpop.f32.mrb[9].mxu1 }
 0x10a   :  { %v581_v26 = vpack.c.bf16 %v366_v20, %v365_v18  ;;  %v263_v32 = vpop.f32.mrb[10].mxu0  ;;  %v295_v33 = vpop.f32.mrb[10].mxu1 }
 0x10b   :  { %600 = vst [vmem:[%s841_s4 + $0x8] sm:$0xff] %v561_v25   ;;  %v343_v34 = vadd.f32 %v531_v15, %v261_v27  ;;  %v351_v35 = vadd.f32 %v547_v16, %v293_v29  ;;  %v264_v36 = vadd.f32 %v777_v28, %v263_v32  ;;  %v296_v37 = vadd.f32 %v777_v28, %v295_v33  ;;  %v265_v38 = vpop.f32.mrb[11].mxu0  ;;  %v297_v39 = vpop.f32.mrb[11].mxu1 }
 0x10c   :  { %604 = vst [vmem:[%s841_s4 + $0x28] sm:$0xff] %v581_v26  }
 0x10d   :  { %v344_v42 = vadd.f32 %v532_v23, %v264_v36  ;;  %v352_v43 = vadd.f32 %v548_v24, %v296_v37  ;;  %v359_v46 = vmax.f32 %v343_v34, 0.0  ;;  %v367_v47 = vmax.f32 %v351_v35, 0.0 }
 0x10f   :  { %v360_v48 = vmax.f32 %v344_v42, 0.0  ;;  %v368_v49 = vmax.f32 %v352_v43, 0.0 }
 0x110   :  { %v268_v50 = vpop.f32.mrb[12].mxu0  ;;  %v300_v51 = vpop.f32.mrb[12].mxu1 }
 0x111   :  { %v566_v54 = vpack.c.bf16 %v360_v48, %v359_v46  ;;  %v586_v55 = vpack.c.bf16 %v368_v49, %v367_v47  ;;  %v269_v56 = vadd.f32 %v777_v28, %v268_v50  ;;  %v301_v57 = vadd.f32 %v777_v28, %v300_v51  ;;  %v270_v58 = vpop.f32.mrb[13].mxu0  ;;  %v302_v59 = vpop.f32.mrb[13].mxu1 }
 0x112   :  { %v271_v60 = vpop.f32.mrb[14].mxu0  ;;  %v303_v61 = vpop.f32.mrb[14].mxu1 }
 0x113   :  { %601 = vst [vmem:[%s841_s4 + $0x10] sm:$0xff] %v566_v54   ;;  %605 = vst [vmem:[%s841_s4 + $0x30] sm:$0xff] %v586_v55   ;;  %v345_v62 = vadd.f32 %v535_v44, %v269_v56  ;;  %v353_v63 = vadd.f32 %v551_v45, %v301_v57  ;;  %v272_v0 = vadd.f32 %v777_v28, %v271_v60  ;;  %v273_v2 = vpop.f32.mrb[15].mxu0  ;;  %v305_v3 = vpop.f32.mrb[15].mxu1 }
 0x114   :  { %v304_v1 = vadd.f32 %v777_v28, %v303_v61 }
 0x115   :  { %v346_v4 = vadd.f32 %v536_v52, %v272_v0  ;;  %v361_v6 = vmax.f32 %v345_v62, 0.0  ;;  %v369_v7 = vmax.f32 %v353_v63, 0.0 }
 0x116   :  { %v354_v5 = vadd.f32 %v552_v53, %v304_v1 }
 0x117   :  { %v362_v8 = vmax.f32 %v346_v4, 0.0 }
 0x118   :  { %v370_v9 = vmax.f32 %v354_v5, 0.0 }
 0x119   :  { %v571_v10 = vpack.c.bf16 %v362_v8, %v361_v6 }
 0x11a   :  { %v591_v11 = vpack.c.bf16 %v370_v9, %v369_v7 }
 0x11b   :  { %602 = vst [vmem:[%s841_s4 + $0x18] sm:$0xff] %v571_v10  }
 0x11c   :  { %606 = vst [vmem:[%s841_s4 + $0x38] sm:$0xff] %v591_v11  }

// kernel: _lambda_.35
= control target key start
LH: loop header
LB: loop body
LE: loop exit
PB: predicated region body
PF: predicated region fallthrough
CT: control target
= control target key end

     0   :  { %v569_v0 = vmov 0   ;;  %vm182_vm0 = vcmask 130048   ;;  %s718_s1 = inlined_call_operand.vmem [shape: bf16[144,128], index: 1, kind: input, shape index: {}]   ;;  %s719_s0 = inlined_call_operand.vmem [shape: bf16[128,144], index: 0, kind: input, shape index: {}]   ;;  %s720_s2 = inlined_call_operand.vmem [shape: f32[1,128], index: 2, kind: input, shape index: {}]   ;;  %s721_s3 = inlined_call_operand.vmem [shape: bf16[128,128], index: 3, kind: output, shape index: {}]  }
   0x1   :  { %207 = vmatprep.subr.bf16.mxu0 %v569_v0  ;;  %517 = vmatprep.subr.bf16.mxu1 %v569_v0  ;;  %v536_v1 = vld [vmem:[%s718_s1] sm:$0xff]   ;;  %v537_v2 = vld [vmem:[%s718_s1 + $0x8] sm:$0xff]   ;;  %v538_v3 = vld [vmem:[%s718_s1 + $0x10] sm:$0xff]  }
   0x2   :  { %208 = vmatpush1.bf16.msra.mxu0 %v536_v1  ;;  %526 = vmatpush1.bf16.msra.mxu1 %v536_v1  ;;  %v539_v4 = vld [vmem:[%s718_s1 + $0x18] sm:$0xff]   ;;  %v547_v5 = vld [vmem:[%s719_s0 + $0x4] ss:$8 sps:$4 sm:$0xff]   ;;  %v542_v9 = vld [vmem:[%s718_s1 + $0x30] sm:$0xff]  }
   0x3   :  { %209 = vmatprep.subr.bf16.mxu0 %v569_v0  ;;  %518 = vmatprep.subr.bf16.mxu1 %v569_v0  ;;  %v550_v6 = vld [vmem:[%s719_s0 + $0x44] ss:$8 sps:$4 sm:$0xff]   ;;  %v543_v10 = vld [vmem:[%s718_s1 + $0x38] sm:$0xff]   ;;  %v545_v12 = vld [vmem:[%s719_s0] ss:$8 sps:$4 sm:$0xff]  }
   0x4   :  { %430 = vmatprep.mubr.msk.bf16.mxu0 %vm182_vm0, %v547_v5  ;;  %434 = vmatprep.mubr.msk.bf16.mxu1 %vm182_vm0, %v550_v6  ;;  %v540_v7 = vld [vmem:[%s718_s1 + $0x20] sm:$0xff]   ;;  %v541_v8 = vld [vmem:[%s718_s1 + $0x28] sm:$0xff]   ;;  %v551_v14 = vld [vmem:[%s719_s0 + $0x14] ss:$8 sps:$4 sm:$0xff]  }
   0x5   :  { %v544_v11 = vld [vmem:[%s718_s1 + $0x40] sm:$0xff]   ;;  %v553_v15 = vld [vmem:[%s719_s0 + $0x54] ss:$8 sps:$4 sm:$0xff]   ;;  %v555_v16 = vld [vmem:[%s719_s0 + $0x10] ss:$8 sps:$4 sm:$0xff]  }
   0x6   :  { %210 = vmatpush1.bf16.msra.mxu0 %v537_v2  ;;  %527 = vmatpush1.bf16.msra.mxu1 %v537_v2  ;;  %v548_v13 = vld [vmem:[%s719_s0 + $0x40] ss:$8 sps:$4 sm:$0xff]   ;;  %v556_v17 = vld [vmem:[%s719_s0 + $0x50] ss:$8 sps:$4 sm:$0xff]   ;;  %v557_v18 = vld [vmem:[%s719_s0 + $0x24] ss:$8 sps:$4 sm:$0xff]  }
   0x7   :  { %211 = vmatprep.subr.bf16.mxu0 %v569_v0  ;;  %519 = vmatprep.subr.bf16.mxu1 %v569_v0  ;;  %v559_v19 = vld [vmem:[%s719_s0 + $0x64] ss:$8 sps:$4 sm:$0xff]   ;;  %v561_v20 = vld [vmem:[%s719_s0 + $0x20] ss:$8 sps:$4 sm:$0xff]   ;;  %v563_v22 = vld [vmem:[%s719_s0 + $0x34] ss:$8 sps:$4 sm:$0xff]  }
   0x8   :  { %v562_v21 = vld [vmem:[%s719_s0 + $0x60] ss:$8 sps:$4 sm:$0xff]   ;;  %v565_v23 = vld [vmem:[%s719_s0 + $0x74] ss:$8 sps:$4 sm:$0xff]   ;;  %v567_v24 = vld [vmem:[%s719_s0 + $0x30] ss:$8 sps:$4 sm:$0xff]  }
   0x9   :  { %v568_v25 = vld [vmem:[%s719_s0 + $0x70] ss:$8 sps:$4 sm:$0xff]   ;;  %v676_v26 = vld [vmem:[%s720_s2] ss:$0 sm:$0xff] }
   0xa   :  { %212 = vmatpush1.bf16.msra.mxu0 %v538_v3  ;;  %528 = vmatpush1.bf16.msra.mxu1 %v538_v3 }
   0xb   :  { %213 = vmatprep.subr.bf16.mxu0 %v569_v0  ;;  %520 = vmatprep.subr.bf16.mxu1 %v569_v0 }
   0xe   :  { %214 = vmatpush1.bf16.msra.mxu0 %v539_v4  ;;  %529 = vmatpush1.bf16.msra.mxu1 %v539_v4 }
   0xf   :  { %215 = vmatprep.subr.bf16.mxu0 %v569_v0  ;;  %521 = vmatprep.subr.bf16.mxu1 %v569_v0 }
  0x12   :  { %216 = vmatpush1.bf16.msra.mxu0 %v540_v7  ;;  %530 = vmatpush1.bf16.msra.mxu1 %v540_v7 }
  0x13   :  { %217 = vmatprep.subr.bf16.mxu0 %v569_v0  ;;  %522 = vmatprep.subr.bf16.mxu1 %v569_v0 }
  0x16   :  { %218 = vmatpush1.bf16.msra.mxu0 %v541_v8  ;;  %531 = vmatpush1.bf16.msra.mxu1 %v541_v8 }
  0x17   :  { %219 = vmatprep.subr.bf16.mxu0 %v569_v0  ;;  %523 = vmatprep.subr.bf16.mxu1 %v569_v0 }
  0x1a   :  { %220 = vmatpush1.bf16.msra.mxu0 %v542_v9  ;;  %532 = vmatpush1.bf16.msra.mxu1 %v542_v9 }
  0x1b   :  { %221 = vmatprep.subr.bf16.mxu0 %v569_v0  ;;  %524 = vmatprep.subr.bf16.mxu1 %v569_v0 }
  0x1e   :  { %222 = vmatpush1.bf16.msra.mxu0 %v543_v10  ;;  %533 = vmatpush1.bf16.msra.mxu1 %v543_v10 }
  0x1f   :  { %223 = vmatprep.subr.bf16.mxu0 %v569_v0  ;;  %525 = vmatprep.subr.bf16.mxu1 %v569_v0 }
  0x22   :  { %224 = vmatpush1.bf16.msra.mxu0 %v544_v11  ;;  %534 = vmatpush1.bf16.msra.mxu1 %v544_v11 }
  0x25   :  { %240 = vmatmul.mubr.bf16.vlgmr.msra.gmra.mrb[0].mxu0 %v545_v12  ;;  %272 = vmatmul.mubr.bf16.vlgmr.msra.gmra.mrb[0].mxu1 %v548_v13 }
  0x26   :  { %431 = vmatprep.mubr.msk.bf16.mxu0 %vm182_vm0, %v551_v14  ;;  %435 = vmatprep.mubr.msk.bf16.mxu1 %vm182_vm0, %v553_v15 }
  0x2d   :  { %248 = vmatmul.mubr.bf16.gmra.mrb[4].mxu0 %v555_v16  ;;  %280 = vmatmul.mubr.bf16.gmra.mrb[4].mxu1 %v556_v17 }
  0x2e   :  { %432 = vmatprep.mubr.msk.bf16.mxu0 %vm182_vm0, %v557_v18  ;;  %436 = vmatprep.mubr.msk.bf16.mxu1 %vm182_vm0, %v559_v19 }
  0x35   :  { %256 = vmatmul.mubr.bf16.gmra.mrb[8].mxu0 %v561_v20  ;;  %288 = vmatmul.mubr.bf16.gmra.mrb[8].mxu1 %v562_v21 }
  0x36   :  { %433 = vmatprep.mubr.msk.bf16.mxu0 %vm182_vm0, %v563_v22  ;;  %437 = vmatprep.mubr.msk.bf16.mxu1 %vm182_vm0, %v565_v23 }
  0x3d   :  { %264 = vmatmul.mubr.bf16.gmra.mrb[12].mxu0 %v567_v24  ;;  %296 = vmatmul.mubr.bf16.gmra.mrb[12].mxu1 %v568_v25 }
  0xf8   :  { %v241_v27 = vpop.f32.mrb[0].mxu0  ;;  %v273_v28 = vpop.f32.mrb[0].mxu1 }
  0xf9   :  { %v242_v29 = vadd.f32 %v676_v26, %v241_v27  ;;  %v274_v30 = vadd.f32 %v676_v26, %v273_v28  ;;  %v243_v31 = vpop.f32.mrb[1].mxu0  ;;  %v275_v32 = vpop.f32.mrb[1].mxu1 }
  0xfa   :  { %v244_v33 = vpop.f32.mrb[2].mxu0  ;;  %v276_v34 = vpop.f32.mrb[2].mxu1 }
  0xfb   :  { %v245_v35 = vadd.f32 %v676_v26, %v244_v33  ;;  %v277_v36 = vadd.f32 %v676_v26, %v276_v34  ;;  %v246_v37 = vpop.f32.mrb[3].mxu0  ;;  %v278_v38 = vpop.f32.mrb[3].mxu1  ;;  %v304_v39 = vmax.f32 %v242_v29, 0.0  ;;  %v312_v40 = vmax.f32 %v274_v30, 0.0 }
  0xfd   :  { %v305_v41 = vmax.f32 %v245_v35, 0.0  ;;  %v313_v42 = vmax.f32 %v277_v36, 0.0 }
  0xff   :  { %v473_v43 = vpack.c.bf16 %v305_v41, %v304_v39  ;;  %v493_v44 = vpack.c.bf16 %v313_v42, %v312_v40 }
 0x100   :  { %v249_v45 = vpop.f32.mrb[4].mxu0  ;;  %v281_v46 = vpop.f32.mrb[4].mxu1 }
 0x101   :  { %474 = vst [vmem:[%s721_s3] sm:$0xff] %v473_v43   ;;  %513 = vst [vmem:[%s721_s3 + $0x20] sm:$0xff] %v493_v44   ;;  %v250_v47 = vadd.f32 %v676_v26, %v249_v45  ;;  %v282_v48 = vadd.f32 %v676_v26, %v281_v46  ;;  %v251_v49 = vpop.f32.mrb[5].mxu0  ;;  %v283_v50 = vpop.f32.mrb[5].mxu1 }
 0x102   :  { %v252_v51 = vpop.f32.mrb[6].mxu0  ;;  %v284_v52 = vpop.f32.mrb[6].mxu1 }
 0x103   :  { %v253_v53 = vadd.f32 %v676_v26, %v252_v51  ;;  %v285_v54 = vadd.f32 %v676_v26, %v284_v52  ;;  %v254_v55 = vpop.f32.mrb[7].mxu0  ;;  %v286_v56 = vpop.f32.mrb[7].mxu1  ;;  %v306_v57 = vmax.f32 %v250_v47, 0.0  ;;  %v314_v58 = vmax.f32 %v282_v48, 0.0 }
 0x105   :  { %v307_v59 = vmax.f32 %v253_v53, 0.0  ;;  %v315_v60 = vmax.f32 %v285_v54, 0.0 }
 0x107   :  { %v478_v61 = vpack.c.bf16 %v307_v59, %v306_v57  ;;  %v498_v62 = vpack.c.bf16 %v315_v60, %v314_v58 }
 0x108   :  { %v257_v63 = vpop.f32.mrb[8].mxu0  ;;  %v289_v0 = vpop.f32.mrb[8].mxu1 }
 0x109   :  { %510 = vst [vmem:[%s721_s3 + $0x8] sm:$0xff] %v478_v61   ;;  %514 = vst [vmem:[%s721_s3 + $0x28] sm:$0xff] %v498_v62   ;;  %v258_v1 = vadd.f32 %v676_v26, %v257_v63  ;;  %v290_v2 = vadd.f32 %v676_v26, %v289_v0  ;;  %v259_v3 = vpop.f32.mrb[9].mxu0  ;;  %v291_v4 = vpop.f32.mrb[9].mxu1 }
 0x10a   :  { %v260_v5 = vpop.f32.mrb[10].mxu0  ;;  %v292_v6 = vpop.f32.mrb[10].mxu1 }
 0x10b   :  { %v261_v7 = vadd.f32 %v676_v26, %v260_v5  ;;  %v293_v8 = vadd.f32 %v676_v26, %v292_v6  ;;  %v262_v9 = vpop.f32.mrb[11].mxu0  ;;  %v294_v10 = vpop.f32.mrb[11].mxu1  ;;  %v308_v11 = vmax.f32 %v258_v1, 0.0  ;;  %v316_v12 = vmax.f32 %v290_v2, 0.0 }
 0x10d   :  { %v309_v13 = vmax.f32 %v261_v7, 0.0  ;;  %v317_v14 = vmax.f32 %v293_v8, 0.0 }
 0x10f   :  { %v483_v15 = vpack.c.bf16 %v309_v13, %v308_v11  ;;  %v503_v16 = vpack.c.bf16 %v317_v14, %v316_v12 }
 0x110   :  { %v265_v17 = vpop.f32.mrb[12].mxu0  ;;  %v297_v18 = vpop.f32.mrb[12].mxu1 }
 0x111   :  { %511 = vst [vmem:[%s721_s3 + $0x10] sm:$0xff] %v483_v15   ;;  %515 = vst [vmem:[%s721_s3 + $0x30] sm:$0xff] %v503_v16   ;;  %v266_v19 = vadd.f32 %v676_v26, %v265_v17  ;;  %v298_v20 = vadd.f32 %v676_v26, %v297_v18  ;;  %v267_v21 = vpop.f32.mrb[13].mxu0  ;;  %v299_v22 = vpop.f32.mrb[13].mxu1 }
 0x112   :  { %v268_v23 = vpop.f32.mrb[14].mxu0  ;;  %v300_v24 = vpop.f32.mrb[14].mxu1 }
 0x113   :  { %v269_v25 = vadd.f32 %v676_v26, %v268_v23  ;;  %v301_v27 = vadd.f32 %v676_v26, %v300_v24  ;;  %v270_v28 = vpop.f32.mrb[15].mxu0  ;;  %v302_v29 = vpop.f32.mrb[15].mxu1  ;;  %v310_v30 = vmax.f32 %v266_v19, 0.0  ;;  %v318_v31 = vmax.f32 %v298_v20, 0.0 }
 0x115   :  { %v311_v32 = vmax.f32 %v269_v25, 0.0  ;;  %v319_v33 = vmax.f32 %v301_v27, 0.0 }
 0x117   :  { %v488_v34 = vpack.c.bf16 %v311_v32, %v310_v30  ;;  %v508_v35 = vpack.c.bf16 %v319_v33, %v318_v31 }
 0x119   :  { %512 = vst [vmem:[%s721_s3 + $0x18] sm:$0xff] %v488_v34   ;;  %516 = vst [vmem:[%s721_s3 + $0x38] sm:$0xff] %v508_v35  }

// kernel: _lambda_.37
= control target key start
LH: loop header
LB: loop body
LE: loop exit
PB: predicated region body
PF: predicated region fallthrough
CT: control target
= control target key end

     0   :  { %v269_v0 = vmov 0   ;;  %vm116_vm0 = vcmask 130048   ;;  %s338_s1 = inlined_call_operand.vmem [shape: bf16[144,128], index: 1, kind: input, shape index: {}]   ;;  %s339_s0 = inlined_call_operand.vmem [shape: bf16[32,144], index: 0, kind: input, shape index: {}]   ;;  %s340_s2 = inlined_call_operand.vmem [shape: f32[1,128], index: 2, kind: input, shape index: {}]   ;;  %s341_s3 = inlined_call_operand.vmem [shape: bf16[32,128], index: 3, kind: output, shape index: {}]  }
   0x1   :  { %123 = vmatprep.subr.bf16.mxu0 %v269_v0  ;;  %235 = vmatprep.subr.bf16.mxu1 %v269_v0  ;;  %v254_v1 = vld [vmem:[%s338_s1] sm:$0xff]   ;;  %v255_v2 = vld [vmem:[%s338_s1 + $0x8] sm:$0xff]   ;;  %v256_v3 = vld [vmem:[%s338_s1 + $0x10] sm:$0xff]  }
   0x2   :  { %124 = vmatpush1.bf16.msra.mxu0 %v254_v1  ;;  %244 = vmatpush1.bf16.msra.mxu1 %v254_v1  ;;  %v257_v4 = vld [vmem:[%s338_s1 + $0x18] sm:$0xff]   ;;  %v265_v5 = vld [vmem:[%s339_s0 + $0x4] ss:$8 sps:$4 sm:$0xff]   ;;  %v260_v9 = vld [vmem:[%s338_s1 + $0x30] sm:$0xff]  }
   0x3   :  { %125 = vmatprep.subr.bf16.mxu0 %v269_v0  ;;  %236 = vmatprep.subr.bf16.mxu1 %v269_v0  ;;  %v268_v6 = vld [vmem:[%s339_s0 + $0x14] ss:$8 sps:$4 sm:$0xff]   ;;  %v258_v7 = vld [vmem:[%s338_s1 + $0x20] sm:$0xff]   ;;  %v259_v8 = vld [vmem:[%s338_s1 + $0x28] sm:$0xff]  }
   0x4   :  { %214 = vmatprep.mubr.msk.bf16.mxu0 %vm116_vm0, %v265_v5  ;;  %215 = vmatprep.mubr.msk.bf16.mxu1 %vm116_vm0, %v268_v6  ;;  %v261_v10 = vld [vmem:[%s338_s1 + $0x38] sm:$0xff]   ;;  %v262_v11 = vld [vmem:[%s338_s1 + $0x40] sm:$0xff]  }
   0x5   :  { %v263_v12 = vld [vmem:[%s339_s0] ss:$8 sps:$4 sm:$0xff]   ;;  %v266_v13 = vld [vmem:[%s339_s0 + $0x10] ss:$8 sps:$4 sm:$0xff]  }
   0x6   :  { %126 = vmatpush1.bf16.msra.mxu0 %v255_v2  ;;  %245 = vmatpush1.bf16.msra.mxu1 %v255_v2  ;;  %v200_v14 = vld [vmem:[%s340_s2] ss:$0 sm:$0xff] }
   0x7   :  { %127 = vmatprep.subr.bf16.mxu0 %v269_v0  ;;  %237 = vmatprep.subr.bf16.mxu1 %v269_v0 }
   0xa   :  { %128 = vmatpush1.bf16.msra.mxu0 %v256_v3  ;;  %246 = vmatpush1.bf16.msra.mxu1 %v256_v3 }
   0xb   :  { %129 = vmatprep.subr.bf16.mxu0 %v269_v0  ;;  %238 = vmatprep.subr.bf16.mxu1 %v269_v0 }
   0xe   :  { %130 = vmatpush1.bf16.msra.mxu0 %v257_v4  ;;  %247 = vmatpush1.bf16.msra.mxu1 %v257_v4 }
   0xf   :  { %131 = vmatprep.subr.bf16.mxu0 %v269_v0  ;;  %239 = vmatprep.subr.bf16.mxu1 %v269_v0 }
  0x12   :  { %132 = vmatpush1.bf16.msra.mxu0 %v258_v7  ;;  %248 = vmatpush1.bf16.msra.mxu1 %v258_v7 }
  0x13   :  { %133 = vmatprep.subr.bf16.mxu0 %v269_v0  ;;  %240 = vmatprep.subr.bf16.mxu1 %v269_v0 }
  0x16   :  { %134 = vmatpush1.bf16.msra.mxu0 %v259_v8  ;;  %249 = vmatpush1.bf16.msra.mxu1 %v259_v8 }
  0x17   :  { %135 = vmatprep.subr.bf16.mxu0 %v269_v0  ;;  %241 = vmatprep.subr.bf16.mxu1 %v269_v0 }
  0x1a   :  { %136 = vmatpush1.bf16.msra.mxu0 %v260_v9  ;;  %250 = vmatpush1.bf16.msra.mxu1 %v260_v9 }
  0x1b   :  { %137 = vmatprep.subr.bf16.mxu0 %v269_v0  ;;  %242 = vmatprep.subr.bf16.mxu1 %v269_v0 }
  0x1e   :  { %138 = vmatpush1.bf16.msra.mxu0 %v261_v10  ;;  %251 = vmatpush1.bf16.msra.mxu1 %v261_v10 }
  0x1f   :  { %139 = vmatprep.subr.bf16.mxu0 %v269_v0  ;;  %243 = vmatprep.subr.bf16.mxu1 %v269_v0 }
  0x22   :  { %140 = vmatpush1.bf16.msra.mxu0 %v262_v11  ;;  %252 = vmatpush1.bf16.msra.mxu1 %v262_v11 }
  0x25   :  { %156 = vmatmul.mubr.bf16.vlgmr.msra.gmra.mrb[0].mxu0 %v263_v12  ;;  %164 = vmatmul.mubr.bf16.vlgmr.msra.gmra.mrb[0].mxu1 %v266_v13 }
  0xf8   :  { %v157_v15 = vpop.f32.mrb[0].mxu0  ;;  %v165_v16 = vpop.f32.mrb[0].mxu1 }
  0xf9   :  { %v158_v17 = vadd.f32 %v200_v14, %v157_v15  ;;  %v166_v18 = vadd.f32 %v200_v14, %v165_v16  ;;  %v159_v19 = vpop.f32.mrb[1].mxu0  ;;  %v167_v20 = vpop.f32.mrb[1].mxu1 }
  0xfa   :  { %v160_v21 = vpop.f32.mrb[2].mxu0  ;;  %v168_v22 = vpop.f32.mrb[2].mxu1 }
  0xfb   :  { %v161_v23 = vadd.f32 %v200_v14, %v160_v21  ;;  %v169_v24 = vadd.f32 %v200_v14, %v168_v22  ;;  %v162_v25 = vpop.f32.mrb[3].mxu0  ;;  %v170_v26 = vpop.f32.mrb[3].mxu1  ;;  %v172_v27 = vmax.f32 %v158_v17, 0.0  ;;  %v174_v28 = vmax.f32 %v166_v18, 0.0 }
  0xfd   :  { %v173_v29 = vmax.f32 %v161_v23, 0.0  ;;  %v175_v30 = vmax.f32 %v169_v24, 0.0 }
  0xff   :  { %v227_v31 = vpack.c.bf16 %v173_v29, %v172_v27  ;;  %v232_v32 = vpack.c.bf16 %v175_v30, %v174_v28 }
 0x101   :  { %228 = vst [vmem:[%s341_s3] sm:$0xff] %v227_v31   ;;  %234 = vst [vmem:[%s341_s3 + $0x8] sm:$0xff] %v232_v32  }

// kernel: _lambda_.38
= control target key start
LH: loop header
LB: loop body
LE: loop exit
PB: predicated region body
PF: predicated region fallthrough
CT: control target
= control target key end

     0   :  { %vm44_vm0 = vcmask 130048   ;;  %s199_s1 = inlined_call_operand.vmem [shape: bf16[16,128], index: 1, kind: input, shape index: {}]   ;;  %s200_s0 = inlined_call_operand.vmem [shape: bf16[32,16], index: 0, kind: input, shape index: {}]   ;;  %s201_s2 = inlined_call_operand.vmem [shape: f32[1,128], index: 2, kind: input, shape index: {}]   ;;  %s202_s3 = inlined_call_operand.vmem [shape: bf16[32,128], index: 3, kind: output, shape index: {}]  }
   0x1   :  { %v158_v0 = vld [vmem:[%s199_s1] sm:$0xff]   ;;  %v160_v2 = vld [vmem:[%s200_s0 + $0x8] sm:$0xff]  }
   0x2   :  { %v159_v1 = vld [vmem:[%s200_s0] sm:$0xff]   ;;  %152 = vmatprep.subr.bf16.mxu0 %v158_v0 }
   0x3   :  { %153 = vmatpush3.bf16.msra.mxu0 %v158_v0  ;;  %154 = vmatprep.mubr.msk.bf16.mxu0 %vm44_vm0, %v159_v1  ;;  %v124_v4 = vld [vmem:[%s201_s2] ss:$0 sm:$0xff] }
   0x6   :  { %155 = vmatmul.mubr.msk.bf16.vlgmr.msra.gmra.mrb[0].mxu0 %vm44_vm0, %v160_v2 }
  0xd9   :  { %v156_v3 = vpop.f32.mrb[0].mxu0 }
  0xda   :  { %v85_v5 = vpop.f32.mrb[1].mxu0  ;;  %v94_v7 = vadd.f32 %v156_v3, %v124_v4 }
  0xdb   :  { %v157_v6 = vpop.f32.mrb[2].mxu0  ;;  %v86_v10 = vadd.f32 %v124_v4, %v85_v5 }
  0xdc   :  { %v97_v8 = vadd.f32 %v157_v6, %v124_v4  ;;  %v88_v9 = vpop.f32.mrb[3].mxu0 }
  0xdd   :  { %v89_v11 = vadd.f32 %v124_v4, %v88_v9 }
  0xde   :  { %v146_v12 = vpack.c.bf16 %v97_v8, %v94_v7 }
  0xdf   :  { %v141_v13 = vpack.c.bf16 %v89_v11, %v86_v10 }
  0xe0   :  { %148 = vst [vmem:[%s202_s3 + $0x8] sm:$0xff] %v146_v12  }
  0xe1   :  { %142 = vst [vmem:[%s202_s3] sm:$0xff] %v141_v13  }

// kernel: _lambda_.39
= control target key start
LH: loop header
LB: loop body
LE: loop exit
PB: predicated region body
PF: predicated region fallthrough
CT: control target
= control target key end

     0   :  { %vm207_vm0 = vcmask 261120   ;;  %s585_s1 = inlined_call_operand.vmem [shape: bf16[288,128], index: 1, kind: input, shape index: {}]   ;;  %s586_s0 = inlined_call_operand.vmem [shape: bf16[32,288], index: 0, kind: input, shape index: {}]   ;;  %s587_s2 = inlined_call_operand.vmem [shape: f32[1,128], index: 2, kind: input, shape index: {}]   ;;  %s588_s3 = inlined_call_operand.vmem [shape: bf16[32,128], index: 3, kind: input, shape index: {}]   ;;  %s589_s4 = inlined_call_operand.vmem [shape: bf16[32,128], index: 4, kind: output, shape index: {}]  }
   0x1   :  { %v447_v0 = vld [vmem:[%s585_s1 + $0x40] sm:$0xff]   ;;  %v449_v2 = vld [vmem:[%s585_s1 + $0x48] sm:$0xff]   ;;  %v451_v4 = vld [vmem:[%s585_s1 + $0x50] sm:$0xff]  }
   0x2   :  { %v448_v1 = vld [vmem:[%s585_s1] sm:$0xff]   ;;  %407 = vmatprep.subr.bf16.mxu0 %v447_v0  ;;  %v450_v3 = vld [vmem:[%s585_s1 + $0x8] sm:$0xff]   ;;  %v452_v5 = vld [vmem:[%s585_s1 + $0x10] sm:$0xff]  }
   0x3   :  { %408 = vmatpush3.bf16.msra.mxu0 %v448_v1  ;;  %v453_v6 = vld [vmem:[%s585_s1 + $0x58] sm:$0xff]   ;;  %v455_v8 = vld [vmem:[%s585_s1 + $0x60] sm:$0xff]   ;;  %v457_v11 = vld [vmem:[%s585_s1 + $0x68] sm:$0xff]  }
   0x4   :  { %409 = vmatprep.subr.bf16.mxu0 %v449_v2  ;;  %v454_v7 = vld [vmem:[%s585_s1 + $0x18] sm:$0xff]   ;;  %v456_v9 = vld [vmem:[%s585_s1 + $0x20] sm:$0xff]   ;;  %v458_v12 = vld [vmem:[%s585_s1 + $0x28] sm:$0xff]  }
   0x5   :  { %v462_v10 = vld [vmem:[%s585_s1 + $0x80] sm:$0xff]   ;;  %v459_v13 = vld [vmem:[%s585_s1 + $0x70] sm:$0xff]   ;;  %v467_v15 = vld [vmem:[%s585_s1 + $0x88] sm:$0xff]  }
   0x6   :  { %439 = vmatprep.subr.bf16.mxu1 %v462_v10  ;;  %v466_v14 = vld [vmem:[%s586_s0 + $0x4] ss:$12 sps:$4 sm:$0xff]   ;;  %v468_v16 = vld [vmem:[%s586_s0 + $0x8] ss:$12 sps:$4 sm:$0xff]   ;;  %v469_v17 = vld [vmem:[%s586_s0 + $0x20] ss:$12 sps:$4 sm:$0xff]  }
   0x7   :  { %410 = vmatpush3.bf16.msra.mxu0 %v450_v3  ;;  %440 = vmatpush3.bf16.msra.mxu1 %v462_v10  ;;  %v460_v18 = vld [vmem:[%s585_s1 + $0x30] sm:$0xff]   ;;  %v461_v19 = vld [vmem:[%s585_s1 + $0x78] sm:$0xff]   ;;  %v464_v21 = vld [vmem:[%s586_s0] ss:$12 sps:$4 sm:$0xff]  }
   0x8   :  { %411 = vmatprep.subr.bf16.mxu0 %v451_v4  ;;  %246 = vmatprep.mubr.bf16.mxu0 %v466_v14  ;;  %v463_v20 = vld [vmem:[%s585_s1 + $0x38] sm:$0xff]   ;;  %v352_v30 = vld [vmem:[%s587_s2] ss:$0 sm:$0xff]  ;;  %v405_v41 = vld [vmem:[%s588_s3 + $0x8] sm:$0xff]  }
   0x9   :  { %441 = vmatprep.subr.bf16.mxu1 %v467_v15  ;;  %443 = vmatprep.mubr.msk.bf16.mxu1 %vm207_vm0, %v468_v16  ;;  %v470_v22 = vld [vmem:[%s586_s0 + $0x1c] ss:$12 sps:$4 sm:$0xff]   ;;  %v472_v23 = vld [vmem:[%s586_s0 + $0x18] ss:$12 sps:$4 sm:$0xff]   ;;  %v393_v49 = vunpack.c.l.bf16 %v405_v41  ;;  %v394_v58 = vunpack.c.h.bf16 %v405_v41 }
   0xa   :  { %v388_v31 = vld [vmem:[%s588_s3] sm:$0xff]  }
   0xb   :  { %412 = vmatpush3.bf16.msra.mxu0 %v452_v5  ;;  %442 = vmatpush3.bf16.msra.mxu1 %v467_v15  ;;  %v389_v37 = vunpack.c.l.bf16 %v388_v31  ;;  %v390_v40 = vunpack.c.h.bf16 %v388_v31 }
   0xc   :  { %413 = vmatprep.subr.bf16.mxu0 %v453_v6 }
   0xe   :  { %444 = vmatmul.mubr.msk.bf16.vlgmr.msra.gmra.mrb[0].mxu1 %vm207_vm0, %v469_v17 }
   0xf   :  { %414 = vmatpush3.bf16.msra.mxu0 %v454_v7 }
  0x10   :  { %415 = vmatprep.subr.bf16.mxu0 %v455_v8 }
  0x13   :  { %416 = vmatpush3.bf16.msra.mxu0 %v456_v9 }
  0x14   :  { %417 = vmatprep.subr.bf16.mxu0 %v457_v11 }
  0x17   :  { %418 = vmatpush3.bf16.msra.mxu0 %v458_v12 }
  0x18   :  { %419 = vmatprep.subr.bf16.mxu0 %v459_v13 }
  0x1b   :  { %420 = vmatpush3.bf16.msra.mxu0 %v460_v18 }
  0x1c   :  { %421 = vmatprep.subr.bf16.mxu0 %v461_v19 }
  0x1f   :  { %422 = vmatpush3.bf16.msra.mxu0 %v463_v20 }
  0x22   :  { %247 = vmatmul.mubr.bf16.vlgmr.msra.gmra.mrb[0].mxu0 %v464_v21 }
  0x23   :  { %254 = vmatprep.mubr.bf16.mxu0 %v470_v22 }
  0x2a   :  { %255 = vmatmul.mubr.bf16.gmra.mrb[4].mxu0 %v472_v23 }
  0xe1   :  { %v445_v24 = vpop.f32.mrb[0].mxu1 }
  0xe2   :  { %v297_v25 = vpop.f32.mrb[1].mxu1 }
  0xe3   :  { %v446_v26 = vpop.f32.mrb[2].mxu1 }
  0xe4   :  { %v300_v27 = vpop.f32.mrb[3].mxu1 }
  0xf5   :  { %v423_v28 = vpop.f32.mrb[0].mxu0 }
  0xf6   :  { %v424_v29 = vpop.f32.mrb[1].mxu0 }
  0xf7   :  { %v425_v32 = vadd.f32 %v424_v29, %v423_v28  ;;  %v426_v33 = vpop.f32.mrb[2].mxu0 }
  0xf8   :  { %v427_v34 = vpop.f32.mrb[3].mxu0 }
  0xf9   :  { %v428_v35 = vadd.f32 %v427_v34, %v426_v33  ;;  %v249_v36 = vadd.f32 %v425_v32, %v352_v30 }
  0xfb   :  { %v298_v38 = vadd.f32 %v297_v25, %v249_v36  ;;  %v252_v39 = vadd.f32 %v428_v35, %v352_v30 }
  0xfd   :  { %v320_v42 = vadd.f32 %v389_v37, %v298_v38  ;;  %v301_v43 = vadd.f32 %v300_v27, %v252_v39  ;;  %v429_v44 = vpop.f32.mrb[4].mxu0 }
  0xfe   :  { %v430_v45 = vpop.f32.mrb[5].mxu0 }
  0xff   :  { %v321_v46 = vadd.f32 %v390_v40, %v301_v43  ;;  %v431_v47 = vadd.f32 %v430_v45, %v429_v44  ;;  %v432_v48 = vpop.f32.mrb[6].mxu0  ;;  %v324_v51 = vmax.f32 %v320_v42, 0.0 }
 0x100   :  { %v433_v50 = vpop.f32.mrb[7].mxu0 }
 0x101   :  { %v325_v52 = vmax.f32 %v321_v46, 0.0  ;;  %v257_v53 = vadd.f32 %v431_v47, %v352_v30  ;;  %v434_v54 = vadd.f32 %v433_v50, %v432_v48 }
 0x103   :  { %v398_v55 = vpack.c.bf16 %v325_v52, %v324_v51  ;;  %v306_v56 = vadd.f32 %v445_v24, %v257_v53  ;;  %v260_v57 = vadd.f32 %v434_v54, %v352_v30 }
 0x105   :  { %399 = vst [vmem:[%s589_s4] sm:$0xff] %v398_v55   ;;  %v322_v59 = vadd.f32 %v393_v49, %v306_v56  ;;  %v309_v60 = vadd.f32 %v446_v26, %v260_v57 }
 0x107   :  { %v323_v61 = vadd.f32 %v394_v58, %v309_v60  ;;  %v326_v62 = vmax.f32 %v322_v59, 0.0 }
 0x109   :  { %v327_v63 = vmax.f32 %v323_v61, 0.0 }
 0x10b   :  { %v403_v0 = vpack.c.bf16 %v327_v63, %v326_v62 }
 0x10d   :  { %406 = vst [vmem:[%s589_s4 + $0x8] sm:$0xff] %v403_v0  }

// kernel: _lambda_.40
= control target key start
LH: loop header
LB: loop body
LE: loop exit
PB: predicated region body
PF: predicated region fallthrough
CT: control target
= control target key end

     0   :  { %vm204_vm0 = vcmask 261120   ;;  %s550_s1 = inlined_call_operand.vmem [shape: bf16[288,128], index: 1, kind: input, shape index: {}]   ;;  %s551_s0 = inlined_call_operand.vmem [shape: bf16[32,288], index: 0, kind: input, shape index: {}]   ;;  %s552_s2 = inlined_call_operand.vmem [shape: f32[1,128], index: 2, kind: input, shape index: {}]   ;;  %s553_s3 = inlined_call_operand.vmem [shape: bf16[32,128], index: 3, kind: output, shape index: {}]  }
   0x1   :  { %v423_v0 = vld [vmem:[%s550_s1 + $0x40] sm:$0xff]   ;;  %v425_v2 = vld [vmem:[%s550_s1 + $0x48] sm:$0xff]   ;;  %v427_v4 = vld [vmem:[%s550_s1 + $0x50] sm:$0xff]  }
   0x2   :  { %v424_v1 = vld [vmem:[%s550_s1] sm:$0xff]   ;;  %383 = vmatprep.subr.bf16.mxu0 %v423_v0  ;;  %v426_v3 = vld [vmem:[%s550_s1 + $0x8] sm:$0xff]   ;;  %v428_v5 = vld [vmem:[%s550_s1 + $0x10] sm:$0xff]  }
   0x3   :  { %384 = vmatpush3.bf16.msra.mxu0 %v424_v1  ;;  %v429_v6 = vld [vmem:[%s550_s1 + $0x58] sm:$0xff]   ;;  %v431_v8 = vld [vmem:[%s550_s1 + $0x60] sm:$0xff]   ;;  %v433_v11 = vld [vmem:[%s550_s1 + $0x68] sm:$0xff]  }
   0x4   :  { %385 = vmatprep.subr.bf16.mxu0 %v425_v2  ;;  %v430_v7 = vld [vmem:[%s550_s1 + $0x18] sm:$0xff]   ;;  %v432_v9 = vld [vmem:[%s550_s1 + $0x20] sm:$0xff]   ;;  %v434_v12 = vld [vmem:[%s550_s1 + $0x28] sm:$0xff]  }
   0x5   :  { %v438_v10 = vld [vmem:[%s550_s1 + $0x80] sm:$0xff]   ;;  %v435_v13 = vld [vmem:[%s550_s1 + $0x70] sm:$0xff]   ;;  %v443_v15 = vld [vmem:[%s550_s1 + $0x88] sm:$0xff]  }
   0x6   :  { %415 = vmatprep.subr.bf16.mxu1 %v438_v10  ;;  %v442_v14 = vld [vmem:[%s551_s0 + $0x4] ss:$12 sps:$4 sm:$0xff]   ;;  %v444_v16 = vld [vmem:[%s551_s0 + $0x8] ss:$12 sps:$4 sm:$0xff]   ;;  %v445_v17 = vld [vmem:[%s551_s0 + $0x20] ss:$12 sps:$4 sm:$0xff]  }
   0x7   :  { %386 = vmatpush3.bf16.msra.mxu0 %v426_v3  ;;  %416 = vmatpush3.bf16.msra.mxu1 %v438_v10  ;;  %v436_v18 = vld [vmem:[%s550_s1 + $0x30] sm:$0xff]   ;;  %v437_v19 = vld [vmem:[%s550_s1 + $0x78] sm:$0xff]   ;;  %v440_v21 = vld [vmem:[%s551_s0] ss:$12 sps:$4 sm:$0xff]  }
   0x8   :  { %387 = vmatprep.subr.bf16.mxu0 %v427_v4  ;;  %243 = vmatprep.mubr.bf16.mxu0 %v442_v14  ;;  %v439_v20 = vld [vmem:[%s550_s1 + $0x38] sm:$0xff]   ;;  %v337_v30 = vld [vmem:[%s552_s2] ss:$0 sm:$0xff] }
   0x9   :  { %417 = vmatprep.subr.bf16.mxu1 %v443_v15  ;;  %419 = vmatprep.mubr.msk.bf16.mxu1 %vm204_vm0, %v444_v16  ;;  %v446_v22 = vld [vmem:[%s551_s0 + $0x1c] ss:$12 sps:$4 sm:$0xff]   ;;  %v448_v23 = vld [vmem:[%s551_s0 + $0x18] ss:$12 sps:$4 sm:$0xff]  }
   0xb   :  { %388 = vmatpush3.bf16.msra.mxu0 %v428_v5  ;;  %418 = vmatpush3.bf16.msra.mxu1 %v443_v15 }
   0xc   :  { %389 = vmatprep.subr.bf16.mxu0 %v429_v6 }
   0xe   :  { %420 = vmatmul.mubr.msk.bf16.vlgmr.msra.gmra.mrb[0].mxu1 %vm204_vm0, %v445_v17 }
   0xf   :  { %390 = vmatpush3.bf16.msra.mxu0 %v430_v7 }
  0x10   :  { %391 = vmatprep.subr.bf16.mxu0 %v431_v8 }
  0x13   :  { %392 = vmatpush3.bf16.msra.mxu0 %v432_v9 }
  0x14   :  { %393 = vmatprep.subr.bf16.mxu0 %v433_v11 }
  0x17   :  { %394 = vmatpush3.bf16.msra.mxu0 %v434_v12 }
  0x18   :  { %395 = vmatprep.subr.bf16.mxu0 %v435_v13 }
  0x1b   :  { %396 = vmatpush3.bf16.msra.mxu0 %v436_v18 }
  0x1c   :  { %397 = vmatprep.subr.bf16.mxu0 %v437_v19 }
  0x1f   :  { %398 = vmatpush3.bf16.msra.mxu0 %v439_v20 }
  0x22   :  { %244 = vmatmul.mubr.bf16.vlgmr.msra.gmra.mrb[0].mxu0 %v440_v21 }
  0x23   :  { %251 = vmatprep.mubr.bf16.mxu0 %v446_v22 }
  0x2a   :  { %252 = vmatmul.mubr.bf16.gmra.mrb[4].mxu0 %v448_v23 }
  0xe1   :  { %v421_v24 = vpop.f32.mrb[0].mxu1 }
  0xe2   :  { %v294_v25 = vpop.f32.mrb[1].mxu1 }
  0xe3   :  { %v422_v26 = vpop.f32.mrb[2].mxu1 }
  0xe4   :  { %v297_v27 = vpop.f32.mrb[3].mxu1 }
  0xf5   :  { %v399_v28 = vpop.f32.mrb[0].mxu0 }
  0xf6   :  { %v400_v29 = vpop.f32.mrb[1].mxu0 }
  0xf7   :  { %v401_v31 = vadd.f32 %v400_v29, %v399_v28  ;;  %v402_v32 = vpop.f32.mrb[2].mxu0 }
  0xf8   :  { %v403_v33 = vpop.f32.mrb[3].mxu0 }
  0xf9   :  { %v404_v34 = vadd.f32 %v403_v33, %v402_v32  ;;  %v246_v35 = vadd.f32 %v401_v31, %v337_v30 }
  0xfb   :  { %v295_v36 = vadd.f32 %v294_v25, %v246_v35  ;;  %v249_v37 = vadd.f32 %v404_v34, %v337_v30 }
  0xfd   :  { %v298_v38 = vadd.f32 %v297_v27, %v249_v37  ;;  %v405_v39 = vpop.f32.mrb[4].mxu0  ;;  %v309_v41 = vmax.f32 %v295_v36, 0.0 }
  0xfe   :  { %v406_v40 = vpop.f32.mrb[5].mxu0 }
  0xff   :  { %v310_v42 = vmax.f32 %v298_v38, 0.0  ;;  %v407_v43 = vadd.f32 %v406_v40, %v405_v39  ;;  %v408_v44 = vpop.f32.mrb[6].mxu0 }
 0x100   :  { %v409_v45 = vpop.f32.mrb[7].mxu0 }
 0x101   :  { %v375_v46 = vpack.c.bf16 %v310_v42, %v309_v41  ;;  %v254_v47 = vadd.f32 %v407_v43, %v337_v30  ;;  %v410_v48 = vadd.f32 %v409_v45, %v408_v44 }
 0x103   :  { %376 = vst [vmem:[%s553_s3] sm:$0xff] %v375_v46   ;;  %v303_v49 = vadd.f32 %v421_v24, %v254_v47  ;;  %v257_v50 = vadd.f32 %v410_v48, %v337_v30 }
 0x105   :  { %v306_v51 = vadd.f32 %v422_v26, %v257_v50  ;;  %v311_v52 = vmax.f32 %v303_v49, 0.0 }
 0x107   :  { %v312_v53 = vmax.f32 %v306_v51, 0.0 }
 0x109   :  { %v380_v54 = vpack.c.bf16 %v312_v53, %v311_v52 }
 0x10b   :  { %382 = vst [vmem:[%s553_s3 + $0x8] sm:$0xff] %v380_v54  }

// kernel: _lambda_.42
= control target key start
LH: loop header
LB: loop body
LE: loop exit
PB: predicated region body
PF: predicated region fallthrough
CT: control target
= control target key end

     0   :  { %v376_v1 = vmov 0.0   ;;  %vm377_vm0 = vmmov 0   ;;  %vm185_vm1 = vcmask 261120   ;;  %s467_s1 = inlined_call_operand.vmem [shape: bf16[288,128], index: 1, kind: input, shape index: {}]   ;;  %s468_s0 = inlined_call_operand.vmem [shape: bf16[16,288], index: 0, kind: input, shape index: {}]   ;;  %s469_s2 = inlined_call_operand.vmem [shape: f32[1,128], index: 2, kind: input, shape index: {}]   ;;  %s470_s3 = inlined_call_operand.vmem [shape: bf16[16,128], index: 3, kind: output, shape index: {}]  }
   0x1   :  { %v354_v0 = vld [vmem:[%s467_s1 + $0x40] sm:$0xff]   ;;  %344 = vmatprep.subr.bf16.mxu1 %v376_v1  ;;  %348 = vmatprep.mubr.msk.bf16.mxu1 %vm377_vm0, %v376_v1  ;;  %v356_v3 = vld [vmem:[%s467_s1 + $0x48] sm:$0xff]   ;;  %v358_v5 = vld [vmem:[%s467_s1 + $0x50] sm:$0xff]  }
   0x2   :  { %v355_v2 = vld [vmem:[%s467_s1] sm:$0xff]   ;;  %319 = vmatprep.subr.bf16.mxu0 %v354_v0  ;;  %v357_v4 = vld [vmem:[%s467_s1 + $0x8] sm:$0xff]   ;;  %v359_v6 = vld [vmem:[%s467_s1 + $0x10] sm:$0xff]  }
   0x3   :  { %320 = vmatpush3.bf16.msra.mxu0 %v355_v2  ;;  %v360_v7 = vld [vmem:[%s467_s1 + $0x58] sm:$0xff]   ;;  %v362_v9 = vld [vmem:[%s467_s1 + $0x60] sm:$0xff]   ;;  %v364_v12 = vld [vmem:[%s467_s1 + $0x68] sm:$0xff]  }
   0x4   :  { %321 = vmatprep.subr.bf16.mxu0 %v356_v3  ;;  %v361_v8 = vld [vmem:[%s467_s1 + $0x18] sm:$0xff]   ;;  %v368_v10 = vld [vmem:[%s467_s1 + $0x80] sm:$0xff]   ;;  %v365_v13 = vld [vmem:[%s467_s1 + $0x28] sm:$0xff]  }
   0x5   :  { %v363_v11 = vld [vmem:[%s467_s1 + $0x20] sm:$0xff]   ;;  %345 = vmatpush3.bf16.msra.mxu1 %v368_v10  ;;  %v374_v15 = vld [vmem:[%s467_s1 + $0x88] sm:$0xff]   ;;  %v366_v16 = vld [vmem:[%s467_s1 + $0x70] sm:$0xff]  }
   0x6   :  { %346 = vmatprep.subr.bf16.mxu1 %v376_v1  ;;  %v373_v14 = vld [vmem:[%s468_s0 + $0x4] ss:$12 sps:$4 sm:$0xff]   ;;  %v375_v17 = vld [vmem:[%s468_s0 + $0x8] ss:$12 sps:$4 sm:$0xff]   ;;  %v369_v19 = vld [vmem:[%s467_s1 + $0x78] sm:$0xff]  }
   0x7   :  { %322 = vmatpush3.bf16.msra.mxu0 %v357_v4  ;;  %221 = vmatprep.mubr.bf16.mxu0 %v373_v14  ;;  %v367_v18 = vld [vmem:[%s467_s1 + $0x30] sm:$0xff]   ;;  %v370_v20 = vld [vmem:[%s467_s1 + $0x38] sm:$0xff]   ;;  %v371_v21 = vld [vmem:[%s468_s0] ss:$12 sps:$4 sm:$0xff]  }
   0x8   :  { %323 = vmatprep.subr.bf16.mxu0 %v358_v5  ;;  %v287_v28 = vld [vmem:[%s469_s2] ss:$0 sm:$0xff] }
   0x9   :  { %347 = vmatpush3.bf16.msra.mxu1 %v374_v15 }
   0xb   :  { %324 = vmatpush3.bf16.msra.mxu0 %v359_v6 }
   0xc   :  { %325 = vmatprep.subr.bf16.mxu0 %v360_v7  ;;  %349 = vmatmul.mubr.msk.bf16.vlgmr.msra.gmra.mrb[0].mxu1 %vm185_vm1, %v375_v17 }
   0xf   :  { %326 = vmatpush3.bf16.msra.mxu0 %v361_v8 }
  0x10   :  { %327 = vmatprep.subr.bf16.mxu0 %v362_v9 }
  0x13   :  { %328 = vmatpush3.bf16.msra.mxu0 %v363_v11 }
  0x14   :  { %329 = vmatprep.subr.bf16.mxu0 %v364_v12 }
  0x17   :  { %330 = vmatpush3.bf16.msra.mxu0 %v365_v13 }
  0x18   :  { %331 = vmatprep.subr.bf16.mxu0 %v366_v16 }
  0x1b   :  { %332 = vmatpush3.bf16.msra.mxu0 %v367_v18 }
  0x1c   :  { %333 = vmatprep.subr.bf16.mxu0 %v369_v19 }
  0x1f   :  { %334 = vmatpush3.bf16.msra.mxu0 %v370_v20 }
  0x22   :  { %222 = vmatmul.mubr.bf16.vlgmr.msra.gmra.mrb[0].mxu0 %v371_v21 }
  0xdf   :  { %v264_v22 = vpop.f32.mrb[0].mxu1 }
  0xe0   :  { %v350_v23 = vpop.f32.mrb[1].mxu1 }
  0xe1   :  { %v267_v24 = vpop.f32.mrb[2].mxu1 }
  0xe2   :  { %v351_v25 = vpop.f32.mrb[3].mxu1 }
  0xf5   :  { %v335_v26 = vpop.f32.mrb[0].mxu0 }
  0xf6   :  { %v336_v27 = vpop.f32.mrb[1].mxu0 }
  0xf7   :  { %v337_v29 = vadd.f32 %v336_v27, %v335_v26  ;;  %v338_v30 = vpop.f32.mrb[2].mxu0 }
  0xf8   :  { %v339_v31 = vpop.f32.mrb[3].mxu0 }
  0xf9   :  { %v224_v32 = vadd.f32 %v337_v29, %v287_v28  ;;  %v340_v33 = vadd.f32 %v339_v31, %v338_v30 }
  0xfb   :  { %v265_v34 = vadd.f32 %v264_v22, %v224_v32  ;;  %v227_v35 = vadd.f32 %v340_v33, %v287_v28 }
  0xfd   :  { %v268_v36 = vadd.f32 %v267_v24, %v227_v35  ;;  %v271_v37 = vmax.f32 %v265_v34, 0.0 }
  0xff   :  { %v272_v38 = vmax.f32 %v268_v36, 0.0 }
 0x101   :  { %v317_v39 = vpack.c.bf16 %v272_v38, %v271_v37 }
 0x103   :  { %318 = vst [vmem:[%s470_s3] sm:$0xff] %v317_v39  }

// kernel: _lambda_.43
= control target key start
LH: loop header
LB: loop body
LE: loop exit
PB: predicated region body
PF: predicated region fallthrough
CT: control target
= control target key end

     0   :  { %v134_v0 = vmov 0.0   ;;  %vm135_vm0 = vmmov 0   ;;  %vm45_vm1 = vcmask 261120   ;;  %s171_s1 = inlined_call_operand.vmem [shape: bf16[32,128], index: 1, kind: input, shape index: {}]   ;;  %s172_s0 = inlined_call_operand.vmem [shape: bf16[16,32], index: 0, kind: input, shape index: {}]   ;;  %s173_s2 = inlined_call_operand.vmem [shape: f32[1,128], index: 2, kind: input, shape index: {}]   ;;  %s174_s3 = inlined_call_operand.vmem [shape: bf16[16,128], index: 3, kind: output, shape index: {}]  }
   0x1   :  { %121 = vmatprep.subr.bf16.mxu0 %v134_v0  ;;  %v131_v1 = vld [vmem:[%s171_s1] sm:$0xff]   ;;  %125 = vmatprep.mubr.msk.bf16.mxu0 %vm135_vm0, %v134_v0  ;;  %v132_v2 = vld [vmem:[%s171_s1 + $0x8] sm:$0xff]  }
   0x2   :  { %122 = vmatpush3.bf16.msra.mxu0 %v131_v1  ;;  %v133_v3 = vld [vmem:[%s172_s0] sm:$0xff]  }
   0x3   :  { %123 = vmatprep.subr.bf16.mxu0 %v134_v0  ;;  %v104_v4 = vld [vmem:[%s173_s2] ss:$0 sm:$0xff] }
   0x6   :  { %124 = vmatpush3.bf16.msra.mxu0 %v132_v2 }
   0x9   :  { %126 = vmatmul.mubr.msk.bf16.vlgmr.msra.gmra.mrb[0].mxu0 %vm45_vm1, %v133_v3 }
  0xdc   :  { %v83_v5 = vpop.f32.mrb[0].mxu0 }
  0xdd   :  { %v127_v6 = vpop.f32.mrb[1].mxu0  ;;  %v84_v8 = vadd.f32 %v104_v4, %v83_v5 }
  0xde   :  { %v86_v7 = vpop.f32.mrb[2].mxu0 }
  0xdf   :  { %v87_v9 = vadd.f32 %v104_v4, %v86_v7  ;;  %v128_v10 = vpop.f32.mrb[3].mxu0 }
  0xe1   :  { %v116_v11 = vpack.c.bf16 %v87_v9, %v84_v8 }
  0xe3   :  { %117 = vst [vmem:[%s174_s3] sm:$0xff] %v116_v11  }

// kernel: _lambda_.44
= control target key start
LH: loop header
LB: loop body
LE: loop exit
PB: predicated region body
PF: predicated region fallthrough
CT: control target
= control target key end

     0   :  { %v655_v33 = vmov 0.0   ;;  %vm656_vm0 = vmmov 0   ;;  %vm344_vm1 = vcmask 523264   ;;  %s814_s1 = inlined_call_operand.vmem [shape: bf16[576,128], index: 1, kind: input, shape index: {}]   ;;  %s815_s0 = inlined_call_operand.vmem [shape: bf16[16,576], index: 0, kind: input, shape index: {}]   ;;  %s816_s2 = inlined_call_operand.vmem [shape: f32[1,128], index: 2, kind: input, shape index: {}]   ;;  %s817_s3 = inlined_call_operand.vmem [shape: bf16[16,128], index: 3, kind: input, shape index: {}]   ;;  %s818_s4 = inlined_call_operand.vmem [shape: bf16[16,128], index: 4, kind: output, shape index: {}]  }
   0x1   :  { %v612_v0 = vld [vmem:[%s814_s1 + $0x40] sm:$0xff]   ;;  %v616_v4 = vld [vmem:[%s814_s1 + $0x48] sm:$0xff]   ;;  %v620_v8 = vld [vmem:[%s814_s1 + $0x50] sm:$0xff]  }
   0x2   :  { %v613_v1 = vld [vmem:[%s814_s1] sm:$0xff]   ;;  %549 = vmatprep.subr.bf16.mxu0 %v612_v0  ;;  %v617_v5 = vld [vmem:[%s814_s1 + $0x8] sm:$0xff]   ;;  %v621_v9 = vld [vmem:[%s814_s1 + $0x10] sm:$0xff]  }
   0x3   :  { %v614_v2 = vld [vmem:[%s814_s1 + $0xc0] sm:$0xff]   ;;  %550 = vmatpush3.bf16.msra.mxu0 %v613_v1  ;;  %v618_v6 = vld [vmem:[%s814_s1 + $0xc8] sm:$0xff]   ;;  %v622_v10 = vld [vmem:[%s814_s1 + $0xd0] sm:$0xff]  }
   0x4   :  { %v615_v3 = vld [vmem:[%s814_s1 + $0x80] sm:$0xff]   ;;  %571 = vmatprep.subr.bf16.mxu1 %v614_v2  ;;  %551 = vmatprep.subr.bf16.mxu0 %v616_v4  ;;  %v619_v7 = vld [vmem:[%s814_s1 + $0x88] sm:$0xff]   ;;  %v623_v11 = vld [vmem:[%s814_s1 + $0x90] sm:$0xff]  }
   0x5   :  { %572 = vmatpush3.bf16.msra.mxu1 %v615_v3  ;;  %v624_v12 = vld [vmem:[%s814_s1 + $0x58] sm:$0xff]   ;;  %v628_v16 = vld [vmem:[%s814_s1 + $0x60] sm:$0xff]   ;;  %v632_v20 = vld [vmem:[%s814_s1 + $0x68] sm:$0xff]  }
   0x6   :  { %573 = vmatprep.subr.bf16.mxu1 %v618_v6  ;;  %v625_v13 = vld [vmem:[%s814_s1 + $0x18] sm:$0xff]   ;;  %v629_v17 = vld [vmem:[%s814_s1 + $0x20] sm:$0xff]   ;;  %v633_v21 = vld [vmem:[%s814_s1 + $0x28] sm:$0xff]  }
   0x7   :  { %552 = vmatpush3.bf16.msra.mxu0 %v617_v5  ;;  %v626_v14 = vld [vmem:[%s814_s1 + $0xd8] sm:$0xff]   ;;  %v630_v18 = vld [vmem:[%s814_s1 + $0xe0] sm:$0xff]   ;;  %v634_v22 = vld [vmem:[%s814_s1 + $0xe8] sm:$0xff]  }
   0x8   :  { %553 = vmatprep.subr.bf16.mxu0 %v620_v8  ;;  %v627_v15 = vld [vmem:[%s814_s1 + $0x98] sm:$0xff]   ;;  %v631_v19 = vld [vmem:[%s814_s1 + $0xa0] sm:$0xff]   ;;  %v635_v23 = vld [vmem:[%s814_s1 + $0xa8] sm:$0xff]  }
   0x9   :  { %574 = vmatpush3.bf16.msra.mxu1 %v619_v7  ;;  %v636_v24 = vld [vmem:[%s814_s1 + $0x70] sm:$0xff]   ;;  %v640_v28 = vld [vmem:[%s814_s1 + $0x78] sm:$0xff]   ;;  %v649_v36 = vld [vmem:[%s815_s0 + $0xc] ss:$20 sps:$4 sm:$0xff]  }
   0xa   :  { %575 = vmatprep.subr.bf16.mxu1 %v622_v10  ;;  %v637_v25 = vld [vmem:[%s814_s1 + $0x30] sm:$0xff]   ;;  %v641_v29 = vld [vmem:[%s814_s1 + $0x38] sm:$0xff]   ;;  %v650_v37 = vld [vmem:[%s814_s1 + $0x100] sm:$0xff]   ;;  %421 = vmatprep.mubr.bf16.mxu1 %v649_v36 }
   0xb   :  { %554 = vmatpush3.bf16.msra.mxu0 %v621_v9  ;;  %v638_v26 = vld [vmem:[%s814_s1 + $0xf0] sm:$0xff]   ;;  %v642_v30 = vld [vmem:[%s814_s1 + $0xf8] sm:$0xff]   ;;  %v651_v38 = vld [vmem:[%s814_s1 + $0x108] sm:$0xff]  }
   0xc   :  { %555 = vmatprep.subr.bf16.mxu0 %v624_v12  ;;  %v639_v27 = vld [vmem:[%s814_s1 + $0xb0] sm:$0xff]   ;;  %v645_v32 = vld [vmem:[%s815_s0 + $0x4] ss:$20 sps:$4 sm:$0xff]   ;;  %v647_v35 = vld [vmem:[%s815_s0 + $0x8] ss:$20 sps:$4 sm:$0xff]  }
   0xd   :  { %576 = vmatpush3.bf16.msra.mxu1 %v623_v11  ;;  %v643_v31 = vld [vmem:[%s815_s0] ss:$20 sps:$4 sm:$0xff]   ;;  %v646_v34 = vld [vmem:[%s814_s1 + $0xb8] sm:$0xff]   ;;  %380 = vmatprep.mubr.bf16.mxu0 %v645_v32  ;;  %v654_v41 = vld [vmem:[%s815_s0 + $0x10] ss:$20 sps:$4 sm:$0xff]  }
   0xe   :  { %577 = vmatprep.subr.bf16.mxu1 %v626_v14  ;;  %v652_v39 = vld [vmem:[%s814_s1 + $0x110] sm:$0xff]   ;;  %v653_v40 = vld [vmem:[%s814_s1 + $0x118] sm:$0xff]   ;;  %v493_v43 = vld [vmem:[%s816_s2] ss:$0 sm:$0xff] }
   0xf   :  { %556 = vmatpush3.bf16.msra.mxu0 %v625_v13  ;;  %v541_v59 = vld [vmem:[%s817_s3] sm:$0xff]  }
  0x10   :  { %557 = vmatprep.subr.bf16.mxu0 %v628_v16  ;;  %v542_v60 = vunpack.c.l.bf16 %v541_v59  ;;  %v543_v0 = vunpack.c.h.bf16 %v541_v59 }
  0x11   :  { %578 = vmatpush3.bf16.msra.mxu1 %v627_v15 }
  0x12   :  { %579 = vmatprep.subr.bf16.mxu1 %v630_v18 }
  0x13   :  { %558 = vmatpush3.bf16.msra.mxu0 %v629_v17 }
  0x14   :  { %559 = vmatprep.subr.bf16.mxu0 %v632_v20 }
  0x15   :  { %580 = vmatpush3.bf16.msra.mxu1 %v631_v19 }
  0x16   :  { %581 = vmatprep.subr.bf16.mxu1 %v634_v22 }
  0x17   :  { %560 = vmatpush3.bf16.msra.mxu0 %v633_v21 }
  0x18   :  { %561 = vmatprep.subr.bf16.mxu0 %v636_v24 }
  0x19   :  { %582 = vmatpush3.bf16.msra.mxu1 %v635_v23 }
  0x1a   :  { %583 = vmatprep.subr.bf16.mxu1 %v638_v26 }
  0x1b   :  { %562 = vmatpush3.bf16.msra.mxu0 %v637_v25 }
  0x1c   :  { %563 = vmatprep.subr.bf16.mxu0 %v640_v28 }
  0x1d   :  { %584 = vmatpush3.bf16.msra.mxu1 %v639_v27 }
  0x1e   :  { %585 = vmatprep.subr.bf16.mxu1 %v642_v30 }
  0x1f   :  { %564 = vmatpush3.bf16.msra.mxu0 %v641_v29 }
  0x20   :  { %598 = vmatprep.subr.bf16.mxu0 %v655_v33 }
  0x21   :  { %586 = vmatpush3.bf16.msra.mxu1 %v646_v34 }
  0x22   :  { %381 = vmatmul.mubr.bf16.vlgmr.msra.gmra.mrb[0].mxu0 %v643_v31 }
  0x23   :  { %606 = vmatprep.mubr.msk.bf16.mxu0 %vm656_vm0, %v655_v33  ;;  %599 = vmatpush3.bf16.msra.mxu0 %v650_v37 }
  0x24   :  { %422 = vmatmul.mubr.bf16.vlgmr.msra.gmra.mrb[0].mxu1 %v647_v35  ;;  %600 = vmatprep.subr.bf16.mxu0 %v655_v33 }
  0x27   :  { %601 = vmatpush3.bf16.msra.mxu0 %v651_v38 }
  0x28   :  { %602 = vmatprep.subr.bf16.mxu0 %v655_v33 }
  0x2b   :  { %603 = vmatpush3.bf16.msra.mxu0 %v652_v39 }
  0x2c   :  { %604 = vmatprep.subr.bf16.mxu0 %v655_v33 }
  0x2f   :  { %605 = vmatpush3.bf16.msra.mxu0 %v653_v40 }
  0x32   :  { %607 = vmatmul.mubr.msk.bf16.vlgmr.msra.gmra.mrb[4].mxu0 %vm344_vm1, %v654_v41 }
  0xf5   :  { %v565_v42 = vpop.f32.mrb[0].mxu0 }
  0xf6   :  { %v566_v44 = vpop.f32.mrb[1].mxu0 }
  0xf7   :  { %v567_v45 = vadd.f32 %v566_v44, %v565_v42  ;;  %v568_v46 = vpop.f32.mrb[2].mxu0  ;;  %v587_v47 = vpop.f32.mrb[0].mxu1 }
  0xf8   :  { %v569_v48 = vpop.f32.mrb[3].mxu0  ;;  %v588_v51 = vpop.f32.mrb[1].mxu1 }
  0xf9   :  { %v383_v49 = vadd.f32 %v567_v45, %v493_v43  ;;  %v570_v50 = vadd.f32 %v569_v48, %v568_v46  ;;  %v589_v52 = vadd.f32 %v588_v51, %v587_v47  ;;  %v590_v53 = vpop.f32.mrb[2].mxu1 }
  0xfa   :  { %v591_v55 = vpop.f32.mrb[3].mxu1 }
  0xfb   :  { %v386_v54 = vadd.f32 %v570_v50, %v493_v43  ;;  %v592_v56 = vadd.f32 %v591_v55, %v590_v53  ;;  %v424_v57 = vadd.f32 %v589_v52, %v383_v49 }
  0xfd   :  { %v427_v58 = vadd.f32 %v592_v56, %v386_v54 }
 0x105   :  { %v464_v61 = vpop.f32.mrb[4].mxu0 }
 0x106   :  { %v465_v62 = vadd.f32 %v464_v61, %v424_v57  ;;  %v608_v63 = vpop.f32.mrb[5].mxu0 }
 0x107   :  { %v467_v1 = vpop.f32.mrb[6].mxu0 }
 0x108   :  { %v475_v2 = vadd.f32 %v542_v60, %v465_v62  ;;  %v468_v3 = vadd.f32 %v467_v1, %v427_v58  ;;  %v609_v4 = vpop.f32.mrb[7].mxu0 }
 0x10a   :  { %v476_v5 = vadd.f32 %v543_v0, %v468_v3  ;;  %v477_v6 = vmax.f32 %v475_v2, 0.0 }
 0x10c   :  { %v478_v7 = vmax.f32 %v476_v5, 0.0 }
 0x10e   :  { %v547_v8 = vpack.c.bf16 %v478_v7, %v477_v6 }
 0x110   :  { %548 = vst [vmem:[%s818_s4] sm:$0xff] %v547_v8  }

// kernel: _lambda_.45
= control target key start
LH: loop header
LB: loop body
LE: loop exit
PB: predicated region body
PF: predicated region fallthrough
CT: control target
= control target key end

     0   :  { %v642_v33 = vmov 0.0   ;;  %vm643_vm0 = vmmov 0   ;;  %vm341_vm1 = vcmask 523264   ;;  %s793_s1 = inlined_call_operand.vmem [shape: bf16[576,128], index: 1, kind: input, shape index: {}]   ;;  %s794_s0 = inlined_call_operand.vmem [shape: bf16[16,576], index: 0, kind: input, shape index: {}]   ;;  %s795_s2 = inlined_call_operand.vmem [shape: f32[1,128], index: 2, kind: input, shape index: {}]   ;;  %s796_s3 = inlined_call_operand.vmem [shape: bf16[16,128], index: 3, kind: output, shape index: {}]  }
   0x1   :  { %v599_v0 = vld [vmem:[%s793_s1 + $0x40] sm:$0xff]   ;;  %v603_v4 = vld [vmem:[%s793_s1 + $0x48] sm:$0xff]   ;;  %v607_v8 = vld [vmem:[%s793_s1 + $0x50] sm:$0xff]  }
   0x2   :  { %v600_v1 = vld [vmem:[%s793_s1] sm:$0xff]   ;;  %536 = vmatprep.subr.bf16.mxu0 %v599_v0  ;;  %v604_v5 = vld [vmem:[%s793_s1 + $0x8] sm:$0xff]   ;;  %v608_v9 = vld [vmem:[%s793_s1 + $0x10] sm:$0xff]  }
   0x3   :  { %v601_v2 = vld [vmem:[%s793_s1 + $0xc0] sm:$0xff]   ;;  %537 = vmatpush3.bf16.msra.mxu0 %v600_v1  ;;  %v605_v6 = vld [vmem:[%s793_s1 + $0xc8] sm:$0xff]   ;;  %v609_v10 = vld [vmem:[%s793_s1 + $0xd0] sm:$0xff]  }
   0x4   :  { %v602_v3 = vld [vmem:[%s793_s1 + $0x80] sm:$0xff]   ;;  %558 = vmatprep.subr.bf16.mxu1 %v601_v2  ;;  %538 = vmatprep.subr.bf16.mxu0 %v603_v4  ;;  %v606_v7 = vld [vmem:[%s793_s1 + $0x88] sm:$0xff]   ;;  %v610_v11 = vld [vmem:[%s793_s1 + $0x90] sm:$0xff]  }
   0x5   :  { %559 = vmatpush3.bf16.msra.mxu1 %v602_v3  ;;  %v611_v12 = vld [vmem:[%s793_s1 + $0x58] sm:$0xff]   ;;  %v615_v16 = vld [vmem:[%s793_s1 + $0x60] sm:$0xff]   ;;  %v619_v20 = vld [vmem:[%s793_s1 + $0x68] sm:$0xff]  }
   0x6   :  { %560 = vmatprep.subr.bf16.mxu1 %v605_v6  ;;  %v612_v13 = vld [vmem:[%s793_s1 + $0x18] sm:$0xff]   ;;  %v616_v17 = vld [vmem:[%s793_s1 + $0x20] sm:$0xff]   ;;  %v620_v21 = vld [vmem:[%s793_s1 + $0x28] sm:$0xff]  }
   0x7   :  { %539 = vmatpush3.bf16.msra.mxu0 %v604_v5  ;;  %v613_v14 = vld [vmem:[%s793_s1 + $0xd8] sm:$0xff]   ;;  %v617_v18 = vld [vmem:[%s793_s1 + $0xe0] sm:$0xff]   ;;  %v621_v22 = vld [vmem:[%s793_s1 + $0xe8] sm:$0xff]  }
   0x8   :  { %540 = vmatprep.subr.bf16.mxu0 %v607_v8  ;;  %v614_v15 = vld [vmem:[%s793_s1 + $0x98] sm:$0xff]   ;;  %v618_v19 = vld [vmem:[%s793_s1 + $0xa0] sm:$0xff]   ;;  %v622_v23 = vld [vmem:[%s793_s1 + $0xa8] sm:$0xff]  }
   0x9   :  { %561 = vmatpush3.bf16.msra.mxu1 %v606_v7  ;;  %v623_v24 = vld [vmem:[%s793_s1 + $0x70] sm:$0xff]   ;;  %v627_v28 = vld [vmem:[%s793_s1 + $0x78] sm:$0xff]   ;;  %v636_v36 = vld [vmem:[%s794_s0 + $0xc] ss:$20 sps:$4 sm:$0xff]  }
   0xa   :  { %562 = vmatprep.subr.bf16.mxu1 %v609_v10  ;;  %v624_v25 = vld [vmem:[%s793_s1 + $0x30] sm:$0xff]   ;;  %v628_v29 = vld [vmem:[%s793_s1 + $0x38] sm:$0xff]   ;;  %v637_v37 = vld [vmem:[%s793_s1 + $0x100] sm:$0xff]   ;;  %418 = vmatprep.mubr.bf16.mxu1 %v636_v36 }
   0xb   :  { %541 = vmatpush3.bf16.msra.mxu0 %v608_v9  ;;  %v625_v26 = vld [vmem:[%s793_s1 + $0xf0] sm:$0xff]   ;;  %v629_v30 = vld [vmem:[%s793_s1 + $0xf8] sm:$0xff]   ;;  %v638_v38 = vld [vmem:[%s793_s1 + $0x108] sm:$0xff]  }
   0xc   :  { %542 = vmatprep.subr.bf16.mxu0 %v611_v12  ;;  %v626_v27 = vld [vmem:[%s793_s1 + $0xb0] sm:$0xff]   ;;  %v632_v32 = vld [vmem:[%s794_s0 + $0x4] ss:$20 sps:$4 sm:$0xff]   ;;  %v634_v35 = vld [vmem:[%s794_s0 + $0x8] ss:$20 sps:$4 sm:$0xff]  }
   0xd   :  { %563 = vmatpush3.bf16.msra.mxu1 %v610_v11  ;;  %v630_v31 = vld [vmem:[%s794_s0] ss:$20 sps:$4 sm:$0xff]   ;;  %v633_v34 = vld [vmem:[%s793_s1 + $0xb8] sm:$0xff]   ;;  %377 = vmatprep.mubr.bf16.mxu0 %v632_v32  ;;  %v641_v41 = vld [vmem:[%s794_s0 + $0x10] ss:$20 sps:$4 sm:$0xff]  }
   0xe   :  { %564 = vmatprep.subr.bf16.mxu1 %v613_v14  ;;  %v639_v39 = vld [vmem:[%s793_s1 + $0x110] sm:$0xff]   ;;  %v640_v40 = vld [vmem:[%s793_s1 + $0x118] sm:$0xff]   ;;  %v484_v43 = vld [vmem:[%s795_s2] ss:$0 sm:$0xff] }
   0xf   :  { %543 = vmatpush3.bf16.msra.mxu0 %v612_v13 }
  0x10   :  { %544 = vmatprep.subr.bf16.mxu0 %v615_v16 }
  0x11   :  { %565 = vmatpush3.bf16.msra.mxu1 %v614_v15 }
  0x12   :  { %566 = vmatprep.subr.bf16.mxu1 %v617_v18 }
  0x13   :  { %545 = vmatpush3.bf16.msra.mxu0 %v616_v17 }
  0x14   :  { %546 = vmatprep.subr.bf16.mxu0 %v619_v20 }
  0x15   :  { %567 = vmatpush3.bf16.msra.mxu1 %v618_v19 }
  0x16   :  { %568 = vmatprep.subr.bf16.mxu1 %v621_v22 }
  0x17   :  { %547 = vmatpush3.bf16.msra.mxu0 %v620_v21 }
  0x18   :  { %548 = vmatprep.subr.bf16.mxu0 %v623_v24 }
  0x19   :  { %569 = vmatpush3.bf16.msra.mxu1 %v622_v23 }
  0x1a   :  { %570 = vmatprep.subr.bf16.mxu1 %v625_v26 }
  0x1b   :  { %549 = vmatpush3.bf16.msra.mxu0 %v624_v25 }
  0x1c   :  { %550 = vmatprep.subr.bf16.mxu0 %v627_v28 }
  0x1d   :  { %571 = vmatpush3.bf16.msra.mxu1 %v626_v27 }
  0x1e   :  { %572 = vmatprep.subr.bf16.mxu1 %v629_v30 }
  0x1f   :  { %551 = vmatpush3.bf16.msra.mxu0 %v628_v29 }
  0x20   :  { %585 = vmatprep.subr.bf16.mxu0 %v642_v33 }
  0x21   :  { %573 = vmatpush3.bf16.msra.mxu1 %v633_v34 }
  0x22   :  { %378 = vmatmul.mubr.bf16.vlgmr.msra.gmra.mrb[0].mxu0 %v630_v31 }
  0x23   :  { %593 = vmatprep.mubr.msk.bf16.mxu0 %vm643_vm0, %v642_v33  ;;  %586 = vmatpush3.bf16.msra.mxu0 %v637_v37 }
  0x24   :  { %419 = vmatmul.mubr.bf16.vlgmr.msra.gmra.mrb[0].mxu1 %v634_v35  ;;  %587 = vmatprep.subr.bf16.mxu0 %v642_v33 }
  0x27   :  { %588 = vmatpush3.bf16.msra.mxu0 %v638_v38 }
  0x28   :  { %589 = vmatprep.subr.bf16.mxu0 %v642_v33 }
  0x2b   :  { %590 = vmatpush3.bf16.msra.mxu0 %v639_v39 }
  0x2c   :  { %591 = vmatprep.subr.bf16.mxu0 %v642_v33 }
  0x2f   :  { %592 = vmatpush3.bf16.msra.mxu0 %v640_v40 }
  0x32   :  { %594 = vmatmul.mubr.msk.bf16.vlgmr.msra.gmra.mrb[4].mxu0 %vm341_vm1, %v641_v41 }
  0xf5   :  { %v552_v42 = vpop.f32.mrb[0].mxu0 }
  0xf6   :  { %v553_v44 = vpop.f32.mrb[1].mxu0 }
  0xf7   :  { %v554_v45 = vadd.f32 %v553_v44, %v552_v42  ;;  %v555_v46 = vpop.f32.mrb[2].mxu0  ;;  %v574_v47 = vpop.f32.mrb[0].mxu1 }
  0xf8   :  { %v556_v48 = vpop.f32.mrb[3].mxu0  ;;  %v575_v51 = vpop.f32.mrb[1].mxu1 }
  0xf9   :  { %v380_v49 = vadd.f32 %v554_v45, %v484_v43  ;;  %v557_v50 = vadd.f32 %v556_v48, %v555_v46  ;;  %v576_v52 = vadd.f32 %v575_v51, %v574_v47  ;;  %v577_v53 = vpop.f32.mrb[2].mxu1 }
  0xfa   :  { %v578_v55 = vpop.f32.mrb[3].mxu1 }
  0xfb   :  { %v383_v54 = vadd.f32 %v557_v50, %v484_v43  ;;  %v579_v56 = vadd.f32 %v578_v55, %v577_v53  ;;  %v421_v57 = vadd.f32 %v576_v52, %v380_v49 }
  0xfd   :  { %v424_v58 = vadd.f32 %v579_v56, %v383_v54 }
 0x105   :  { %v461_v59 = vpop.f32.mrb[4].mxu0 }
 0x106   :  { %v462_v60 = vadd.f32 %v461_v59, %v421_v57  ;;  %v595_v61 = vpop.f32.mrb[5].mxu0 }
 0x107   :  { %v464_v62 = vpop.f32.mrb[6].mxu0 }
 0x108   :  { %v465_v63 = vadd.f32 %v464_v62, %v424_v58  ;;  %v596_v0 = vpop.f32.mrb[7].mxu0  ;;  %v468_v1 = vmax.f32 %v462_v60, 0.0 }
 0x10a   :  { %v469_v2 = vmax.f32 %v465_v63, 0.0 }
 0x10c   :  { %v534_v3 = vpack.c.bf16 %v469_v2, %v468_v1 }
 0x10e   :  { %535 = vst [vmem:[%s796_s3] sm:$0xff] %v534_v3  }

// kernel: _lambda_.47
= control target key start
LH: loop header
LB: loop body
LE: loop exit
PB: predicated region body
PF: predicated region fallthrough
CT: control target
= control target key end

     0   :  { %v179_v1 = vmov 0   ;;  %vm82_vm0 = vcmask 523264   ;;  %v27_v10 = vlaneseq  ;;  %s236_s1 = inlined_call_operand.vmem [shape: bf16[64,256], index: 1, kind: input, shape index: {}]   ;;  %s237_s0 = inlined_call_operand.vmem [shape: bf16[16,64], index: 0, kind: input, shape index: {}]   ;;  %s238_s2 = inlined_call_operand.vmem [shape: f32[1,256], index: 2, kind: input, shape index: {}]   ;;  %s239_s3 = inlined_call_operand.vmem [shape: bf16[16,256], index: 3, kind: output, shape index: {}]  }
   0x1   :  { %v166_v0 = vld [vmem:[%s236_s1 + $0x4] ss:$8 sps:$4 sm:$0xff]   ;;  %118 = vmatprep.mubr.bf16.mxu0 %v179_v1  ;;  %v168_v2 = vld [vmem:[%s236_s1] ss:$8 sps:$4 sm:$0xff]   ;;  %v169_v3 = vld [vmem:[%s236_s1 + $0x14] ss:$8 sps:$4 sm:$0xff]  }
   0x2   :  { %86 = vmatprep.subr.bf16.mxu0 %v166_v0  ;;  %v171_v4 = vld [vmem:[%s236_s1 + $0x10] ss:$8 sps:$4 sm:$0xff]   ;;  %v172_v5 = vld [vmem:[%s236_s1 + $0x24] ss:$8 sps:$4 sm:$0xff]   ;;  %v174_v6 = vld [vmem:[%s236_s1 + $0x20] ss:$8 sps:$4 sm:$0xff]  }
   0x3   :  { %87 = vmatpush1.bf16.msra.mxu0 %v168_v2  ;;  %v175_v7 = vld [vmem:[%s236_s1 + $0x34] ss:$8 sps:$4 sm:$0xff]   ;;  %v177_v8 = vld [vmem:[%s236_s1 + $0x30] ss:$8 sps:$4 sm:$0xff]   ;;  %v178_v9 = vld [vmem:[%s237_s0] sm:$0xff]   ;;  %v28_v11 = vshrl.u32 %v27_v10, 7 }
   0x4   :  { %88 = vmatprep.subr.bf16.mxu0 %v169_v3  ;;  %v25_v13 = vld [vmem:[%s238_s2] sm:$0x3] }
   0x5   :  { %v29_v12 = vsub.s32 0, %v28_v11  ;;  %v33_v14 = vsub.s32 1, %v28_v11 }
   0x7   :  { %89 = vmatpush1.bf16.msra.mxu0 %v171_v4  ;;  %v30_v15 = vrot.slane %v25_v13, %v29_v12  ;;  %v34_v16 = vrot.slane %v25_v13, %v33_v14 }
   0x8   :  { %90 = vmatprep.subr.bf16.mxu0 %v172_v5 }
   0xb   :  { %91 = vmatpush1.bf16.msra.mxu0 %v174_v6 }
   0xc   :  { %92 = vmatprep.subr.bf16.mxu0 %v175_v7 }
   0xf   :  { %93 = vmatpush1.bf16.msra.mxu0 %v177_v8 }
  0x12   :  { %160 = vmatmul.mubr.msk.bf16.vlgmr.msra.gmra.mrb[0].mxu0 %vm82_vm0, %v178_v9 }
  0xe5   :  { %v120_v17 = vpop.f32.mrb[0].mxu0 }
  0xe6   :  { %v121_v18 = vadd.f32 %v120_v17, %v30_v15  ;;  %v122_v19 = vpop.f32.mrb[1].mxu0 }
  0xe7   :  { %v123_v20 = vadd.f32 %v122_v19, %v34_v16  ;;  %v124_v21 = vpop.f32.mrb[2].mxu0 }
  0xe8   :  { %v129_v22 = vmax.f32 %v121_v18, 0.0  ;;  %v125_v23 = vadd.f32 %v124_v21, %v30_v15  ;;  %v126_v24 = vpop.f32.mrb[3].mxu0 }
  0xe9   :  { %v130_v25 = vmax.f32 %v123_v20, 0.0  ;;  %v127_v26 = vadd.f32 %v126_v24, %v34_v16 }
  0xea   :  { %v131_v27 = vmax.f32 %v125_v23, 0.0 }
  0xeb   :  { %v163_v28 = vpack.c.bf16 %v130_v25, %v129_v22  ;;  %v132_v29 = vmax.f32 %v127_v26, 0.0 }
  0xed   :  { %145 = vst [vmem:[%s239_s3] sm:$0xff] %v163_v28  ;;  %v164_v30 = vpack.c.bf16 %v132_v29, %v131_v27 }
  0xef   :  { %146 = vst [vmem:[%s239_s3 + $0x8] sm:$0xff] %v164_v30 }

// kernel: _lambda_.48
= control target key start
LH: loop header
LB: loop body
LE: loop exit
PB: predicated region body
PF: predicated region fallthrough
CT: control target
= control target key end

     0   :  { %v162_v0 = vmov 0.0   ;;  %vm163_vm0 = vmmov 0   ;;  %vm61_vm1 = vcmask 523264   ;;  %s205_s1 = inlined_call_operand.vmem [shape: bf16[64,128], index: 1, kind: input, shape index: {}]   ;;  %s206_s0 = inlined_call_operand.vmem [shape: bf16[16,64], index: 0, kind: input, shape index: {}]   ;;  %s207_s2 = inlined_call_operand.vmem [shape: f32[1,128], index: 2, kind: input, shape index: {}]   ;;  %s208_s3 = inlined_call_operand.vmem [shape: bf16[16,128], index: 3, kind: output, shape index: {}]  }
   0x1   :  { %143 = vmatprep.subr.bf16.mxu0 %v162_v0  ;;  %v157_v1 = vld [vmem:[%s205_s1] sm:$0xff]   ;;  %151 = vmatprep.mubr.msk.bf16.mxu0 %vm163_vm0, %v162_v0  ;;  %v158_v2 = vld [vmem:[%s205_s1 + $0x8] sm:$0xff]   ;;  %v159_v3 = vld [vmem:[%s205_s1 + $0x10] sm:$0xff]  }
   0x2   :  { %144 = vmatpush3.bf16.msra.mxu0 %v157_v1  ;;  %v160_v4 = vld [vmem:[%s205_s1 + $0x18] sm:$0xff]   ;;  %v161_v5 = vld [vmem:[%s206_s0] sm:$0xff]  }
   0x3   :  { %145 = vmatprep.subr.bf16.mxu0 %v162_v0  ;;  %v122_v6 = vld [vmem:[%s207_s2] ss:$0 sm:$0xff] }
   0x6   :  { %146 = vmatpush3.bf16.msra.mxu0 %v158_v2 }
   0x7   :  { %147 = vmatprep.subr.bf16.mxu0 %v162_v0 }
   0xa   :  { %148 = vmatpush3.bf16.msra.mxu0 %v159_v3 }
   0xb   :  { %149 = vmatprep.subr.bf16.mxu0 %v162_v0 }
   0xe   :  { %150 = vmatpush3.bf16.msra.mxu0 %v160_v4 }
  0x11   :  { %152 = vmatmul.mubr.msk.bf16.vlgmr.msra.gmra.mrb[0].mxu0 %vm61_vm1, %v161_v5 }
  0xe4   :  { %v99_v7 = vpop.f32.mrb[0].mxu0 }
  0xe5   :  { %v100_v8 = vadd.f32 %v122_v6, %v99_v7  ;;  %v153_v9 = vpop.f32.mrb[1].mxu0 }
  0xe6   :  { %v102_v10 = vpop.f32.mrb[2].mxu0 }
  0xe7   :  { %v103_v11 = vadd.f32 %v122_v6, %v102_v10  ;;  %v154_v12 = vpop.f32.mrb[3].mxu0  ;;  %v106_v13 = vmax.f32 %v100_v8, 0.0 }
  0xe9   :  { %v107_v14 = vmax.f32 %v103_v11, 0.0 }
  0xeb   :  { %v136_v15 = vpack.c.bf16 %v107_v14, %v106_v13 }
  0xed   :  { %137 = vst [vmem:[%s208_s3] sm:$0xff] %v136_v15  }

// kernel: _lambda_.49
= control target key start
LH: loop header
LB: loop body
LE: loop exit
PB: predicated region body
PF: predicated region fallthrough
CT: control target
= control target key end

     0   :  { %v402_v1 = vmov 0.0   ;;  %vm403_vm0 = vmmov 0   ;;  %vm201_vm1 = vcmask 523264   ;;  %s499_s1 = inlined_call_operand.vmem [shape: bf16[320,128], index: 1, kind: input, shape index: {}]   ;;  %s500_s0 = inlined_call_operand.vmem [shape: bf16[16,320], index: 0, kind: input, shape index: {}]   ;;  %s501_s2 = inlined_call_operand.vmem [shape: f32[1,128], index: 2, kind: input, shape index: {}]   ;;  %s502_s3 = inlined_call_operand.vmem [shape: bf16[16,128], index: 3, kind: output, shape index: {}]  }
   0x1   :  { %v378_v0 = vld [vmem:[%s499_s1 + $0x40] sm:$0xff]   ;;  %364 = vmatprep.subr.bf16.mxu1 %v402_v1  ;;  %372 = vmatprep.mubr.msk.bf16.mxu1 %vm403_vm0, %v402_v1  ;;  %v380_v3 = vld [vmem:[%s499_s1 + $0x48] sm:$0xff]   ;;  %v382_v5 = vld [vmem:[%s499_s1 + $0x50] sm:$0xff]  }
   0x2   :  { %v379_v2 = vld [vmem:[%s499_s1] sm:$0xff]   ;;  %337 = vmatprep.subr.bf16.mxu0 %v378_v0  ;;  %v381_v4 = vld [vmem:[%s499_s1 + $0x8] sm:$0xff]   ;;  %v383_v6 = vld [vmem:[%s499_s1 + $0x10] sm:$0xff]  }
   0x3   :  { %338 = vmatpush3.bf16.msra.mxu0 %v379_v2  ;;  %v384_v7 = vld [vmem:[%s499_s1 + $0x58] sm:$0xff]   ;;  %v388_v8 = vld [vmem:[%s499_s1 + $0x80] sm:$0xff]   ;;  %v391_v11 = vld [vmem:[%s499_s1 + $0x88] sm:$0xff]  }
   0x4   :  { %339 = vmatprep.subr.bf16.mxu0 %v380_v3  ;;  %v385_v9 = vld [vmem:[%s499_s1 + $0x18] sm:$0xff]   ;;  %v386_v10 = vld [vmem:[%s499_s1 + $0x60] sm:$0xff]   ;;  %365 = vmatpush3.bf16.msra.mxu1 %v388_v8  ;;  %v389_v13 = vld [vmem:[%s499_s1 + $0x68] sm:$0xff]  }
   0x5   :  { %366 = vmatprep.subr.bf16.mxu1 %v402_v1  ;;  %v387_v12 = vld [vmem:[%s499_s1 + $0x20] sm:$0xff]   ;;  %v394_v14 = vld [vmem:[%s499_s1 + $0x90] sm:$0xff]   ;;  %v390_v15 = vld [vmem:[%s499_s1 + $0x28] sm:$0xff]  }
   0x6   :  { %v392_v16 = vld [vmem:[%s499_s1 + $0x70] sm:$0xff]   ;;  %v400_v18 = vld [vmem:[%s499_s1 + $0x98] sm:$0xff]   ;;  %v397_v23 = vld [vmem:[%s500_s0] ss:$12 sps:$4 sm:$0xff]  }
   0x7   :  { %340 = vmatpush3.bf16.msra.mxu0 %v381_v4  ;;  %v399_v17 = vld [vmem:[%s500_s0 + $0x4] ss:$12 sps:$4 sm:$0xff]   ;;  %v401_v20 = vld [vmem:[%s500_s0 + $0x8] ss:$12 sps:$4 sm:$0xff]   ;;  %v395_v21 = vld [vmem:[%s499_s1 + $0x78] sm:$0xff]  }
   0x8   :  { %341 = vmatprep.subr.bf16.mxu0 %v382_v5  ;;  %367 = vmatpush3.bf16.msra.mxu1 %v391_v11  ;;  %v393_v19 = vld [vmem:[%s499_s1 + $0x30] sm:$0xff]   ;;  %v396_v22 = vld [vmem:[%s499_s1 + $0x38] sm:$0xff]   ;;  %v303_v30 = vld [vmem:[%s501_s2] ss:$0 sm:$0xff] }
   0x9   :  { %368 = vmatprep.subr.bf16.mxu1 %v402_v1  ;;  %237 = vmatprep.mubr.bf16.mxu0 %v399_v17 }
   0xb   :  { %342 = vmatpush3.bf16.msra.mxu0 %v383_v6 }
   0xc   :  { %343 = vmatprep.subr.bf16.mxu0 %v384_v7  ;;  %369 = vmatpush3.bf16.msra.mxu1 %v394_v14 }
   0xd   :  { %370 = vmatprep.subr.bf16.mxu1 %v402_v1 }
   0xf   :  { %344 = vmatpush3.bf16.msra.mxu0 %v385_v9 }
  0x10   :  { %345 = vmatprep.subr.bf16.mxu0 %v386_v10  ;;  %371 = vmatpush3.bf16.msra.mxu1 %v400_v18 }
  0x13   :  { %346 = vmatpush3.bf16.msra.mxu0 %v387_v12  ;;  %373 = vmatmul.mubr.msk.bf16.vlgmr.msra.gmra.mrb[0].mxu1 %vm201_vm1, %v401_v20 }
  0x14   :  { %347 = vmatprep.subr.bf16.mxu0 %v389_v13 }
  0x17   :  { %348 = vmatpush3.bf16.msra.mxu0 %v390_v15 }
  0x18   :  { %349 = vmatprep.subr.bf16.mxu0 %v392_v16 }
  0x1b   :  { %350 = vmatpush3.bf16.msra.mxu0 %v393_v19 }
  0x1c   :  { %351 = vmatprep.subr.bf16.mxu0 %v395_v21 }
  0x1f   :  { %352 = vmatpush3.bf16.msra.mxu0 %v396_v22 }
  0x22   :  { %238 = vmatmul.mubr.bf16.vlgmr.msra.gmra.mrb[0].mxu0 %v397_v23 }
  0xe6   :  { %v280_v24 = vpop.f32.mrb[0].mxu1 }
  0xe7   :  { %v374_v25 = vpop.f32.mrb[1].mxu1 }
  0xe8   :  { %v283_v26 = vpop.f32.mrb[2].mxu1 }
  0xe9   :  { %v375_v27 = vpop.f32.mrb[3].mxu1 }
  0xf5   :  { %v353_v28 = vpop.f32.mrb[0].mxu0 }
  0xf6   :  { %v354_v29 = vpop.f32.mrb[1].mxu0 }
  0xf7   :  { %v355_v31 = vadd.f32 %v354_v29, %v353_v28  ;;  %v356_v32 = vpop.f32.mrb[2].mxu0 }
  0xf8   :  { %v357_v33 = vpop.f32.mrb[3].mxu0 }
  0xf9   :  { %v240_v34 = vadd.f32 %v355_v31, %v303_v30  ;;  %v358_v35 = vadd.f32 %v357_v33, %v356_v32 }
  0xfb   :  { %v281_v36 = vadd.f32 %v280_v24, %v240_v34  ;;  %v243_v37 = vadd.f32 %v358_v35, %v303_v30 }
  0xfd   :  { %v284_v38 = vadd.f32 %v283_v26, %v243_v37  ;;  %v287_v39 = vmax.f32 %v281_v36, 0.0 }
  0xff   :  { %v288_v40 = vmax.f32 %v284_v38, 0.0 }
 0x101   :  { %v335_v41 = vpack.c.bf16 %v288_v40, %v287_v39 }
 0x103   :  { %336 = vst [vmem:[%s502_s3] sm:$0xff] %v335_v41  }

// kernel: _lambda_.50
= control target key start
LH: loop header
LB: loop body
LE: loop exit
PB: predicated region body
PF: predicated region fallthrough
CT: control target
= control target key end

     0   :  { %vm254_vm0 = vcmask 130048   ;;  %s1863_s1 = inlined_call_operand.vmem [shape: bf16[16,128], index: 1, kind: input, shape index: {}]   ;;  %s1864_s0 = inlined_call_operand.vmem [shape: bf16[512,16], index: 0, kind: input, shape index: {}]   ;;  %s1865_s2 = inlined_call_operand.vmem [shape: f32[1,128], index: 2, kind: input, shape index: {}]   ;;  %s1866_s3 = inlined_call_operand.vmem [shape: bf16[512,128], index: 3, kind: output, shape index: {}]  }
   0x1   :  { %v1514_v0 = vld [vmem:[%s1863_s1] sm:$0xff]   ;;  %v1517_v3 = vld [vmem:[%s1864_s0 + $0x8] sm:$0xff]   ;;  %v1519_v5 = vld [vmem:[%s1864_s0 + $0x10] sm:$0xff]  }
   0x2   :  { %v1515_v1 = vld [vmem:[%s1864_s0] sm:$0xff]   ;;  %1446 = vmatprep.subr.bf16.mxu0 %v1514_v0  ;;  %1512 = vmatprep.subr.bf16.mxu1 %v1514_v0  ;;  %v1518_v4 = vld [vmem:[%s1864_s0 + $0x88] sm:$0xff]   ;;  %v1520_v6 = vld [vmem:[%s1864_s0 + $0x90] sm:$0xff]  }
   0x3   :  { %v1516_v2 = vld [vmem:[%s1864_s0 + $0x80] sm:$0xff]   ;;  %1447 = vmatpush3.bf16.msra.mxu0 %v1514_v0  ;;  %1513 = vmatpush3.bf16.msra.mxu1 %v1514_v0  ;;  %v1521_v7 = vld [vmem:[%s1864_s0 + $0x18] sm:$0xff]   ;;  %v1525_v11 = vld [vmem:[%s1864_s0 + $0x28] sm:$0xff]  }
   0x4   :  { %1448 = vmatprep.mubr.msk.bf16.mxu0 %vm254_vm0, %v1515_v1  ;;  %1480 = vmatprep.mubr.msk.bf16.mxu1 %vm254_vm0, %v1516_v2  ;;  %v1522_v8 = vld [vmem:[%s1864_s0 + $0x98] sm:$0xff]   ;;  %v1523_v9 = vld [vmem:[%s1864_s0 + $0x20] sm:$0xff]   ;;  %v1526_v12 = vld [vmem:[%s1864_s0 + $0xa8] sm:$0xff]  }
   0x5   :  { %v1524_v10 = vld [vmem:[%s1864_s0 + $0xa0] sm:$0xff]   ;;  %v1527_v13 = vld [vmem:[%s1864_s0 + $0x30] sm:$0xff]   ;;  %v1529_v15 = vld [vmem:[%s1864_s0 + $0x38] sm:$0xff]  }
   0x6   :  { %1449 = vmatmul.mubr.msk.bf16.vlgmr.msra.gmra.mrb[0].mxu0 %vm254_vm0, %v1517_v3  ;;  %1481 = vmatmul.mubr.msk.bf16.vlgmr.msra.gmra.mrb[0].mxu1 %vm254_vm0, %v1518_v4  ;;  %v1528_v14 = vld [vmem:[%s1864_s0 + $0xb0] sm:$0xff]   ;;  %v1530_v16 = vld [vmem:[%s1864_s0 + $0xb8] sm:$0xff]   ;;  %v1531_v17 = vld [vmem:[%s1864_s0 + $0x40] sm:$0xff]  }
   0x7   :  { %1452 = vmatprep.mubr.msk.bf16.mxu0 %vm254_vm0, %v1519_v5  ;;  %1484 = vmatprep.mubr.msk.bf16.mxu1 %vm254_vm0, %v1520_v6  ;;  %v1532_v18 = vld [vmem:[%s1864_s0 + $0xc0] sm:$0xff]   ;;  %v1533_v19 = vld [vmem:[%s1864_s0 + $0x48] sm:$0xff]   ;;  %v1535_v21 = vld [vmem:[%s1864_s0 + $0x50] sm:$0xff]  }
   0x8   :  { %v1534_v20 = vld [vmem:[%s1864_s0 + $0xc8] sm:$0xff]   ;;  %v1536_v22 = vld [vmem:[%s1864_s0 + $0xd0] sm:$0xff]   ;;  %v1537_v23 = vld [vmem:[%s1864_s0 + $0x58] sm:$0xff]  }
   0x9   :  { %v1538_v24 = vld [vmem:[%s1864_s0 + $0xd8] sm:$0xff]   ;;  %v1539_v25 = vld [vmem:[%s1864_s0 + $0x60] sm:$0xff]   ;;  %v1541_v27 = vld [vmem:[%s1864_s0 + $0x68] sm:$0xff]  }
   0xa   :  { %v1540_v26 = vld [vmem:[%s1864_s0 + $0xe0] sm:$0xff]   ;;  %v1542_v28 = vld [vmem:[%s1864_s0 + $0xe8] sm:$0xff]   ;;  %v1543_v29 = vld [vmem:[%s1864_s0 + $0x70] sm:$0xff]  }
   0xb   :  { %v1544_v30 = vld [vmem:[%s1864_s0 + $0xf0] sm:$0xff]   ;;  %v1545_v31 = vld [vmem:[%s1864_s0 + $0x78] sm:$0xff]   ;;  %v1701_v33 = vld [vmem:[%s1865_s2] ss:$0 sm:$0xff] }
   0xc   :  { %v1546_v32 = vld [vmem:[%s1864_s0 + $0xf8] sm:$0xff]  }
   0xe   :  { %1453 = vmatmul.mubr.msk.bf16.gmra.mrb[4].mxu0 %vm254_vm0, %v1521_v7  ;;  %1485 = vmatmul.mubr.msk.bf16.gmra.mrb[4].mxu1 %vm254_vm0, %v1522_v8 }
   0xf   :  { %1456 = vmatprep.mubr.msk.bf16.mxu0 %vm254_vm0, %v1523_v9  ;;  %1488 = vmatprep.mubr.msk.bf16.mxu1 %vm254_vm0, %v1524_v10 }
  0x16   :  { %1457 = vmatmul.mubr.msk.bf16.gmra.mrb[8].mxu0 %vm254_vm0, %v1525_v11  ;;  %1489 = vmatmul.mubr.msk.bf16.gmra.mrb[8].mxu1 %vm254_vm0, %v1526_v12 }
  0x17   :  { %1460 = vmatprep.mubr.msk.bf16.mxu0 %vm254_vm0, %v1527_v13  ;;  %1492 = vmatprep.mubr.msk.bf16.mxu1 %vm254_vm0, %v1528_v14 }
  0x1e   :  { %1461 = vmatmul.mubr.msk.bf16.gmra.mrb[12].mxu0 %vm254_vm0, %v1529_v15  ;;  %1493 = vmatmul.mubr.msk.bf16.gmra.mrb[12].mxu1 %vm254_vm0, %v1530_v16 }
  0x1f   :  { %1464 = vmatprep.mubr.msk.bf16.mxu0 %vm254_vm0, %v1531_v17  ;;  %1496 = vmatprep.mubr.msk.bf16.mxu1 %vm254_vm0, %v1532_v18 }
  0x26   :  { %1465 = vmatmul.mubr.msk.bf16.gmra.mrb[16].mxu0 %vm254_vm0, %v1533_v19  ;;  %1497 = vmatmul.mubr.msk.bf16.gmra.mrb[16].mxu1 %vm254_vm0, %v1534_v20 }
  0x27   :  { %1468 = vmatprep.mubr.msk.bf16.mxu0 %vm254_vm0, %v1535_v21  ;;  %1500 = vmatprep.mubr.msk.bf16.mxu1 %vm254_vm0, %v1536_v22 }
  0x2e   :  { %1469 = vmatmul.mubr.msk.bf16.gmra.mrb[20].mxu0 %vm254_vm0, %v1537_v23  ;;  %1501 = vmatmul.mubr.msk.bf16.gmra.mrb[20].mxu1 %vm254_vm0, %v1538_v24 }
  0x2f   :  { %1472 = vmatprep.mubr.msk.bf16.mxu0 %vm254_vm0, %v1539_v25  ;;  %1504 = vmatprep.mubr.msk.bf16.mxu1 %vm254_vm0, %v1540_v26 }
  0x36   :  { %1473 = vmatmul.mubr.msk.bf16.gmra.mrb[24].mxu0 %vm254_vm0, %v1541_v27  ;;  %1505 = vmatmul.mubr.msk.bf16.gmra.mrb[24].mxu1 %vm254_vm0, %v1542_v28 }
  0x37   :  { %1476 = vmatprep.mubr.msk.bf16.mxu0 %vm254_vm0, %v1543_v29  ;;  %1508 = vmatprep.mubr.msk.bf16.mxu1 %vm254_vm0, %v1544_v30 }
  0x3e   :  { %1477 = vmatmul.mubr.msk.bf16.gmra.mrb[28].mxu0 %vm254_vm0, %v1545_v31  ;;  %1509 = vmatmul.mubr.msk.bf16.gmra.mrb[28].mxu1 %vm254_vm0, %v1546_v32 }
  0xd9   :  { %v1450_v34 = vpop.f32.mrb[0].mxu0  ;;  %v1482_v35 = vpop.f32.mrb[0].mxu1 }
  0xda   :  { %v394_v36 = vadd.f32 %v1450_v34, %v1701_v33  ;;  %v522_v37 = vadd.f32 %v1482_v35, %v1701_v33  ;;  %v385_v38 = vpop.f32.mrb[1].mxu0  ;;  %v513_v39 = vpop.f32.mrb[1].mxu1 }
  0xdb   :  { %v386_v40 = vadd.f32 %v1701_v33, %v385_v38  ;;  %v514_v41 = vadd.f32 %v1701_v33, %v513_v39  ;;  %v1451_v42 = vpop.f32.mrb[2].mxu0  ;;  %v1483_v43 = vpop.f32.mrb[2].mxu1 }
  0xdc   :  { %v397_v44 = vadd.f32 %v1451_v42, %v1701_v33  ;;  %v525_v45 = vadd.f32 %v1483_v43, %v1701_v33  ;;  %v388_v46 = vpop.f32.mrb[3].mxu0  ;;  %v516_v47 = vpop.f32.mrb[3].mxu1  ;;  %v642_v50 = vmax.f32 %v394_v36, 0.0  ;;  %v674_v51 = vmax.f32 %v522_v37, 0.0 }
  0xdd   :  { %v389_v48 = vadd.f32 %v1701_v33, %v388_v46  ;;  %v517_v49 = vadd.f32 %v1701_v33, %v516_v47  ;;  %v640_v54 = vmax.f32 %v386_v40, 0.0  ;;  %v672_v55 = vmax.f32 %v514_v41, 0.0 }
  0xde   :  { %v643_v52 = vmax.f32 %v397_v44, 0.0  ;;  %v675_v53 = vmax.f32 %v525_v45, 0.0 }
  0xdf   :  { %v641_v56 = vmax.f32 %v389_v48, 0.0  ;;  %v673_v57 = vmax.f32 %v517_v49, 0.0 }
  0xe0   :  { %v1230_v58 = vpack.c.bf16 %v643_v52, %v642_v50  ;;  %v1310_v59 = vpack.c.bf16 %v675_v53, %v674_v51 }
  0xe1   :  { %v1225_v60 = vpack.c.bf16 %v641_v56, %v640_v54  ;;  %v1305_v61 = vpack.c.bf16 %v673_v57, %v672_v55  ;;  %v1454_v62 = vpop.f32.mrb[4].mxu0  ;;  %v1486_v63 = vpop.f32.mrb[4].mxu1 }
  0xe2   :  { %1382 = vst [vmem:[%s1866_s3 + $0x8] sm:$0xff] %v1230_v58   ;;  %1398 = vst [vmem:[%s1866_s3 + $0x88] sm:$0xff] %v1310_v59   ;;  %v410_v0 = vadd.f32 %v1454_v62, %v1701_v33  ;;  %v538_v1 = vadd.f32 %v1486_v63, %v1701_v33  ;;  %v401_v2 = vpop.f32.mrb[5].mxu0  ;;  %v529_v3 = vpop.f32.mrb[5].mxu1 }
  0xe3   :  { %1226 = vst [vmem:[%s1866_s3] sm:$0xff] %v1225_v60   ;;  %1397 = vst [vmem:[%s1866_s3 + $0x80] sm:$0xff] %v1305_v61   ;;  %v402_v4 = vadd.f32 %v1701_v33, %v401_v2  ;;  %v530_v5 = vadd.f32 %v1701_v33, %v529_v3  ;;  %v1455_v6 = vpop.f32.mrb[6].mxu0  ;;  %v1487_v7 = vpop.f32.mrb[6].mxu1 }
  0xe4   :  { %v413_v8 = vadd.f32 %v1455_v6, %v1701_v33  ;;  %v541_v9 = vadd.f32 %v1487_v7, %v1701_v33  ;;  %v404_v10 = vpop.f32.mrb[7].mxu0  ;;  %v532_v11 = vpop.f32.mrb[7].mxu1  ;;  %v646_v14 = vmax.f32 %v410_v0, 0.0  ;;  %v678_v15 = vmax.f32 %v538_v1, 0.0 }
  0xe5   :  { %v405_v12 = vadd.f32 %v1701_v33, %v404_v10  ;;  %v533_v13 = vadd.f32 %v1701_v33, %v532_v11  ;;  %v644_v18 = vmax.f32 %v402_v4, 0.0  ;;  %v676_v19 = vmax.f32 %v530_v5, 0.0 }
  0xe6   :  { %v647_v16 = vmax.f32 %v413_v8, 0.0  ;;  %v679_v17 = vmax.f32 %v541_v9, 0.0 }
  0xe7   :  { %v645_v20 = vmax.f32 %v405_v12, 0.0  ;;  %v677_v21 = vmax.f32 %v533_v13, 0.0 }
  0xe8   :  { %v1240_v22 = vpack.c.bf16 %v647_v16, %v646_v14  ;;  %v1320_v23 = vpack.c.bf16 %v679_v17, %v678_v15 }
  0xe9   :  { %v1235_v24 = vpack.c.bf16 %v645_v20, %v644_v18  ;;  %v1315_v25 = vpack.c.bf16 %v677_v21, %v676_v19  ;;  %v1458_v26 = vpop.f32.mrb[8].mxu0  ;;  %v1490_v27 = vpop.f32.mrb[8].mxu1 }
  0xea   :  { %1384 = vst [vmem:[%s1866_s3 + $0x18] sm:$0xff] %v1240_v22   ;;  %1400 = vst [vmem:[%s1866_s3 + $0x98] sm:$0xff] %v1320_v23   ;;  %v426_v28 = vadd.f32 %v1458_v26, %v1701_v33  ;;  %v554_v29 = vadd.f32 %v1490_v27, %v1701_v33  ;;  %v417_v30 = vpop.f32.mrb[9].mxu0  ;;  %v545_v31 = vpop.f32.mrb[9].mxu1 }
  0xeb   :  { %1383 = vst [vmem:[%s1866_s3 + $0x10] sm:$0xff] %v1235_v24   ;;  %1399 = vst [vmem:[%s1866_s3 + $0x90] sm:$0xff] %v1315_v25   ;;  %v418_v32 = vadd.f32 %v1701_v33, %v417_v30  ;;  %v546_v34 = vadd.f32 %v1701_v33, %v545_v31  ;;  %v1459_v35 = vpop.f32.mrb[10].mxu0  ;;  %v1491_v36 = vpop.f32.mrb[10].mxu1 }
  0xec   :  { %v429_v37 = vadd.f32 %v1459_v35, %v1701_v33  ;;  %v557_v38 = vadd.f32 %v1491_v36, %v1701_v33  ;;  %v420_v39 = vpop.f32.mrb[11].mxu0  ;;  %v548_v40 = vpop.f32.mrb[11].mxu1  ;;  %v650_v43 = vmax.f32 %v426_v28, 0.0  ;;  %v682_v44 = vmax.f32 %v554_v29, 0.0 }
  0xed   :  { %v421_v41 = vadd.f32 %v1701_v33, %v420_v39  ;;  %v549_v42 = vadd.f32 %v1701_v33, %v548_v40  ;;  %v648_v47 = vmax.f32 %v418_v32, 0.0  ;;  %v680_v48 = vmax.f32 %v546_v34, 0.0 }
  0xee   :  { %v651_v45 = vmax.f32 %v429_v37, 0.0  ;;  %v683_v46 = vmax.f32 %v557_v38, 0.0 }
  0xef   :  { %v649_v49 = vmax.f32 %v421_v41, 0.0  ;;  %v681_v50 = vmax.f32 %v549_v42, 0.0 }
  0xf0   :  { %v1250_v51 = vpack.c.bf16 %v651_v45, %v650_v43  ;;  %v1330_v52 = vpack.c.bf16 %v683_v46, %v682_v44 }
  0xf1   :  { %v1245_v53 = vpack.c.bf16 %v649_v49, %v648_v47  ;;  %v1325_v54 = vpack.c.bf16 %v681_v50, %v680_v48  ;;  %v1462_v55 = vpop.f32.mrb[12].mxu0  ;;  %v1494_v56 = vpop.f32.mrb[12].mxu1 }
  0xf2   :  { %1386 = vst [vmem:[%s1866_s3 + $0x28] sm:$0xff] %v1250_v51   ;;  %1402 = vst [vmem:[%s1866_s3 + $0xa8] sm:$0xff] %v1330_v52   ;;  %v442_v57 = vadd.f32 %v1462_v55, %v1701_v33  ;;  %v570_v58 = vadd.f32 %v1494_v56, %v1701_v33  ;;  %v433_v59 = vpop.f32.mrb[13].mxu0  ;;  %v561_v60 = vpop.f32.mrb[13].mxu1 }
  0xf3   :  { %1385 = vst [vmem:[%s1866_s3 + $0x20] sm:$0xff] %v1245_v53   ;;  %1401 = vst [vmem:[%s1866_s3 + $0xa0] sm:$0xff] %v1325_v54   ;;  %v434_v61 = vadd.f32 %v1701_v33, %v433_v59  ;;  %v562_v62 = vadd.f32 %v1701_v33, %v561_v60  ;;  %v1463_v63 = vpop.f32.mrb[14].mxu0  ;;  %v1495_v0 = vpop.f32.mrb[14].mxu1 }
  0xf4   :  { %v445_v1 = vadd.f32 %v1463_v63, %v1701_v33  ;;  %v573_v2 = vadd.f32 %v1495_v0, %v1701_v33  ;;  %v436_v3 = vpop.f32.mrb[15].mxu0  ;;  %v564_v4 = vpop.f32.mrb[15].mxu1  ;;  %v654_v7 = vmax.f32 %v442_v57, 0.0  ;;  %v686_v8 = vmax.f32 %v570_v58, 0.0 }
  0xf5   :  { %v437_v5 = vadd.f32 %v1701_v33, %v436_v3  ;;  %v565_v6 = vadd.f32 %v1701_v33, %v564_v4  ;;  %v652_v11 = vmax.f32 %v434_v61, 0.0  ;;  %v684_v12 = vmax.f32 %v562_v62, 0.0 }
  0xf6   :  { %v655_v9 = vmax.f32 %v445_v1, 0.0  ;;  %v687_v10 = vmax.f32 %v573_v2, 0.0 }
  0xf7   :  { %v653_v13 = vmax.f32 %v437_v5, 0.0  ;;  %v685_v14 = vmax.f32 %v565_v6, 0.0 }
  0xf8   :  { %v1260_v15 = vpack.c.bf16 %v655_v9, %v654_v7  ;;  %v1340_v16 = vpack.c.bf16 %v687_v10, %v686_v8 }
  0xf9   :  { %v1255_v17 = vpack.c.bf16 %v653_v13, %v652_v11  ;;  %v1335_v18 = vpack.c.bf16 %v685_v14, %v684_v12  ;;  %v1466_v19 = vpop.f32.mrb[16].mxu0  ;;  %v1498_v20 = vpop.f32.mrb[16].mxu1 }
  0xfa   :  { %1388 = vst [vmem:[%s1866_s3 + $0x38] sm:$0xff] %v1260_v15   ;;  %1404 = vst [vmem:[%s1866_s3 + $0xb8] sm:$0xff] %v1340_v16   ;;  %v458_v21 = vadd.f32 %v1466_v19, %v1701_v33  ;;  %v586_v22 = vadd.f32 %v1498_v20, %v1701_v33  ;;  %v449_v23 = vpop.f32.mrb[17].mxu0  ;;  %v577_v24 = vpop.f32.mrb[17].mxu1 }
  0xfb   :  { %1387 = vst [vmem:[%s1866_s3 + $0x30] sm:$0xff] %v1255_v17   ;;  %1403 = vst [vmem:[%s1866_s3 + $0xb0] sm:$0xff] %v1335_v18   ;;  %v450_v25 = vadd.f32 %v1701_v33, %v449_v23  ;;  %v578_v26 = vadd.f32 %v1701_v33, %v577_v24  ;;  %v1467_v27 = vpop.f32.mrb[18].mxu0  ;;  %v1499_v28 = vpop.f32.mrb[18].mxu1 }
  0xfc   :  { %v461_v29 = vadd.f32 %v1467_v27, %v1701_v33  ;;  %v589_v30 = vadd.f32 %v1499_v28, %v1701_v33  ;;  %v452_v31 = vpop.f32.mrb[19].mxu0  ;;  %v580_v32 = vpop.f32.mrb[19].mxu1  ;;  %v658_v36 = vmax.f32 %v458_v21, 0.0  ;;  %v690_v37 = vmax.f32 %v586_v22, 0.0 }
  0xfd   :  { %v453_v34 = vadd.f32 %v1701_v33, %v452_v31  ;;  %v581_v35 = vadd.f32 %v1701_v33, %v580_v32  ;;  %v656_v40 = vmax.f32 %v450_v25, 0.0  ;;  %v688_v41 = vmax.f32 %v578_v26, 0.0 }
  0xfe   :  { %v659_v38 = vmax.f32 %v461_v29, 0.0  ;;  %v691_v39 = vmax.f32 %v589_v30, 0.0 }
  0xff   :  { %v657_v42 = vmax.f32 %v453_v34, 0.0  ;;  %v689_v43 = vmax.f32 %v581_v35, 0.0 }
 0x100   :  { %v1270_v44 = vpack.c.bf16 %v659_v38, %v658_v36  ;;  %v1350_v45 = vpack.c.bf16 %v691_v39, %v690_v37 }
 0x101   :  { %v1265_v46 = vpack.c.bf16 %v657_v42, %v656_v40  ;;  %v1345_v47 = vpack.c.bf16 %v689_v43, %v688_v41  ;;  %v1470_v48 = vpop.f32.mrb[20].mxu0  ;;  %v1502_v49 = vpop.f32.mrb[20].mxu1 }
 0x102   :  { %1390 = vst [vmem:[%s1866_s3 + $0x48] sm:$0xff] %v1270_v44   ;;  %1406 = vst [vmem:[%s1866_s3 + $0xc8] sm:$0xff] %v1350_v45   ;;  %v474_v50 = vadd.f32 %v1470_v48, %v1701_v33  ;;  %v602_v51 = vadd.f32 %v1502_v49, %v1701_v33  ;;  %v465_v52 = vpop.f32.mrb[21].mxu0  ;;  %v593_v53 = vpop.f32.mrb[21].mxu1 }
 0x103   :  { %1389 = vst [vmem:[%s1866_s3 + $0x40] sm:$0xff] %v1265_v46   ;;  %1405 = vst [vmem:[%s1866_s3 + $0xc0] sm:$0xff] %v1345_v47   ;;  %v466_v54 = vadd.f32 %v1701_v33, %v465_v52  ;;  %v594_v55 = vadd.f32 %v1701_v33, %v593_v53  ;;  %v1471_v56 = vpop.f32.mrb[22].mxu0  ;;  %v1503_v57 = vpop.f32.mrb[22].mxu1 }
 0x104   :  { %v477_v58 = vadd.f32 %v1471_v56, %v1701_v33  ;;  %v605_v59 = vadd.f32 %v1503_v57, %v1701_v33  ;;  %v468_v60 = vpop.f32.mrb[23].mxu0  ;;  %v596_v61 = vpop.f32.mrb[23].mxu1  ;;  %v662_v0 = vmax.f32 %v474_v50, 0.0  ;;  %v694_v1 = vmax.f32 %v602_v51, 0.0 }
 0x105   :  { %v469_v62 = vadd.f32 %v1701_v33, %v468_v60  ;;  %v597_v63 = vadd.f32 %v1701_v33, %v596_v61  ;;  %v660_v4 = vmax.f32 %v466_v54, 0.0  ;;  %v692_v5 = vmax.f32 %v594_v55, 0.0 }
 0x106   :  { %v663_v2 = vmax.f32 %v477_v58, 0.0  ;;  %v695_v3 = vmax.f32 %v605_v59, 0.0 }
 0x107   :  { %v661_v6 = vmax.f32 %v469_v62, 0.0  ;;  %v693_v7 = vmax.f32 %v597_v63, 0.0 }
 0x108   :  { %v1280_v8 = vpack.c.bf16 %v663_v2, %v662_v0  ;;  %v1360_v9 = vpack.c.bf16 %v695_v3, %v694_v1 }
 0x109   :  { %v1275_v10 = vpack.c.bf16 %v661_v6, %v660_v4  ;;  %v1355_v11 = vpack.c.bf16 %v693_v7, %v692_v5  ;;  %v1474_v12 = vpop.f32.mrb[24].mxu0  ;;  %v1506_v13 = vpop.f32.mrb[24].mxu1 }
 0x10a   :  { %1392 = vst [vmem:[%s1866_s3 + $0x58] sm:$0xff] %v1280_v8   ;;  %1408 = vst [vmem:[%s1866_s3 + $0xd8] sm:$0xff] %v1360_v9   ;;  %v490_v14 = vadd.f32 %v1474_v12, %v1701_v33  ;;  %v618_v15 = vadd.f32 %v1506_v13, %v1701_v33  ;;  %v481_v16 = vpop.f32.mrb[25].mxu0  ;;  %v609_v17 = vpop.f32.mrb[25].mxu1 }
 0x10b   :  { %1391 = vst [vmem:[%s1866_s3 + $0x50] sm:$0xff] %v1275_v10   ;;  %1407 = vst [vmem:[%s1866_s3 + $0xd0] sm:$0xff] %v1355_v11   ;;  %v482_v18 = vadd.f32 %v1701_v33, %v481_v16  ;;  %v610_v19 = vadd.f32 %v1701_v33, %v609_v17  ;;  %v1475_v20 = vpop.f32.mrb[26].mxu0  ;;  %v1507_v21 = vpop.f32.mrb[26].mxu1 }
 0x10c   :  { %v493_v22 = vadd.f32 %v1475_v20, %v1701_v33  ;;  %v621_v23 = vadd.f32 %v1507_v21, %v1701_v33  ;;  %v484_v24 = vpop.f32.mrb[27].mxu0  ;;  %v612_v25 = vpop.f32.mrb[27].mxu1  ;;  %v666_v28 = vmax.f32 %v490_v14, 0.0  ;;  %v698_v29 = vmax.f32 %v618_v15, 0.0 }
 0x10d   :  { %v485_v26 = vadd.f32 %v1701_v33, %v484_v24  ;;  %v613_v27 = vadd.f32 %v1701_v33, %v612_v25  ;;  %v664_v32 = vmax.f32 %v482_v18, 0.0  ;;  %v696_v34 = vmax.f32 %v610_v19, 0.0 }
 0x10e   :  { %v667_v30 = vmax.f32 %v493_v22, 0.0  ;;  %v699_v31 = vmax.f32 %v621_v23, 0.0 }
 0x10f   :  { %v665_v35 = vmax.f32 %v485_v26, 0.0  ;;  %v697_v36 = vmax.f32 %v613_v27, 0.0 }
 0x110   :  { %v1290_v37 = vpack.c.bf16 %v667_v30, %v666_v28  ;;  %v1370_v38 = vpack.c.bf16 %v699_v31, %v698_v29 }
 0x111   :  { %v1285_v39 = vpack.c.bf16 %v665_v35, %v664_v32  ;;  %v1365_v40 = vpack.c.bf16 %v697_v36, %v696_v34  ;;  %v1478_v41 = vpop.f32.mrb[28].mxu0  ;;  %v1510_v42 = vpop.f32.mrb[28].mxu1 }
 0x112   :  { %1394 = vst [vmem:[%s1866_s3 + $0x68] sm:$0xff] %v1290_v37   ;;  %1410 = vst [vmem:[%s1866_s3 + $0xe8] sm:$0xff] %v1370_v38   ;;  %v506_v43 = vadd.f32 %v1478_v41, %v1701_v33  ;;  %v634_v44 = vadd.f32 %v1510_v42, %v1701_v33  ;;  %v497_v45 = vpop.f32.mrb[29].mxu0  ;;  %v625_v46 = vpop.f32.mrb[29].mxu1 }
 0x113   :  { %1393 = vst [vmem:[%s1866_s3 + $0x60] sm:$0xff] %v1285_v39   ;;  %1409 = vst [vmem:[%s1866_s3 + $0xe0] sm:$0xff] %v1365_v40   ;;  %v498_v47 = vadd.f32 %v1701_v33, %v497_v45  ;;  %v626_v48 = vadd.f32 %v1701_v33, %v625_v46  ;;  %v1479_v49 = vpop.f32.mrb[30].mxu0  ;;  %v1511_v50 = vpop.f32.mrb[30].mxu1 }
 0x114   :  { %v509_v51 = vadd.f32 %v1479_v49, %v1701_v33  ;;  %v637_v52 = vadd.f32 %v1511_v50, %v1701_v33  ;;  %v500_v53 = vpop.f32.mrb[31].mxu0  ;;  %v628_v54 = vpop.f32.mrb[31].mxu1  ;;  %v670_v57 = vmax.f32 %v506_v43, 0.0  ;;  %v702_v58 = vmax.f32 %v634_v44, 0.0 }
 0x115   :  { %v501_v55 = vadd.f32 %v1701_v33, %v500_v53  ;;  %v629_v56 = vadd.f32 %v1701_v33, %v628_v54  ;;  %v668_v61 = vmax.f32 %v498_v47, 0.0  ;;  %v700_v62 = vmax.f32 %v626_v48, 0.0 }
 0x116   :  { %v671_v59 = vmax.f32 %v509_v51, 0.0  ;;  %v703_v60 = vmax.f32 %v637_v52, 0.0 }
 0x117   :  { %v669_v63 = vmax.f32 %v501_v55, 0.0  ;;  %v701_v0 = vmax.f32 %v629_v56, 0.0 }
 0x118   :  { %v1300_v1 = vpack.c.bf16 %v671_v59, %v670_v57  ;;  %v1380_v2 = vpack.c.bf16 %v703_v60, %v702_v58 }
 0x119   :  { %v1295_v3 = vpack.c.bf16 %v669_v63, %v668_v61  ;;  %v1375_v4 = vpack.c.bf16 %v701_v0, %v700_v62 }
 0x11a   :  { %1396 = vst [vmem:[%s1866_s3 + $0x78] sm:$0xff] %v1300_v1   ;;  %1412 = vst [vmem:[%s1866_s3 + $0xf8] sm:$0xff] %v1380_v2  }
 0x11b   :  { %1395 = vst [vmem:[%s1866_s3 + $0x70] sm:$0xff] %v1295_v3   ;;  %1411 = vst [vmem:[%s1866_s3 + $0xf0] sm:$0xff] %v1375_v4  }

// kernel: _lambda_.51
= control target key start
LH: loop header
LB: loop body
LE: loop exit
PB: predicated region body
PF: predicated region fallthrough
CT: control target
= control target key end

     0   :  { %v3702_v0 = vmov 0   ;;  %s4842_s1 = inlined_call_operand.vmem [shape: bf16[640,128], index: 1, kind: input, shape index: {}]   ;;  %s4843_s0 = inlined_call_operand.vmem [shape: bf16[512,640], index: 0, kind: input, shape index: {}]   ;;  %s4844_s2 = inlined_call_operand.vmem [shape: f32[1,128], index: 2, kind: input, shape index: {}]   ;;  %s4845_s3 = inlined_call_operand.vmem [shape: bf16[512,128], index: 3, kind: output, shape index: {}]  }
   0x1   :  { %1366 = vmatprep.subr.bf16.mxu0 %v3702_v0  ;;  %3261 = vmatprep.subr.bf16.mxu1 %v3702_v0  ;;  %v3438_v1 = vld [vmem:[%s4842_s1] sm:$0xff]   ;;  %v3439_v2 = vld [vmem:[%s4842_s1 + $0x8] sm:$0xff]   ;;  %v3440_v3 = vld [vmem:[%s4842_s1 + $0x10] sm:$0xff]  }
   0x2   :  { %1367 = vmatpush1.bf16.msra.mxu0 %v3438_v1  ;;  %3277 = vmatpush1.bf16.msra.mxu1 %v3438_v1  ;;  %v3441_v4 = vld [vmem:[%s4842_s1 + $0x18] sm:$0xff]   ;;  %v3442_v5 = vld [vmem:[%s4842_s1 + $0x20] sm:$0xff]   ;;  %v3443_v7 = vld [vmem:[%s4842_s1 + $0x28] sm:$0xff]  }
   0x3   :  { %1368 = vmatprep.subr.bf16.mxu0 %v3702_v0  ;;  %3262 = vmatprep.subr.bf16.mxu1 %v3702_v0  ;;  %v3456_v6 = vld [vmem:[%s4843_s0 + $0x4] ss:$20 sps:$4 sm:$0xff]   ;;  %v3444_v9 = vld [vmem:[%s4842_s1 + $0x30] sm:$0xff]   ;;  %v3447_v12 = vld [vmem:[%s4842_s1 + $0x48] sm:$0xff]  }
   0x4   :  { %v3459_v8 = vld [vmem:[%s4843_s0 + $0x144] ss:$20 sps:$4 sm:$0xff]   ;;  %1398 = vmatprep.mubr.bf16.mxu0 %v3456_v6  ;;  %v3448_v13 = vld [vmem:[%s4842_s1 + $0x50] sm:$0xff]   ;;  %v3451_v16 = vld [vmem:[%s4842_s1 + $0x68] sm:$0xff]  }
   0x5   :  { %1462 = vmatprep.mubr.bf16.mxu1 %v3459_v8  ;;  %v3445_v10 = vld [vmem:[%s4842_s1 + $0x38] sm:$0xff]   ;;  %v3446_v11 = vld [vmem:[%s4842_s1 + $0x40] sm:$0xff]   ;;  %v3452_v17 = vld [vmem:[%s4842_s1 + $0x70] sm:$0xff]  }
   0x6   :  { %1369 = vmatpush1.bf16.msra.mxu0 %v3439_v2  ;;  %3278 = vmatpush1.bf16.msra.mxu1 %v3439_v2  ;;  %v3449_v14 = vld [vmem:[%s4842_s1 + $0x58] sm:$0xff]   ;;  %v3450_v15 = vld [vmem:[%s4842_s1 + $0x60] sm:$0xff]   ;;  %v3486_v25 = vld [vmem:[%s4842_s1 + $0x108] sm:$0xff]  }
   0x7   :  { %1370 = vmatprep.subr.bf16.mxu0 %v3702_v0  ;;  %3263 = vmatprep.subr.bf16.mxu1 %v3702_v0  ;;  %v3453_v18 = vld [vmem:[%s4842_s1 + $0x78] sm:$0xff]   ;;  %v3461_v19 = vld [vmem:[%s4842_s1 + $0x100] sm:$0xff]   ;;  %v3462_v26 = vld [vmem:[%s4842_s1 + $0x88] sm:$0xff]  }
   0x8   :  { %v3454_v20 = vld [vmem:[%s4843_s0] ss:$20 sps:$4 sm:$0xff]   ;;  %v3467_v28 = vld [vmem:[%s4843_s0 + $0x28] ss:$20 sps:$4 sm:$0xff]   ;;  %v3475_v35 = vld [vmem:[%s4843_s0 + $0x50] ss:$20 sps:$4 sm:$0xff]  }
   0x9   :  { %v3457_v21 = vld [vmem:[%s4843_s0 + $0x140] ss:$20 sps:$4 sm:$0xff]   ;;  %v3468_v29 = vld [vmem:[%s4843_s0 + $0x168] ss:$20 sps:$4 sm:$0xff]   ;;  %v3476_v36 = vld [vmem:[%s4843_s0 + $0x190] ss:$20 sps:$4 sm:$0xff]  }
   0xa   :  { %1371 = vmatpush1.bf16.msra.mxu0 %v3440_v3  ;;  %3279 = vmatpush1.bf16.msra.mxu1 %v3440_v3  ;;  %v3460_v22 = vld [vmem:[%s4842_s1 + $0x80] sm:$0xff]   ;;  %v3511_v27 = vld [vmem:[%s4842_s1 + $0x110] sm:$0xff]   ;;  %v3533_v33 = vld [vmem:[%s4842_s1 + $0x118] sm:$0xff]  }
   0xb   :  { %1372 = vmatprep.subr.bf16.mxu0 %v3702_v0  ;;  %3264 = vmatprep.subr.bf16.mxu1 %v3702_v0  ;;  %v3463_v23 = vld [vmem:[%s4843_s0 + $0x2c] ss:$20 sps:$4 sm:$0xff]   ;;  %v3469_v30 = vld [vmem:[%s4842_s1 + $0x90] sm:$0xff]   ;;  %v3470_v34 = vld [vmem:[%s4842_s1 + $0x98] sm:$0xff]  }
   0xc   :  { %v3465_v24 = vld [vmem:[%s4843_s0 + $0x16c] ss:$20 sps:$4 sm:$0xff]   ;;  %v3471_v31 = vld [vmem:[%s4843_s0 + $0x54] ss:$20 sps:$4 sm:$0xff]   ;;  %v3479_v38 = vld [vmem:[%s4843_s0 + $0x7c] ss:$20 sps:$4 sm:$0xff]  }
   0xd   :  { %v3473_v32 = vld [vmem:[%s4843_s0 + $0x194] ss:$20 sps:$4 sm:$0xff]   ;;  %v3477_v37 = vld [vmem:[%s4842_s1 + $0xa0] sm:$0xff]   ;;  %v3481_v39 = vld [vmem:[%s4843_s0 + $0x1bc] ss:$20 sps:$4 sm:$0xff]  }
   0xe   :  { %1373 = vmatpush1.bf16.msra.mxu0 %v3441_v4  ;;  %3280 = vmatpush1.bf16.msra.mxu1 %v3441_v4  ;;  %v3552_v40 = vld [vmem:[%s4842_s1 + $0x120] sm:$0xff]   ;;  %v3478_v41 = vld [vmem:[%s4842_s1 + $0xa8] sm:$0xff]   ;;  %v3485_v45 = vld [vmem:[%s4842_s1 + $0xb0] sm:$0xff]  }
   0xf   :  { %1374 = vmatprep.subr.bf16.mxu0 %v3702_v0  ;;  %3265 = vmatprep.subr.bf16.mxu1 %v3702_v0  ;;  %v3571_v42 = vld [vmem:[%s4842_s1 + $0x128] sm:$0xff]   ;;  %v3488_v46 = vld [vmem:[%s4843_s0 + $0xa4] ss:$20 sps:$4 sm:$0xff]   ;;  %v3590_v48 = vld [vmem:[%s4842_s1 + $0x130] sm:$0xff]  }
  0x10   :  { %v3483_v43 = vld [vmem:[%s4843_s0 + $0x78] ss:$20 sps:$4 sm:$0xff]   ;;  %v3492_v50 = vld [vmem:[%s4843_s0 + $0xa0] ss:$20 sps:$4 sm:$0xff]   ;;  %v3500_v56 = vld [vmem:[%s4843_s0 + $0xc8] ss:$20 sps:$4 sm:$0xff]  }
  0x11   :  { %v3484_v44 = vld [vmem:[%s4843_s0 + $0x1b8] ss:$20 sps:$4 sm:$0xff]   ;;  %v3493_v51 = vld [vmem:[%s4843_s0 + $0x1e0] ss:$20 sps:$4 sm:$0xff]   ;;  %v3501_v57 = vld [vmem:[%s4843_s0 + $0x208] ss:$20 sps:$4 sm:$0xff]  }
  0x12   :  { %1375 = vmatpush1.bf16.msra.mxu0 %v3442_v5  ;;  %3281 = vmatpush1.bf16.msra.mxu1 %v3442_v5  ;;  %v3490_v47 = vld [vmem:[%s4843_s0 + $0x1e4] ss:$20 sps:$4 sm:$0xff]   ;;  %v3496_v53 = vld [vmem:[%s4843_s0 + $0xcc] ss:$20 sps:$4 sm:$0xff]   ;;  %v3502_v58 = vld [vmem:[%s4842_s1 + $0xd0] sm:$0xff]  }
  0x13   :  { %1376 = vmatprep.subr.bf16.mxu0 %v3702_v0  ;;  %3266 = vmatprep.subr.bf16.mxu1 %v3702_v0  ;;  %v3487_v49 = vld [vmem:[%s4842_s1 + $0xb8] sm:$0xff]   ;;  %v3494_v52 = vld [vmem:[%s4842_s1 + $0xc0] sm:$0xff]   ;;  %v3495_v55 = vld [vmem:[%s4842_s1 + $0xc8] sm:$0xff]  }
  0x14   :  { %v3498_v54 = vld [vmem:[%s4843_s0 + $0x20c] ss:$20 sps:$4 sm:$0xff]   ;;  %v3504_v59 = vld [vmem:[%s4843_s0 + $0xf4] ss:$20 sps:$4 sm:$0xff]   ;;  %v3609_v61 = vld [vmem:[%s4842_s1 + $0x138] sm:$0xff]  }
  0x15   :  { %v3506_v60 = vld [vmem:[%s4843_s0 + $0x234] ss:$20 sps:$4 sm:$0xff]   ;;  %v3503_v62 = vld [vmem:[%s4842_s1 + $0xd8] sm:$0xff]   ;;  %v3508_v63 = vld [vmem:[%s4843_s0 + $0xf0] ss:$20 sps:$4 sm:$0xff]  }
  0x16   :  { %1377 = vmatpush1.bf16.msra.mxu0 %v3443_v7  ;;  %3282 = vmatpush1.bf16.msra.mxu1 %v3443_v7  ;;  %v3509_v1 = vld [vmem:[%s4843_s0 + $0x230] ss:$20 sps:$4 sm:$0xff]   ;;  %v3512_v5 = vld [vmem:[%s4842_s1 + $0xe8] sm:$0xff]  }
  0x17   :  { %1378 = vmatprep.subr.bf16.mxu0 %v3702_v0  ;;  %3267 = vmatprep.subr.bf16.mxu1 %v3702_v0  ;;  %v3510_v2 = vld [vmem:[%s4842_s1 + $0xe0] sm:$0xff]   ;;  %v3513_v3 = vld [vmem:[%s4843_s0 + $0x11c] ss:$20 sps:$4 sm:$0xff]   ;;  %v3517_v6 = vld [vmem:[%s4843_s0 + $0x118] ss:$20 sps:$4 sm:$0xff]  }
  0x18   :  { %v3515_v4 = vld [vmem:[%s4843_s0 + $0x25c] ss:$20 sps:$4 sm:$0xff]   ;;  %v3518_v7 = vld [vmem:[%s4843_s0 + $0x258] ss:$20 sps:$4 sm:$0xff]  }
  0x19   :  { %v3519_v8 = vld [vmem:[%s4842_s1 + $0xf0] sm:$0xff]  }
  0x1a   :  { %1379 = vmatpush1.bf16.msra.mxu0 %v3444_v9  ;;  %3283 = vmatpush1.bf16.msra.mxu1 %v3444_v9  ;;  %v3521_v9 = vld [vmem:[%s4843_s0 + $0x284] ss:$20 sps:$4 sm:$0xff]  }
  0x1b   :  { %1380 = vmatprep.subr.bf16.mxu0 %v3702_v0  ;;  %3268 = vmatprep.subr.bf16.mxu1 %v3702_v0 }
  0x1e   :  { %1381 = vmatpush1.bf16.msra.mxu0 %v3445_v10  ;;  %3284 = vmatpush1.bf16.msra.mxu1 %v3445_v10  ;;  %v3525_v10 = vld [vmem:[%s4843_s0 + $0xc] ss:$20 sps:$4 sm:$0xff]  }
  0x1f   :  { %1382 = vmatprep.subr.bf16.mxu0 %v3702_v0  ;;  %3269 = vmatprep.subr.bf16.mxu1 %v3702_v0 }
  0x22   :  { %1383 = vmatpush1.bf16.msra.mxu0 %v3446_v11  ;;  %3285 = vmatpush1.bf16.msra.mxu1 %v3446_v11  ;;  %v3520_v11 = vld [vmem:[%s4842_s1 + $0xf8] sm:$0xff]  }
  0x23   :  { %1384 = vmatprep.subr.bf16.mxu0 %v3702_v0  ;;  %3270 = vmatprep.subr.bf16.mxu1 %v3702_v0 }
  0x26   :  { %1385 = vmatpush1.bf16.msra.mxu0 %v3447_v12  ;;  %3286 = vmatpush1.bf16.msra.mxu1 %v3447_v12  ;;  %v3523_v12 = vld [vmem:[%s4843_s0 + $0x8] ss:$20 sps:$4 sm:$0xff]  }
  0x27   :  { %1386 = vmatprep.subr.bf16.mxu0 %v3702_v0  ;;  %3271 = vmatprep.subr.bf16.mxu1 %v3702_v0 }
  0x2a   :  { %1387 = vmatpush1.bf16.msra.mxu0 %v3448_v13  ;;  %3287 = vmatpush1.bf16.msra.mxu1 %v3448_v13  ;;  %v3526_v13 = vld [vmem:[%s4843_s0 + $0x280] ss:$20 sps:$4 sm:$0xff]  }
  0x2b   :  { %1388 = vmatprep.subr.bf16.mxu0 %v3702_v0  ;;  %3272 = vmatprep.subr.bf16.mxu1 %v3702_v0 }
  0x2e   :  { %1389 = vmatpush1.bf16.msra.mxu0 %v3449_v14  ;;  %3288 = vmatpush1.bf16.msra.mxu1 %v3449_v14  ;;  %v3527_v14 = vld [vmem:[%s4843_s0 + $0x2ac] ss:$20 sps:$4 sm:$0xff]  }
  0x2f   :  { %1390 = vmatprep.subr.bf16.mxu0 %v3702_v0  ;;  %3273 = vmatprep.subr.bf16.mxu1 %v3702_v0 }
  0x32   :  { %1391 = vmatpush1.bf16.msra.mxu0 %v3450_v15  ;;  %3289 = vmatpush1.bf16.msra.mxu1 %v3450_v15  ;;  %v3529_v15 = vld [vmem:[%s4843_s0 + $0x34] ss:$20 sps:$4 sm:$0xff]  }
  0x33   :  { %1392 = vmatprep.subr.bf16.mxu0 %v3702_v0  ;;  %3274 = vmatprep.subr.bf16.mxu1 %v3702_v0 }
  0x36   :  { %1393 = vmatpush1.bf16.msra.mxu0 %v3451_v16  ;;  %3290 = vmatpush1.bf16.msra.mxu1 %v3451_v16  ;;  %v3532_v16 = vld [vmem:[%s4843_s0 + $0x30] ss:$20 sps:$4 sm:$0xff]  }
  0x37   :  { %1394 = vmatprep.subr.bf16.mxu0 %v3702_v0  ;;  %3275 = vmatprep.subr.bf16.mxu1 %v3702_v0 }
  0x3a   :  { %1395 = vmatpush1.bf16.msra.mxu0 %v3452_v17  ;;  %3291 = vmatpush1.bf16.msra.mxu1 %v3452_v17  ;;  %v3534_v17 = vld [vmem:[%s4843_s0 + $0x2d4] ss:$20 sps:$4 sm:$0xff]  }
  0x3b   :  { %1396 = vmatprep.subr.bf16.mxu0 %v3702_v0  ;;  %3276 = vmatprep.subr.bf16.mxu1 %v3702_v0 }
  0x3e   :  { %1397 = vmatpush1.bf16.msra.mxu0 %v3453_v18  ;;  %3292 = vmatpush1.bf16.msra.mxu1 %v3453_v18  ;;  %v3536_v18 = vld [vmem:[%s4843_s0 + $0x5c] ss:$20 sps:$4 sm:$0xff]  }
  0x3f   :  { %1655 = vmatprep.subr.bf16.mxu0 %v3702_v0  ;;  %3181 = vmatprep.subr.bf16.mxu1 %v3461_v19 }
  0x41   :  { %1399 = vmatmul.mubr.bf16.vlgmr.msra.gmra.mrb[0].mxu0 %v3454_v20  ;;  %1463 = vmatmul.mubr.bf16.vlgmr.msra.gmra.mrb[0].mxu1 %v3457_v21  ;;  %v3539_v20 = vld [vmem:[%s4843_s0 + $0x58] ss:$20 sps:$4 sm:$0xff]   ;;  %v3540_v21 = vld [vmem:[%s4843_s0 + $0x2fc] ss:$20 sps:$4 sm:$0xff]  }
  0x42   :  { %1656 = vmatpush1.bf16.msra.mxu0 %v3460_v22  ;;  %3182 = vmatpush3.bf16.msra.mxu1 %v3461_v19  ;;  %v3538_v19 = vld [vmem:[%s4843_s0 + $0x2d0] ss:$20 sps:$4 sm:$0xff]  }
  0x43   :  { %1657 = vmatprep.subr.bf16.mxu0 %v3702_v0  ;;  %1406 = vmatprep.mubr.bf16.mxu0 %v3463_v23  ;;  %v3542_v22 = vld [vmem:[%s4843_s0 + $0x84] ss:$20 sps:$4 sm:$0xff]  }
  0x44   :  { %1470 = vmatprep.mubr.bf16.mxu1 %v3465_v24  ;;  %3183 = vmatprep.subr.bf16.mxu1 %v3486_v25  ;;  %v3544_v23 = vld [vmem:[%s4843_s0 + $0x2f8] ss:$20 sps:$4 sm:$0xff]   ;;  %v3545_v24 = vld [vmem:[%s4843_s0 + $0x80] ss:$20 sps:$4 sm:$0xff]  }
  0x46   :  { %1658 = vmatpush1.bf16.msra.mxu0 %v3462_v26  ;;  %3184 = vmatpush3.bf16.msra.mxu1 %v3486_v25  ;;  %v3546_v25 = vld [vmem:[%s4843_s0 + $0x324] ss:$20 sps:$4 sm:$0xff]   ;;  %v3548_v26 = vld [vmem:[%s4843_s0 + $0xac] ss:$20 sps:$4 sm:$0xff]  }
  0x47   :  { %1659 = vmatprep.subr.bf16.mxu0 %v3702_v0  ;;  %3185 = vmatprep.subr.bf16.mxu1 %v3511_v27 }
  0x49   :  { %1407 = vmatmul.mubr.bf16.gmra.mrb[4].mxu0 %v3467_v28  ;;  %1471 = vmatmul.mubr.bf16.gmra.mrb[4].mxu1 %v3468_v29  ;;  %v3551_v28 = vld [vmem:[%s4843_s0 + $0xa8] ss:$20 sps:$4 sm:$0xff]   ;;  %v3553_v29 = vld [vmem:[%s4843_s0 + $0x34c] ss:$20 sps:$4 sm:$0xff]  }
  0x4a   :  { %1660 = vmatpush1.bf16.msra.mxu0 %v3469_v30  ;;  %1414 = vmatprep.mubr.bf16.mxu0 %v3471_v31  ;;  %v3555_v30 = vld [vmem:[%s4843_s0 + $0xd4] ss:$20 sps:$4 sm:$0xff]  }
  0x4b   :  { %1661 = vmatprep.subr.bf16.mxu0 %v3702_v0  ;;  %1478 = vmatprep.mubr.bf16.mxu1 %v3473_v32  ;;  %v3557_v31 = vld [vmem:[%s4843_s0 + $0x348] ss:$20 sps:$4 sm:$0xff]   ;;  %v3558_v32 = vld [vmem:[%s4843_s0 + $0xd0] ss:$20 sps:$4 sm:$0xff]  }
  0x4c   :  { %3186 = vmatpush3.bf16.msra.mxu1 %v3511_v27  ;;  %v3550_v27 = vld [vmem:[%s4843_s0 + $0x320] ss:$20 sps:$4 sm:$0xff]  }
  0x4d   :  { %3187 = vmatprep.subr.bf16.mxu1 %v3533_v33 }
  0x4e   :  { %1662 = vmatpush1.bf16.msra.mxu0 %v3470_v34  ;;  %v3561_v34 = vld [vmem:[%s4843_s0 + $0xfc] ss:$20 sps:$4 sm:$0xff]  }
  0x4f   :  { %1663 = vmatprep.subr.bf16.mxu0 %v3702_v0 }
  0x50   :  { %3188 = vmatpush3.bf16.msra.mxu1 %v3533_v33  ;;  %v3559_v33 = vld [vmem:[%s4843_s0 + $0x374] ss:$20 sps:$4 sm:$0xff]  }
  0x51   :  { %1415 = vmatmul.mubr.bf16.gmra.mrb[8].mxu0 %v3475_v35  ;;  %1479 = vmatmul.mubr.bf16.gmra.mrb[8].mxu1 %v3476_v36  ;;  %v3563_v35 = vld [vmem:[%s4843_s0 + $0x370] ss:$20 sps:$4 sm:$0xff]   ;;  %v3564_v36 = vld [vmem:[%s4843_s0 + $0xf8] ss:$20 sps:$4 sm:$0xff]  }
  0x52   :  { %1664 = vmatpush1.bf16.msra.mxu0 %v3477_v37  ;;  %1422 = vmatprep.mubr.bf16.mxu0 %v3479_v38  ;;  %v3565_v37 = vld [vmem:[%s4843_s0 + $0x39c] ss:$20 sps:$4 sm:$0xff]   ;;  %v3567_v38 = vld [vmem:[%s4843_s0 + $0x124] ss:$20 sps:$4 sm:$0xff]  }
  0x53   :  { %1665 = vmatprep.subr.bf16.mxu0 %v3702_v0  ;;  %1486 = vmatprep.mubr.bf16.mxu1 %v3481_v39  ;;  %v3569_v39 = vld [vmem:[%s4843_s0 + $0x398] ss:$20 sps:$4 sm:$0xff]  }
  0x54   :  { %3189 = vmatprep.subr.bf16.mxu1 %v3552_v40 }
  0x55   :  { %3190 = vmatpush3.bf16.msra.mxu1 %v3552_v40  ;;  %v3570_v40 = vld [vmem:[%s4843_s0 + $0x120] ss:$20 sps:$4 sm:$0xff]  }
  0x56   :  { %1666 = vmatpush1.bf16.msra.mxu0 %v3478_v41  ;;  %3191 = vmatprep.subr.bf16.mxu1 %v3571_v42  ;;  %v3572_v41 = vld [vmem:[%s4843_s0 + $0x3c4] ss:$20 sps:$4 sm:$0xff]  }
  0x57   :  { %1667 = vmatprep.subr.bf16.mxu0 %v3702_v0 }
  0x59   :  { %1423 = vmatmul.mubr.bf16.gmra.mrb[12].mxu0 %v3483_v43  ;;  %1487 = vmatmul.mubr.bf16.gmra.mrb[12].mxu1 %v3484_v44  ;;  %v3576_v43 = vld [vmem:[%s4843_s0 + $0x3c0] ss:$20 sps:$4 sm:$0xff]   ;;  %v3577_v44 = vld [vmem:[%s4843_s0 + $0x148] ss:$20 sps:$4 sm:$0xff]  }
  0x5a   :  { %1668 = vmatpush1.bf16.msra.mxu0 %v3485_v45  ;;  %1430 = vmatprep.mubr.bf16.mxu0 %v3488_v46  ;;  %v3578_v45 = vld [vmem:[%s4843_s0 + $0x3ec] ss:$20 sps:$4 sm:$0xff]   ;;  %v3580_v46 = vld [vmem:[%s4843_s0 + $0x174] ss:$20 sps:$4 sm:$0xff]  }
  0x5b   :  { %1669 = vmatprep.subr.bf16.mxu0 %v3702_v0  ;;  %1494 = vmatprep.mubr.bf16.mxu1 %v3490_v47  ;;  %v3582_v47 = vld [vmem:[%s4843_s0 + $0x3e8] ss:$20 sps:$4 sm:$0xff]  }
  0x5c   :  { %3192 = vmatpush3.bf16.msra.mxu1 %v3571_v42  ;;  %v3574_v42 = vld [vmem:[%s4843_s0 + $0x14c] ss:$20 sps:$4 sm:$0xff]  }
  0x5d   :  { %3193 = vmatprep.subr.bf16.mxu1 %v3590_v48 }
  0x5e   :  { %1670 = vmatpush1.bf16.msra.mxu0 %v3487_v49  ;;  %v3584_v49 = vld [vmem:[%s4843_s0 + $0x414] ss:$20 sps:$4 sm:$0xff]  }
  0x5f   :  { %1671 = vmatprep.subr.bf16.mxu0 %v3702_v0 }
  0x60   :  { %3194 = vmatpush3.bf16.msra.mxu1 %v3590_v48  ;;  %v3583_v48 = vld [vmem:[%s4843_s0 + $0x170] ss:$20 sps:$4 sm:$0xff]  }
  0x61   :  { %1431 = vmatmul.mubr.bf16.gmra.mrb[16].mxu0 %v3492_v50  ;;  %1495 = vmatmul.mubr.bf16.gmra.mrb[16].mxu1 %v3493_v51  ;;  %v3586_v50 = vld [vmem:[%s4843_s0 + $0x19c] ss:$20 sps:$4 sm:$0xff]  }
  0x62   :  { %1672 = vmatpush1.bf16.msra.mxu0 %v3494_v52  ;;  %1438 = vmatprep.mubr.bf16.mxu0 %v3496_v53  ;;  %v3588_v51 = vld [vmem:[%s4843_s0 + $0x410] ss:$20 sps:$4 sm:$0xff]   ;;  %v3589_v52 = vld [vmem:[%s4843_s0 + $0x198] ss:$20 sps:$4 sm:$0xff]  }
  0x63   :  { %1673 = vmatprep.subr.bf16.mxu0 %v3702_v0  ;;  %1502 = vmatprep.mubr.bf16.mxu1 %v3498_v54  ;;  %v3591_v53 = vld [vmem:[%s4843_s0 + $0x43c] ss:$20 sps:$4 sm:$0xff]   ;;  %v3593_v54 = vld [vmem:[%s4843_s0 + $0x1c4] ss:$20 sps:$4 sm:$0xff]  }
  0x64   :  { %3195 = vmatprep.subr.bf16.mxu1 %v3609_v61 }
  0x65   :  { %3196 = vmatpush3.bf16.msra.mxu1 %v3609_v61  ;;  %v3603_v61 = vld [vmem:[%s4843_s0 + $0x48c] ss:$20 sps:$4 sm:$0xff]  }
  0x66   :  { %1674 = vmatpush1.bf16.msra.mxu0 %v3495_v55  ;;  %v3595_v55 = vld [vmem:[%s4843_s0 + $0x438] ss:$20 sps:$4 sm:$0xff]  }
  0x67   :  { %1675 = vmatprep.subr.bf16.mxu0 %v3702_v0 }
  0x69   :  { %1439 = vmatmul.mubr.bf16.gmra.mrb[20].mxu0 %v3500_v56  ;;  %1503 = vmatmul.mubr.bf16.gmra.mrb[20].mxu1 %v3501_v57  ;;  %v3596_v56 = vld [vmem:[%s4843_s0 + $0x1c0] ss:$20 sps:$4 sm:$0xff]   ;;  %v3597_v57 = vld [vmem:[%s4843_s0 + $0x464] ss:$20 sps:$4 sm:$0xff]  }
  0x6a   :  { %1676 = vmatpush1.bf16.msra.mxu0 %v3502_v58  ;;  %1446 = vmatprep.mubr.bf16.mxu0 %v3504_v59  ;;  %v3599_v58 = vld [vmem:[%s4843_s0 + $0x1ec] ss:$20 sps:$4 sm:$0xff]  }
  0x6b   :  { %1677 = vmatprep.subr.bf16.mxu0 %v3702_v0  ;;  %1510 = vmatprep.mubr.bf16.mxu1 %v3506_v60  ;;  %v3601_v59 = vld [vmem:[%s4843_s0 + $0x460] ss:$20 sps:$4 sm:$0xff]   ;;  %v3602_v60 = vld [vmem:[%s4843_s0 + $0x1e8] ss:$20 sps:$4 sm:$0xff]  }
  0x6e   :  { %1678 = vmatpush1.bf16.msra.mxu0 %v3503_v62  ;;  %v3605_v62 = vld [vmem:[%s4843_s0 + $0x214] ss:$20 sps:$4 sm:$0xff]  }
  0x6f   :  { %1679 = vmatprep.subr.bf16.mxu0 %v3702_v0 }
  0x71   :  { %1447 = vmatmul.mubr.bf16.gmra.mrb[24].mxu0 %v3508_v63  ;;  %1511 = vmatmul.mubr.bf16.gmra.mrb[24].mxu1 %v3509_v1  ;;  %v3607_v63 = vld [vmem:[%s4843_s0 + $0x488] ss:$20 sps:$4 sm:$0xff]   ;;  %v3608_v1 = vld [vmem:[%s4843_s0 + $0x210] ss:$20 sps:$4 sm:$0xff]  }
  0x72   :  { %1680 = vmatpush1.bf16.msra.mxu0 %v3510_v2  ;;  %1454 = vmatprep.mubr.bf16.mxu0 %v3513_v3  ;;  %v3610_v2 = vld [vmem:[%s4843_s0 + $0x4b4] ss:$20 sps:$4 sm:$0xff]   ;;  %v3612_v3 = vld [vmem:[%s4843_s0 + $0x23c] ss:$20 sps:$4 sm:$0xff]  }
  0x73   :  { %1681 = vmatprep.subr.bf16.mxu0 %v3702_v0  ;;  %1518 = vmatprep.mubr.bf16.mxu1 %v3515_v4  ;;  %v3614_v4 = vld [vmem:[%s4843_s0 + $0x4b0] ss:$20 sps:$4 sm:$0xff]  }
  0x76   :  { %1682 = vmatpush1.bf16.msra.mxu0 %v3512_v5  ;;  %v3615_v5 = vld [vmem:[%s4843_s0 + $0x238] ss:$20 sps:$4 sm:$0xff]  }
  0x77   :  { %1683 = vmatprep.subr.bf16.mxu0 %v3702_v0 }
  0x79   :  { %1455 = vmatmul.mubr.bf16.gmra.mrb[28].mxu0 %v3517_v6  ;;  %1519 = vmatmul.mubr.bf16.gmra.mrb[28].mxu1 %v3518_v7  ;;  %v3616_v6 = vld [vmem:[%s4843_s0 + $0x4dc] ss:$20 sps:$4 sm:$0xff]   ;;  %v3618_v7 = vld [vmem:[%s4843_s0 + $0x264] ss:$20 sps:$4 sm:$0xff]  }
  0x7a   :  { %1684 = vmatpush1.bf16.msra.mxu0 %v3519_v8  ;;  %1526 = vmatprep.mubr.bf16.mxu1 %v3521_v9  ;;  %v3620_v8 = vld [vmem:[%s4843_s0 + $0x4d8] ss:$20 sps:$4 sm:$0xff]   ;;  %v3621_v9 = vld [vmem:[%s4843_s0 + $0x260] ss:$20 sps:$4 sm:$0xff]  }
  0x7b   :  { %1685 = vmatprep.subr.bf16.mxu0 %v3702_v0  ;;  %1687 = vmatprep.mubr.bf16.mxu0 %v3525_v10  ;;  %v3531_v0 = vld [vmem:[%s4843_s0 + $0x2a8] ss:$20 sps:$4 sm:$0xff]   ;;  %v3622_v10 = vld [vmem:[%s4843_s0 + $0x28c] ss:$20 sps:$4 sm:$0xff]  }
  0x7e   :  { %1686 = vmatpush1.bf16.msra.mxu0 %v3520_v11  ;;  %v3624_v11 = vld [vmem:[%s4843_s0 + $0x10] ss:$20 sps:$4 sm:$0xff]  }
  0x81   :  { %1527 = vmatmul.mubr.bf16.gmra.mrb[32].mxu1 %v3526_v13  ;;  %1688 = vmatmul.mubr.bf16.vlgmr.msra.gmra.mrb[0].mxu0 %v3523_v12  ;;  %v3625_v12 = vld [vmem:[%s4843_s0 + $0x288] ss:$20 sps:$4 sm:$0xff]   ;;  %v3626_v13 = vld [vmem:[%s4843_s0 + $0x38] ss:$20 sps:$4 sm:$0xff]  }
  0x82   :  { %1534 = vmatprep.mubr.bf16.mxu1 %v3527_v14  ;;  %1695 = vmatprep.mubr.bf16.mxu0 %v3529_v15  ;;  %v3627_v14 = vld [vmem:[%s4843_s0 + $0x2b4] ss:$20 sps:$4 sm:$0xff]  }
  0x83   :  { %v3629_v15 = vld [vmem:[%s4843_s0 + $0x60] ss:$20 sps:$4 sm:$0xff]  }
  0x89   :  { %1535 = vmatmul.mubr.bf16.gmra.mrb[36].mxu1 %v3531_v0  ;;  %1696 = vmatmul.mubr.bf16.gmra.mrb[4].mxu0 %v3532_v16  ;;  %v3630_v0 = vld [vmem:[%s4843_s0 + $0x2b0] ss:$20 sps:$4 sm:$0xff]   ;;  %v3631_v16 = vld [vmem:[%s4843_s0 + $0x88] ss:$20 sps:$4 sm:$0xff]  }
  0x8a   :  { %1542 = vmatprep.mubr.bf16.mxu1 %v3534_v17  ;;  %1703 = vmatprep.mubr.bf16.mxu0 %v3536_v18  ;;  %v3632_v17 = vld [vmem:[%s4843_s0 + $0x2dc] ss:$20 sps:$4 sm:$0xff]  }
  0x8b   :  { %v3634_v18 = vld [vmem:[%s4843_s0 + $0xb0] ss:$20 sps:$4 sm:$0xff]  }
  0x91   :  { %1543 = vmatmul.mubr.bf16.gmra.mrb[40].mxu1 %v3538_v19  ;;  %1704 = vmatmul.mubr.bf16.gmra.mrb[8].mxu0 %v3539_v20  ;;  %v3635_v19 = vld [vmem:[%s4843_s0 + $0x2d8] ss:$20 sps:$4 sm:$0xff]  }
  0x92   :  { %1550 = vmatprep.mubr.bf16.mxu1 %v3540_v21  ;;  %1711 = vmatprep.mubr.bf16.mxu0 %v3542_v22  ;;  %v3636_v20 = vld [vmem:[%s4843_s0 + $0xd8] ss:$20 sps:$4 sm:$0xff]   ;;  %v3639_v22 = vld [vmem:[%s4843_s0 + $0x100] ss:$20 sps:$4 sm:$0xff]  }
  0x93   :  { %v3637_v21 = vld [vmem:[%s4843_s0 + $0x304] ss:$20 sps:$4 sm:$0xff]  }
  0x99   :  { %1551 = vmatmul.mubr.bf16.gmra.mrb[44].mxu1 %v3544_v23  ;;  %1712 = vmatmul.mubr.bf16.gmra.mrb[12].mxu0 %v3545_v24 }
  0x9a   :  { %1558 = vmatprep.mubr.bf16.mxu1 %v3546_v25  ;;  %1719 = vmatprep.mubr.bf16.mxu0 %v3548_v26  ;;  %v3640_v25 = vld [vmem:[%s4843_s0 + $0x300] ss:$20 sps:$4 sm:$0xff]   ;;  %v3641_v26 = vld [vmem:[%s4843_s0 + $0x128] ss:$20 sps:$4 sm:$0xff]  }
  0xa1   :  { %1559 = vmatmul.mubr.bf16.gmra.mrb[48].mxu1 %v3550_v27  ;;  %1720 = vmatmul.mubr.bf16.gmra.mrb[16].mxu0 %v3551_v28  ;;  %v3642_v28 = vld [vmem:[%s4843_s0 + $0x32c] ss:$20 sps:$4 sm:$0xff]  }
  0xa2   :  { %1566 = vmatprep.mubr.bf16.mxu1 %v3553_v29  ;;  %1727 = vmatprep.mubr.bf16.mxu0 %v3555_v30  ;;  %v3644_v29 = vld [vmem:[%s4843_s0 + $0x150] ss:$20 sps:$4 sm:$0xff]  }
  0xa9   :  { %1567 = vmatmul.mubr.bf16.gmra.mrb[52].mxu1 %v3557_v31  ;;  %1728 = vmatmul.mubr.bf16.gmra.mrb[20].mxu0 %v3558_v32 }
  0xaa   :  { %1574 = vmatprep.mubr.bf16.mxu1 %v3559_v33  ;;  %1735 = vmatprep.mubr.bf16.mxu0 %v3561_v34  ;;  %v3645_v33 = vld [vmem:[%s4843_s0 + $0x328] ss:$20 sps:$4 sm:$0xff]   ;;  %v3646_v34 = vld [vmem:[%s4843_s0 + $0x178] ss:$20 sps:$4 sm:$0xff]  }
  0xb1   :  { %1575 = vmatmul.mubr.bf16.gmra.mrb[56].mxu1 %v3563_v35  ;;  %1736 = vmatmul.mubr.bf16.gmra.mrb[24].mxu0 %v3564_v36  ;;  %v3647_v36 = vld [vmem:[%s4843_s0 + $0x354] ss:$20 sps:$4 sm:$0xff]  }
  0xb2   :  { %1582 = vmatprep.mubr.bf16.mxu1 %v3565_v37  ;;  %1743 = vmatprep.mubr.bf16.mxu0 %v3567_v38  ;;  %v3649_v37 = vld [vmem:[%s4843_s0 + $0x1a0] ss:$20 sps:$4 sm:$0xff]  }
  0xb9   :  { %1583 = vmatmul.mubr.bf16.gmra.mrb[60].mxu1 %v3569_v39  ;;  %1744 = vmatmul.mubr.bf16.gmra.mrb[28].mxu0 %v3570_v40 }
  0xba   :  { %1590 = vmatprep.mubr.bf16.mxu1 %v3572_v41  ;;  %1751 = vmatprep.mubr.bf16.mxu0 %v3574_v42  ;;  %v3650_v41 = vld [vmem:[%s4843_s0 + $0x350] ss:$20 sps:$4 sm:$0xff]   ;;  %v3651_v42 = vld [vmem:[%s4843_s0 + $0x1c8] ss:$20 sps:$4 sm:$0xff]  }
  0xc1   :  { %1591 = vmatmul.mubr.bf16.gmra.mrb[64].mxu1 %v3576_v43  ;;  %1752 = vmatmul.mubr.bf16.gmra.mrb[32].mxu0 %v3577_v44  ;;  %v3652_v44 = vld [vmem:[%s4843_s0 + $0x37c] ss:$20 sps:$4 sm:$0xff]  }
  0xc2   :  { %1598 = vmatprep.mubr.bf16.mxu1 %v3578_v45  ;;  %1759 = vmatprep.mubr.bf16.mxu0 %v3580_v46  ;;  %v3654_v45 = vld [vmem:[%s4843_s0 + $0x1f0] ss:$20 sps:$4 sm:$0xff]  }
  0xc9   :  { %1599 = vmatmul.mubr.bf16.gmra.mrb[68].mxu1 %v3582_v47  ;;  %1760 = vmatmul.mubr.bf16.gmra.mrb[36].mxu0 %v3583_v48 }
  0xca   :  { %1606 = vmatprep.mubr.bf16.mxu1 %v3584_v49  ;;  %1767 = vmatprep.mubr.bf16.mxu0 %v3586_v50  ;;  %v3655_v49 = vld [vmem:[%s4843_s0 + $0x378] ss:$20 sps:$4 sm:$0xff]  }
  0xcb   :  { %v3656_v50 = vld [vmem:[%s4843_s0 + $0x218] ss:$20 sps:$4 sm:$0xff]  }
  0xd1   :  { %1607 = vmatmul.mubr.bf16.gmra.mrb[72].mxu1 %v3588_v51  ;;  %1768 = vmatmul.mubr.bf16.gmra.mrb[40].mxu0 %v3589_v52  ;;  %v3657_v52 = vld [vmem:[%s4843_s0 + $0x3a4] ss:$20 sps:$4 sm:$0xff]  }
  0xd2   :  { %1614 = vmatprep.mubr.bf16.mxu1 %v3591_v53  ;;  %1775 = vmatprep.mubr.bf16.mxu0 %v3593_v54  ;;  %v3659_v53 = vld [vmem:[%s4843_s0 + $0x240] ss:$20 sps:$4 sm:$0xff]  }
  0xd9   :  { %1615 = vmatmul.mubr.bf16.gmra.mrb[76].mxu1 %v3595_v55  ;;  %1776 = vmatmul.mubr.bf16.gmra.mrb[44].mxu0 %v3596_v56 }
  0xda   :  { %1622 = vmatprep.mubr.bf16.mxu1 %v3597_v57  ;;  %1783 = vmatprep.mubr.bf16.mxu0 %v3599_v58  ;;  %v3660_v57 = vld [vmem:[%s4843_s0 + $0x3a0] ss:$20 sps:$4 sm:$0xff]   ;;  %v3661_v58 = vld [vmem:[%s4843_s0 + $0x268] ss:$20 sps:$4 sm:$0xff]  }
  0xe1   :  { %1623 = vmatmul.mubr.bf16.gmra.mrb[80].mxu1 %v3601_v59  ;;  %1784 = vmatmul.mubr.bf16.gmra.mrb[48].mxu0 %v3602_v60  ;;  %v3662_v60 = vld [vmem:[%s4843_s0 + $0x3cc] ss:$20 sps:$4 sm:$0xff]  }
  0xe2   :  { %1630 = vmatprep.mubr.bf16.mxu1 %v3603_v61  ;;  %1791 = vmatprep.mubr.bf16.mxu0 %v3605_v62  ;;  %v3664_v61 = vld [vmem:[%s4843_s0 + $0x290] ss:$20 sps:$4 sm:$0xff]  }
  0xe9   :  { %1631 = vmatmul.mubr.bf16.gmra.mrb[84].mxu1 %v3607_v63  ;;  %1792 = vmatmul.mubr.bf16.gmra.mrb[52].mxu0 %v3608_v1 }
  0xea   :  { %1638 = vmatprep.mubr.bf16.mxu1 %v3610_v2  ;;  %1799 = vmatprep.mubr.bf16.mxu0 %v3612_v3  ;;  %v3665_v2 = vld [vmem:[%s4843_s0 + $0x3c8] ss:$20 sps:$4 sm:$0xff]   ;;  %v3666_v3 = vld [vmem:[%s4843_s0 + $0x2b8] ss:$20 sps:$4 sm:$0xff]  }
  0xf1   :  { %1639 = vmatmul.mubr.bf16.gmra.mrb[88].mxu1 %v3614_v4  ;;  %1800 = vmatmul.mubr.bf16.gmra.mrb[56].mxu0 %v3615_v5  ;;  %v3667_v5 = vld [vmem:[%s4843_s0 + $0x3f4] ss:$20 sps:$4 sm:$0xff]  }
  0xf2   :  { %1646 = vmatprep.mubr.bf16.mxu1 %v3616_v6  ;;  %1807 = vmatprep.mubr.bf16.mxu0 %v3618_v7  ;;  %v3669_v6 = vld [vmem:[%s4843_s0 + $0x2e0] ss:$20 sps:$4 sm:$0xff]  }
  0xf9   :  { %1647 = vmatmul.mubr.bf16.gmra.mrb[92].mxu1 %v3620_v8  ;;  %1808 = vmatmul.mubr.bf16.gmra.mrb[60].mxu0 %v3621_v9 }
  0xfa   :  { %1815 = vmatprep.mubr.bf16.mxu0 %v3622_v10  ;;  %3197 = vmatprep.mubr.bf16.mxu1 %v3624_v11  ;;  %v3670_v10 = vld [vmem:[%s4843_s0 + $0x3f0] ss:$20 sps:$4 sm:$0xff]   ;;  %v3671_v11 = vld [vmem:[%s4843_s0 + $0x308] ss:$20 sps:$4 sm:$0xff]  }
 0x101   :  { %1816 = vmatmul.mubr.bf16.gmra.mrb[64].mxu0 %v3625_v12  ;;  %3198 = vmatmul.mubr.bf16.vlgmr.msra.gmra.mrb[96].mxu1 %v3626_v13  ;;  %v3672_v13 = vld [vmem:[%s4843_s0 + $0x41c] ss:$20 sps:$4 sm:$0xff]  }
 0x102   :  { %1823 = vmatprep.mubr.bf16.mxu0 %v3627_v14  ;;  %3201 = vmatprep.mubr.bf16.mxu1 %v3629_v15  ;;  %v3674_v14 = vld [vmem:[%s4843_s0 + $0x330] ss:$20 sps:$4 sm:$0xff]  }
 0x109   :  { %1824 = vmatmul.mubr.bf16.gmra.mrb[68].mxu0 %v3630_v0  ;;  %3202 = vmatmul.mubr.bf16.gmra.mrb[100].mxu1 %v3631_v16 }
 0x10a   :  { %1831 = vmatprep.mubr.bf16.mxu0 %v3632_v17  ;;  %3205 = vmatprep.mubr.bf16.mxu1 %v3634_v18  ;;  %v3675_v17 = vld [vmem:[%s4843_s0 + $0x418] ss:$20 sps:$4 sm:$0xff]  }
 0x10b   :  { %v3676_v18 = vld [vmem:[%s4843_s0 + $0x358] ss:$20 sps:$4 sm:$0xff]  }
 0x111   :  { %1832 = vmatmul.mubr.bf16.gmra.mrb[72].mxu0 %v3635_v19  ;;  %3206 = vmatmul.mubr.bf16.gmra.mrb[104].mxu1 %v3636_v20  ;;  %v3677_v20 = vld [vmem:[%s4843_s0 + $0x444] ss:$20 sps:$4 sm:$0xff]  }
 0x112   :  { %1839 = vmatprep.mubr.bf16.mxu0 %v3637_v21  ;;  %3209 = vmatprep.mubr.bf16.mxu1 %v3639_v22  ;;  %v3679_v21 = vld [vmem:[%s4843_s0 + $0x380] ss:$20 sps:$4 sm:$0xff]  }
 0x114   :  { %v4221_v23 = vpop.f32.mrb[0].mxu1 }
 0x115   :  { %v1466_v24 = vpop.f32.mrb[1].mxu1 }
 0x116   :  { %v4229_v27 = vpop.f32.mrb[2].mxu1 }
 0x117   :  { %v1469_v30 = vpop.f32.mrb[3].mxu1 }
 0x118   :  { %v3681_v30 = vld [vmem:[%s4843_s0 + $0x3a8] ss:$20 sps:$4 sm:$0xff]  }
 0x119   :  { %1840 = vmatmul.mubr.bf16.gmra.mrb[76].mxu0 %v3640_v25  ;;  %3210 = vmatmul.mubr.bf16.gmra.mrb[108].mxu1 %v3641_v26 }
 0x11a   :  { %1847 = vmatprep.mubr.bf16.mxu0 %v3642_v28  ;;  %3213 = vmatprep.mubr.bf16.mxu1 %v3644_v29  ;;  %v3680_v29 = vld [vmem:[%s4843_s0 + $0x440] ss:$20 sps:$4 sm:$0xff]  }
 0x11c   :  { %v4237_v31 = vpop.f32.mrb[4].mxu1 }
 0x11d   :  { %v1474_v32 = vpop.f32.mrb[5].mxu1 }
 0x11e   :  { %v4245_v35 = vpop.f32.mrb[6].mxu1 }
 0x11f   :  { %v1477_v38 = vpop.f32.mrb[7].mxu1 }
 0x121   :  { %1848 = vmatmul.mubr.bf16.gmra.mrb[80].mxu0 %v3645_v33  ;;  %3214 = vmatmul.mubr.bf16.gmra.mrb[112].mxu1 %v3646_v34  ;;  %v3682_v34 = vld [vmem:[%s4843_s0 + $0x46c] ss:$20 sps:$4 sm:$0xff]  }
 0x122   :  { %1855 = vmatprep.mubr.bf16.mxu0 %v3647_v36  ;;  %3217 = vmatprep.mubr.bf16.mxu1 %v3649_v37  ;;  %v3684_v36 = vld [vmem:[%s4843_s0 + $0x3d0] ss:$20 sps:$4 sm:$0xff]  }
 0x124   :  { %v4253_v39 = vpop.f32.mrb[8].mxu1 }
 0x125   :  { %v1482_v40 = vpop.f32.mrb[9].mxu1 }
 0x126   :  { %v4261_v43 = vpop.f32.mrb[10].mxu1 }
 0x127   :  { %v1485_v46 = vpop.f32.mrb[11].mxu1 }
 0x128   :  { %v3686_v46 = vld [vmem:[%s4843_s0 + $0x3f8] ss:$20 sps:$4 sm:$0xff]  }
 0x129   :  { %1856 = vmatmul.mubr.bf16.gmra.mrb[84].mxu0 %v3650_v41  ;;  %3218 = vmatmul.mubr.bf16.gmra.mrb[116].mxu1 %v3651_v42 }
 0x12a   :  { %1863 = vmatprep.mubr.bf16.mxu0 %v3652_v44  ;;  %3221 = vmatprep.mubr.bf16.mxu1 %v3654_v45  ;;  %v3685_v45 = vld [vmem:[%s4843_s0 + $0x468] ss:$20 sps:$4 sm:$0xff]  }
 0x12c   :  { %v4269_v47 = vpop.f32.mrb[12].mxu1 }
 0x12d   :  { %v1490_v48 = vpop.f32.mrb[13].mxu1 }
 0x12e   :  { %v4277_v51 = vpop.f32.mrb[14].mxu1 }
 0x12f   :  { %v1493_v54 = vpop.f32.mrb[15].mxu1 }
 0x131   :  { %1864 = vmatmul.mubr.bf16.gmra.mrb[88].mxu0 %v3655_v49  ;;  %3222 = vmatmul.mubr.bf16.gmra.mrb[120].mxu1 %v3656_v50  ;;  %v3687_v50 = vld [vmem:[%s4843_s0 + $0x494] ss:$20 sps:$4 sm:$0xff]  }
 0x132   :  { %1871 = vmatprep.mubr.bf16.mxu0 %v3657_v52  ;;  %3225 = vmatprep.mubr.bf16.mxu1 %v3659_v53  ;;  %v3689_v52 = vld [vmem:[%s4843_s0 + $0x420] ss:$20 sps:$4 sm:$0xff]  }
 0x134   :  { %v4285_v55 = vpop.f32.mrb[16].mxu1 }
 0x135   :  { %v1498_v56 = vpop.f32.mrb[17].mxu1 }
 0x136   :  { %v4293_v59 = vpop.f32.mrb[18].mxu1 }
 0x137   :  { %v1501_v62 = vpop.f32.mrb[19].mxu1 }
 0x138   :  { %v3691_v62 = vld [vmem:[%s4843_s0 + $0x448] ss:$20 sps:$4 sm:$0xff]  }
 0x139   :  { %1872 = vmatmul.mubr.bf16.gmra.mrb[92].mxu0 %v3660_v57  ;;  %3226 = vmatmul.mubr.bf16.gmra.mrb[124].mxu1 %v3661_v58 }
 0x13a   :  { %1879 = vmatprep.mubr.bf16.mxu0 %v3662_v60  ;;  %3229 = vmatprep.mubr.bf16.mxu1 %v3664_v61  ;;  %v3690_v61 = vld [vmem:[%s4843_s0 + $0x490] ss:$20 sps:$4 sm:$0xff]  }
 0x13c   :  { %v4301_v63 = vpop.f32.mrb[20].mxu1 }
 0x13d   :  { %v1506_v1 = vpop.f32.mrb[21].mxu1 }
 0x13e   :  { %v4309_v4 = vpop.f32.mrb[22].mxu1 }
 0x13f   :  { %v1509_v7 = vpop.f32.mrb[23].mxu1 }
 0x141   :  { %1880 = vmatmul.mubr.bf16.gmra.mrb[96].mxu0 %v3665_v2  ;;  %3230 = vmatmul.mubr.bf16.gmra.mrb[128].mxu1 %v3666_v3  ;;  %v3692_v3 = vld [vmem:[%s4843_s0 + $0x4bc] ss:$20 sps:$4 sm:$0xff]  }
 0x142   :  { %1887 = vmatprep.mubr.bf16.mxu0 %v3667_v5  ;;  %3233 = vmatprep.mubr.bf16.mxu1 %v3669_v6  ;;  %v3694_v5 = vld [vmem:[%s4843_s0 + $0x470] ss:$20 sps:$4 sm:$0xff]  }
 0x144   :  { %v4317_v8 = vpop.f32.mrb[24].mxu1 }
 0x145   :  { %v1514_v9 = vpop.f32.mrb[25].mxu1 }
 0x146   :  { %v4325_v12 = vpop.f32.mrb[26].mxu1 }
 0x147   :  { %v1517_v15 = vpop.f32.mrb[27].mxu1 }
 0x148   :  { %v3696_v15 = vld [vmem:[%s4843_s0 + $0x498] ss:$20 sps:$4 sm:$0xff]  }
 0x149   :  { %1888 = vmatmul.mubr.bf16.gmra.mrb[100].mxu0 %v3670_v10  ;;  %3234 = vmatmul.mubr.bf16.gmra.mrb[132].mxu1 %v3671_v11 }
 0x14a   :  { %1895 = vmatprep.mubr.bf16.mxu0 %v3672_v13  ;;  %3237 = vmatprep.mubr.bf16.mxu1 %v3674_v14  ;;  %v3695_v14 = vld [vmem:[%s4843_s0 + $0x4b8] ss:$20 sps:$4 sm:$0xff]  }
 0x14c   :  { %v4333_v0 = vpop.f32.mrb[28].mxu1 }
 0x14d   :  { %v1522_v16 = vpop.f32.mrb[29].mxu1 }
 0x14e   :  { %v4341_v19 = vpop.f32.mrb[30].mxu1 }
 0x14f   :  { %v1525_v22 = vpop.f32.mrb[31].mxu1 }
 0x151   :  { %1896 = vmatmul.mubr.bf16.gmra.mrb[104].mxu0 %v3675_v17  ;;  %3238 = vmatmul.mubr.bf16.gmra.mrb[136].mxu1 %v3676_v18  ;;  %v3697_v18 = vld [vmem:[%s4843_s0 + $0x4e4] ss:$20 sps:$4 sm:$0xff]  }
 0x152   :  { %1903 = vmatprep.mubr.bf16.mxu0 %v3677_v20  ;;  %3241 = vmatprep.mubr.bf16.mxu1 %v3679_v21  ;;  %v3699_v20 = vld [vmem:[%s4843_s0 + $0x4c0] ss:$20 sps:$4 sm:$0xff]  }
 0x154   :  { %v4349_v24 = vpop.f32.mrb[32].mxu1  ;;  %v4351_v25 = vpop.f32.mrb[0].mxu0 }
 0x155   :  { %v1530_v26 = vpop.f32.mrb[33].mxu1  ;;  %v1691_v28 = vpop.f32.mrb[1].mxu0 }
 0x156   :  { %v4359_v32 = vpop.f32.mrb[34].mxu1  ;;  %v4361_v33 = vpop.f32.mrb[2].mxu0 }
 0x157   :  { %v1533_v37 = vpop.f32.mrb[35].mxu1  ;;  %v1694_v38 = vpop.f32.mrb[3].mxu0 }
 0x159   :  { %1904 = vmatmul.mubr.bf16.gmra.mrb[108].mxu0 %v3680_v29  ;;  %3242 = vmatmul.mubr.bf16.gmra.mrb[140].mxu1 %v3681_v30 }
 0x15a   :  { %1911 = vmatprep.mubr.bf16.mxu0 %v3682_v34  ;;  %3245 = vmatprep.mubr.bf16.mxu1 %v3684_v36  ;;  %v3700_v34 = vld [vmem:[%s4843_s0 + $0x4e0] ss:$20 sps:$4 sm:$0xff]   ;;  %v3701_v36 = vld [vmem:[%s4843_s0 + $0x4e8] ss:$20 sps:$4 sm:$0xff]  }
 0x15c   :  { %v4369_v40 = vpop.f32.mrb[36].mxu1  ;;  %v4371_v41 = vpop.f32.mrb[4].mxu0 }
 0x15d   :  { %v1538_v42 = vpop.f32.mrb[37].mxu1  ;;  %v1699_v44 = vpop.f32.mrb[5].mxu0 }
 0x15e   :  { %v4379_v48 = vpop.f32.mrb[38].mxu1  ;;  %v4381_v49 = vpop.f32.mrb[6].mxu0 }
 0x15f   :  { %v1541_v53 = vpop.f32.mrb[39].mxu1  ;;  %v1702_v54 = vpop.f32.mrb[7].mxu0 }
 0x161   :  { %1912 = vmatmul.mubr.bf16.gmra.mrb[112].mxu0 %v3685_v45  ;;  %3246 = vmatmul.mubr.bf16.gmra.mrb[144].mxu1 %v3686_v46 }
 0x162   :  { %1919 = vmatprep.mubr.bf16.mxu0 %v3687_v50  ;;  %3249 = vmatprep.mubr.bf16.mxu1 %v3689_v52 }
 0x164   :  { %v4389_v56 = vpop.f32.mrb[40].mxu1  ;;  %v4391_v57 = vpop.f32.mrb[8].mxu0 }
 0x165   :  { %v1546_v58 = vpop.f32.mrb[41].mxu1  ;;  %v1707_v60 = vpop.f32.mrb[9].mxu0 }
 0x166   :  { %v4399_v1 = vpop.f32.mrb[42].mxu1  ;;  %v4401_v2 = vpop.f32.mrb[10].mxu0 }
 0x167   :  { %v1549_v6 = vpop.f32.mrb[43].mxu1  ;;  %v1710_v7 = vpop.f32.mrb[11].mxu0 }
 0x169   :  { %1920 = vmatmul.mubr.bf16.gmra.mrb[116].mxu0 %v3690_v61  ;;  %3250 = vmatmul.mubr.bf16.gmra.mrb[148].mxu1 %v3691_v62 }
 0x16a   :  { %1927 = vmatprep.mubr.bf16.mxu0 %v3692_v3  ;;  %3253 = vmatprep.mubr.bf16.mxu1 %v3694_v5 }
 0x16c   :  { %v4409_v9 = vpop.f32.mrb[44].mxu1  ;;  %v4411_v10 = vpop.f32.mrb[12].mxu0 }
 0x16d   :  { %v1554_v11 = vpop.f32.mrb[45].mxu1  ;;  %v1715_v13 = vpop.f32.mrb[13].mxu0 }
 0x16e   :  { %v4419_v16 = vpop.f32.mrb[46].mxu1  ;;  %v4421_v17 = vpop.f32.mrb[14].mxu0 }
 0x16f   :  { %v1557_v21 = vpop.f32.mrb[47].mxu1  ;;  %v1718_v22 = vpop.f32.mrb[15].mxu0 }
 0x171   :  { %1928 = vmatmul.mubr.bf16.gmra.mrb[120].mxu0 %v3695_v14  ;;  %3254 = vmatmul.mubr.bf16.gmra.mrb[152].mxu1 %v3696_v15 }
 0x172   :  { %1935 = vmatprep.mubr.bf16.mxu0 %v3697_v18  ;;  %3257 = vmatprep.mubr.bf16.mxu1 %v3699_v20 }
 0x174   :  { %v4429_v26 = vpop.f32.mrb[48].mxu1  ;;  %v4431_v28 = vpop.f32.mrb[16].mxu0 }
 0x175   :  { %v1562_v29 = vpop.f32.mrb[49].mxu1  ;;  %v1723_v30 = vpop.f32.mrb[17].mxu0 }
 0x176   :  { %v4439_v37 = vpop.f32.mrb[50].mxu1  ;;  %v4441_v38 = vpop.f32.mrb[18].mxu0 }
 0x177   :  { %v1565_v42 = vpop.f32.mrb[51].mxu1  ;;  %v1726_v44 = vpop.f32.mrb[19].mxu0 }
 0x179   :  { %1936 = vmatmul.mubr.bf16.gmra.mrb[124].mxu0 %v3700_v34  ;;  %3258 = vmatmul.mubr.bf16.gmra.mrb[156].mxu1 %v3701_v36  ;;  %v4470_v34 = vld [vmem:[%s4844_s2] ss:$0 sm:$0xff] }
 0x17a   :  { %v1465_v36 = vadd.f32 %v4470_v34, %v4221_v23  ;;  %v1473_v23 = vadd.f32 %v4470_v34, %v4237_v31  ;;  %v1481_v31 = vadd.f32 %v4470_v34, %v4253_v39  ;;  %v1489_v39 = vadd.f32 %v4470_v34, %v4269_v47 }
 0x17b   :  { %v1497_v47 = vadd.f32 %v4470_v34, %v4285_v55  ;;  %v1505_v55 = vadd.f32 %v4470_v34, %v4301_v63  ;;  %v1513_v63 = vadd.f32 %v4470_v34, %v4317_v8  ;;  %v1521_v8 = vadd.f32 %v4470_v34, %v4333_v0 }
 0x17c   :  { %v4443_v45 = vpop.f32.mrb[52].mxu1  ;;  %v4445_v46 = vpop.f32.mrb[20].mxu0  ;;  %v1529_v0 = vadd.f32 %v4470_v34, %v4349_v24  ;;  %v3294_v24 = vadd.f32 %v4470_v34, %v4361_v33 }
 0x17d   :  { %v1570_v50 = vpop.f32.mrb[53].mxu1  ;;  %v1731_v52 = vpop.f32.mrb[21].mxu0 }
 0x17e   :  { %v4447_v53 = vpop.f32.mrb[54].mxu1  ;;  %v4449_v54 = vpop.f32.mrb[22].mxu0  ;;  %v1468_v50 = vadd.f32 %v4470_v34, %v4229_v27  ;;  %v1476_v27 = vadd.f32 %v4470_v34, %v4245_v35  ;;  %v1484_v35 = vadd.f32 %v4470_v34, %v4261_v43  ;;  %v1492_v43 = vadd.f32 %v4470_v34, %v4277_v51 }
 0x17f   :  { %v1573_v58 = vpop.f32.mrb[55].mxu1  ;;  %v1734_v60 = vpop.f32.mrb[23].mxu0  ;;  %v1500_v51 = vadd.f32 %v4470_v34, %v4293_v59  ;;  %v1508_v59 = vadd.f32 %v4470_v34, %v4309_v4  ;;  %v1516_v4 = vadd.f32 %v4470_v34, %v4325_v12  ;;  %v1524_v12 = vadd.f32 %v4470_v34, %v4341_v19 }
 0x180   :  { %v3293_v19 = vadd.f32 %v4470_v34, %v4351_v25 }
 0x184   :  { %v4451_v61 = vpop.f32.mrb[56].mxu1  ;;  %v4453_v62 = vpop.f32.mrb[24].mxu0 }
 0x185   :  { %v1578_v3 = vpop.f32.mrb[57].mxu1  ;;  %v1739_v5 = vpop.f32.mrb[25].mxu0 }
 0x186   :  { %v4455_v6 = vpop.f32.mrb[58].mxu1  ;;  %v4457_v7 = vpop.f32.mrb[26].mxu0 }
 0x187   :  { %v1581_v11 = vpop.f32.mrb[59].mxu1  ;;  %v1742_v13 = vpop.f32.mrb[27].mxu0 }
 0x18c   :  { %v4459_v14 = vpop.f32.mrb[60].mxu1  ;;  %v4461_v15 = vpop.f32.mrb[28].mxu0 }
 0x18d   :  { %v1586_v18 = vpop.f32.mrb[61].mxu1  ;;  %v1747_v20 = vpop.f32.mrb[29].mxu0 }
 0x18e   :  { %v4463_v21 = vpop.f32.mrb[62].mxu1  ;;  %v4465_v22 = vpop.f32.mrb[30].mxu0 }
 0x18f   :  { %v1589_v29 = vpop.f32.mrb[63].mxu1  ;;  %v1750_v30 = vpop.f32.mrb[31].mxu0 }
 0x194   :  { %v4474_v42 = vpop.f32.mrb[64].mxu1  ;;  %v1753_v44 = vpop.f32.mrb[32].mxu0 }
 0x195   :  { %4846 = vst [vmem:[#allocation2_spill] sm:$0xff] %v4474_v42  ;;  %v4478_v52 = vadd.f32 %v1753_v44, %v1465_v36  ;;  %v1594_v58 = vpop.f32.mrb[65].mxu1  ;;  %v1755_v60 = vpop.f32.mrb[33].mxu0 }
 0x196   :  { %v4480_v3 = vpop.f32.mrb[66].mxu1  ;;  %v1756_v5 = vpop.f32.mrb[34].mxu0 }
 0x197   :  { %4847 = vst [vmem:[#allocation3_spill] sm:$0xff] %v4480_v3  ;;  %v4482_v11 = vadd.f32 %v1756_v5, %v1468_v50  ;;  %v1597_v13 = vpop.f32.mrb[67].mxu1  ;;  %v1758_v18 = vpop.f32.mrb[35].mxu0 }
 0x19c   :  { %v4486_v20 = vpop.f32.mrb[68].mxu1  ;;  %v1761_v29 = vpop.f32.mrb[36].mxu0 }
 0x19d   :  { %4848 = vst [vmem:[#allocation4_spill] sm:$0xff] %v4486_v20  ;;  %v4490_v30 = vadd.f32 %v1761_v29, %v1473_v23  ;;  %v1602_v36 = vpop.f32.mrb[69].mxu1  ;;  %v1763_v44 = vpop.f32.mrb[37].mxu0 }
 0x19e   :  { %v4492_v58 = vpop.f32.mrb[70].mxu1  ;;  %v1764_v60 = vpop.f32.mrb[38].mxu0 }
 0x19f   :  { %4849 = vst [vmem:[#allocation5_spill] sm:$0xff] %v4492_v58  ;;  %v4494_v50 = vadd.f32 %v1764_v60, %v1476_v27  ;;  %v1605_v5 = vpop.f32.mrb[71].mxu1  ;;  %v1766_v13 = vpop.f32.mrb[39].mxu0 }
 0x1a4   :  { %v4498_v18 = vpop.f32.mrb[72].mxu1  ;;  %v1769_v20 = vpop.f32.mrb[40].mxu0 }
 0x1a5   :  { %4850 = vst [vmem:[#allocation6_spill] sm:$0xff] %v4498_v18  ;;  %v4502_v23 = vadd.f32 %v1769_v20, %v1481_v31  ;;  %v1610_v29 = vpop.f32.mrb[73].mxu1  ;;  %v1771_v36 = vpop.f32.mrb[41].mxu0 }
 0x1a6   :  { %v4504_v44 = vpop.f32.mrb[74].mxu1  ;;  %v1772_v58 = vpop.f32.mrb[42].mxu0 }
 0x1a7   :  { %4851 = vst [vmem:[#allocation7_spill] sm:$0xff] %v4504_v44  ;;  %v4506_v27 = vadd.f32 %v1772_v58, %v1484_v35  ;;  %v1613_v60 = vpop.f32.mrb[75].mxu1  ;;  %v1774_v5 = vpop.f32.mrb[43].mxu0 }
 0x1ac   :  { %v4510_v13 = vpop.f32.mrb[76].mxu1  ;;  %v1777_v18 = vpop.f32.mrb[44].mxu0 }
 0x1ad   :  { %4852 = vst [vmem:[#allocation8_spill] sm:$0xff] %v4510_v13  ;;  %v4514_v20 = vadd.f32 %v1777_v18, %v1489_v39  ;;  %v1618_v31 = vpop.f32.mrb[77].mxu1  ;;  %v1779_v29 = vpop.f32.mrb[45].mxu0 }
 0x1ae   :  { %v4516_v36 = vpop.f32.mrb[78].mxu1  ;;  %v1780_v44 = vpop.f32.mrb[46].mxu0 }
 0x1af   :  { %4853 = vst [vmem:[#allocation9_spill] sm:$0xff] %v4516_v36  ;;  %v4518_v58 = vadd.f32 %v1780_v44, %v1492_v43  ;;  %v1621_v35 = vpop.f32.mrb[79].mxu1  ;;  %v1782_v60 = vpop.f32.mrb[47].mxu0 }
 0x1b4   :  { %v4522_v5 = vpop.f32.mrb[80].mxu1  ;;  %v1785_v13 = vpop.f32.mrb[48].mxu0 }
 0x1b5   :  { %4854 = vst [vmem:[#allocation10_spill] sm:$0xff] %v4522_v5  ;;  %v4526_v18 = vadd.f32 %v1785_v13, %v1497_v47  ;;  %v1626_v39 = vpop.f32.mrb[81].mxu1  ;;  %v1787_v31 = vpop.f32.mrb[49].mxu0 }
 0x1b6   :  { %v4528_v29 = vpop.f32.mrb[82].mxu1  ;;  %v1788_v36 = vpop.f32.mrb[50].mxu0 }
 0x1b7   :  { %4855 = vst [vmem:[#allocation11_spill] sm:$0xff] %v4528_v29  ;;  %v4530_v44 = vadd.f32 %v1788_v36, %v1500_v51  ;;  %v1629_v43 = vpop.f32.mrb[83].mxu1  ;;  %v1790_v35 = vpop.f32.mrb[51].mxu0 }
 0x1bc   :  { %v4534_v60 = vpop.f32.mrb[84].mxu1  ;;  %v1793_v5 = vpop.f32.mrb[52].mxu0 }
 0x1bd   :  { %4856 = vst [vmem:[#allocation12_spill] sm:$0xff] %v4534_v60  ;;  %v4538_v13 = vadd.f32 %v1793_v5, %v1505_v55  ;;  %v1634_v47 = vpop.f32.mrb[85].mxu1  ;;  %v1795_v39 = vpop.f32.mrb[53].mxu0 }
 0x1be   :  { %v4540_v31 = vpop.f32.mrb[86].mxu1  ;;  %v1796_v29 = vpop.f32.mrb[54].mxu0 }
 0x1bf   :  { %4857 = vst [vmem:[#allocation13_spill] sm:$0xff] %v4540_v31  ;;  %v4542_v36 = vadd.f32 %v1796_v29, %v1508_v59  ;;  %v1637_v51 = vpop.f32.mrb[87].mxu1  ;;  %v1798_v43 = vpop.f32.mrb[55].mxu0 }
 0x1c4   :  { %v4546_v35 = vpop.f32.mrb[88].mxu1  ;;  %v1801_v60 = vpop.f32.mrb[56].mxu0 }
 0x1c5   :  { %4858 = vst [vmem:[#allocation14_spill] sm:$0xff] %v4546_v35  ;;  %v4550_v5 = vadd.f32 %v1801_v60, %v1513_v63  ;;  %v1642_v55 = vpop.f32.mrb[89].mxu1  ;;  %v1803_v47 = vpop.f32.mrb[57].mxu0 }
 0x1c6   :  { %v4552_v39 = vpop.f32.mrb[90].mxu1  ;;  %v1804_v31 = vpop.f32.mrb[58].mxu0 }
 0x1c7   :  { %4859 = vst [vmem:[#allocation15_spill] sm:$0xff] %v4550_v5  ;;  %4860 = vst [vmem:[#allocation16_spill] sm:$0xff] %v4552_v39  ;;  %v4554_v29 = vadd.f32 %v1804_v31, %v1516_v4  ;;  %v1645_v59 = vpop.f32.mrb[91].mxu1  ;;  %v1806_v51 = vpop.f32.mrb[59].mxu0 }
 0x1c8   :  { %v3295_v51 = vadd.f32 %v4470_v34, %v4371_v41 }
 0x1c9   :  { %4861 = vst [vmem:[#allocation17_spill] sm:$0xff] %v4554_v29 }
 0x1cc   :  { %v4558_v43 = vpop.f32.mrb[92].mxu1  ;;  %v1809_v35 = vpop.f32.mrb[60].mxu0 }
 0x1cd   :  { %4862 = vst [vmem:[#allocation18_spill] sm:$0xff] %v4558_v43  ;;  %v4562_v60 = vadd.f32 %v1809_v35, %v1521_v8  ;;  %v1650_v63 = vpop.f32.mrb[93].mxu1  ;;  %v1811_v55 = vpop.f32.mrb[61].mxu0 }
 0x1ce   :  { %v4564_v47 = vpop.f32.mrb[94].mxu1  ;;  %v1812_v39 = vpop.f32.mrb[62].mxu0  ;;  %v1532_v63 = vadd.f32 %v4470_v34, %v4359_v32 }
 0x1cf   :  { %4863 = vst [vmem:[#allocation19_spill] sm:$0xff] %v4564_v47  ;;  %v4566_v31 = vadd.f32 %v1812_v39, %v1524_v12  ;;  %v1653_v4 = vpop.f32.mrb[95].mxu1  ;;  %v1814_v59 = vpop.f32.mrb[63].mxu0  ;;  %v3296_v39 = vadd.f32 %v4470_v34, %v4381_v49 }
 0x1d1   :  { %4864 = vst [vmem:[#allocation20_spill] sm:$0xff] %v4566_v31 }
 0x1d4   :  { %v1817_v35 = vpop.f32.mrb[64].mxu0  ;;  %v3199_v8 = vpop.f32.mrb[96].mxu1 }
 0x1d5   :  { %v4578_v12 = vadd.f32 %v1817_v35, %v1529_v0  ;;  %v1987_v55 = vadd.f32 %v3295_v51, %v3199_v8  ;;  %v1819_v4 = vpop.f32.mrb[65].mxu0  ;;  %v1978_v59 = vpop.f32.mrb[97].mxu1  ;;  %v1537_v51 = vadd.f32 %v4470_v34, %v4369_v40  ;;  %v3299_v35 = vadd.f32 %v4470_v34, %v4411_v10 }
 0x1d6   :  { %v1979_v41 = vadd.f32 %v3293_v19, %v1978_v59  ;;  %v1820_v47 = vpop.f32.mrb[66].mxu0  ;;  %v3200_v43 = vpop.f32.mrb[98].mxu1  ;;  %v3297_v19 = vadd.f32 %v4470_v34, %v4391_v57  ;;  %v3298_v57 = vadd.f32 %v4470_v34, %v4401_v2  ;;  %v1545_v2 = vadd.f32 %v4470_v34, %v4389_v56 }
 0x1d7   :  { %v4582_v25 = vadd.f32 %v1820_v47, %v1532_v63  ;;  %v1990_v3 = vadd.f32 %v3296_v39, %v3200_v43  ;;  %v1822_v42 = vpop.f32.mrb[67].mxu0  ;;  %v1981_v29 = vpop.f32.mrb[99].mxu1  ;;  %v2235_v31 = vmax.f32 %v1987_v55, 0.0 }
 0x1d8   :  { %v1982_v32 = vadd.f32 %v3294_v24, %v1981_v29  ;;  %v2233_v49 = vmax.f32 %v1979_v41, 0.0  ;;  %v1540_v42 = vadd.f32 %v4470_v34, %v4379_v48 }
 0x1d9   :  { %v2236_v5 = vmax.f32 %v1990_v3, 0.0  ;;  %v3300_v3 = vadd.f32 %v4470_v34, %v4421_v17 }
 0x1da   :  { %v2234_v0 = vmax.f32 %v1982_v32, 0.0 }
 0x1db   :  { %v2958_v33 = vpack.c.bf16 %v2236_v5, %v2235_v31 }
 0x1dc   :  { %v2953_v47 = vpack.c.bf16 %v2234_v0, %v2233_v49  ;;  %v1825_v8 = vpop.f32.mrb[68].mxu0  ;;  %v3203_v43 = vpop.f32.mrb[100].mxu1  ;;  %v3303_v0 = vadd.f32 %v4470_v34, %v4445_v46 }
 0x1dd   :  { %3110 = vst [vmem:[%s4845_s3 + $0x8] sm:$0xff] %v2958_v33   ;;  %v4597_v40 = vadd.f32 %v1825_v8, %v1537_v51  ;;  %v2003_v10 = vadd.f32 %v3299_v35, %v3203_v43  ;;  %v1827_v5 = vpop.f32.mrb[69].mxu0  ;;  %v1994_v29 = vpop.f32.mrb[101].mxu1  ;;  %v3301_v35 = vadd.f32 %v4470_v34, %v4431_v28  ;;  %v1548_v8 = vadd.f32 %v4470_v34, %v4399_v1 }
 0x1de   :  { %2954 = vst [vmem:[%s4845_s3] sm:$0xff] %v2953_v47   ;;  %v1995_v48 = vadd.f32 %v3297_v19, %v1994_v29  ;;  %v1828_v31 = vpop.f32.mrb[70].mxu0  ;;  %v3204_v63 = vpop.f32.mrb[102].mxu1  ;;  %v3304_v43 = vadd.f32 %v4470_v34, %v4449_v54  ;;  %v3302_v28 = vadd.f32 %v4470_v34, %v4441_v38  ;;  %v1553_v38 = vadd.f32 %v4470_v34, %v4409_v9 }
 0x1df   :  { %v4604_v17 = vadd.f32 %v1828_v31, %v1540_v42  ;;  %v2006_v39 = vadd.f32 %v3300_v3, %v3204_v63  ;;  %v1830_v55 = vpop.f32.mrb[71].mxu0  ;;  %v1997_v4 = vpop.f32.mrb[103].mxu1  ;;  %v2239_v24 = vmax.f32 %v2003_v10, 0.0 }
 0x1e0   :  { %v1998_v59 = vadd.f32 %v3298_v57, %v1997_v4  ;;  %v2237_v32 = vmax.f32 %v1995_v48, 0.0 }
 0x1e1   :  { %v2240_v41 = vmax.f32 %v2006_v39, 0.0 }
 0x1e2   :  { %v2238_v49 = vmax.f32 %v1998_v59, 0.0  ;;  %v3307_v59 = vadd.f32 %v4470_v34, %v4461_v15 }
 0x1e3   :  { %v2968_v51 = vpack.c.bf16 %v2240_v41, %v2239_v24  ;;  %v3305_v41 = vadd.f32 %v4470_v34, %v4453_v62  ;;  %v3306_v62 = vadd.f32 %v4470_v34, %v4457_v7  ;;  %v1561_v7 = vadd.f32 %v4470_v34, %v4429_v26 }
 0x1e4   :  { %v2963_v33 = vpack.c.bf16 %v2238_v49, %v2237_v32  ;;  %v1833_v19 = vpop.f32.mrb[72].mxu0  ;;  %v3207_v47 = vpop.f32.mrb[104].mxu1 }
 0x1e5   :  { %3112 = vst [vmem:[%s4845_s3 + $0x18] sm:$0xff] %v2968_v51   ;;  %v4619_v56 = vadd.f32 %v1833_v19, %v1545_v2  ;;  %v2019_v46 = vadd.f32 %v3303_v0, %v3207_v47  ;;  %v1835_v42 = vpop.f32.mrb[73].mxu0  ;;  %v2010_v3 = vpop.f32.mrb[105].mxu1  ;;  %v1556_v0 = vadd.f32 %v4470_v34, %v4419_v16  ;;  %v3308_v51 = vadd.f32 %v4470_v34, %v4465_v22 }
 0x1e6   :  { %3111 = vst [vmem:[%s4845_s3 + $0x10] sm:$0xff] %v2963_v33   ;;  %v2011_v1 = vadd.f32 %v3301_v35, %v2010_v3  ;;  %v1836_v10 = vpop.f32.mrb[74].mxu0  ;;  %v3208_v5 = vpop.f32.mrb[106].mxu1 }
 0x1e7   :  { %v4626_v54 = vadd.f32 %v1836_v10, %v1548_v8  ;;  %v2022_v29 = vadd.f32 %v3304_v43, %v3208_v5  ;;  %v1838_v57 = vpop.f32.mrb[75].mxu0  ;;  %v2013_v48 = vpop.f32.mrb[107].mxu1  ;;  %v2243_v63 = vmax.f32 %v2019_v46, 0.0 }
 0x1e8   :  { %v2014_v31 = vadd.f32 %v3302_v28, %v2013_v48  ;;  %v2241_v55 = vmax.f32 %v2011_v1, 0.0 }
 0x1e9   :  { %v2244_v39 = vmax.f32 %v2022_v29, 0.0 }
 0x1ea   :  { %v2242_v4 = vmax.f32 %v2014_v31, 0.0  ;;  %v1564_v31 = vadd.f32 %v4470_v34, %v4439_v37 }
 0x1eb   :  { %v2978_v24 = vpack.c.bf16 %v2244_v39, %v2243_v63 }
 0x1ec   :  { %v2973_v32 = vpack.c.bf16 %v2242_v4, %v2241_v55  ;;  %v1841_v49 = vpop.f32.mrb[76].mxu0  ;;  %v3211_v2 = vpop.f32.mrb[108].mxu1 }
 0x1ed   :  { %3114 = vst [vmem:[%s4845_s3 + $0x28] sm:$0xff] %v2978_v24   ;;  %v4641_v9 = vadd.f32 %v1841_v49, %v1553_v38  ;;  %v2035_v15 = vadd.f32 %v3307_v59, %v3211_v2  ;;  %v1843_v35 = vpop.f32.mrb[77].mxu0  ;;  %v2026_v33 = vpop.f32.mrb[109].mxu1 }
 0x1ee   :  { %3113 = vst [vmem:[%s4845_s3 + $0x20] sm:$0xff] %v2973_v32   ;;  %v2027_v16 = vadd.f32 %v3305_v41, %v2026_v33  ;;  %v1844_v19 = vpop.f32.mrb[78].mxu0  ;;  %v3212_v47 = vpop.f32.mrb[110].mxu1 }
 0x1ef   :  { %v4648_v22 = vadd.f32 %v1844_v19, %v1556_v0  ;;  %v2038_v8 = vadd.f32 %v3308_v51, %v3212_v47  ;;  %v1846_v43 = vpop.f32.mrb[79].mxu0  ;;  %v2029_v46 = vpop.f32.mrb[111].mxu1  ;;  %v2247_v3 = vmax.f32 %v2035_v15, 0.0  ;;  %v1569_v15 = vadd.f32 %v4470_v34, %v4443_v45 }
 0x1f0   :  { %v2030_v42 = vadd.f32 %v3306_v62, %v2029_v46  ;;  %v2245_v1 = vmax.f32 %v2027_v16, 0.0  ;;  %v1572_v16 = vadd.f32 %v4470_v34, %v4447_v53 }
 0x1f1   :  { %v2248_v28 = vmax.f32 %v2038_v8, 0.0 }
 0x1f2   :  { %v2246_v10 = vmax.f32 %v2030_v42, 0.0 }
 0x1f3   :  { %v2988_v5 = vpack.c.bf16 %v2248_v28, %v2247_v3 }
 0x1f4   :  { %v2983_v29 = vpack.c.bf16 %v2246_v10, %v2245_v1  ;;  %v1849_v57 = vpop.f32.mrb[80].mxu0  ;;  %v3215_v48 = vpop.f32.mrb[112].mxu1 }
 0x1f5   :  { %3116 = vst [vmem:[%s4845_s3 + $0x38] sm:$0xff] %v2988_v5   ;;  %v4657_v63 = vadd.f32 %v1849_v57, %v1561_v7  ;;  %v2051_v39 = vadd.f32 %v3215_v48, %v4490_v30  ;;  %v1851_v55 = vpop.f32.mrb[81].mxu0  ;;  %v2042_v4 = vpop.f32.mrb[113].mxu1  ;;  %v1577_v5 = vadd.f32 %v4470_v34, %v4451_v61 }
 0x1f6   :  { %3115 = vst [vmem:[%s4845_s3 + $0x30] sm:$0xff] %v2983_v29   ;;  %v2043_v26 = vadd.f32 %v2042_v4, %v4478_v52  ;;  %v1852_v38 = vpop.f32.mrb[82].mxu0  ;;  %v3216_v59 = vpop.f32.mrb[114].mxu1 }
 0x1f7   :  { %v4664_v24 = vadd.f32 %v1852_v38, %v1564_v31  ;;  %v2054_v37 = vadd.f32 %v3216_v59, %v4494_v50  ;;  %v1854_v41 = vpop.f32.mrb[83].mxu0  ;;  %v2045_v32 = vpop.f32.mrb[115].mxu1  ;;  %v2251_v2 = vmax.f32 %v2051_v39, 0.0  ;;  %v1580_v31 = vadd.f32 %v4470_v34, %v4455_v6 }
 0x1f8   :  { %v2046_v49 = vadd.f32 %v2045_v32, %v4482_v11  ;;  %v2249_v0 = vmax.f32 %v2043_v26, 0.0 }
 0x1f9   :  { %v2252_v30 = vmax.f32 %v2054_v37, 0.0 }
 0x1fa   :  { %v2250_v51 = vmax.f32 %v2046_v49, 0.0 }
 0x1fb   :  { %v2998_v35 = vpack.c.bf16 %v2252_v30, %v2251_v2  ;;  %v1585_v30 = vadd.f32 %v4470_v34, %v4459_v14  ;;  %v4865_v14 = vld [vmem:[#allocation15_spill] sm:$0xff] }
 0x1fc   :  { %v2993_v33 = vpack.c.bf16 %v2250_v51, %v2249_v0  ;;  %v1857_v52 = vpop.f32.mrb[84].mxu0  ;;  %v3219_v62 = vpop.f32.mrb[116].mxu1 }
 0x1fd   :  { %3118 = vst [vmem:[%s4845_s3 + $0x48] sm:$0xff] %v2998_v35   ;;  %v4675_v50 = vadd.f32 %v1857_v52, %v1569_v15  ;;  %v2067_v11 = vadd.f32 %v3219_v62, %v4514_v20  ;;  %v1859_v19 = vpop.f32.mrb[85].mxu0  ;;  %v2058_v47 = vpop.f32.mrb[117].mxu1  ;;  %v1588_v35 = vadd.f32 %v4470_v34, %v4463_v21  ;;  %v4866_v21 = vld [vmem:[#allocation20_spill] sm:$0xff] }
 0x1fe   :  { %3117 = vst [vmem:[%s4845_s3 + $0x40] sm:$0xff] %v2993_v33   ;;  %v2059_v45 = vadd.f32 %v2058_v47, %v4502_v23  ;;  %v1860_v8 = vpop.f32.mrb[86].mxu0  ;;  %v3220_v43 = vpop.f32.mrb[118].mxu1 }
 0x1ff   :  { %v4682_v46 = vadd.f32 %v1860_v8, %v1572_v16  ;;  %v2070_v53 = vadd.f32 %v3220_v43, %v4518_v58  ;;  %v1862_v42 = vpop.f32.mrb[87].mxu0  ;;  %v2061_v3 = vpop.f32.mrb[119].mxu1  ;;  %v2255_v1 = vmax.f32 %v2067_v11, 0.0  ;;  %v4867_v43 = vld [vmem:[#allocation17_spill] sm:$0xff] }
 0x200   :  { %v2062_v28 = vadd.f32 %v2061_v3, %v4506_v27  ;;  %v2253_v10 = vmax.f32 %v2059_v45, 0.0 }
 0x201   :  { %v2256_v20 = vmax.f32 %v2070_v53, 0.0 }
 0x202   :  { %v2254_v7 = vmax.f32 %v2062_v28, 0.0 }
 0x203   :  { %v3008_v29 = vpack.c.bf16 %v2256_v20, %v2255_v1  ;;  %v4868_v1 = vld [vmem:[#allocation2_spill] sm:$0xff] }
 0x204   :  { %v3003_v57 = vpack.c.bf16 %v2254_v7, %v2253_v10  ;;  %v1865_v23 = vpop.f32.mrb[88].mxu0  ;;  %v3223_v48 = vpop.f32.mrb[120].mxu1  ;;  %v1593_v20 = vadd.f32 %v4470_v34, %v4868_v1 }
 0x205   :  { %3120 = vst [vmem:[%s4845_s3 + $0x58] sm:$0xff] %v3008_v29   ;;  %v4693_v58 = vadd.f32 %v1865_v23, %v1577_v5  ;;  %v2083_v27 = vadd.f32 %v3223_v48, %v4538_v13  ;;  %v1867_v39 = vpop.f32.mrb[89].mxu0  ;;  %v2074_v55 = vpop.f32.mrb[121].mxu1 }
 0x206   :  { %3119 = vst [vmem:[%s4845_s3 + $0x50] sm:$0xff] %v3003_v57   ;;  %v2075_v61 = vadd.f32 %v2074_v55, %v4526_v18  ;;  %v1868_v4 = vpop.f32.mrb[90].mxu0  ;;  %v3224_v26 = vpop.f32.mrb[122].mxu1  ;;  %v4869_v57 = vld [vmem:[#allocation3_spill] sm:$0xff] }
 0x207   :  { %v4700_v38 = vadd.f32 %v1868_v4, %v1580_v31  ;;  %v2086_v6 = vadd.f32 %v3224_v26, %v4542_v36  ;;  %v1870_v59 = vpop.f32.mrb[91].mxu0  ;;  %v2077_v37 = vpop.f32.mrb[123].mxu1  ;;  %v2259_v32 = vmax.f32 %v2083_v27, 0.0  ;;  %v1596_v23 = vadd.f32 %v4470_v34, %v4869_v57 }
 0x208   :  { %v2078_v41 = vadd.f32 %v2077_v37, %v4530_v44  ;;  %v2257_v49 = vmax.f32 %v2075_v61, 0.0 }
 0x209   :  { %v2260_v13 = vmax.f32 %v2086_v6, 0.0 }
 0x20a   :  { %v2258_v2 = vmax.f32 %v2078_v41, 0.0 }
 0x20b   :  { %v3018_v0 = vpack.c.bf16 %v2260_v13, %v2259_v32 }
 0x20c   :  { %v3013_v51 = vpack.c.bf16 %v2258_v2, %v2257_v49  ;;  %v1873_v18 = vpop.f32.mrb[92].mxu0  ;;  %v3227_v15 = vpop.f32.mrb[124].mxu1  ;;  %v4870_v2 = vld [vmem:[#allocation4_spill] sm:$0xff] }
 0x20d   :  { %3122 = vst [vmem:[%s4845_s3 + $0x68] sm:$0xff] %v3018_v0   ;;  %v4711_v36 = vadd.f32 %v1873_v18, %v1585_v30  ;;  %v2099_v44 = vadd.f32 %v3227_v15, %v4562_v60  ;;  %v1875_v33 = vpop.f32.mrb[93].mxu0  ;;  %v2090_v52 = vpop.f32.mrb[125].mxu1  ;;  %v1601_v30 = vadd.f32 %v4470_v34, %v4870_v2  ;;  %v4871_v15 = vld [vmem:[#allocation5_spill] sm:$0xff] }
 0x20e   :  { %3121 = vst [vmem:[%s4845_s3 + $0x60] sm:$0xff] %v3013_v51   ;;  %v2091_v62 = vadd.f32 %v2090_v52, %v4865_v14  ;;  %v1876_v16 = vpop.f32.mrb[94].mxu0  ;;  %v3228_v11 = vpop.f32.mrb[126].mxu1 }
 0x20f   :  { %v4718_v19 = vadd.f32 %v1876_v16, %v1588_v35  ;;  %v2102_v47 = vadd.f32 %v3228_v11, %v4866_v21  ;;  %v1878_v45 = vpop.f32.mrb[95].mxu0  ;;  %v2093_v8 = vpop.f32.mrb[127].mxu1  ;;  %v2263_v42 = vmax.f32 %v2099_v44, 0.0  ;;  %v1604_v35 = vadd.f32 %v4470_v34, %v4871_v15 }
 0x210   :  { %v2094_v53 = vadd.f32 %v2093_v8, %v4867_v43  ;;  %v2261_v3 = vmax.f32 %v2091_v62, 0.0 }
 0x211   :  { %v2264_v60 = vmax.f32 %v2102_v47, 0.0 }
 0x212   :  { %v2262_v28 = vmax.f32 %v2094_v53, 0.0 }
 0x213   :  { %v3028_v10 = vpack.c.bf16 %v2264_v60, %v2263_v42  ;;  %v4872_v42 = vld [vmem:[#allocation6_spill] sm:$0xff] }
 0x214   :  { %v3023_v7 = vpack.c.bf16 %v2262_v28, %v2261_v3  ;;  %v1881_v5 = vpop.f32.mrb[96].mxu0  ;;  %v3231_v29 = vpop.f32.mrb[128].mxu1  ;;  %v1609_v60 = vadd.f32 %v4470_v34, %v4872_v42 }
 0x215   :  { %3124 = vst [vmem:[%s4845_s3 + $0x78] sm:$0xff] %v3028_v10   ;;  %v4729_v48 = vadd.f32 %v1881_v5, %v1593_v20  ;;  %v2115_v31 = vadd.f32 %v3231_v29, %v4597_v40  ;;  %v1883_v27 = vpop.f32.mrb[97].mxu0  ;;  %v2106_v39 = vpop.f32.mrb[129].mxu1  ;;  %v4873_v20 = vld [vmem:[#allocation7_spill] sm:$0xff] }
 0x216   :  { %3123 = vst [vmem:[%s4845_s3 + $0x70] sm:$0xff] %v3023_v7   ;;  %v2107_v55 = vadd.f32 %v2106_v39, %v4578_v12  ;;  %v1884_v61 = vpop.f32.mrb[98].mxu0  ;;  %v3232_v4 = vpop.f32.mrb[130].mxu1  ;;  %v1612_v10 = vadd.f32 %v4470_v34, %v4873_v20 }
 0x217   :  { %v4736_v26 = vadd.f32 %v1884_v61, %v1596_v23  ;;  %v2118_v6 = vadd.f32 %v3232_v4, %v4604_v17  ;;  %v1886_v59 = vpop.f32.mrb[99].mxu0  ;;  %v2109_v37 = vpop.f32.mrb[131].mxu1  ;;  %v2267_v32 = vmax.f32 %v2115_v31, 0.0 }
 0x218   :  { %v2110_v41 = vadd.f32 %v2109_v37, %v4582_v25  ;;  %v2265_v13 = vmax.f32 %v2107_v55, 0.0  ;;  %v4874_v37 = vld [vmem:[#allocation8_spill] sm:$0xff] }
 0x219   :  { %v2268_v40 = vmax.f32 %v2118_v6, 0.0 }
 0x21a   :  { %v2266_v49 = vmax.f32 %v2110_v41, 0.0  ;;  %v1617_v41 = vadd.f32 %v4470_v34, %v4874_v37 }
 0x21b   :  { %v3038_v0 = vpack.c.bf16 %v2268_v40, %v2267_v32 }
 0x21c   :  { %v3033_v51 = vpack.c.bf16 %v2266_v49, %v2265_v13  ;;  %v1889_v12 = vpop.f32.mrb[100].mxu0  ;;  %v3235_v18 = vpop.f32.mrb[132].mxu1  ;;  %v4875_v49 = vld [vmem:[#allocation9_spill] sm:$0xff] }
 0x21d   :  { %3126 = vst [vmem:[%s4845_s3 + $0x88] sm:$0xff] %v3038_v0   ;;  %v4747_v17 = vadd.f32 %v1889_v12, %v1601_v30  ;;  %v2131_v25 = vadd.f32 %v3235_v18, %v4641_v9  ;;  %v1891_v44 = vpop.f32.mrb[101].mxu0  ;;  %v2122_v33 = vpop.f32.mrb[133].mxu1  ;;  %v1620_v2 = vadd.f32 %v4470_v34, %v4875_v49 }
 0x21e   :  { %3125 = vst [vmem:[%s4845_s3 + $0x80] sm:$0xff] %v3033_v51   ;;  %v2123_v52 = vadd.f32 %v2122_v33, %v4619_v56  ;;  %v1892_v14 = vpop.f32.mrb[102].mxu0  ;;  %v3236_v62 = vpop.f32.mrb[134].mxu1 }
 0x21f   :  { %v4754_v16 = vadd.f32 %v1892_v14, %v1604_v35  ;;  %v2134_v11 = vadd.f32 %v3236_v62, %v4648_v22  ;;  %v1894_v21 = vpop.f32.mrb[103].mxu0  ;;  %v2125_v47 = vpop.f32.mrb[135].mxu1  ;;  %v2271_v8 = vmax.f32 %v2131_v25, 0.0 }
 0x220   :  { %v2126_v45 = vadd.f32 %v2125_v47, %v4626_v54  ;;  %v2269_v43 = vmax.f32 %v2123_v52, 0.0 }
 0x221   :  { %v2272_v9 = vmax.f32 %v2134_v11, 0.0  ;;  %v4876_v11 = vld [vmem:[#allocation10_spill] sm:$0xff] }
 0x222   :  { %v2270_v53 = vmax.f32 %v2126_v45, 0.0  ;;  %v1625_v21 = vadd.f32 %v4470_v34, %v4876_v11 }
 0x223   :  { %v3048_v3 = vpack.c.bf16 %v2272_v9, %v2271_v8  ;;  %v4877_v9 = vld [vmem:[#allocation11_spill] sm:$0xff] }
 0x224   :  { %v3043_v28 = vpack.c.bf16 %v2270_v53, %v2269_v43  ;;  %v1897_v56 = vpop.f32.mrb[104].mxu0  ;;  %v3239_v1 = vpop.f32.mrb[136].mxu1  ;;  %v1628_v43 = vadd.f32 %v4470_v34, %v4877_v9 }
 0x225   :  { %3128 = vst [vmem:[%s4845_s3 + $0x98] sm:$0xff] %v3048_v3   ;;  %v4765_v22 = vadd.f32 %v1897_v56, %v1609_v60  ;;  %v2147_v54 = vadd.f32 %v3239_v1, %v4675_v50  ;;  %v1899_v7 = vpop.f32.mrb[105].mxu0  ;;  %v2138_v5 = vpop.f32.mrb[137].mxu1 }
 0x226   :  { %3127 = vst [vmem:[%s4845_s3 + $0x90] sm:$0xff] %v3043_v28   ;;  %v2139_v29 = vadd.f32 %v2138_v5, %v4657_v63  ;;  %v1900_v57 = vpop.f32.mrb[106].mxu0  ;;  %v3240_v23 = vpop.f32.mrb[138].mxu1 }
 0x227   :  { %v4772_v31 = vadd.f32 %v1900_v57, %v1612_v10  ;;  %v2150_v27 = vadd.f32 %v3240_v23, %v4682_v46  ;;  %v1902_v39 = vpop.f32.mrb[107].mxu0  ;;  %v2141_v55 = vpop.f32.mrb[139].mxu1  ;;  %v2275_v4 = vmax.f32 %v2147_v54, 0.0  ;;  %v4878_v57 = vld [vmem:[#allocation12_spill] sm:$0xff] }
 0x228   :  { %v2142_v61 = vadd.f32 %v2141_v55, %v4664_v24  ;;  %v2273_v6 = vmax.f32 %v2139_v29, 0.0  ;;  %v1633_v23 = vadd.f32 %v4470_v34, %v4878_v57 }
 0x229   :  { %v2276_v50 = vmax.f32 %v2150_v27, 0.0 }
 0x22a   :  { %v2274_v59 = vmax.f32 %v2142_v61, 0.0  ;;  %v4879_v61 = vld [vmem:[#allocation13_spill] sm:$0xff] }
 0x22b   :  { %v3058_v32 = vpack.c.bf16 %v2276_v50, %v2275_v4  ;;  %v1636_v4 = vadd.f32 %v4470_v34, %v4879_v61 }
 0x22c   :  { %v3053_v40 = vpack.c.bf16 %v2274_v59, %v2273_v6  ;;  %v1905_v63 = vpop.f32.mrb[108].mxu0  ;;  %v3243_v13 = vpop.f32.mrb[140].mxu1 }
 0x22d   :  { %3130 = vst [vmem:[%s4845_s3 + $0xa8] sm:$0xff] %v3058_v32   ;;  %v1906_v46 = vadd.f32 %v1905_v63, %v1617_v41  ;;  %v2163_v24 = vadd.f32 %v3243_v13, %v4711_v36  ;;  %v1907_v30 = vpop.f32.mrb[109].mxu0  ;;  %v2154_v0 = vpop.f32.mrb[141].mxu1 }
 0x22e   :  { %3129 = vst [vmem:[%s4845_s3 + $0xa0] sm:$0xff] %v3053_v40   ;;  %v2155_v51 = vadd.f32 %v2154_v0, %v4693_v58  ;;  %v1908_v12 = vpop.f32.mrb[110].mxu0  ;;  %v3244_v18 = vpop.f32.mrb[142].mxu1  ;;  %v4880_v0 = vld [vmem:[#allocation14_spill] sm:$0xff] }
 0x22f   :  { %v1909_v15 = vadd.f32 %v1908_v12, %v1620_v2  ;;  %v2166_v35 = vadd.f32 %v3244_v18, %v4718_v19  ;;  %v1910_v25 = vpop.f32.mrb[111].mxu0  ;;  %v2157_v44 = vpop.f32.mrb[143].mxu1  ;;  %v2279_v52 = vmax.f32 %v2163_v24, 0.0 }
 0x230   :  { %v2158_v33 = vadd.f32 %v2157_v44, %v4700_v38  ;;  %v2277_v36 = vmax.f32 %v2155_v51, 0.0  ;;  %v1641_v51 = vadd.f32 %v4470_v34, %v4880_v0 }
 0x231   :  { %v2280_v14 = vmax.f32 %v2166_v35, 0.0 }
 0x232   :  { %v2278_v62 = vmax.f32 %v2158_v33, 0.0 }
 0x233   :  { %v3068_v47 = vpack.c.bf16 %v2280_v14, %v2279_v52 }
 0x234   :  { %v3063_v45 = vpack.c.bf16 %v2278_v62, %v2277_v36  ;;  %v1913_v8 = vpop.f32.mrb[112].mxu0  ;;  %v3247_v58 = vpop.f32.mrb[144].mxu1 }
 0x235   :  { %3132 = vst [vmem:[%s4845_s3 + $0xb8] sm:$0xff] %v3068_v47   ;;  %v1914_v19 = vadd.f32 %v1913_v8, %v1625_v21  ;;  %v2179_v38 = vadd.f32 %v3247_v58, %v4747_v17  ;;  %v1915_v53 = vpop.f32.mrb[113].mxu0  ;;  %v2170_v42 = vpop.f32.mrb[145].mxu1 }
 0x236   :  { %3131 = vst [vmem:[%s4845_s3 + $0xb0] sm:$0xff] %v3063_v45   ;;  %v2171_v60 = vadd.f32 %v2170_v42, %v4729_v48  ;;  %v1916_v3 = vpop.f32.mrb[114].mxu0  ;;  %v3248_v28 = vpop.f32.mrb[146].mxu1  ;;  %v4882_v53 = vld [vmem:[#allocation18_spill] sm:$0xff] }
 0x237   :  { %v1917_v56 = vadd.f32 %v1916_v3, %v1628_v43  ;;  %v2182_v1 = vadd.f32 %v3248_v28, %v4754_v16  ;;  %v1918_v20 = vpop.f32.mrb[115].mxu0  ;;  %v2173_v10 = vpop.f32.mrb[147].mxu1  ;;  %v2283_v7 = vmax.f32 %v2179_v38, 0.0  ;;  %v1649_v42 = vadd.f32 %v4470_v34, %v4882_v53 }
 0x238   :  { %v2174_v54 = vadd.f32 %v2173_v10, %v4736_v26  ;;  %v2281_v17 = vmax.f32 %v2171_v60, 0.0  ;;  %v4883_v20 = vld [vmem:[#allocation19_spill] sm:$0xff] }
 0x239   :  { %v2284_v5 = vmax.f32 %v2182_v1, 0.0 }
 0x23a   :  { %v2282_v29 = vmax.f32 %v2174_v54, 0.0 }
 0x23b   :  { %v3078_v27 = vpack.c.bf16 %v2284_v5, %v2283_v7 }
 0x23c   :  { %v3073_v39 = vpack.c.bf16 %v2282_v29, %v2281_v17  ;;  %v1921_v55 = vpop.f32.mrb[116].mxu0  ;;  %v3251_v48 = vpop.f32.mrb[148].mxu1 }
 0x23d   :  { %3134 = vst [vmem:[%s4845_s3 + $0xc8] sm:$0xff] %v3078_v27   ;;  %v1922_v16 = vadd.f32 %v1921_v55, %v1633_v23  ;;  %v2195_v26 = vadd.f32 %v3251_v48, %v1906_v46  ;;  %v1923_v50 = vpop.f32.mrb[117].mxu0  ;;  %v2186_v6 = vpop.f32.mrb[149].mxu1 }
 0x23e   :  { %3133 = vst [vmem:[%s4845_s3 + $0xc0] sm:$0xff] %v3073_v39   ;;  %v2187_v59 = vadd.f32 %v2186_v6, %v4765_v22  ;;  %v1924_v37 = vpop.f32.mrb[118].mxu0  ;;  %v3252_v41 = vpop.f32.mrb[150].mxu1  ;;  %v4881_v22 = vld [vmem:[#allocation16_spill] sm:$0xff] }
 0x23f   :  { %v1925_v32 = vadd.f32 %v1924_v37, %v1636_v4  ;;  %v2198_v40 = vadd.f32 %v3252_v41, %v1909_v15  ;;  %v1926_v63 = vpop.f32.mrb[119].mxu0  ;;  %v2189_v13 = vpop.f32.mrb[151].mxu1  ;;  %v2287_v2 = vmax.f32 %v2195_v26, 0.0  ;;  %v1644_v44 = vadd.f32 %v4470_v34, %v4881_v22 }
 0x240   :  { %v2190_v49 = vadd.f32 %v2189_v13, %v4772_v31  ;;  %v2285_v30 = vmax.f32 %v2187_v59, 0.0 }
 0x241   :  { %v2288_v24 = vmax.f32 %v2198_v40, 0.0 }
 0x242   :  { %v2286_v46 = vmax.f32 %v2190_v49, 0.0 }
 0x243   :  { %v3088_v12 = vpack.c.bf16 %v2288_v24, %v2287_v2 }
 0x244   :  { %v3083_v18 = vpack.c.bf16 %v2286_v46, %v2285_v30  ;;  %v1929_v35 = vpop.f32.mrb[120].mxu0  ;;  %v3255_v25 = vpop.f32.mrb[152].mxu1 }
 0x245   :  { %3136 = vst [vmem:[%s4845_s3 + $0xd8] sm:$0xff] %v3088_v12   ;;  %v1930_v15 = vadd.f32 %v1929_v35, %v1641_v51  ;;  %v2211_v31 = vadd.f32 %v3255_v25, %v1922_v16  ;;  %v1931_v33 = vpop.f32.mrb[121].mxu0  ;;  %v2202_v52 = vpop.f32.mrb[153].mxu1 }
 0x246   :  { %3135 = vst [vmem:[%s4845_s3 + $0xd0] sm:$0xff] %v3083_v18   ;;  %v2203_v14 = vadd.f32 %v2202_v52, %v1914_v19  ;;  %v1932_v36 = vpop.f32.mrb[122].mxu0  ;;  %v3256_v62 = vpop.f32.mrb[154].mxu1  ;;  %v1652_v19 = vadd.f32 %v4470_v34, %v4883_v20 }
 0x247   :  { %v1933_v11 = vadd.f32 %v1932_v36, %v1644_v44  ;;  %v2214_v21 = vadd.f32 %v3256_v62, %v1925_v32  ;;  %v1934_v47 = vpop.f32.mrb[123].mxu0  ;;  %v2205_v45 = vpop.f32.mrb[155].mxu1  ;;  %v2291_v58 = vmax.f32 %v2211_v31, 0.0 }
 0x248   :  { %v2206_v8 = vadd.f32 %v2205_v45, %v1917_v56  ;;  %v2289_v43 = vmax.f32 %v2203_v14, 0.0 }
 0x249   :  { %v2292_v9 = vmax.f32 %v2214_v21, 0.0 }
 0x24a   :  { %v2290_v38 = vmax.f32 %v2206_v8, 0.0 }
 0x24b   :  { %v3098_v60 = vpack.c.bf16 %v2292_v9, %v2291_v58 }
 0x24c   :  { %v3093_v3 = vpack.c.bf16 %v2290_v38, %v2289_v43  ;;  %v1937_v28 = vpop.f32.mrb[124].mxu0  ;;  %v3259_v1 = vpop.f32.mrb[156].mxu1 }
 0x24d   :  { %3138 = vst [vmem:[%s4845_s3 + $0xe8] sm:$0xff] %v3098_v60   ;;  %v1938_v10 = vadd.f32 %v1937_v28, %v1649_v42  ;;  %v1939_v56 = vpop.f32.mrb[125].mxu0  ;;  %v2218_v54 = vpop.f32.mrb[157].mxu1 }
 0x24e   :  { %3137 = vst [vmem:[%s4845_s3 + $0xe0] sm:$0xff] %v3093_v3   ;;  %v2219_v7 = vadd.f32 %v2218_v54, %v1930_v15  ;;  %v1940_v5 = vpop.f32.mrb[126].mxu0  ;;  %v3260_v17 = vpop.f32.mrb[158].mxu1 }
 0x24f   :  { %v2227_v29 = vadd.f32 %v3259_v1, %v1938_v10  ;;  %v1941_v57 = vadd.f32 %v1940_v5, %v1652_v19  ;;  %v1942_v23 = vpop.f32.mrb[127].mxu0  ;;  %v2221_v27 = vpop.f32.mrb[159].mxu1 }
 0x250   :  { %v2222_v39 = vadd.f32 %v2221_v27, %v1933_v11  ;;  %v2293_v55 = vmax.f32 %v2219_v7, 0.0 }
 0x251   :  { %v2230_v34 = vadd.f32 %v3260_v17, %v1941_v57  ;;  %v2295_v61 = vmax.f32 %v2227_v29, 0.0 }
 0x252   :  { %v2294_v48 = vmax.f32 %v2222_v39, 0.0 }
 0x253   :  { %v2296_v4 = vmax.f32 %v2230_v34, 0.0 }
 0x254   :  { %v3103_v16 = vpack.c.bf16 %v2294_v48, %v2293_v55 }
 0x255   :  { %v3108_v26 = vpack.c.bf16 %v2296_v4, %v2295_v61 }
 0x256   :  { %3139 = vst [vmem:[%s4845_s3 + $0xf0] sm:$0xff] %v3103_v16  }
 0x257   :  { %3140 = vst [vmem:[%s4845_s3 + $0xf8] sm:$0xff] %v3108_v26  }

// kernel: _lambda_.53
= control target key start
LH: loop header
LB: loop body
LE: loop exit
PB: predicated region body
PF: predicated region fallthrough
CT: control target
= control target key end

     0   :  { %vm278_vm0 = vcmask 523264   ;;  %s1374_s1 = inlined_call_operand.vmem [shape: bf16[64,128], index: 1, kind: input, shape index: {}]   ;;  %s1375_s0 = inlined_call_operand.vmem [shape: bf16[512,64], index: 0, kind: input, shape index: {}]   ;;  %s1376_s2 = inlined_call_operand.vmem [shape: f32[1,128], index: 2, kind: input, shape index: {}]   ;;  %s1377_s3 = inlined_call_operand.vmem [shape: f32[512,128], index: 3, kind: output, shape index: {}]  }
   0x1   :  { %v917_v0 = vld [vmem:[%s1374_s1] sm:$0xff]   ;;  %v918_v1 = vld [vmem:[%s1374_s1 + $0x8] sm:$0xff]   ;;  %v919_v2 = vld [vmem:[%s1374_s1 + $0x10] sm:$0xff]  }
   0x2   :  { %837 = vmatprep.subr.bf16.mxu0 %v917_v0  ;;  %909 = vmatprep.subr.bf16.mxu1 %v917_v0  ;;  %v921_v3 = vld [vmem:[%s1375_s0] sm:$0xff]   ;;  %v920_v5 = vld [vmem:[%s1374_s1 + $0x18] sm:$0xff]   ;;  %v923_v6 = vld [vmem:[%s1375_s0 + $0x8] sm:$0xff]  }
   0x3   :  { %838 = vmatpush3.bf16.msra.mxu0 %v917_v0  ;;  %913 = vmatpush3.bf16.msra.mxu1 %v917_v0  ;;  %v922_v4 = vld [vmem:[%s1375_s0 + $0x80] sm:$0xff]   ;;  %v924_v7 = vld [vmem:[%s1375_s0 + $0x88] sm:$0xff]   ;;  %v925_v8 = vld [vmem:[%s1375_s0 + $0x10] sm:$0xff]  }
   0x4   :  { %839 = vmatprep.subr.bf16.mxu0 %v918_v1  ;;  %910 = vmatprep.subr.bf16.mxu1 %v918_v1  ;;  %v926_v9 = vld [vmem:[%s1375_s0 + $0x90] sm:$0xff]   ;;  %v927_v10 = vld [vmem:[%s1375_s0 + $0x18] sm:$0xff]   ;;  %v929_v12 = vld [vmem:[%s1375_s0 + $0x20] sm:$0xff]  }
   0x5   :  { %845 = vmatprep.mubr.msk.bf16.mxu0 %vm278_vm0, %v921_v3  ;;  %877 = vmatprep.mubr.msk.bf16.mxu1 %vm278_vm0, %v922_v4  ;;  %v928_v11 = vld [vmem:[%s1375_s0 + $0x98] sm:$0xff]   ;;  %v930_v13 = vld [vmem:[%s1375_s0 + $0xa0] sm:$0xff]   ;;  %v931_v14 = vld [vmem:[%s1375_s0 + $0x28] sm:$0xff]  }
   0x6   :  { %v932_v15 = vld [vmem:[%s1375_s0 + $0xa8] sm:$0xff]   ;;  %v933_v16 = vld [vmem:[%s1375_s0 + $0x30] sm:$0xff]   ;;  %v935_v18 = vld [vmem:[%s1375_s0 + $0x38] sm:$0xff]  }
   0x7   :  { %840 = vmatpush3.bf16.msra.mxu0 %v918_v1  ;;  %914 = vmatpush3.bf16.msra.mxu1 %v918_v1  ;;  %v934_v17 = vld [vmem:[%s1375_s0 + $0xb0] sm:$0xff]   ;;  %v936_v19 = vld [vmem:[%s1375_s0 + $0xb8] sm:$0xff]   ;;  %v937_v20 = vld [vmem:[%s1375_s0 + $0x40] sm:$0xff]  }
   0x8   :  { %841 = vmatprep.subr.bf16.mxu0 %v919_v2  ;;  %911 = vmatprep.subr.bf16.mxu1 %v919_v2  ;;  %v938_v21 = vld [vmem:[%s1375_s0 + $0xc0] sm:$0xff]   ;;  %v939_v22 = vld [vmem:[%s1375_s0 + $0x48] sm:$0xff]   ;;  %v941_v24 = vld [vmem:[%s1375_s0 + $0x50] sm:$0xff]  }
   0x9   :  { %v940_v23 = vld [vmem:[%s1375_s0 + $0xc8] sm:$0xff]   ;;  %v942_v25 = vld [vmem:[%s1375_s0 + $0xd0] sm:$0xff]   ;;  %v943_v26 = vld [vmem:[%s1375_s0 + $0x58] sm:$0xff]  }
   0xa   :  { %v944_v27 = vld [vmem:[%s1375_s0 + $0xd8] sm:$0xff]   ;;  %v945_v28 = vld [vmem:[%s1375_s0 + $0x60] sm:$0xff]   ;;  %v947_v30 = vld [vmem:[%s1375_s0 + $0x68] sm:$0xff]  }
   0xb   :  { %842 = vmatpush3.bf16.msra.mxu0 %v919_v2  ;;  %915 = vmatpush3.bf16.msra.mxu1 %v919_v2  ;;  %v946_v29 = vld [vmem:[%s1375_s0 + $0xe0] sm:$0xff]   ;;  %v948_v31 = vld [vmem:[%s1375_s0 + $0xe8] sm:$0xff]   ;;  %v949_v32 = vld [vmem:[%s1375_s0 + $0x70] sm:$0xff]  }
   0xc   :  { %843 = vmatprep.subr.bf16.mxu0 %v920_v5  ;;  %912 = vmatprep.subr.bf16.mxu1 %v920_v5  ;;  %v950_v33 = vld [vmem:[%s1375_s0 + $0xf0] sm:$0xff]   ;;  %v951_v34 = vld [vmem:[%s1375_s0 + $0x78] sm:$0xff]   ;;  %v1116_v36 = vld [vmem:[%s1376_s2] ss:$0 sm:$0xff] }
   0xd   :  { %v952_v35 = vld [vmem:[%s1375_s0 + $0xf8] sm:$0xff]  }
   0xf   :  { %844 = vmatpush3.bf16.msra.mxu0 %v920_v5  ;;  %916 = vmatpush3.bf16.msra.mxu1 %v920_v5 }
  0x12   :  { %846 = vmatmul.mubr.msk.bf16.vlgmr.msra.gmra.mrb[0].mxu0 %vm278_vm0, %v923_v6  ;;  %878 = vmatmul.mubr.msk.bf16.vlgmr.msra.gmra.mrb[0].mxu1 %vm278_vm0, %v924_v7 }
  0x13   :  { %849 = vmatprep.mubr.msk.bf16.mxu0 %vm278_vm0, %v925_v8  ;;  %881 = vmatprep.mubr.msk.bf16.mxu1 %vm278_vm0, %v926_v9 }
  0x1a   :  { %850 = vmatmul.mubr.msk.bf16.gmra.mrb[4].mxu0 %vm278_vm0, %v927_v10  ;;  %882 = vmatmul.mubr.msk.bf16.gmra.mrb[4].mxu1 %vm278_vm0, %v928_v11 }
  0x1b   :  { %853 = vmatprep.mubr.msk.bf16.mxu0 %vm278_vm0, %v929_v12  ;;  %885 = vmatprep.mubr.msk.bf16.mxu1 %vm278_vm0, %v930_v13 }
  0x22   :  { %854 = vmatmul.mubr.msk.bf16.gmra.mrb[8].mxu0 %vm278_vm0, %v931_v14  ;;  %886 = vmatmul.mubr.msk.bf16.gmra.mrb[8].mxu1 %vm278_vm0, %v932_v15 }
  0x23   :  { %857 = vmatprep.mubr.msk.bf16.mxu0 %vm278_vm0, %v933_v16  ;;  %889 = vmatprep.mubr.msk.bf16.mxu1 %vm278_vm0, %v934_v17 }
  0x2a   :  { %858 = vmatmul.mubr.msk.bf16.gmra.mrb[12].mxu0 %vm278_vm0, %v935_v18  ;;  %890 = vmatmul.mubr.msk.bf16.gmra.mrb[12].mxu1 %vm278_vm0, %v936_v19 }
  0x2b   :  { %861 = vmatprep.mubr.msk.bf16.mxu0 %vm278_vm0, %v937_v20  ;;  %893 = vmatprep.mubr.msk.bf16.mxu1 %vm278_vm0, %v938_v21 }
  0x32   :  { %862 = vmatmul.mubr.msk.bf16.gmra.mrb[16].mxu0 %vm278_vm0, %v939_v22  ;;  %894 = vmatmul.mubr.msk.bf16.gmra.mrb[16].mxu1 %vm278_vm0, %v940_v23 }
  0x33   :  { %865 = vmatprep.mubr.msk.bf16.mxu0 %vm278_vm0, %v941_v24  ;;  %897 = vmatprep.mubr.msk.bf16.mxu1 %vm278_vm0, %v942_v25 }
  0x3a   :  { %866 = vmatmul.mubr.msk.bf16.gmra.mrb[20].mxu0 %vm278_vm0, %v943_v26  ;;  %898 = vmatmul.mubr.msk.bf16.gmra.mrb[20].mxu1 %vm278_vm0, %v944_v27 }
  0x3b   :  { %869 = vmatprep.mubr.msk.bf16.mxu0 %vm278_vm0, %v945_v28  ;;  %901 = vmatprep.mubr.msk.bf16.mxu1 %vm278_vm0, %v946_v29 }
  0x42   :  { %870 = vmatmul.mubr.msk.bf16.gmra.mrb[24].mxu0 %vm278_vm0, %v947_v30  ;;  %902 = vmatmul.mubr.msk.bf16.gmra.mrb[24].mxu1 %vm278_vm0, %v948_v31 }
  0x43   :  { %873 = vmatprep.mubr.msk.bf16.mxu0 %vm278_vm0, %v949_v32  ;;  %905 = vmatprep.mubr.msk.bf16.mxu1 %vm278_vm0, %v950_v33 }
  0x4a   :  { %874 = vmatmul.mubr.msk.bf16.gmra.mrb[28].mxu0 %vm278_vm0, %v951_v34  ;;  %906 = vmatmul.mubr.msk.bf16.gmra.mrb[28].mxu1 %vm278_vm0, %v952_v35 }
  0xe5   :  { %v847_v37 = vpop.f32.mrb[0].mxu0  ;;  %v879_v38 = vpop.f32.mrb[0].mxu1 }
  0xe6   :  { %v418_v39 = vadd.f32 %v847_v37, %v1116_v36  ;;  %v546_v40 = vadd.f32 %v879_v38, %v1116_v36  ;;  %v409_v41 = vpop.f32.mrb[1].mxu0  ;;  %v537_v42 = vpop.f32.mrb[1].mxu1 }
  0xe7   :  { %v410_v43 = vadd.f32 %v1116_v36, %v409_v41  ;;  %v538_v44 = vadd.f32 %v1116_v36, %v537_v42  ;;  %v848_v45 = vpop.f32.mrb[2].mxu0  ;;  %v880_v46 = vpop.f32.mrb[2].mxu1 }
  0xe8   :  { %666 = vst [vmem:[%s1377_s3 + $0x10] sm:$0xff] %v418_v39  ;;  %698 = vst [vmem:[%s1377_s3 + $0x110] sm:$0xff] %v546_v40  ;;  %v421_v47 = vadd.f32 %v848_v45, %v1116_v36  ;;  %v549_v48 = vadd.f32 %v880_v46, %v1116_v36  ;;  %v412_v49 = vpop.f32.mrb[3].mxu0  ;;  %v540_v50 = vpop.f32.mrb[3].mxu1 }
  0xe9   :  { %664 = vst [vmem:[%s1377_s3] sm:$0xff] %v410_v43  ;;  %696 = vst [vmem:[%s1377_s3 + $0x100] sm:$0xff] %v538_v44  ;;  %v413_v51 = vadd.f32 %v1116_v36, %v412_v49  ;;  %v541_v52 = vadd.f32 %v1116_v36, %v540_v50 }
  0xea   :  { %667 = vst [vmem:[%s1377_s3 + $0x18] sm:$0xff] %v421_v47  ;;  %699 = vst [vmem:[%s1377_s3 + $0x118] sm:$0xff] %v549_v48 }
  0xeb   :  { %665 = vst [vmem:[%s1377_s3 + $0x8] sm:$0xff] %v413_v51  ;;  %697 = vst [vmem:[%s1377_s3 + $0x108] sm:$0xff] %v541_v52 }
  0xed   :  { %v851_v53 = vpop.f32.mrb[4].mxu0  ;;  %v883_v54 = vpop.f32.mrb[4].mxu1 }
  0xee   :  { %v434_v55 = vadd.f32 %v851_v53, %v1116_v36  ;;  %v562_v56 = vadd.f32 %v883_v54, %v1116_v36  ;;  %v425_v57 = vpop.f32.mrb[5].mxu0  ;;  %v553_v58 = vpop.f32.mrb[5].mxu1 }
  0xef   :  { %v426_v59 = vadd.f32 %v1116_v36, %v425_v57  ;;  %v554_v60 = vadd.f32 %v1116_v36, %v553_v58  ;;  %v852_v61 = vpop.f32.mrb[6].mxu0  ;;  %v884_v62 = vpop.f32.mrb[6].mxu1 }
  0xf0   :  { %670 = vst [vmem:[%s1377_s3 + $0x30] sm:$0xff] %v434_v55  ;;  %702 = vst [vmem:[%s1377_s3 + $0x130] sm:$0xff] %v562_v56  ;;  %v437_v63 = vadd.f32 %v852_v61, %v1116_v36  ;;  %v565_v0 = vadd.f32 %v884_v62, %v1116_v36  ;;  %v428_v1 = vpop.f32.mrb[7].mxu0  ;;  %v556_v2 = vpop.f32.mrb[7].mxu1 }
  0xf1   :  { %668 = vst [vmem:[%s1377_s3 + $0x20] sm:$0xff] %v426_v59  ;;  %700 = vst [vmem:[%s1377_s3 + $0x120] sm:$0xff] %v554_v60  ;;  %v429_v3 = vadd.f32 %v1116_v36, %v428_v1  ;;  %v557_v4 = vadd.f32 %v1116_v36, %v556_v2 }
  0xf2   :  { %671 = vst [vmem:[%s1377_s3 + $0x38] sm:$0xff] %v437_v63  ;;  %703 = vst [vmem:[%s1377_s3 + $0x138] sm:$0xff] %v565_v0 }
  0xf3   :  { %669 = vst [vmem:[%s1377_s3 + $0x28] sm:$0xff] %v429_v3  ;;  %701 = vst [vmem:[%s1377_s3 + $0x128] sm:$0xff] %v557_v4 }
  0xf5   :  { %v855_v5 = vpop.f32.mrb[8].mxu0  ;;  %v887_v6 = vpop.f32.mrb[8].mxu1 }
  0xf6   :  { %v450_v7 = vadd.f32 %v855_v5, %v1116_v36  ;;  %v578_v8 = vadd.f32 %v887_v6, %v1116_v36  ;;  %v441_v9 = vpop.f32.mrb[9].mxu0  ;;  %v569_v10 = vpop.f32.mrb[9].mxu1 }
  0xf7   :  { %v442_v11 = vadd.f32 %v1116_v36, %v441_v9  ;;  %v570_v12 = vadd.f32 %v1116_v36, %v569_v10  ;;  %v856_v13 = vpop.f32.mrb[10].mxu0  ;;  %v888_v14 = vpop.f32.mrb[10].mxu1 }
  0xf8   :  { %674 = vst [vmem:[%s1377_s3 + $0x50] sm:$0xff] %v450_v7  ;;  %706 = vst [vmem:[%s1377_s3 + $0x150] sm:$0xff] %v578_v8  ;;  %v453_v15 = vadd.f32 %v856_v13, %v1116_v36  ;;  %v581_v16 = vadd.f32 %v888_v14, %v1116_v36  ;;  %v444_v17 = vpop.f32.mrb[11].mxu0  ;;  %v572_v18 = vpop.f32.mrb[11].mxu1 }
  0xf9   :  { %672 = vst [vmem:[%s1377_s3 + $0x40] sm:$0xff] %v442_v11  ;;  %704 = vst [vmem:[%s1377_s3 + $0x140] sm:$0xff] %v570_v12  ;;  %v445_v19 = vadd.f32 %v1116_v36, %v444_v17  ;;  %v573_v20 = vadd.f32 %v1116_v36, %v572_v18 }
  0xfa   :  { %675 = vst [vmem:[%s1377_s3 + $0x58] sm:$0xff] %v453_v15  ;;  %707 = vst [vmem:[%s1377_s3 + $0x158] sm:$0xff] %v581_v16 }
  0xfb   :  { %673 = vst [vmem:[%s1377_s3 + $0x48] sm:$0xff] %v445_v19  ;;  %705 = vst [vmem:[%s1377_s3 + $0x148] sm:$0xff] %v573_v20 }
  0xfd   :  { %v859_v21 = vpop.f32.mrb[12].mxu0  ;;  %v891_v22 = vpop.f32.mrb[12].mxu1 }
  0xfe   :  { %v466_v23 = vadd.f32 %v859_v21, %v1116_v36  ;;  %v594_v24 = vadd.f32 %v891_v22, %v1116_v36  ;;  %v457_v25 = vpop.f32.mrb[13].mxu0  ;;  %v585_v26 = vpop.f32.mrb[13].mxu1 }
  0xff   :  { %v458_v27 = vadd.f32 %v1116_v36, %v457_v25  ;;  %v586_v28 = vadd.f32 %v1116_v36, %v585_v26  ;;  %v860_v29 = vpop.f32.mrb[14].mxu0  ;;  %v892_v30 = vpop.f32.mrb[14].mxu1 }
 0x100   :  { %678 = vst [vmem:[%s1377_s3 + $0x70] sm:$0xff] %v466_v23  ;;  %710 = vst [vmem:[%s1377_s3 + $0x170] sm:$0xff] %v594_v24  ;;  %v469_v31 = vadd.f32 %v860_v29, %v1116_v36  ;;  %v597_v32 = vadd.f32 %v892_v30, %v1116_v36  ;;  %v460_v33 = vpop.f32.mrb[15].mxu0  ;;  %v588_v34 = vpop.f32.mrb[15].mxu1 }
 0x101   :  { %676 = vst [vmem:[%s1377_s3 + $0x60] sm:$0xff] %v458_v27  ;;  %708 = vst [vmem:[%s1377_s3 + $0x160] sm:$0xff] %v586_v28  ;;  %v461_v35 = vadd.f32 %v1116_v36, %v460_v33  ;;  %v589_v37 = vadd.f32 %v1116_v36, %v588_v34 }
 0x102   :  { %679 = vst [vmem:[%s1377_s3 + $0x78] sm:$0xff] %v469_v31  ;;  %711 = vst [vmem:[%s1377_s3 + $0x178] sm:$0xff] %v597_v32 }
 0x103   :  { %677 = vst [vmem:[%s1377_s3 + $0x68] sm:$0xff] %v461_v35  ;;  %709 = vst [vmem:[%s1377_s3 + $0x168] sm:$0xff] %v589_v37 }
 0x105   :  { %v863_v38 = vpop.f32.mrb[16].mxu0  ;;  %v895_v39 = vpop.f32.mrb[16].mxu1 }
 0x106   :  { %v482_v40 = vadd.f32 %v863_v38, %v1116_v36  ;;  %v610_v41 = vadd.f32 %v895_v39, %v1116_v36  ;;  %v473_v42 = vpop.f32.mrb[17].mxu0  ;;  %v601_v43 = vpop.f32.mrb[17].mxu1 }
 0x107   :  { %v474_v44 = vadd.f32 %v1116_v36, %v473_v42  ;;  %v602_v45 = vadd.f32 %v1116_v36, %v601_v43  ;;  %v864_v46 = vpop.f32.mrb[18].mxu0  ;;  %v896_v47 = vpop.f32.mrb[18].mxu1 }
 0x108   :  { %682 = vst [vmem:[%s1377_s3 + $0x90] sm:$0xff] %v482_v40  ;;  %714 = vst [vmem:[%s1377_s3 + $0x190] sm:$0xff] %v610_v41  ;;  %v485_v48 = vadd.f32 %v864_v46, %v1116_v36  ;;  %v613_v49 = vadd.f32 %v896_v47, %v1116_v36  ;;  %v476_v50 = vpop.f32.mrb[19].mxu0  ;;  %v604_v51 = vpop.f32.mrb[19].mxu1 }
 0x109   :  { %680 = vst [vmem:[%s1377_s3 + $0x80] sm:$0xff] %v474_v44  ;;  %712 = vst [vmem:[%s1377_s3 + $0x180] sm:$0xff] %v602_v45  ;;  %v477_v52 = vadd.f32 %v1116_v36, %v476_v50  ;;  %v605_v53 = vadd.f32 %v1116_v36, %v604_v51 }
 0x10a   :  { %683 = vst [vmem:[%s1377_s3 + $0x98] sm:$0xff] %v485_v48  ;;  %715 = vst [vmem:[%s1377_s3 + $0x198] sm:$0xff] %v613_v49 }
 0x10b   :  { %681 = vst [vmem:[%s1377_s3 + $0x88] sm:$0xff] %v477_v52  ;;  %713 = vst [vmem:[%s1377_s3 + $0x188] sm:$0xff] %v605_v53 }
 0x10d   :  { %v867_v54 = vpop.f32.mrb[20].mxu0  ;;  %v899_v55 = vpop.f32.mrb[20].mxu1 }
 0x10e   :  { %v498_v56 = vadd.f32 %v867_v54, %v1116_v36  ;;  %v626_v57 = vadd.f32 %v899_v55, %v1116_v36  ;;  %v489_v58 = vpop.f32.mrb[21].mxu0  ;;  %v617_v59 = vpop.f32.mrb[21].mxu1 }
 0x10f   :  { %v490_v60 = vadd.f32 %v1116_v36, %v489_v58  ;;  %v618_v61 = vadd.f32 %v1116_v36, %v617_v59  ;;  %v868_v62 = vpop.f32.mrb[22].mxu0  ;;  %v900_v63 = vpop.f32.mrb[22].mxu1 }
 0x110   :  { %686 = vst [vmem:[%s1377_s3 + $0xb0] sm:$0xff] %v498_v56  ;;  %718 = vst [vmem:[%s1377_s3 + $0x1b0] sm:$0xff] %v626_v57  ;;  %v501_v0 = vadd.f32 %v868_v62, %v1116_v36  ;;  %v629_v1 = vadd.f32 %v900_v63, %v1116_v36  ;;  %v492_v2 = vpop.f32.mrb[23].mxu0  ;;  %v620_v3 = vpop.f32.mrb[23].mxu1 }
 0x111   :  { %684 = vst [vmem:[%s1377_s3 + $0xa0] sm:$0xff] %v490_v60  ;;  %716 = vst [vmem:[%s1377_s3 + $0x1a0] sm:$0xff] %v618_v61  ;;  %v493_v4 = vadd.f32 %v1116_v36, %v492_v2  ;;  %v621_v5 = vadd.f32 %v1116_v36, %v620_v3 }
 0x112   :  { %687 = vst [vmem:[%s1377_s3 + $0xb8] sm:$0xff] %v501_v0  ;;  %719 = vst [vmem:[%s1377_s3 + $0x1b8] sm:$0xff] %v629_v1 }
 0x113   :  { %685 = vst [vmem:[%s1377_s3 + $0xa8] sm:$0xff] %v493_v4  ;;  %717 = vst [vmem:[%s1377_s3 + $0x1a8] sm:$0xff] %v621_v5 }
 0x115   :  { %v871_v6 = vpop.f32.mrb[24].mxu0  ;;  %v903_v7 = vpop.f32.mrb[24].mxu1 }
 0x116   :  { %v514_v8 = vadd.f32 %v871_v6, %v1116_v36  ;;  %v642_v9 = vadd.f32 %v903_v7, %v1116_v36  ;;  %v505_v10 = vpop.f32.mrb[25].mxu0  ;;  %v633_v11 = vpop.f32.mrb[25].mxu1 }
 0x117   :  { %v506_v12 = vadd.f32 %v1116_v36, %v505_v10  ;;  %v634_v13 = vadd.f32 %v1116_v36, %v633_v11  ;;  %v872_v14 = vpop.f32.mrb[26].mxu0  ;;  %v904_v15 = vpop.f32.mrb[26].mxu1 }
 0x118   :  { %690 = vst [vmem:[%s1377_s3 + $0xd0] sm:$0xff] %v514_v8  ;;  %722 = vst [vmem:[%s1377_s3 + $0x1d0] sm:$0xff] %v642_v9  ;;  %v517_v16 = vadd.f32 %v872_v14, %v1116_v36  ;;  %v645_v17 = vadd.f32 %v904_v15, %v1116_v36  ;;  %v508_v18 = vpop.f32.mrb[27].mxu0  ;;  %v636_v19 = vpop.f32.mrb[27].mxu1 }
 0x119   :  { %688 = vst [vmem:[%s1377_s3 + $0xc0] sm:$0xff] %v506_v12  ;;  %720 = vst [vmem:[%s1377_s3 + $0x1c0] sm:$0xff] %v634_v13  ;;  %v509_v20 = vadd.f32 %v1116_v36, %v508_v18  ;;  %v637_v21 = vadd.f32 %v1116_v36, %v636_v19 }
 0x11a   :  { %691 = vst [vmem:[%s1377_s3 + $0xd8] sm:$0xff] %v517_v16  ;;  %723 = vst [vmem:[%s1377_s3 + $0x1d8] sm:$0xff] %v645_v17 }
 0x11b   :  { %689 = vst [vmem:[%s1377_s3 + $0xc8] sm:$0xff] %v509_v20  ;;  %721 = vst [vmem:[%s1377_s3 + $0x1c8] sm:$0xff] %v637_v21 }
 0x11d   :  { %v875_v22 = vpop.f32.mrb[28].mxu0  ;;  %v907_v23 = vpop.f32.mrb[28].mxu1 }
 0x11e   :  { %v530_v24 = vadd.f32 %v875_v22, %v1116_v36  ;;  %v658_v25 = vadd.f32 %v907_v23, %v1116_v36  ;;  %v521_v26 = vpop.f32.mrb[29].mxu0  ;;  %v649_v27 = vpop.f32.mrb[29].mxu1 }
 0x11f   :  { %v522_v28 = vadd.f32 %v1116_v36, %v521_v26  ;;  %v650_v29 = vadd.f32 %v1116_v36, %v649_v27  ;;  %v876_v30 = vpop.f32.mrb[30].mxu0  ;;  %v908_v31 = vpop.f32.mrb[30].mxu1 }
 0x120   :  { %694 = vst [vmem:[%s1377_s3 + $0xf0] sm:$0xff] %v530_v24  ;;  %726 = vst [vmem:[%s1377_s3 + $0x1f0] sm:$0xff] %v658_v25  ;;  %v533_v32 = vadd.f32 %v876_v30, %v1116_v36  ;;  %v661_v33 = vadd.f32 %v908_v31, %v1116_v36  ;;  %v524_v34 = vpop.f32.mrb[31].mxu0  ;;  %v652_v35 = vpop.f32.mrb[31].mxu1 }
 0x121   :  { %692 = vst [vmem:[%s1377_s3 + $0xe0] sm:$0xff] %v522_v28  ;;  %724 = vst [vmem:[%s1377_s3 + $0x1e0] sm:$0xff] %v650_v29  ;;  %v525_v37 = vadd.f32 %v1116_v36, %v524_v34  ;;  %v653_v38 = vadd.f32 %v1116_v36, %v652_v35 }
 0x122   :  { %695 = vst [vmem:[%s1377_s3 + $0xf8] sm:$0xff] %v533_v32  ;;  %727 = vst [vmem:[%s1377_s3 + $0x1f8] sm:$0xff] %v661_v33 }
 0x123   :  { %693 = vst [vmem:[%s1377_s3 + $0xe8] sm:$0xff] %v525_v37  ;;  %725 = vst [vmem:[%s1377_s3 + $0x1e8] sm:$0xff] %v653_v38 }

// kernel: _lambda_.52
= control target key start
LH: loop header
LB: loop body
LE: loop exit
PB: predicated region body
PF: predicated region fallthrough
CT: control target
= control target key end

     0   :  { %v3747_v0 = vmov 0   ;;  %vm1302_vm0 = vcmask 523264   ;;  %s4907_s1 = inlined_call_operand.vmem [shape: bf16[576,128], index: 1, kind: input, shape index: {}]   ;;  %s4908_s0 = inlined_call_operand.vmem [shape: bf16[512,576], index: 0, kind: input, shape index: {}]   ;;  %s4909_s2 = inlined_call_operand.vmem [shape: f32[1,128], index: 2, kind: input, shape index: {}]   ;;  %s4910_s3 = inlined_call_operand.vmem [shape: bf16[512,128], index: 3, kind: output, shape index: {}]  }
   0x1   :  { %1399 = vmatprep.subr.bf16.mxu0 %v3747_v0  ;;  %3310 = vmatprep.subr.bf16.mxu1 %v3747_v0  ;;  %v3487_v1 = vld [vmem:[%s4907_s1] sm:$0xff]   ;;  %v3488_v2 = vld [vmem:[%s4907_s1 + $0x8] sm:$0xff]   ;;  %v3489_v3 = vld [vmem:[%s4907_s1 + $0x10] sm:$0xff]  }
   0x2   :  { %1400 = vmatpush1.bf16.msra.mxu0 %v3487_v1  ;;  %3326 = vmatpush1.bf16.msra.mxu1 %v3487_v1  ;;  %v3490_v4 = vld [vmem:[%s4907_s1 + $0x18] sm:$0xff]   ;;  %v3491_v5 = vld [vmem:[%s4907_s1 + $0x20] sm:$0xff]   ;;  %v3492_v7 = vld [vmem:[%s4907_s1 + $0x28] sm:$0xff]  }
   0x3   :  { %1401 = vmatprep.subr.bf16.mxu0 %v3747_v0  ;;  %3311 = vmatprep.subr.bf16.mxu1 %v3747_v0  ;;  %v3505_v6 = vld [vmem:[%s4908_s0 + $0x4] ss:$20 sps:$4 sm:$0xff]   ;;  %v3493_v9 = vld [vmem:[%s4907_s1 + $0x30] sm:$0xff]   ;;  %v3496_v12 = vld [vmem:[%s4907_s1 + $0x48] sm:$0xff]  }
   0x4   :  { %v3508_v8 = vld [vmem:[%s4908_s0 + $0x144] ss:$20 sps:$4 sm:$0xff]   ;;  %1431 = vmatprep.mubr.bf16.mxu0 %v3505_v6  ;;  %v3497_v13 = vld [vmem:[%s4907_s1 + $0x50] sm:$0xff]   ;;  %v3500_v16 = vld [vmem:[%s4907_s1 + $0x68] sm:$0xff]  }
   0x5   :  { %1495 = vmatprep.mubr.bf16.mxu1 %v3508_v8  ;;  %v3494_v10 = vld [vmem:[%s4907_s1 + $0x38] sm:$0xff]   ;;  %v3495_v11 = vld [vmem:[%s4907_s1 + $0x40] sm:$0xff]   ;;  %v3501_v17 = vld [vmem:[%s4907_s1 + $0x70] sm:$0xff]  }
   0x6   :  { %1402 = vmatpush1.bf16.msra.mxu0 %v3488_v2  ;;  %3327 = vmatpush1.bf16.msra.mxu1 %v3488_v2  ;;  %v3498_v14 = vld [vmem:[%s4907_s1 + $0x58] sm:$0xff]   ;;  %v3499_v15 = vld [vmem:[%s4907_s1 + $0x60] sm:$0xff]   ;;  %v3559_v25 = vld [vmem:[%s4907_s1 + $0x108] sm:$0xff]  }
   0x7   :  { %1403 = vmatprep.subr.bf16.mxu0 %v3747_v0  ;;  %3312 = vmatprep.subr.bf16.mxu1 %v3747_v0  ;;  %v3502_v18 = vld [vmem:[%s4907_s1 + $0x78] sm:$0xff]   ;;  %v3510_v19 = vld [vmem:[%s4907_s1 + $0x100] sm:$0xff]   ;;  %v3511_v26 = vld [vmem:[%s4907_s1 + $0x88] sm:$0xff]  }
   0x8   :  { %v3503_v20 = vld [vmem:[%s4908_s0] ss:$20 sps:$4 sm:$0xff]   ;;  %v3516_v27 = vld [vmem:[%s4908_s0 + $0x28] ss:$20 sps:$4 sm:$0xff]   ;;  %v3524_v34 = vld [vmem:[%s4908_s0 + $0x50] ss:$20 sps:$4 sm:$0xff]  }
   0x9   :  { %v3506_v21 = vld [vmem:[%s4908_s0 + $0x140] ss:$20 sps:$4 sm:$0xff]   ;;  %v3517_v28 = vld [vmem:[%s4908_s0 + $0x168] ss:$20 sps:$4 sm:$0xff]   ;;  %v3525_v35 = vld [vmem:[%s4908_s0 + $0x190] ss:$20 sps:$4 sm:$0xff]  }
   0xa   :  { %1404 = vmatpush1.bf16.msra.mxu0 %v3489_v3  ;;  %3328 = vmatpush1.bf16.msra.mxu1 %v3489_v3  ;;  %v3509_v22 = vld [vmem:[%s4907_s1 + $0x80] sm:$0xff]   ;;  %v3518_v29 = vld [vmem:[%s4907_s1 + $0x90] sm:$0xff]   ;;  %v3519_v33 = vld [vmem:[%s4907_s1 + $0x98] sm:$0xff]  }
   0xb   :  { %1405 = vmatprep.subr.bf16.mxu0 %v3747_v0  ;;  %3313 = vmatprep.subr.bf16.mxu1 %v3747_v0  ;;  %v3512_v23 = vld [vmem:[%s4908_s0 + $0x2c] ss:$20 sps:$4 sm:$0xff]   ;;  %v3599_v30 = vld [vmem:[%s4907_s1 + $0x110] sm:$0xff]   ;;  %v3536_v43 = vld [vmem:[%s4908_s0 + $0xa4] ss:$20 sps:$4 sm:$0xff]  }
   0xc   :  { %v3514_v24 = vld [vmem:[%s4908_s0 + $0x16c] ss:$20 sps:$4 sm:$0xff]   ;;  %v3520_v31 = vld [vmem:[%s4908_s0 + $0x54] ss:$20 sps:$4 sm:$0xff]   ;;  %v3528_v37 = vld [vmem:[%s4908_s0 + $0x7c] ss:$20 sps:$4 sm:$0xff]  }
   0xd   :  { %v3522_v32 = vld [vmem:[%s4908_s0 + $0x194] ss:$20 sps:$4 sm:$0xff]   ;;  %v3526_v36 = vld [vmem:[%s4907_s1 + $0xa0] sm:$0xff]   ;;  %v3530_v38 = vld [vmem:[%s4908_s0 + $0x1bc] ss:$20 sps:$4 sm:$0xff]  }
   0xe   :  { %1406 = vmatpush1.bf16.msra.mxu0 %v3490_v4  ;;  %3329 = vmatpush1.bf16.msra.mxu1 %v3490_v4  ;;  %v3527_v39 = vld [vmem:[%s4907_s1 + $0xa8] sm:$0xff]   ;;  %v3534_v42 = vld [vmem:[%s4907_s1 + $0xb0] sm:$0xff]   ;;  %v3636_v44 = vld [vmem:[%s4907_s1 + $0x118] sm:$0xff]  }
   0xf   :  { %1407 = vmatprep.subr.bf16.mxu0 %v3747_v0  ;;  %3314 = vmatprep.subr.bf16.mxu1 %v3747_v0  ;;  %v3532_v40 = vld [vmem:[%s4908_s0 + $0x78] ss:$20 sps:$4 sm:$0xff]   ;;  %v3540_v47 = vld [vmem:[%s4908_s0 + $0xa0] ss:$20 sps:$4 sm:$0xff]   ;;  %v3548_v53 = vld [vmem:[%s4908_s0 + $0xc8] ss:$20 sps:$4 sm:$0xff]  }
  0x10   :  { %v3533_v41 = vld [vmem:[%s4908_s0 + $0x1b8] ss:$20 sps:$4 sm:$0xff]   ;;  %v3541_v48 = vld [vmem:[%s4908_s0 + $0x1e0] ss:$20 sps:$4 sm:$0xff]   ;;  %v3549_v54 = vld [vmem:[%s4908_s0 + $0x208] ss:$20 sps:$4 sm:$0xff]  }
  0x11   :  { %v3538_v45 = vld [vmem:[%s4908_s0 + $0x1e4] ss:$20 sps:$4 sm:$0xff]   ;;  %v3544_v50 = vld [vmem:[%s4908_s0 + $0xcc] ss:$20 sps:$4 sm:$0xff]   ;;  %v3550_v55 = vld [vmem:[%s4907_s1 + $0xd0] sm:$0xff]  }
  0x12   :  { %1408 = vmatpush1.bf16.msra.mxu0 %v3491_v5  ;;  %3330 = vmatpush1.bf16.msra.mxu1 %v3491_v5  ;;  %v3535_v46 = vld [vmem:[%s4907_s1 + $0xb8] sm:$0xff]   ;;  %v3542_v49 = vld [vmem:[%s4907_s1 + $0xc0] sm:$0xff]   ;;  %v3543_v52 = vld [vmem:[%s4907_s1 + $0xc8] sm:$0xff]  }
  0x13   :  { %1409 = vmatprep.subr.bf16.mxu0 %v3747_v0  ;;  %3315 = vmatprep.subr.bf16.mxu1 %v3747_v0  ;;  %v3546_v51 = vld [vmem:[%s4908_s0 + $0x20c] ss:$20 sps:$4 sm:$0xff]   ;;  %v3552_v56 = vld [vmem:[%s4908_s0 + $0xf4] ss:$20 sps:$4 sm:$0xff]   ;;  %v3551_v58 = vld [vmem:[%s4907_s1 + $0xd8] sm:$0xff]  }
  0x14   :  { %v3554_v57 = vld [vmem:[%s4908_s0 + $0x234] ss:$20 sps:$4 sm:$0xff]   ;;  %v3556_v59 = vld [vmem:[%s4908_s0 + $0xf0] ss:$20 sps:$4 sm:$0xff]   ;;  %v3565_v2 = vld [vmem:[%s4908_s0 + $0x118] ss:$20 sps:$4 sm:$0xff]  }
  0x15   :  { %v3557_v60 = vld [vmem:[%s4908_s0 + $0x230] ss:$20 sps:$4 sm:$0xff]   ;;  %v3560_v1 = vld [vmem:[%s4907_s1 + $0xe8] sm:$0xff]  }
  0x16   :  { %1410 = vmatpush1.bf16.msra.mxu0 %v3492_v7  ;;  %3331 = vmatpush1.bf16.msra.mxu1 %v3492_v7  ;;  %v3558_v61 = vld [vmem:[%s4907_s1 + $0xe0] sm:$0xff]   ;;  %v3561_v62 = vld [vmem:[%s4908_s0 + $0x11c] ss:$20 sps:$4 sm:$0xff]   ;;  %v3566_v3 = vld [vmem:[%s4908_s0 + $0x258] ss:$20 sps:$4 sm:$0xff]  }
  0x17   :  { %1411 = vmatprep.subr.bf16.mxu0 %v3747_v0  ;;  %3316 = vmatprep.subr.bf16.mxu1 %v3747_v0  ;;  %v3563_v63 = vld [vmem:[%s4908_s0 + $0x25c] ss:$20 sps:$4 sm:$0xff]   ;;  %v3569_v5 = vld [vmem:[%s4908_s0 + $0x284] ss:$20 sps:$4 sm:$0xff]   ;;  %v3573_v6 = vld [vmem:[%s4908_s0 + $0xc] ss:$20 sps:$4 sm:$0xff]  }
  0x18   :  { %v3567_v4 = vld [vmem:[%s4907_s1 + $0xf0] sm:$0xff]   ;;  %v3568_v7 = vld [vmem:[%s4907_s1 + $0xf8] sm:$0xff]  }
  0x19   :  { %v3571_v8 = vld [vmem:[%s4908_s0 + $0x8] ss:$20 sps:$4 sm:$0xff]  }
  0x1a   :  { %1412 = vmatpush1.bf16.msra.mxu0 %v3493_v9  ;;  %3332 = vmatpush1.bf16.msra.mxu1 %v3493_v9  ;;  %v3574_v9 = vld [vmem:[%s4908_s0 + $0x280] ss:$20 sps:$4 sm:$0xff]  }
  0x1b   :  { %1413 = vmatprep.subr.bf16.mxu0 %v3747_v0  ;;  %3317 = vmatprep.subr.bf16.mxu1 %v3747_v0 }
  0x1e   :  { %1414 = vmatpush1.bf16.msra.mxu0 %v3494_v10  ;;  %3333 = vmatpush1.bf16.msra.mxu1 %v3494_v10  ;;  %v3575_v10 = vld [vmem:[%s4908_s0 + $0x2ac] ss:$20 sps:$4 sm:$0xff]  }
  0x1f   :  { %1415 = vmatprep.subr.bf16.mxu0 %v3747_v0  ;;  %3318 = vmatprep.subr.bf16.mxu1 %v3747_v0 }
  0x22   :  { %1416 = vmatpush1.bf16.msra.mxu0 %v3495_v11  ;;  %3334 = vmatpush1.bf16.msra.mxu1 %v3495_v11  ;;  %v3577_v11 = vld [vmem:[%s4908_s0 + $0x34] ss:$20 sps:$4 sm:$0xff]  }
  0x23   :  { %1417 = vmatprep.subr.bf16.mxu0 %v3747_v0  ;;  %3319 = vmatprep.subr.bf16.mxu1 %v3747_v0 }
  0x26   :  { %1418 = vmatpush1.bf16.msra.mxu0 %v3496_v12  ;;  %3335 = vmatpush1.bf16.msra.mxu1 %v3496_v12  ;;  %v3580_v12 = vld [vmem:[%s4908_s0 + $0x30] ss:$20 sps:$4 sm:$0xff]  }
  0x27   :  { %1419 = vmatprep.subr.bf16.mxu0 %v3747_v0  ;;  %3320 = vmatprep.subr.bf16.mxu1 %v3747_v0 }
  0x2a   :  { %1420 = vmatpush1.bf16.msra.mxu0 %v3497_v13  ;;  %3336 = vmatpush1.bf16.msra.mxu1 %v3497_v13  ;;  %v3581_v13 = vld [vmem:[%s4908_s0 + $0x2d4] ss:$20 sps:$4 sm:$0xff]  }
  0x2b   :  { %1421 = vmatprep.subr.bf16.mxu0 %v3747_v0  ;;  %3321 = vmatprep.subr.bf16.mxu1 %v3747_v0 }
  0x2e   :  { %1422 = vmatpush1.bf16.msra.mxu0 %v3498_v14  ;;  %3337 = vmatpush1.bf16.msra.mxu1 %v3498_v14  ;;  %v3583_v14 = vld [vmem:[%s4908_s0 + $0x5c] ss:$20 sps:$4 sm:$0xff]  }
  0x2f   :  { %1423 = vmatprep.subr.bf16.mxu0 %v3747_v0  ;;  %3322 = vmatprep.subr.bf16.mxu1 %v3747_v0 }
  0x32   :  { %1424 = vmatpush1.bf16.msra.mxu0 %v3499_v15  ;;  %3338 = vmatpush1.bf16.msra.mxu1 %v3499_v15  ;;  %v3585_v15 = vld [vmem:[%s4908_s0 + $0x2d0] ss:$20 sps:$4 sm:$0xff]  }
  0x33   :  { %1425 = vmatprep.subr.bf16.mxu0 %v3747_v0  ;;  %3323 = vmatprep.subr.bf16.mxu1 %v3747_v0 }
  0x36   :  { %1426 = vmatpush1.bf16.msra.mxu0 %v3500_v16  ;;  %3339 = vmatpush1.bf16.msra.mxu1 %v3500_v16  ;;  %v3586_v16 = vld [vmem:[%s4908_s0 + $0x58] ss:$20 sps:$4 sm:$0xff]  }
  0x37   :  { %1427 = vmatprep.subr.bf16.mxu0 %v3747_v0  ;;  %3324 = vmatprep.subr.bf16.mxu1 %v3747_v0 }
  0x3a   :  { %1428 = vmatpush1.bf16.msra.mxu0 %v3501_v17  ;;  %3340 = vmatpush1.bf16.msra.mxu1 %v3501_v17  ;;  %v3587_v17 = vld [vmem:[%s4908_s0 + $0x2fc] ss:$20 sps:$4 sm:$0xff]  }
  0x3b   :  { %1429 = vmatprep.subr.bf16.mxu0 %v3747_v0  ;;  %3325 = vmatprep.subr.bf16.mxu1 %v3747_v0 }
  0x3e   :  { %1430 = vmatpush1.bf16.msra.mxu0 %v3502_v18  ;;  %3341 = vmatpush1.bf16.msra.mxu1 %v3502_v18  ;;  %v3589_v18 = vld [vmem:[%s4908_s0 + $0x84] ss:$20 sps:$4 sm:$0xff]  }
  0x3f   :  { %1688 = vmatprep.subr.bf16.mxu0 %v3747_v0  ;;  %3238 = vmatprep.subr.bf16.mxu1 %v3510_v19 }
  0x41   :  { %1432 = vmatmul.mubr.bf16.vlgmr.msra.gmra.mrb[0].mxu0 %v3503_v20  ;;  %1496 = vmatmul.mubr.bf16.vlgmr.msra.gmra.mrb[0].mxu1 %v3506_v21  ;;  %v3592_v20 = vld [vmem:[%s4908_s0 + $0x80] ss:$20 sps:$4 sm:$0xff]   ;;  %v3593_v21 = vld [vmem:[%s4908_s0 + $0x324] ss:$20 sps:$4 sm:$0xff]  }
  0x42   :  { %1689 = vmatpush1.bf16.msra.mxu0 %v3509_v22  ;;  %3239 = vmatpush3.bf16.msra.mxu1 %v3510_v19  ;;  %v3591_v19 = vld [vmem:[%s4908_s0 + $0x2f8] ss:$20 sps:$4 sm:$0xff]  }
  0x43   :  { %1690 = vmatprep.subr.bf16.mxu0 %v3747_v0  ;;  %1439 = vmatprep.mubr.bf16.mxu0 %v3512_v23  ;;  %v3595_v22 = vld [vmem:[%s4908_s0 + $0xac] ss:$20 sps:$4 sm:$0xff]  }
  0x44   :  { %1503 = vmatprep.mubr.bf16.mxu1 %v3514_v24  ;;  %3240 = vmatprep.subr.bf16.mxu1 %v3559_v25  ;;  %v3597_v23 = vld [vmem:[%s4908_s0 + $0x320] ss:$20 sps:$4 sm:$0xff]   ;;  %v3598_v24 = vld [vmem:[%s4908_s0 + $0xa8] ss:$20 sps:$4 sm:$0xff]  }
  0x46   :  { %1691 = vmatpush1.bf16.msra.mxu0 %v3511_v26  ;;  %3241 = vmatpush3.bf16.msra.mxu1 %v3559_v25  ;;  %v3600_v25 = vld [vmem:[%s4908_s0 + $0x34c] ss:$20 sps:$4 sm:$0xff]   ;;  %v3602_v26 = vld [vmem:[%s4908_s0 + $0xd4] ss:$20 sps:$4 sm:$0xff]  }
  0x47   :  { %1692 = vmatprep.subr.bf16.mxu0 %v3747_v0  ;;  %3242 = vmatprep.subr.bf16.mxu1 %v3599_v30 }
  0x49   :  { %1440 = vmatmul.mubr.bf16.gmra.mrb[4].mxu0 %v3516_v27  ;;  %1504 = vmatmul.mubr.bf16.gmra.mrb[4].mxu1 %v3517_v28  ;;  %v3604_v27 = vld [vmem:[%s4908_s0 + $0x348] ss:$20 sps:$4 sm:$0xff]   ;;  %v3605_v28 = vld [vmem:[%s4908_s0 + $0xd0] ss:$20 sps:$4 sm:$0xff]  }
  0x4a   :  { %1693 = vmatpush1.bf16.msra.mxu0 %v3518_v29  ;;  %1447 = vmatprep.mubr.bf16.mxu0 %v3520_v31  ;;  %v3606_v29 = vld [vmem:[%s4908_s0 + $0x374] ss:$20 sps:$4 sm:$0xff]   ;;  %v3610_v31 = vld [vmem:[%s4908_s0 + $0x370] ss:$20 sps:$4 sm:$0xff]  }
  0x4b   :  { %1694 = vmatprep.subr.bf16.mxu0 %v3747_v0  ;;  %1511 = vmatprep.mubr.bf16.mxu1 %v3522_v32  ;;  %v3611_v32 = vld [vmem:[%s4908_s0 + $0xf8] ss:$20 sps:$4 sm:$0xff]  }
  0x4c   :  { %3243 = vmatpush3.bf16.msra.mxu1 %v3599_v30  ;;  %v3608_v30 = vld [vmem:[%s4908_s0 + $0xfc] ss:$20 sps:$4 sm:$0xff]  }
  0x4d   :  { %3244 = vmatprep.subr.bf16.mxu1 %v3636_v44 }
  0x4e   :  { %1695 = vmatpush1.bf16.msra.mxu0 %v3519_v33  ;;  %v3612_v33 = vld [vmem:[%s4908_s0 + $0x39c] ss:$20 sps:$4 sm:$0xff]  }
  0x4f   :  { %1696 = vmatprep.subr.bf16.mxu0 %v3747_v0 }
  0x50   :  { %3245 = vmatpush3.bf16.msra.mxu1 %v3636_v44  ;;  %v3629_v44 = vld [vmem:[%s4908_s0 + $0x170] ss:$20 sps:$4 sm:$0xff]  }
  0x51   :  { %1448 = vmatmul.mubr.bf16.gmra.mrb[8].mxu0 %v3524_v34  ;;  %1512 = vmatmul.mubr.bf16.gmra.mrb[8].mxu1 %v3525_v35  ;;  %v3614_v34 = vld [vmem:[%s4908_s0 + $0x124] ss:$20 sps:$4 sm:$0xff]  }
  0x52   :  { %1697 = vmatpush1.bf16.msra.mxu0 %v3526_v36  ;;  %1455 = vmatprep.mubr.bf16.mxu0 %v3528_v37  ;;  %v3616_v35 = vld [vmem:[%s4908_s0 + $0x398] ss:$20 sps:$4 sm:$0xff]   ;;  %v3617_v36 = vld [vmem:[%s4908_s0 + $0x120] ss:$20 sps:$4 sm:$0xff]  }
  0x53   :  { %1698 = vmatprep.subr.bf16.mxu0 %v3747_v0  ;;  %1519 = vmatprep.mubr.bf16.mxu1 %v3530_v38  ;;  %v3618_v37 = vld [vmem:[%s4908_s0 + $0x3c4] ss:$20 sps:$4 sm:$0xff]   ;;  %v3620_v38 = vld [vmem:[%s4908_s0 + $0x14c] ss:$20 sps:$4 sm:$0xff]  }
  0x56   :  { %1699 = vmatpush1.bf16.msra.mxu0 %v3527_v39  ;;  %v3622_v39 = vld [vmem:[%s4908_s0 + $0x3c0] ss:$20 sps:$4 sm:$0xff]  }
  0x57   :  { %1700 = vmatprep.subr.bf16.mxu0 %v3747_v0 }
  0x59   :  { %1456 = vmatmul.mubr.bf16.gmra.mrb[12].mxu0 %v3532_v40  ;;  %1520 = vmatmul.mubr.bf16.gmra.mrb[12].mxu1 %v3533_v41  ;;  %v3623_v40 = vld [vmem:[%s4908_s0 + $0x148] ss:$20 sps:$4 sm:$0xff]   ;;  %v3624_v41 = vld [vmem:[%s4908_s0 + $0x3ec] ss:$20 sps:$4 sm:$0xff]  }
  0x5a   :  { %1701 = vmatpush1.bf16.msra.mxu0 %v3534_v42  ;;  %1463 = vmatprep.mubr.bf16.mxu0 %v3536_v43  ;;  %v3626_v42 = vld [vmem:[%s4908_s0 + $0x174] ss:$20 sps:$4 sm:$0xff]  }
  0x5b   :  { %1702 = vmatprep.subr.bf16.mxu0 %v3747_v0  ;;  %1527 = vmatprep.mubr.bf16.mxu1 %v3538_v45  ;;  %v3628_v43 = vld [vmem:[%s4908_s0 + $0x3e8] ss:$20 sps:$4 sm:$0xff]  }
  0x5c   :  { %v3630_v45 = vld [vmem:[%s4908_s0 + $0x414] ss:$20 sps:$4 sm:$0xff]  }
  0x5e   :  { %1703 = vmatpush1.bf16.msra.mxu0 %v3535_v46  ;;  %v3632_v46 = vld [vmem:[%s4908_s0 + $0x19c] ss:$20 sps:$4 sm:$0xff]  }
  0x5f   :  { %1704 = vmatprep.subr.bf16.mxu0 %v3747_v0 }
  0x61   :  { %1464 = vmatmul.mubr.bf16.gmra.mrb[16].mxu0 %v3540_v47  ;;  %1528 = vmatmul.mubr.bf16.gmra.mrb[16].mxu1 %v3541_v48  ;;  %v3634_v47 = vld [vmem:[%s4908_s0 + $0x410] ss:$20 sps:$4 sm:$0xff]   ;;  %v3635_v48 = vld [vmem:[%s4908_s0 + $0x198] ss:$20 sps:$4 sm:$0xff]  }
  0x62   :  { %1705 = vmatpush1.bf16.msra.mxu0 %v3542_v49  ;;  %1471 = vmatprep.mubr.bf16.mxu0 %v3544_v50  ;;  %v3637_v49 = vld [vmem:[%s4908_s0 + $0x43c] ss:$20 sps:$4 sm:$0xff]   ;;  %v3639_v50 = vld [vmem:[%s4908_s0 + $0x1c4] ss:$20 sps:$4 sm:$0xff]  }
  0x63   :  { %1706 = vmatprep.subr.bf16.mxu0 %v3747_v0  ;;  %1535 = vmatprep.mubr.bf16.mxu1 %v3546_v51  ;;  %v3641_v51 = vld [vmem:[%s4908_s0 + $0x438] ss:$20 sps:$4 sm:$0xff]  }
  0x66   :  { %1707 = vmatpush1.bf16.msra.mxu0 %v3543_v52  ;;  %v3642_v52 = vld [vmem:[%s4908_s0 + $0x1c0] ss:$20 sps:$4 sm:$0xff]  }
  0x67   :  { %1708 = vmatprep.subr.bf16.mxu0 %v3747_v0 }
  0x69   :  { %1472 = vmatmul.mubr.bf16.gmra.mrb[20].mxu0 %v3548_v53  ;;  %1536 = vmatmul.mubr.bf16.gmra.mrb[20].mxu1 %v3549_v54  ;;  %v3643_v53 = vld [vmem:[%s4908_s0 + $0x464] ss:$20 sps:$4 sm:$0xff]   ;;  %v3645_v54 = vld [vmem:[%s4908_s0 + $0x1ec] ss:$20 sps:$4 sm:$0xff]  }
  0x6a   :  { %1709 = vmatpush1.bf16.msra.mxu0 %v3550_v55  ;;  %1479 = vmatprep.mubr.bf16.mxu0 %v3552_v56  ;;  %v3647_v55 = vld [vmem:[%s4908_s0 + $0x460] ss:$20 sps:$4 sm:$0xff]   ;;  %v3648_v56 = vld [vmem:[%s4908_s0 + $0x1e8] ss:$20 sps:$4 sm:$0xff]  }
  0x6b   :  { %1710 = vmatprep.subr.bf16.mxu0 %v3747_v0  ;;  %1543 = vmatprep.mubr.bf16.mxu1 %v3554_v57  ;;  %v3649_v57 = vld [vmem:[%s4908_s0 + $0x48c] ss:$20 sps:$4 sm:$0xff]  }
  0x6e   :  { %1711 = vmatpush1.bf16.msra.mxu0 %v3551_v58  ;;  %v3651_v58 = vld [vmem:[%s4908_s0 + $0x214] ss:$20 sps:$4 sm:$0xff]  }
  0x6f   :  { %1712 = vmatprep.subr.bf16.mxu0 %v3747_v0 }
  0x71   :  { %1480 = vmatmul.mubr.bf16.gmra.mrb[24].mxu0 %v3556_v59  ;;  %1544 = vmatmul.mubr.bf16.gmra.mrb[24].mxu1 %v3557_v60  ;;  %v3653_v59 = vld [vmem:[%s4908_s0 + $0x488] ss:$20 sps:$4 sm:$0xff]   ;;  %v3654_v60 = vld [vmem:[%s4908_s0 + $0x210] ss:$20 sps:$4 sm:$0xff]  }
  0x72   :  { %1713 = vmatpush1.bf16.msra.mxu0 %v3558_v61  ;;  %1487 = vmatprep.mubr.bf16.mxu0 %v3561_v62  ;;  %v3655_v61 = vld [vmem:[%s4908_s0 + $0x4b4] ss:$20 sps:$4 sm:$0xff]   ;;  %v3657_v62 = vld [vmem:[%s4908_s0 + $0x23c] ss:$20 sps:$4 sm:$0xff]  }
  0x73   :  { %1714 = vmatprep.subr.bf16.mxu0 %v3747_v0  ;;  %1551 = vmatprep.mubr.bf16.mxu1 %v3563_v63  ;;  %v3659_v63 = vld [vmem:[%s4908_s0 + $0x4b0] ss:$20 sps:$4 sm:$0xff]  }
  0x76   :  { %1715 = vmatpush1.bf16.msra.mxu0 %v3560_v1  ;;  %v3660_v1 = vld [vmem:[%s4908_s0 + $0x238] ss:$20 sps:$4 sm:$0xff]  }
  0x77   :  { %1716 = vmatprep.subr.bf16.mxu0 %v3747_v0 }
  0x79   :  { %1488 = vmatmul.mubr.bf16.gmra.mrb[28].mxu0 %v3565_v2  ;;  %1552 = vmatmul.mubr.bf16.gmra.mrb[28].mxu1 %v3566_v3  ;;  %v3661_v2 = vld [vmem:[%s4908_s0 + $0x4dc] ss:$20 sps:$4 sm:$0xff]   ;;  %v3663_v3 = vld [vmem:[%s4908_s0 + $0x264] ss:$20 sps:$4 sm:$0xff]  }
  0x7a   :  { %1717 = vmatpush1.bf16.msra.mxu0 %v3567_v4  ;;  %1559 = vmatprep.mubr.bf16.mxu1 %v3569_v5  ;;  %v3665_v4 = vld [vmem:[%s4908_s0 + $0x4d8] ss:$20 sps:$4 sm:$0xff]   ;;  %v3666_v5 = vld [vmem:[%s4908_s0 + $0x260] ss:$20 sps:$4 sm:$0xff]  }
  0x7b   :  { %1718 = vmatprep.subr.bf16.mxu0 %v3747_v0  ;;  %1720 = vmatprep.mubr.bf16.mxu0 %v3573_v6  ;;  %v3579_v0 = vld [vmem:[%s4908_s0 + $0x2a8] ss:$20 sps:$4 sm:$0xff]   ;;  %v3667_v6 = vld [vmem:[%s4908_s0 + $0x28c] ss:$20 sps:$4 sm:$0xff]  }
  0x7e   :  { %1719 = vmatpush1.bf16.msra.mxu0 %v3568_v7  ;;  %v3669_v7 = vld [vmem:[%s4908_s0 + $0x10] ss:$20 sps:$4 sm:$0xff]  }
  0x81   :  { %1560 = vmatmul.mubr.bf16.gmra.mrb[32].mxu1 %v3574_v9  ;;  %1721 = vmatmul.mubr.bf16.vlgmr.msra.gmra.mrb[0].mxu0 %v3571_v8  ;;  %v3670_v8 = vld [vmem:[%s4908_s0 + $0x288] ss:$20 sps:$4 sm:$0xff]   ;;  %v3671_v9 = vld [vmem:[%s4908_s0 + $0x38] ss:$20 sps:$4 sm:$0xff]  }
  0x82   :  { %1567 = vmatprep.mubr.bf16.mxu1 %v3575_v10  ;;  %1728 = vmatprep.mubr.bf16.mxu0 %v3577_v11  ;;  %v3672_v10 = vld [vmem:[%s4908_s0 + $0x2b4] ss:$20 sps:$4 sm:$0xff]  }
  0x83   :  { %v3674_v11 = vld [vmem:[%s4908_s0 + $0x60] ss:$20 sps:$4 sm:$0xff]  }
  0x89   :  { %1568 = vmatmul.mubr.bf16.gmra.mrb[36].mxu1 %v3579_v0  ;;  %1729 = vmatmul.mubr.bf16.gmra.mrb[4].mxu0 %v3580_v12  ;;  %v3675_v0 = vld [vmem:[%s4908_s0 + $0x2b0] ss:$20 sps:$4 sm:$0xff]   ;;  %v3676_v12 = vld [vmem:[%s4908_s0 + $0x88] ss:$20 sps:$4 sm:$0xff]  }
  0x8a   :  { %1575 = vmatprep.mubr.bf16.mxu1 %v3581_v13  ;;  %1736 = vmatprep.mubr.bf16.mxu0 %v3583_v14  ;;  %v3677_v13 = vld [vmem:[%s4908_s0 + $0x2dc] ss:$20 sps:$4 sm:$0xff]  }
  0x8b   :  { %v3679_v14 = vld [vmem:[%s4908_s0 + $0xb0] ss:$20 sps:$4 sm:$0xff]  }
  0x91   :  { %1576 = vmatmul.mubr.bf16.gmra.mrb[40].mxu1 %v3585_v15  ;;  %1737 = vmatmul.mubr.bf16.gmra.mrb[8].mxu0 %v3586_v16  ;;  %v3680_v15 = vld [vmem:[%s4908_s0 + $0x2d8] ss:$20 sps:$4 sm:$0xff]  }
  0x92   :  { %1583 = vmatprep.mubr.bf16.mxu1 %v3587_v17  ;;  %1744 = vmatprep.mubr.bf16.mxu0 %v3589_v18  ;;  %v3681_v16 = vld [vmem:[%s4908_s0 + $0xd8] ss:$20 sps:$4 sm:$0xff]   ;;  %v3684_v18 = vld [vmem:[%s4908_s0 + $0x100] ss:$20 sps:$4 sm:$0xff]  }
  0x93   :  { %v3682_v17 = vld [vmem:[%s4908_s0 + $0x304] ss:$20 sps:$4 sm:$0xff]  }
  0x99   :  { %1584 = vmatmul.mubr.bf16.gmra.mrb[44].mxu1 %v3591_v19  ;;  %1745 = vmatmul.mubr.bf16.gmra.mrb[12].mxu0 %v3592_v20 }
  0x9a   :  { %1591 = vmatprep.mubr.bf16.mxu1 %v3593_v21  ;;  %1752 = vmatprep.mubr.bf16.mxu0 %v3595_v22  ;;  %v3685_v21 = vld [vmem:[%s4908_s0 + $0x300] ss:$20 sps:$4 sm:$0xff]   ;;  %v3686_v22 = vld [vmem:[%s4908_s0 + $0x128] ss:$20 sps:$4 sm:$0xff]  }
  0xa1   :  { %1592 = vmatmul.mubr.bf16.gmra.mrb[48].mxu1 %v3597_v23  ;;  %1753 = vmatmul.mubr.bf16.gmra.mrb[16].mxu0 %v3598_v24  ;;  %v3687_v24 = vld [vmem:[%s4908_s0 + $0x32c] ss:$20 sps:$4 sm:$0xff]  }
  0xa2   :  { %1599 = vmatprep.mubr.bf16.mxu1 %v3600_v25  ;;  %1760 = vmatprep.mubr.bf16.mxu0 %v3602_v26  ;;  %v3689_v25 = vld [vmem:[%s4908_s0 + $0x150] ss:$20 sps:$4 sm:$0xff]  }
  0xa9   :  { %1600 = vmatmul.mubr.bf16.gmra.mrb[52].mxu1 %v3604_v27  ;;  %1761 = vmatmul.mubr.bf16.gmra.mrb[20].mxu0 %v3605_v28 }
  0xaa   :  { %1607 = vmatprep.mubr.bf16.mxu1 %v3606_v29  ;;  %1768 = vmatprep.mubr.bf16.mxu0 %v3608_v30  ;;  %v3690_v29 = vld [vmem:[%s4908_s0 + $0x328] ss:$20 sps:$4 sm:$0xff]   ;;  %v3691_v30 = vld [vmem:[%s4908_s0 + $0x178] ss:$20 sps:$4 sm:$0xff]  }
  0xb1   :  { %1608 = vmatmul.mubr.bf16.gmra.mrb[56].mxu1 %v3610_v31  ;;  %1769 = vmatmul.mubr.bf16.gmra.mrb[24].mxu0 %v3611_v32  ;;  %v3692_v32 = vld [vmem:[%s4908_s0 + $0x354] ss:$20 sps:$4 sm:$0xff]  }
  0xb2   :  { %1615 = vmatprep.mubr.bf16.mxu1 %v3612_v33  ;;  %1776 = vmatprep.mubr.bf16.mxu0 %v3614_v34  ;;  %v3694_v33 = vld [vmem:[%s4908_s0 + $0x1a0] ss:$20 sps:$4 sm:$0xff]  }
  0xb9   :  { %1616 = vmatmul.mubr.bf16.gmra.mrb[60].mxu1 %v3616_v35  ;;  %1777 = vmatmul.mubr.bf16.gmra.mrb[28].mxu0 %v3617_v36 }
  0xba   :  { %1623 = vmatprep.mubr.bf16.mxu1 %v3618_v37  ;;  %1784 = vmatprep.mubr.bf16.mxu0 %v3620_v38  ;;  %v3695_v37 = vld [vmem:[%s4908_s0 + $0x350] ss:$20 sps:$4 sm:$0xff]   ;;  %v3696_v38 = vld [vmem:[%s4908_s0 + $0x1c8] ss:$20 sps:$4 sm:$0xff]  }
  0xc1   :  { %1624 = vmatmul.mubr.bf16.gmra.mrb[64].mxu1 %v3622_v39  ;;  %1785 = vmatmul.mubr.bf16.gmra.mrb[32].mxu0 %v3623_v40  ;;  %v3697_v40 = vld [vmem:[%s4908_s0 + $0x37c] ss:$20 sps:$4 sm:$0xff]  }
  0xc2   :  { %1631 = vmatprep.mubr.bf16.mxu1 %v3624_v41  ;;  %1792 = vmatprep.mubr.bf16.mxu0 %v3626_v42  ;;  %v3699_v41 = vld [vmem:[%s4908_s0 + $0x1f0] ss:$20 sps:$4 sm:$0xff]  }
  0xc9   :  { %1632 = vmatmul.mubr.bf16.gmra.mrb[68].mxu1 %v3628_v43  ;;  %1793 = vmatmul.mubr.bf16.gmra.mrb[36].mxu0 %v3629_v44 }
  0xca   :  { %1639 = vmatprep.mubr.bf16.mxu1 %v3630_v45  ;;  %1800 = vmatprep.mubr.bf16.mxu0 %v3632_v46  ;;  %v3700_v45 = vld [vmem:[%s4908_s0 + $0x378] ss:$20 sps:$4 sm:$0xff]  }
  0xcb   :  { %v3701_v46 = vld [vmem:[%s4908_s0 + $0x218] ss:$20 sps:$4 sm:$0xff]  }
  0xd1   :  { %1640 = vmatmul.mubr.bf16.gmra.mrb[72].mxu1 %v3634_v47  ;;  %1801 = vmatmul.mubr.bf16.gmra.mrb[40].mxu0 %v3635_v48  ;;  %v3702_v48 = vld [vmem:[%s4908_s0 + $0x3a4] ss:$20 sps:$4 sm:$0xff]  }
  0xd2   :  { %1647 = vmatprep.mubr.bf16.mxu1 %v3637_v49  ;;  %1808 = vmatprep.mubr.bf16.mxu0 %v3639_v50  ;;  %v3704_v49 = vld [vmem:[%s4908_s0 + $0x240] ss:$20 sps:$4 sm:$0xff]  }
  0xd9   :  { %1648 = vmatmul.mubr.bf16.gmra.mrb[76].mxu1 %v3641_v51  ;;  %1809 = vmatmul.mubr.bf16.gmra.mrb[44].mxu0 %v3642_v52 }
  0xda   :  { %1655 = vmatprep.mubr.bf16.mxu1 %v3643_v53  ;;  %1816 = vmatprep.mubr.bf16.mxu0 %v3645_v54  ;;  %v3705_v53 = vld [vmem:[%s4908_s0 + $0x3a0] ss:$20 sps:$4 sm:$0xff]   ;;  %v3706_v54 = vld [vmem:[%s4908_s0 + $0x268] ss:$20 sps:$4 sm:$0xff]  }
  0xe1   :  { %1656 = vmatmul.mubr.bf16.gmra.mrb[80].mxu1 %v3647_v55  ;;  %1817 = vmatmul.mubr.bf16.gmra.mrb[48].mxu0 %v3648_v56  ;;  %v3707_v56 = vld [vmem:[%s4908_s0 + $0x3cc] ss:$20 sps:$4 sm:$0xff]  }
  0xe2   :  { %1663 = vmatprep.mubr.bf16.mxu1 %v3649_v57  ;;  %1824 = vmatprep.mubr.bf16.mxu0 %v3651_v58  ;;  %v3709_v57 = vld [vmem:[%s4908_s0 + $0x290] ss:$20 sps:$4 sm:$0xff]  }
  0xe9   :  { %1664 = vmatmul.mubr.bf16.gmra.mrb[84].mxu1 %v3653_v59  ;;  %1825 = vmatmul.mubr.bf16.gmra.mrb[52].mxu0 %v3654_v60 }
  0xea   :  { %1671 = vmatprep.mubr.bf16.mxu1 %v3655_v61  ;;  %1832 = vmatprep.mubr.bf16.mxu0 %v3657_v62  ;;  %v3710_v61 = vld [vmem:[%s4908_s0 + $0x3c8] ss:$20 sps:$4 sm:$0xff]   ;;  %v3711_v62 = vld [vmem:[%s4908_s0 + $0x2b8] ss:$20 sps:$4 sm:$0xff]  }
  0xf1   :  { %1672 = vmatmul.mubr.bf16.gmra.mrb[88].mxu1 %v3659_v63  ;;  %1833 = vmatmul.mubr.bf16.gmra.mrb[56].mxu0 %v3660_v1  ;;  %v3712_v1 = vld [vmem:[%s4908_s0 + $0x3f4] ss:$20 sps:$4 sm:$0xff]  }
  0xf2   :  { %1679 = vmatprep.mubr.bf16.mxu1 %v3661_v2  ;;  %1840 = vmatprep.mubr.bf16.mxu0 %v3663_v3  ;;  %v3714_v2 = vld [vmem:[%s4908_s0 + $0x2e0] ss:$20 sps:$4 sm:$0xff]  }
  0xf9   :  { %1680 = vmatmul.mubr.bf16.gmra.mrb[92].mxu1 %v3665_v4  ;;  %1841 = vmatmul.mubr.bf16.gmra.mrb[60].mxu0 %v3666_v5 }
  0xfa   :  { %1848 = vmatprep.mubr.bf16.mxu0 %v3667_v6  ;;  %3246 = vmatprep.mubr.msk.bf16.mxu1 %vm1302_vm0, %v3669_v7  ;;  %v3715_v6 = vld [vmem:[%s4908_s0 + $0x3f0] ss:$20 sps:$4 sm:$0xff]   ;;  %v3716_v7 = vld [vmem:[%s4908_s0 + $0x308] ss:$20 sps:$4 sm:$0xff]  }
 0x101   :  { %1849 = vmatmul.mubr.bf16.gmra.mrb[64].mxu0 %v3670_v8  ;;  %3247 = vmatmul.mubr.msk.bf16.vlgmr.msra.gmra.mrb[96].mxu1 %vm1302_vm0, %v3671_v9  ;;  %v3717_v9 = vld [vmem:[%s4908_s0 + $0x41c] ss:$20 sps:$4 sm:$0xff]  }
 0x102   :  { %1856 = vmatprep.mubr.bf16.mxu0 %v3672_v10  ;;  %3250 = vmatprep.mubr.msk.bf16.mxu1 %vm1302_vm0, %v3674_v11  ;;  %v3719_v10 = vld [vmem:[%s4908_s0 + $0x330] ss:$20 sps:$4 sm:$0xff]  }
 0x109   :  { %1857 = vmatmul.mubr.bf16.gmra.mrb[68].mxu0 %v3675_v0  ;;  %3251 = vmatmul.mubr.msk.bf16.gmra.mrb[100].mxu1 %vm1302_vm0, %v3676_v12 }
 0x10a   :  { %1864 = vmatprep.mubr.bf16.mxu0 %v3677_v13  ;;  %3254 = vmatprep.mubr.msk.bf16.mxu1 %vm1302_vm0, %v3679_v14  ;;  %v3720_v13 = vld [vmem:[%s4908_s0 + $0x418] ss:$20 sps:$4 sm:$0xff]  }
 0x10b   :  { %v3721_v14 = vld [vmem:[%s4908_s0 + $0x358] ss:$20 sps:$4 sm:$0xff]  }
 0x111   :  { %1865 = vmatmul.mubr.bf16.gmra.mrb[72].mxu0 %v3680_v15  ;;  %3255 = vmatmul.mubr.msk.bf16.gmra.mrb[104].mxu1 %vm1302_vm0, %v3681_v16  ;;  %v3722_v16 = vld [vmem:[%s4908_s0 + $0x444] ss:$20 sps:$4 sm:$0xff]  }
 0x112   :  { %1872 = vmatprep.mubr.bf16.mxu0 %v3682_v17  ;;  %3258 = vmatprep.mubr.msk.bf16.mxu1 %vm1302_vm0, %v3684_v18  ;;  %v3724_v17 = vld [vmem:[%s4908_s0 + $0x380] ss:$20 sps:$4 sm:$0xff]  }
 0x114   :  { %v4261_v19 = vpop.f32.mrb[0].mxu1 }
 0x115   :  { %v1499_v20 = vpop.f32.mrb[1].mxu1 }
 0x116   :  { %v4269_v23 = vpop.f32.mrb[2].mxu1 }
 0x117   :  { %v1502_v26 = vpop.f32.mrb[3].mxu1 }
 0x118   :  { %v3726_v26 = vld [vmem:[%s4908_s0 + $0x3a8] ss:$20 sps:$4 sm:$0xff]  }
 0x119   :  { %1873 = vmatmul.mubr.bf16.gmra.mrb[76].mxu0 %v3685_v21  ;;  %3259 = vmatmul.mubr.msk.bf16.gmra.mrb[108].mxu1 %vm1302_vm0, %v3686_v22 }
 0x11a   :  { %1880 = vmatprep.mubr.bf16.mxu0 %v3687_v24  ;;  %3262 = vmatprep.mubr.msk.bf16.mxu1 %vm1302_vm0, %v3689_v25  ;;  %v3725_v25 = vld [vmem:[%s4908_s0 + $0x440] ss:$20 sps:$4 sm:$0xff]  }
 0x11c   :  { %v4279_v27 = vpop.f32.mrb[4].mxu1 }
 0x11d   :  { %v1507_v28 = vpop.f32.mrb[5].mxu1 }
 0x11e   :  { %v4287_v31 = vpop.f32.mrb[6].mxu1 }
 0x11f   :  { %v1510_v34 = vpop.f32.mrb[7].mxu1 }
 0x121   :  { %1881 = vmatmul.mubr.bf16.gmra.mrb[80].mxu0 %v3690_v29  ;;  %3263 = vmatmul.mubr.msk.bf16.gmra.mrb[112].mxu1 %vm1302_vm0, %v3691_v30  ;;  %v3727_v30 = vld [vmem:[%s4908_s0 + $0x46c] ss:$20 sps:$4 sm:$0xff]  }
 0x122   :  { %1888 = vmatprep.mubr.bf16.mxu0 %v3692_v32  ;;  %3266 = vmatprep.mubr.msk.bf16.mxu1 %vm1302_vm0, %v3694_v33  ;;  %v3729_v32 = vld [vmem:[%s4908_s0 + $0x3d0] ss:$20 sps:$4 sm:$0xff]  }
 0x124   :  { %v4297_v35 = vpop.f32.mrb[8].mxu1 }
 0x125   :  { %v1515_v36 = vpop.f32.mrb[9].mxu1 }
 0x126   :  { %v4305_v39 = vpop.f32.mrb[10].mxu1 }
 0x127   :  { %v1518_v42 = vpop.f32.mrb[11].mxu1 }
 0x128   :  { %v3731_v42 = vld [vmem:[%s4908_s0 + $0x3f8] ss:$20 sps:$4 sm:$0xff]  }
 0x129   :  { %1889 = vmatmul.mubr.bf16.gmra.mrb[84].mxu0 %v3695_v37  ;;  %3267 = vmatmul.mubr.msk.bf16.gmra.mrb[116].mxu1 %vm1302_vm0, %v3696_v38 }
 0x12a   :  { %1896 = vmatprep.mubr.bf16.mxu0 %v3697_v40  ;;  %3270 = vmatprep.mubr.msk.bf16.mxu1 %vm1302_vm0, %v3699_v41  ;;  %v3730_v41 = vld [vmem:[%s4908_s0 + $0x468] ss:$20 sps:$4 sm:$0xff]  }
 0x12c   :  { %v4315_v43 = vpop.f32.mrb[12].mxu1 }
 0x12d   :  { %v1523_v44 = vpop.f32.mrb[13].mxu1 }
 0x12e   :  { %v4323_v47 = vpop.f32.mrb[14].mxu1 }
 0x12f   :  { %v1526_v50 = vpop.f32.mrb[15].mxu1 }
 0x131   :  { %1897 = vmatmul.mubr.bf16.gmra.mrb[88].mxu0 %v3700_v45  ;;  %3271 = vmatmul.mubr.msk.bf16.gmra.mrb[120].mxu1 %vm1302_vm0, %v3701_v46  ;;  %v3732_v46 = vld [vmem:[%s4908_s0 + $0x494] ss:$20 sps:$4 sm:$0xff]  }
 0x132   :  { %1904 = vmatprep.mubr.bf16.mxu0 %v3702_v48  ;;  %3274 = vmatprep.mubr.msk.bf16.mxu1 %vm1302_vm0, %v3704_v49  ;;  %v3734_v48 = vld [vmem:[%s4908_s0 + $0x420] ss:$20 sps:$4 sm:$0xff]  }
 0x134   :  { %v4333_v51 = vpop.f32.mrb[16].mxu1 }
 0x135   :  { %v1531_v52 = vpop.f32.mrb[17].mxu1 }
 0x136   :  { %v4341_v55 = vpop.f32.mrb[18].mxu1 }
 0x137   :  { %v1534_v58 = vpop.f32.mrb[19].mxu1 }
 0x138   :  { %v3736_v58 = vld [vmem:[%s4908_s0 + $0x448] ss:$20 sps:$4 sm:$0xff]  }
 0x139   :  { %1905 = vmatmul.mubr.bf16.gmra.mrb[92].mxu0 %v3705_v53  ;;  %3275 = vmatmul.mubr.msk.bf16.gmra.mrb[124].mxu1 %vm1302_vm0, %v3706_v54 }
 0x13a   :  { %1912 = vmatprep.mubr.bf16.mxu0 %v3707_v56  ;;  %3278 = vmatprep.mubr.msk.bf16.mxu1 %vm1302_vm0, %v3709_v57  ;;  %v3735_v57 = vld [vmem:[%s4908_s0 + $0x490] ss:$20 sps:$4 sm:$0xff]  }
 0x13c   :  { %v4351_v59 = vpop.f32.mrb[20].mxu1 }
 0x13d   :  { %v1539_v60 = vpop.f32.mrb[21].mxu1 }
 0x13e   :  { %v4359_v63 = vpop.f32.mrb[22].mxu1 }
 0x13f   :  { %v1542_v3 = vpop.f32.mrb[23].mxu1 }
 0x141   :  { %1913 = vmatmul.mubr.bf16.gmra.mrb[96].mxu0 %v3710_v61  ;;  %3279 = vmatmul.mubr.msk.bf16.gmra.mrb[128].mxu1 %vm1302_vm0, %v3711_v62  ;;  %v3737_v62 = vld [vmem:[%s4908_s0 + $0x4bc] ss:$20 sps:$4 sm:$0xff]  }
 0x142   :  { %1920 = vmatprep.mubr.bf16.mxu0 %v3712_v1  ;;  %3282 = vmatprep.mubr.msk.bf16.mxu1 %vm1302_vm0, %v3714_v2  ;;  %v3739_v1 = vld [vmem:[%s4908_s0 + $0x470] ss:$20 sps:$4 sm:$0xff]  }
 0x144   :  { %v4369_v4 = vpop.f32.mrb[24].mxu1 }
 0x145   :  { %v1547_v5 = vpop.f32.mrb[25].mxu1 }
 0x146   :  { %v4377_v8 = vpop.f32.mrb[26].mxu1 }
 0x147   :  { %v1550_v11 = vpop.f32.mrb[27].mxu1 }
 0x148   :  { %v3741_v11 = vld [vmem:[%s4908_s0 + $0x498] ss:$20 sps:$4 sm:$0xff]  }
 0x149   :  { %1921 = vmatmul.mubr.bf16.gmra.mrb[100].mxu0 %v3715_v6  ;;  %3283 = vmatmul.mubr.msk.bf16.gmra.mrb[132].mxu1 %vm1302_vm0, %v3716_v7 }
 0x14a   :  { %1928 = vmatprep.mubr.bf16.mxu0 %v3717_v9  ;;  %3286 = vmatprep.mubr.msk.bf16.mxu1 %vm1302_vm0, %v3719_v10  ;;  %v3740_v10 = vld [vmem:[%s4908_s0 + $0x4b8] ss:$20 sps:$4 sm:$0xff]  }
 0x14c   :  { %v4387_v0 = vpop.f32.mrb[28].mxu1 }
 0x14d   :  { %v1555_v12 = vpop.f32.mrb[29].mxu1 }
 0x14e   :  { %v4395_v15 = vpop.f32.mrb[30].mxu1 }
 0x14f   :  { %v1558_v18 = vpop.f32.mrb[31].mxu1 }
 0x151   :  { %1929 = vmatmul.mubr.bf16.gmra.mrb[104].mxu0 %v3720_v13  ;;  %3287 = vmatmul.mubr.msk.bf16.gmra.mrb[136].mxu1 %vm1302_vm0, %v3721_v14  ;;  %v3742_v14 = vld [vmem:[%s4908_s0 + $0x4e4] ss:$20 sps:$4 sm:$0xff]  }
 0x152   :  { %1936 = vmatprep.mubr.bf16.mxu0 %v3722_v16  ;;  %3290 = vmatprep.mubr.msk.bf16.mxu1 %vm1302_vm0, %v3724_v17  ;;  %v3744_v16 = vld [vmem:[%s4908_s0 + $0x4c0] ss:$20 sps:$4 sm:$0xff]  }
 0x154   :  { %v4405_v20 = vpop.f32.mrb[32].mxu1  ;;  %v4407_v21 = vpop.f32.mrb[0].mxu0 }
 0x155   :  { %v1563_v22 = vpop.f32.mrb[33].mxu1  ;;  %v1724_v24 = vpop.f32.mrb[1].mxu0 }
 0x156   :  { %v4415_v28 = vpop.f32.mrb[34].mxu1  ;;  %v4417_v29 = vpop.f32.mrb[2].mxu0 }
 0x157   :  { %v1566_v33 = vpop.f32.mrb[35].mxu1  ;;  %v1727_v34 = vpop.f32.mrb[3].mxu0 }
 0x159   :  { %1937 = vmatmul.mubr.bf16.gmra.mrb[108].mxu0 %v3725_v25  ;;  %3291 = vmatmul.mubr.msk.bf16.gmra.mrb[140].mxu1 %vm1302_vm0, %v3726_v26 }
 0x15a   :  { %1944 = vmatprep.mubr.bf16.mxu0 %v3727_v30  ;;  %3294 = vmatprep.mubr.msk.bf16.mxu1 %vm1302_vm0, %v3729_v32  ;;  %v3745_v30 = vld [vmem:[%s4908_s0 + $0x4e0] ss:$20 sps:$4 sm:$0xff]   ;;  %v3746_v32 = vld [vmem:[%s4908_s0 + $0x4e8] ss:$20 sps:$4 sm:$0xff]  }
 0x15c   :  { %v4427_v36 = vpop.f32.mrb[36].mxu1  ;;  %v4429_v37 = vpop.f32.mrb[4].mxu0 }
 0x15d   :  { %v1571_v38 = vpop.f32.mrb[37].mxu1  ;;  %v1732_v40 = vpop.f32.mrb[5].mxu0 }
 0x15e   :  { %v4437_v44 = vpop.f32.mrb[38].mxu1  ;;  %v4439_v45 = vpop.f32.mrb[6].mxu0 }
 0x15f   :  { %v1574_v49 = vpop.f32.mrb[39].mxu1  ;;  %v1735_v50 = vpop.f32.mrb[7].mxu0 }
 0x161   :  { %1945 = vmatmul.mubr.bf16.gmra.mrb[112].mxu0 %v3730_v41  ;;  %3295 = vmatmul.mubr.msk.bf16.gmra.mrb[144].mxu1 %vm1302_vm0, %v3731_v42 }
 0x162   :  { %1952 = vmatprep.mubr.bf16.mxu0 %v3732_v46  ;;  %3298 = vmatprep.mubr.msk.bf16.mxu1 %vm1302_vm0, %v3734_v48 }
 0x164   :  { %v4449_v52 = vpop.f32.mrb[40].mxu1  ;;  %v4451_v53 = vpop.f32.mrb[8].mxu0 }
 0x165   :  { %v1579_v54 = vpop.f32.mrb[41].mxu1  ;;  %v1740_v56 = vpop.f32.mrb[9].mxu0 }
 0x166   :  { %v4459_v60 = vpop.f32.mrb[42].mxu1  ;;  %v4461_v61 = vpop.f32.mrb[10].mxu0 }
 0x167   :  { %v1582_v2 = vpop.f32.mrb[43].mxu1  ;;  %v1743_v3 = vpop.f32.mrb[11].mxu0 }
 0x169   :  { %1953 = vmatmul.mubr.bf16.gmra.mrb[116].mxu0 %v3735_v57  ;;  %3299 = vmatmul.mubr.msk.bf16.gmra.mrb[148].mxu1 %vm1302_vm0, %v3736_v58 }
 0x16a   :  { %1960 = vmatprep.mubr.bf16.mxu0 %v3737_v62  ;;  %3302 = vmatprep.mubr.msk.bf16.mxu1 %vm1302_vm0, %v3739_v1 }
 0x16c   :  { %v4471_v5 = vpop.f32.mrb[44].mxu1  ;;  %v4473_v6 = vpop.f32.mrb[12].mxu0 }
 0x16d   :  { %v1587_v7 = vpop.f32.mrb[45].mxu1  ;;  %v1748_v9 = vpop.f32.mrb[13].mxu0 }
 0x16e   :  { %v4481_v12 = vpop.f32.mrb[46].mxu1  ;;  %v4483_v13 = vpop.f32.mrb[14].mxu0 }
 0x16f   :  { %v1590_v17 = vpop.f32.mrb[47].mxu1  ;;  %v1751_v18 = vpop.f32.mrb[15].mxu0 }
 0x171   :  { %1961 = vmatmul.mubr.bf16.gmra.mrb[120].mxu0 %v3740_v10  ;;  %3303 = vmatmul.mubr.msk.bf16.gmra.mrb[152].mxu1 %vm1302_vm0, %v3741_v11 }
 0x172   :  { %1968 = vmatprep.mubr.bf16.mxu0 %v3742_v14  ;;  %3306 = vmatprep.mubr.msk.bf16.mxu1 %vm1302_vm0, %v3744_v16 }
 0x174   :  { %v4493_v22 = vpop.f32.mrb[48].mxu1  ;;  %v4495_v24 = vpop.f32.mrb[16].mxu0 }
 0x175   :  { %v1595_v25 = vpop.f32.mrb[49].mxu1  ;;  %v1756_v26 = vpop.f32.mrb[17].mxu0 }
 0x176   :  { %v4503_v33 = vpop.f32.mrb[50].mxu1  ;;  %v4505_v34 = vpop.f32.mrb[18].mxu0 }
 0x177   :  { %v1598_v38 = vpop.f32.mrb[51].mxu1  ;;  %v1759_v40 = vpop.f32.mrb[19].mxu0 }
 0x179   :  { %1969 = vmatmul.mubr.bf16.gmra.mrb[124].mxu0 %v3745_v30  ;;  %3307 = vmatmul.mubr.msk.bf16.gmra.mrb[156].mxu1 %vm1302_vm0, %v3746_v32  ;;  %v4535_v30 = vld [vmem:[%s4909_s2] ss:$0 sm:$0xff] }
 0x17a   :  { %v1498_v32 = vadd.f32 %v4535_v30, %v4261_v19  ;;  %v1506_v19 = vadd.f32 %v4535_v30, %v4279_v27  ;;  %v1514_v27 = vadd.f32 %v4535_v30, %v4297_v35  ;;  %v1522_v35 = vadd.f32 %v4535_v30, %v4315_v43 }
 0x17b   :  { %v1530_v43 = vadd.f32 %v4535_v30, %v4333_v51  ;;  %v1538_v51 = vadd.f32 %v4535_v30, %v4351_v59  ;;  %v1546_v59 = vadd.f32 %v4535_v30, %v4369_v4  ;;  %v1554_v4 = vadd.f32 %v4535_v30, %v4387_v0 }
 0x17c   :  { %v4508_v41 = vpop.f32.mrb[52].mxu1  ;;  %v4510_v42 = vpop.f32.mrb[20].mxu0  ;;  %v1562_v0 = vadd.f32 %v4535_v30, %v4405_v20  ;;  %v3343_v20 = vadd.f32 %v4535_v30, %v4417_v29 }
 0x17d   :  { %v1603_v46 = vpop.f32.mrb[53].mxu1  ;;  %v1764_v48 = vpop.f32.mrb[21].mxu0 }
 0x17e   :  { %v4512_v49 = vpop.f32.mrb[54].mxu1  ;;  %v4514_v50 = vpop.f32.mrb[22].mxu0  ;;  %v1501_v46 = vadd.f32 %v4535_v30, %v4269_v23  ;;  %v1509_v23 = vadd.f32 %v4535_v30, %v4287_v31  ;;  %v1517_v31 = vadd.f32 %v4535_v30, %v4305_v39  ;;  %v1525_v39 = vadd.f32 %v4535_v30, %v4323_v47 }
 0x17f   :  { %v1606_v54 = vpop.f32.mrb[55].mxu1  ;;  %v1767_v56 = vpop.f32.mrb[23].mxu0  ;;  %v1533_v47 = vadd.f32 %v4535_v30, %v4341_v55  ;;  %v1541_v55 = vadd.f32 %v4535_v30, %v4359_v63  ;;  %v1549_v63 = vadd.f32 %v4535_v30, %v4377_v8  ;;  %v1557_v8 = vadd.f32 %v4535_v30, %v4395_v15 }
 0x180   :  { %v3342_v15 = vadd.f32 %v4535_v30, %v4407_v21 }
 0x184   :  { %v4516_v57 = vpop.f32.mrb[56].mxu1  ;;  %v4518_v58 = vpop.f32.mrb[24].mxu0 }
 0x185   :  { %v1611_v62 = vpop.f32.mrb[57].mxu1  ;;  %v1772_v1 = vpop.f32.mrb[25].mxu0 }
 0x186   :  { %v4520_v2 = vpop.f32.mrb[58].mxu1  ;;  %v4522_v3 = vpop.f32.mrb[26].mxu0 }
 0x187   :  { %v1614_v7 = vpop.f32.mrb[59].mxu1  ;;  %v1775_v9 = vpop.f32.mrb[27].mxu0 }
 0x18c   :  { %v4524_v10 = vpop.f32.mrb[60].mxu1  ;;  %v4526_v11 = vpop.f32.mrb[28].mxu0 }
 0x18d   :  { %v1619_v14 = vpop.f32.mrb[61].mxu1  ;;  %v1780_v16 = vpop.f32.mrb[29].mxu0 }
 0x18e   :  { %v4528_v17 = vpop.f32.mrb[62].mxu1  ;;  %v4530_v18 = vpop.f32.mrb[30].mxu0 }
 0x18f   :  { %v1622_v25 = vpop.f32.mrb[63].mxu1  ;;  %v1783_v26 = vpop.f32.mrb[31].mxu0 }
 0x194   :  { %v4539_v38 = vpop.f32.mrb[64].mxu1  ;;  %v1786_v40 = vpop.f32.mrb[32].mxu0 }
 0x195   :  { %4911 = vst [vmem:[#allocation2_spill] sm:$0xff] %v4539_v38  ;;  %v4543_v48 = vadd.f32 %v1786_v40, %v1498_v32  ;;  %v1627_v54 = vpop.f32.mrb[65].mxu1  ;;  %v1788_v56 = vpop.f32.mrb[33].mxu0 }
 0x196   :  { %v4545_v62 = vpop.f32.mrb[66].mxu1  ;;  %v1789_v1 = vpop.f32.mrb[34].mxu0 }
 0x197   :  { %4912 = vst [vmem:[#allocation3_spill] sm:$0xff] %v4545_v62  ;;  %v4547_v7 = vadd.f32 %v1789_v1, %v1501_v46  ;;  %v1630_v9 = vpop.f32.mrb[67].mxu1  ;;  %v1791_v14 = vpop.f32.mrb[35].mxu0 }
 0x19c   :  { %v4551_v16 = vpop.f32.mrb[68].mxu1  ;;  %v1794_v25 = vpop.f32.mrb[36].mxu0 }
 0x19d   :  { %4913 = vst [vmem:[#allocation4_spill] sm:$0xff] %v4551_v16  ;;  %v4555_v26 = vadd.f32 %v1794_v25, %v1506_v19  ;;  %v1635_v32 = vpop.f32.mrb[69].mxu1  ;;  %v1796_v40 = vpop.f32.mrb[37].mxu0 }
 0x19e   :  { %v4557_v54 = vpop.f32.mrb[70].mxu1  ;;  %v1797_v56 = vpop.f32.mrb[38].mxu0 }
 0x19f   :  { %4914 = vst [vmem:[#allocation5_spill] sm:$0xff] %v4557_v54  ;;  %v4559_v46 = vadd.f32 %v1797_v56, %v1509_v23  ;;  %v1638_v1 = vpop.f32.mrb[71].mxu1  ;;  %v1799_v9 = vpop.f32.mrb[39].mxu0 }
 0x1a4   :  { %v4563_v14 = vpop.f32.mrb[72].mxu1  ;;  %v1802_v16 = vpop.f32.mrb[40].mxu0 }
 0x1a5   :  { %4915 = vst [vmem:[#allocation6_spill] sm:$0xff] %v4563_v14  ;;  %v4567_v19 = vadd.f32 %v1802_v16, %v1514_v27  ;;  %v1643_v25 = vpop.f32.mrb[73].mxu1  ;;  %v1804_v32 = vpop.f32.mrb[41].mxu0 }
 0x1a6   :  { %v4569_v40 = vpop.f32.mrb[74].mxu1  ;;  %v1805_v54 = vpop.f32.mrb[42].mxu0 }
 0x1a7   :  { %4916 = vst [vmem:[#allocation7_spill] sm:$0xff] %v4569_v40  ;;  %v4571_v23 = vadd.f32 %v1805_v54, %v1517_v31  ;;  %v1646_v56 = vpop.f32.mrb[75].mxu1  ;;  %v1807_v1 = vpop.f32.mrb[43].mxu0 }
 0x1ac   :  { %v4575_v9 = vpop.f32.mrb[76].mxu1  ;;  %v1810_v14 = vpop.f32.mrb[44].mxu0 }
 0x1ad   :  { %4917 = vst [vmem:[#allocation8_spill] sm:$0xff] %v4575_v9  ;;  %v4579_v16 = vadd.f32 %v1810_v14, %v1522_v35  ;;  %v1651_v27 = vpop.f32.mrb[77].mxu1  ;;  %v1812_v25 = vpop.f32.mrb[45].mxu0 }
 0x1ae   :  { %v4581_v32 = vpop.f32.mrb[78].mxu1  ;;  %v1813_v40 = vpop.f32.mrb[46].mxu0 }
 0x1af   :  { %4918 = vst [vmem:[#allocation9_spill] sm:$0xff] %v4581_v32  ;;  %v4583_v54 = vadd.f32 %v1813_v40, %v1525_v39  ;;  %v1654_v31 = vpop.f32.mrb[79].mxu1  ;;  %v1815_v56 = vpop.f32.mrb[47].mxu0 }
 0x1b4   :  { %v4587_v1 = vpop.f32.mrb[80].mxu1  ;;  %v1818_v9 = vpop.f32.mrb[48].mxu0 }
 0x1b5   :  { %4919 = vst [vmem:[#allocation10_spill] sm:$0xff] %v4587_v1  ;;  %v4591_v14 = vadd.f32 %v1818_v9, %v1530_v43  ;;  %v1659_v35 = vpop.f32.mrb[81].mxu1  ;;  %v1820_v27 = vpop.f32.mrb[49].mxu0 }
 0x1b6   :  { %v4593_v25 = vpop.f32.mrb[82].mxu1  ;;  %v1821_v32 = vpop.f32.mrb[50].mxu0 }
 0x1b7   :  { %4920 = vst [vmem:[#allocation11_spill] sm:$0xff] %v4593_v25  ;;  %v4595_v40 = vadd.f32 %v1821_v32, %v1533_v47  ;;  %v1662_v39 = vpop.f32.mrb[83].mxu1  ;;  %v1823_v31 = vpop.f32.mrb[51].mxu0 }
 0x1bc   :  { %v4599_v56 = vpop.f32.mrb[84].mxu1  ;;  %v1826_v1 = vpop.f32.mrb[52].mxu0 }
 0x1bd   :  { %4921 = vst [vmem:[#allocation12_spill] sm:$0xff] %v4599_v56  ;;  %v4603_v9 = vadd.f32 %v1826_v1, %v1538_v51  ;;  %v1667_v43 = vpop.f32.mrb[85].mxu1  ;;  %v1828_v35 = vpop.f32.mrb[53].mxu0 }
 0x1be   :  { %v4605_v27 = vpop.f32.mrb[86].mxu1  ;;  %v1829_v25 = vpop.f32.mrb[54].mxu0 }
 0x1bf   :  { %4922 = vst [vmem:[#allocation13_spill] sm:$0xff] %v4605_v27  ;;  %v4607_v32 = vadd.f32 %v1829_v25, %v1541_v55  ;;  %v1670_v47 = vpop.f32.mrb[87].mxu1  ;;  %v1831_v39 = vpop.f32.mrb[55].mxu0 }
 0x1c4   :  { %v4611_v31 = vpop.f32.mrb[88].mxu1  ;;  %v1834_v56 = vpop.f32.mrb[56].mxu0 }
 0x1c5   :  { %4923 = vst [vmem:[#allocation14_spill] sm:$0xff] %v4611_v31  ;;  %v4615_v1 = vadd.f32 %v1834_v56, %v1546_v59  ;;  %v1675_v51 = vpop.f32.mrb[89].mxu1  ;;  %v1836_v43 = vpop.f32.mrb[57].mxu0 }
 0x1c6   :  { %v4617_v35 = vpop.f32.mrb[90].mxu1  ;;  %v1837_v27 = vpop.f32.mrb[58].mxu0 }
 0x1c7   :  { %4924 = vst [vmem:[#allocation15_spill] sm:$0xff] %v4615_v1  ;;  %4925 = vst [vmem:[#allocation16_spill] sm:$0xff] %v4617_v35  ;;  %v4619_v25 = vadd.f32 %v1837_v27, %v1549_v63  ;;  %v1678_v55 = vpop.f32.mrb[91].mxu1  ;;  %v1839_v47 = vpop.f32.mrb[59].mxu0 }
 0x1c8   :  { %v3344_v47 = vadd.f32 %v4535_v30, %v4429_v37 }
 0x1c9   :  { %4926 = vst [vmem:[#allocation17_spill] sm:$0xff] %v4619_v25 }
 0x1cc   :  { %v4623_v39 = vpop.f32.mrb[92].mxu1  ;;  %v1842_v31 = vpop.f32.mrb[60].mxu0 }
 0x1cd   :  { %4927 = vst [vmem:[#allocation18_spill] sm:$0xff] %v4623_v39  ;;  %v4627_v56 = vadd.f32 %v1842_v31, %v1554_v4  ;;  %v1683_v59 = vpop.f32.mrb[93].mxu1  ;;  %v1844_v51 = vpop.f32.mrb[61].mxu0 }
 0x1ce   :  { %v4629_v43 = vpop.f32.mrb[94].mxu1  ;;  %v1845_v35 = vpop.f32.mrb[62].mxu0  ;;  %v1565_v59 = vadd.f32 %v4535_v30, %v4415_v28 }
 0x1cf   :  { %4928 = vst [vmem:[#allocation19_spill] sm:$0xff] %v4629_v43  ;;  %v4631_v27 = vadd.f32 %v1845_v35, %v1557_v8  ;;  %v1686_v63 = vpop.f32.mrb[95].mxu1  ;;  %v1847_v55 = vpop.f32.mrb[63].mxu0  ;;  %v3345_v35 = vadd.f32 %v4535_v30, %v4439_v45 }
 0x1d1   :  { %4929 = vst [vmem:[#allocation20_spill] sm:$0xff] %v4631_v27 }
 0x1d4   :  { %v1850_v31 = vpop.f32.mrb[64].mxu0  ;;  %v3248_v4 = vpop.f32.mrb[96].mxu1 }
 0x1d5   :  { %v4643_v8 = vadd.f32 %v1850_v31, %v1562_v0  ;;  %v2020_v51 = vadd.f32 %v3344_v47, %v3248_v4  ;;  %v1852_v63 = vpop.f32.mrb[65].mxu0  ;;  %v2011_v55 = vpop.f32.mrb[97].mxu1  ;;  %v1570_v47 = vadd.f32 %v4535_v30, %v4427_v36  ;;  %v3348_v31 = vadd.f32 %v4535_v30, %v4473_v6 }
 0x1d6   :  { %v2012_v37 = vadd.f32 %v3342_v15, %v2011_v55  ;;  %v1853_v43 = vpop.f32.mrb[66].mxu0  ;;  %v3249_v39 = vpop.f32.mrb[98].mxu1  ;;  %v3346_v15 = vadd.f32 %v4535_v30, %v4451_v53  ;;  %v3347_v53 = vadd.f32 %v4535_v30, %v4461_v61  ;;  %v1578_v61 = vadd.f32 %v4535_v30, %v4449_v52 }
 0x1d7   :  { %v4647_v21 = vadd.f32 %v1853_v43, %v1565_v59  ;;  %v2023_v62 = vadd.f32 %v3345_v35, %v3249_v39  ;;  %v1855_v38 = vpop.f32.mrb[67].mxu0  ;;  %v2014_v25 = vpop.f32.mrb[99].mxu1  ;;  %v2268_v27 = vmax.f32 %v2020_v51, 0.0 }
 0x1d8   :  { %v2015_v28 = vadd.f32 %v3343_v20, %v2014_v25  ;;  %v2266_v45 = vmax.f32 %v2012_v37, 0.0  ;;  %v1573_v38 = vadd.f32 %v4535_v30, %v4437_v44 }
 0x1d9   :  { %v2269_v1 = vmax.f32 %v2023_v62, 0.0  ;;  %v3349_v62 = vadd.f32 %v4535_v30, %v4483_v13 }
 0x1da   :  { %v2267_v0 = vmax.f32 %v2015_v28, 0.0 }
 0x1db   :  { %v3019_v29 = vpack.c.bf16 %v2269_v1, %v2268_v27 }
 0x1dc   :  { %v3014_v43 = vpack.c.bf16 %v2267_v0, %v2266_v45  ;;  %v1858_v4 = vpop.f32.mrb[68].mxu0  ;;  %v3252_v39 = vpop.f32.mrb[100].mxu1  ;;  %v3352_v0 = vadd.f32 %v4535_v30, %v4510_v42 }
 0x1dd   :  { %3171 = vst [vmem:[%s4910_s3 + $0x8] sm:$0xff] %v3019_v29   ;;  %v4662_v36 = vadd.f32 %v1858_v4, %v1570_v47  ;;  %v2036_v6 = vadd.f32 %v3348_v31, %v3252_v39  ;;  %v1860_v1 = vpop.f32.mrb[69].mxu0  ;;  %v2027_v25 = vpop.f32.mrb[101].mxu1  ;;  %v3350_v31 = vadd.f32 %v4535_v30, %v4495_v24  ;;  %v1581_v4 = vadd.f32 %v4535_v30, %v4459_v60 }
 0x1de   :  { %3015 = vst [vmem:[%s4910_s3] sm:$0xff] %v3014_v43   ;;  %v2028_v44 = vadd.f32 %v3346_v15, %v2027_v25  ;;  %v1861_v27 = vpop.f32.mrb[70].mxu0  ;;  %v3253_v59 = vpop.f32.mrb[102].mxu1  ;;  %v3353_v39 = vadd.f32 %v4535_v30, %v4514_v50  ;;  %v3351_v24 = vadd.f32 %v4535_v30, %v4505_v34  ;;  %v1586_v34 = vadd.f32 %v4535_v30, %v4471_v5 }
 0x1df   :  { %v4669_v13 = vadd.f32 %v1861_v27, %v1573_v38  ;;  %v2039_v35 = vadd.f32 %v3349_v62, %v3253_v59  ;;  %v1863_v51 = vpop.f32.mrb[71].mxu0  ;;  %v2030_v63 = vpop.f32.mrb[103].mxu1  ;;  %v2272_v20 = vmax.f32 %v2036_v6, 0.0 }
 0x1e0   :  { %v2031_v55 = vadd.f32 %v3347_v53, %v2030_v63  ;;  %v2270_v28 = vmax.f32 %v2028_v44, 0.0 }
 0x1e1   :  { %v2273_v37 = vmax.f32 %v2039_v35, 0.0 }
 0x1e2   :  { %v2271_v45 = vmax.f32 %v2031_v55, 0.0  ;;  %v3356_v55 = vadd.f32 %v4535_v30, %v4526_v11 }
 0x1e3   :  { %v3029_v47 = vpack.c.bf16 %v2273_v37, %v2272_v20  ;;  %v3354_v37 = vadd.f32 %v4535_v30, %v4518_v58  ;;  %v3355_v58 = vadd.f32 %v4535_v30, %v4522_v3  ;;  %v1594_v3 = vadd.f32 %v4535_v30, %v4493_v22 }
 0x1e4   :  { %v3024_v29 = vpack.c.bf16 %v2271_v45, %v2270_v28  ;;  %v1866_v15 = vpop.f32.mrb[72].mxu0  ;;  %v3256_v43 = vpop.f32.mrb[104].mxu1 }
 0x1e5   :  { %3173 = vst [vmem:[%s4910_s3 + $0x18] sm:$0xff] %v3029_v47   ;;  %v4684_v52 = vadd.f32 %v1866_v15, %v1578_v61  ;;  %v2052_v42 = vadd.f32 %v3352_v0, %v3256_v43  ;;  %v1868_v38 = vpop.f32.mrb[73].mxu0  ;;  %v2043_v62 = vpop.f32.mrb[105].mxu1  ;;  %v1589_v0 = vadd.f32 %v4535_v30, %v4481_v12  ;;  %v3357_v47 = vadd.f32 %v4535_v30, %v4530_v18 }
 0x1e6   :  { %3172 = vst [vmem:[%s4910_s3 + $0x10] sm:$0xff] %v3024_v29   ;;  %v2044_v60 = vadd.f32 %v3350_v31, %v2043_v62  ;;  %v1869_v6 = vpop.f32.mrb[74].mxu0  ;;  %v3257_v1 = vpop.f32.mrb[106].mxu1 }
 0x1e7   :  { %v4691_v50 = vadd.f32 %v1869_v6, %v1581_v4  ;;  %v2055_v25 = vadd.f32 %v3353_v39, %v3257_v1  ;;  %v1871_v53 = vpop.f32.mrb[75].mxu0  ;;  %v2046_v44 = vpop.f32.mrb[107].mxu1  ;;  %v2276_v59 = vmax.f32 %v2052_v42, 0.0 }
 0x1e8   :  { %v2047_v27 = vadd.f32 %v3351_v24, %v2046_v44  ;;  %v2274_v51 = vmax.f32 %v2044_v60, 0.0 }
 0x1e9   :  { %v2277_v35 = vmax.f32 %v2055_v25, 0.0 }
 0x1ea   :  { %v2275_v63 = vmax.f32 %v2047_v27, 0.0  ;;  %v1597_v27 = vadd.f32 %v4535_v30, %v4503_v33 }
 0x1eb   :  { %v3039_v20 = vpack.c.bf16 %v2277_v35, %v2276_v59 }
 0x1ec   :  { %v3034_v28 = vpack.c.bf16 %v2275_v63, %v2274_v51  ;;  %v1874_v45 = vpop.f32.mrb[76].mxu0  ;;  %v3260_v61 = vpop.f32.mrb[108].mxu1 }
 0x1ed   :  { %3175 = vst [vmem:[%s4910_s3 + $0x28] sm:$0xff] %v3039_v20   ;;  %v4706_v5 = vadd.f32 %v1874_v45, %v1586_v34  ;;  %v2068_v11 = vadd.f32 %v3356_v55, %v3260_v61  ;;  %v1876_v31 = vpop.f32.mrb[77].mxu0  ;;  %v2059_v29 = vpop.f32.mrb[109].mxu1 }
 0x1ee   :  { %3174 = vst [vmem:[%s4910_s3 + $0x20] sm:$0xff] %v3034_v28   ;;  %v2060_v12 = vadd.f32 %v3354_v37, %v2059_v29  ;;  %v1877_v15 = vpop.f32.mrb[78].mxu0  ;;  %v3261_v43 = vpop.f32.mrb[110].mxu1 }
 0x1ef   :  { %v4713_v18 = vadd.f32 %v1877_v15, %v1589_v0  ;;  %v2071_v4 = vadd.f32 %v3357_v47, %v3261_v43  ;;  %v1879_v39 = vpop.f32.mrb[79].mxu0  ;;  %v2062_v42 = vpop.f32.mrb[111].mxu1  ;;  %v2280_v62 = vmax.f32 %v2068_v11, 0.0  ;;  %v1602_v11 = vadd.f32 %v4535_v30, %v4508_v41 }
 0x1f0   :  { %v2063_v38 = vadd.f32 %v3355_v58, %v2062_v42  ;;  %v2278_v60 = vmax.f32 %v2060_v12, 0.0  ;;  %v1605_v12 = vadd.f32 %v4535_v30, %v4512_v49 }
 0x1f1   :  { %v2281_v24 = vmax.f32 %v2071_v4, 0.0 }
 0x1f2   :  { %v2279_v6 = vmax.f32 %v2063_v38, 0.0 }
 0x1f3   :  { %v3049_v1 = vpack.c.bf16 %v2281_v24, %v2280_v62 }
 0x1f4   :  { %v3044_v25 = vpack.c.bf16 %v2279_v6, %v2278_v60  ;;  %v1882_v53 = vpop.f32.mrb[80].mxu0  ;;  %v3264_v44 = vpop.f32.mrb[112].mxu1 }
 0x1f5   :  { %3177 = vst [vmem:[%s4910_s3 + $0x38] sm:$0xff] %v3049_v1   ;;  %v4722_v59 = vadd.f32 %v1882_v53, %v1594_v3  ;;  %v2084_v35 = vadd.f32 %v3264_v44, %v4555_v26  ;;  %v1884_v51 = vpop.f32.mrb[81].mxu0  ;;  %v2075_v63 = vpop.f32.mrb[113].mxu1  ;;  %v1610_v1 = vadd.f32 %v4535_v30, %v4516_v57 }
 0x1f6   :  { %3176 = vst [vmem:[%s4910_s3 + $0x30] sm:$0xff] %v3044_v25   ;;  %v2076_v22 = vadd.f32 %v2075_v63, %v4543_v48  ;;  %v1885_v34 = vpop.f32.mrb[82].mxu0  ;;  %v3265_v55 = vpop.f32.mrb[114].mxu1 }
 0x1f7   :  { %v4729_v20 = vadd.f32 %v1885_v34, %v1597_v27  ;;  %v2087_v33 = vadd.f32 %v3265_v55, %v4559_v46  ;;  %v1887_v37 = vpop.f32.mrb[83].mxu0  ;;  %v2078_v28 = vpop.f32.mrb[115].mxu1  ;;  %v2284_v61 = vmax.f32 %v2084_v35, 0.0  ;;  %v1613_v27 = vadd.f32 %v4535_v30, %v4520_v2 }
 0x1f8   :  { %v2079_v45 = vadd.f32 %v2078_v28, %v4547_v7  ;;  %v2282_v0 = vmax.f32 %v2076_v22, 0.0 }
 0x1f9   :  { %v2285_v26 = vmax.f32 %v2087_v33, 0.0 }
 0x1fa   :  { %v2283_v47 = vmax.f32 %v2079_v45, 0.0 }
 0x1fb   :  { %v3059_v31 = vpack.c.bf16 %v2285_v26, %v2284_v61  ;;  %v1618_v26 = vadd.f32 %v4535_v30, %v4524_v10  ;;  %v4930_v10 = vld [vmem:[#allocation15_spill] sm:$0xff] }
 0x1fc   :  { %v3054_v29 = vpack.c.bf16 %v2283_v47, %v2282_v0  ;;  %v1890_v48 = vpop.f32.mrb[84].mxu0  ;;  %v3268_v58 = vpop.f32.mrb[116].mxu1 }
 0x1fd   :  { %3179 = vst [vmem:[%s4910_s3 + $0x48] sm:$0xff] %v3059_v31   ;;  %v4740_v46 = vadd.f32 %v1890_v48, %v1602_v11  ;;  %v2100_v7 = vadd.f32 %v3268_v58, %v4579_v16  ;;  %v1892_v15 = vpop.f32.mrb[85].mxu0  ;;  %v2091_v43 = vpop.f32.mrb[117].mxu1  ;;  %v1621_v31 = vadd.f32 %v4535_v30, %v4528_v17  ;;  %v4931_v17 = vld [vmem:[#allocation20_spill] sm:$0xff] }
 0x1fe   :  { %3178 = vst [vmem:[%s4910_s3 + $0x40] sm:$0xff] %v3054_v29   ;;  %v2092_v41 = vadd.f32 %v2091_v43, %v4567_v19  ;;  %v1893_v4 = vpop.f32.mrb[86].mxu0  ;;  %v3269_v39 = vpop.f32.mrb[118].mxu1 }
 0x1ff   :  { %v4747_v42 = vadd.f32 %v1893_v4, %v1605_v12  ;;  %v2103_v49 = vadd.f32 %v3269_v39, %v4583_v54  ;;  %v1895_v38 = vpop.f32.mrb[87].mxu0  ;;  %v2094_v62 = vpop.f32.mrb[119].mxu1  ;;  %v2288_v60 = vmax.f32 %v2100_v7, 0.0  ;;  %v4932_v39 = vld [vmem:[#allocation17_spill] sm:$0xff] }
 0x200   :  { %v2095_v24 = vadd.f32 %v2094_v62, %v4571_v23  ;;  %v2286_v6 = vmax.f32 %v2092_v41, 0.0 }
 0x201   :  { %v2289_v16 = vmax.f32 %v2103_v49, 0.0 }
 0x202   :  { %v2287_v3 = vmax.f32 %v2095_v24, 0.0 }
 0x203   :  { %v3069_v25 = vpack.c.bf16 %v2289_v16, %v2288_v60  ;;  %v4933_v60 = vld [vmem:[#allocation2_spill] sm:$0xff] }
 0x204   :  { %v3064_v53 = vpack.c.bf16 %v2287_v3, %v2286_v6  ;;  %v1898_v19 = vpop.f32.mrb[88].mxu0  ;;  %v3272_v44 = vpop.f32.mrb[120].mxu1  ;;  %v1626_v16 = vadd.f32 %v4535_v30, %v4933_v60 }
 0x205   :  { %3181 = vst [vmem:[%s4910_s3 + $0x58] sm:$0xff] %v3069_v25   ;;  %v4758_v54 = vadd.f32 %v1898_v19, %v1610_v1  ;;  %v2116_v23 = vadd.f32 %v3272_v44, %v4603_v9  ;;  %v1900_v35 = vpop.f32.mrb[89].mxu0  ;;  %v2107_v51 = vpop.f32.mrb[121].mxu1 }
 0x206   :  { %3180 = vst [vmem:[%s4910_s3 + $0x50] sm:$0xff] %v3064_v53   ;;  %v2108_v57 = vadd.f32 %v2107_v51, %v4591_v14  ;;  %v1901_v63 = vpop.f32.mrb[90].mxu0  ;;  %v3273_v22 = vpop.f32.mrb[122].mxu1  ;;  %v4934_v53 = vld [vmem:[#allocation3_spill] sm:$0xff] }
 0x207   :  { %v4765_v34 = vadd.f32 %v1901_v63, %v1613_v27  ;;  %v2119_v2 = vadd.f32 %v3273_v22, %v4607_v32  ;;  %v1903_v55 = vpop.f32.mrb[91].mxu0  ;;  %v2110_v33 = vpop.f32.mrb[123].mxu1  ;;  %v2292_v28 = vmax.f32 %v2116_v23, 0.0  ;;  %v1629_v19 = vadd.f32 %v4535_v30, %v4934_v53 }
 0x208   :  { %v2111_v37 = vadd.f32 %v2110_v33, %v4595_v40  ;;  %v2290_v45 = vmax.f32 %v2108_v57, 0.0 }
 0x209   :  { %v2293_v9 = vmax.f32 %v2119_v2, 0.0 }
 0x20a   :  { %v2291_v61 = vmax.f32 %v2111_v37, 0.0 }
 0x20b   :  { %v3079_v0 = vpack.c.bf16 %v2293_v9, %v2292_v28 }
 0x20c   :  { %v3074_v47 = vpack.c.bf16 %v2291_v61, %v2290_v45  ;;  %v1906_v14 = vpop.f32.mrb[92].mxu0  ;;  %v3276_v11 = vpop.f32.mrb[124].mxu1  ;;  %v4935_v61 = vld [vmem:[#allocation4_spill] sm:$0xff] }
 0x20d   :  { %3183 = vst [vmem:[%s4910_s3 + $0x68] sm:$0xff] %v3079_v0   ;;  %v4776_v32 = vadd.f32 %v1906_v14, %v1618_v26  ;;  %v2132_v40 = vadd.f32 %v3276_v11, %v4627_v56  ;;  %v1908_v29 = vpop.f32.mrb[93].mxu0  ;;  %v2123_v48 = vpop.f32.mrb[125].mxu1  ;;  %v1634_v26 = vadd.f32 %v4535_v30, %v4935_v61  ;;  %v4936_v11 = vld [vmem:[#allocation5_spill] sm:$0xff] }
 0x20e   :  { %3182 = vst [vmem:[%s4910_s3 + $0x60] sm:$0xff] %v3074_v47   ;;  %v2124_v58 = vadd.f32 %v2123_v48, %v4930_v10  ;;  %v1909_v12 = vpop.f32.mrb[94].mxu0  ;;  %v3277_v7 = vpop.f32.mrb[126].mxu1 }
 0x20f   :  { %v4783_v15 = vadd.f32 %v1909_v12, %v1621_v31  ;;  %v2135_v43 = vadd.f32 %v3277_v7, %v4931_v17  ;;  %v1911_v41 = vpop.f32.mrb[95].mxu0  ;;  %v2126_v4 = vpop.f32.mrb[127].mxu1  ;;  %v2296_v38 = vmax.f32 %v2132_v40, 0.0  ;;  %v1637_v31 = vadd.f32 %v4535_v30, %v4936_v11 }
 0x210   :  { %v2127_v49 = vadd.f32 %v2126_v4, %v4932_v39  ;;  %v2294_v62 = vmax.f32 %v2124_v58, 0.0 }
 0x211   :  { %v2297_v56 = vmax.f32 %v2135_v43, 0.0 }
 0x212   :  { %v2295_v24 = vmax.f32 %v2127_v49, 0.0 }
 0x213   :  { %v3089_v6 = vpack.c.bf16 %v2297_v56, %v2296_v38  ;;  %v4937_v38 = vld [vmem:[#allocation6_spill] sm:$0xff] }
 0x214   :  { %v3084_v3 = vpack.c.bf16 %v2295_v24, %v2294_v62  ;;  %v1914_v1 = vpop.f32.mrb[96].mxu0  ;;  %v3280_v25 = vpop.f32.mrb[128].mxu1  ;;  %v1642_v56 = vadd.f32 %v4535_v30, %v4937_v38 }
 0x215   :  { %3185 = vst [vmem:[%s4910_s3 + $0x78] sm:$0xff] %v3089_v6   ;;  %v4794_v44 = vadd.f32 %v1914_v1, %v1626_v16  ;;  %v2148_v27 = vadd.f32 %v3280_v25, %v4662_v36  ;;  %v1916_v23 = vpop.f32.mrb[97].mxu0  ;;  %v2139_v35 = vpop.f32.mrb[129].mxu1  ;;  %v4938_v16 = vld [vmem:[#allocation7_spill] sm:$0xff] }
 0x216   :  { %3184 = vst [vmem:[%s4910_s3 + $0x70] sm:$0xff] %v3084_v3   ;;  %v2140_v51 = vadd.f32 %v2139_v35, %v4643_v8  ;;  %v1917_v57 = vpop.f32.mrb[98].mxu0  ;;  %v3281_v63 = vpop.f32.mrb[130].mxu1  ;;  %v1645_v6 = vadd.f32 %v4535_v30, %v4938_v16 }
 0x217   :  { %v4801_v22 = vadd.f32 %v1917_v57, %v1629_v19  ;;  %v2151_v2 = vadd.f32 %v3281_v63, %v4669_v13  ;;  %v1919_v55 = vpop.f32.mrb[99].mxu0  ;;  %v2142_v33 = vpop.f32.mrb[131].mxu1  ;;  %v2300_v28 = vmax.f32 %v2148_v27, 0.0 }
 0x218   :  { %v2143_v37 = vadd.f32 %v2142_v33, %v4647_v21  ;;  %v2298_v9 = vmax.f32 %v2140_v51, 0.0  ;;  %v4939_v33 = vld [vmem:[#allocation8_spill] sm:$0xff] }
 0x219   :  { %v2301_v36 = vmax.f32 %v2151_v2, 0.0 }
 0x21a   :  { %v2299_v45 = vmax.f32 %v2143_v37, 0.0  ;;  %v1650_v37 = vadd.f32 %v4535_v30, %v4939_v33 }
 0x21b   :  { %v3099_v0 = vpack.c.bf16 %v2301_v36, %v2300_v28 }
 0x21c   :  { %v3094_v47 = vpack.c.bf16 %v2299_v45, %v2298_v9  ;;  %v1922_v8 = vpop.f32.mrb[100].mxu0  ;;  %v3284_v14 = vpop.f32.mrb[132].mxu1  ;;  %v4940_v45 = vld [vmem:[#allocation9_spill] sm:$0xff] }
 0x21d   :  { %3187 = vst [vmem:[%s4910_s3 + $0x88] sm:$0xff] %v3099_v0   ;;  %v4812_v13 = vadd.f32 %v1922_v8, %v1634_v26  ;;  %v2164_v21 = vadd.f32 %v3284_v14, %v4706_v5  ;;  %v1924_v40 = vpop.f32.mrb[101].mxu0  ;;  %v2155_v29 = vpop.f32.mrb[133].mxu1  ;;  %v1653_v61 = vadd.f32 %v4535_v30, %v4940_v45 }
 0x21e   :  { %3186 = vst [vmem:[%s4910_s3 + $0x80] sm:$0xff] %v3094_v47   ;;  %v2156_v48 = vadd.f32 %v2155_v29, %v4684_v52  ;;  %v1925_v10 = vpop.f32.mrb[102].mxu0  ;;  %v3285_v58 = vpop.f32.mrb[134].mxu1 }
 0x21f   :  { %v4819_v12 = vadd.f32 %v1925_v10, %v1637_v31  ;;  %v2167_v7 = vadd.f32 %v3285_v58, %v4713_v18  ;;  %v1927_v17 = vpop.f32.mrb[103].mxu0  ;;  %v2158_v43 = vpop.f32.mrb[135].mxu1  ;;  %v2304_v4 = vmax.f32 %v2164_v21, 0.0 }
 0x220   :  { %v2159_v41 = vadd.f32 %v2158_v43, %v4691_v50  ;;  %v2302_v39 = vmax.f32 %v2156_v48, 0.0 }
 0x221   :  { %v2305_v5 = vmax.f32 %v2167_v7, 0.0  ;;  %v4941_v7 = vld [vmem:[#allocation10_spill] sm:$0xff] }
 0x222   :  { %v2303_v49 = vmax.f32 %v2159_v41, 0.0  ;;  %v1658_v17 = vadd.f32 %v4535_v30, %v4941_v7 }
 0x223   :  { %v3109_v62 = vpack.c.bf16 %v2305_v5, %v2304_v4  ;;  %v4942_v5 = vld [vmem:[#allocation11_spill] sm:$0xff] }
 0x224   :  { %v3104_v24 = vpack.c.bf16 %v2303_v49, %v2302_v39  ;;  %v1930_v52 = vpop.f32.mrb[104].mxu0  ;;  %v3288_v60 = vpop.f32.mrb[136].mxu1  ;;  %v1661_v39 = vadd.f32 %v4535_v30, %v4942_v5 }
 0x225   :  { %3189 = vst [vmem:[%s4910_s3 + $0x98] sm:$0xff] %v3109_v62   ;;  %v4830_v18 = vadd.f32 %v1930_v52, %v1642_v56  ;;  %v2180_v50 = vadd.f32 %v3288_v60, %v4740_v46  ;;  %v1932_v3 = vpop.f32.mrb[105].mxu0  ;;  %v2171_v1 = vpop.f32.mrb[137].mxu1 }
 0x226   :  { %3188 = vst [vmem:[%s4910_s3 + $0x90] sm:$0xff] %v3104_v24   ;;  %v2172_v25 = vadd.f32 %v2171_v1, %v4722_v59  ;;  %v1933_v53 = vpop.f32.mrb[106].mxu0  ;;  %v3289_v19 = vpop.f32.mrb[138].mxu1 }
 0x227   :  { %v4837_v27 = vadd.f32 %v1933_v53, %v1645_v6  ;;  %v2183_v23 = vadd.f32 %v3289_v19, %v4747_v42  ;;  %v1935_v35 = vpop.f32.mrb[107].mxu0  ;;  %v2174_v51 = vpop.f32.mrb[139].mxu1  ;;  %v2308_v63 = vmax.f32 %v2180_v50, 0.0  ;;  %v4943_v53 = vld [vmem:[#allocation12_spill] sm:$0xff] }
 0x228   :  { %v2175_v57 = vadd.f32 %v2174_v51, %v4729_v20  ;;  %v2306_v2 = vmax.f32 %v2172_v25, 0.0  ;;  %v1666_v19 = vadd.f32 %v4535_v30, %v4943_v53 }
 0x229   :  { %v2309_v46 = vmax.f32 %v2183_v23, 0.0 }
 0x22a   :  { %v2307_v55 = vmax.f32 %v2175_v57, 0.0  ;;  %v4944_v57 = vld [vmem:[#allocation13_spill] sm:$0xff] }
 0x22b   :  { %v3119_v28 = vpack.c.bf16 %v2309_v46, %v2308_v63  ;;  %v1669_v63 = vadd.f32 %v4535_v30, %v4944_v57 }
 0x22c   :  { %v3114_v36 = vpack.c.bf16 %v2307_v55, %v2306_v2  ;;  %v1938_v59 = vpop.f32.mrb[108].mxu0  ;;  %v3292_v9 = vpop.f32.mrb[140].mxu1 }
 0x22d   :  { %3191 = vst [vmem:[%s4910_s3 + $0xa8] sm:$0xff] %v3119_v28   ;;  %v1939_v42 = vadd.f32 %v1938_v59, %v1650_v37  ;;  %v2196_v20 = vadd.f32 %v3292_v9, %v4776_v32  ;;  %v1940_v26 = vpop.f32.mrb[109].mxu0  ;;  %v2187_v0 = vpop.f32.mrb[141].mxu1 }
 0x22e   :  { %3190 = vst [vmem:[%s4910_s3 + $0xa0] sm:$0xff] %v3114_v36   ;;  %v2188_v47 = vadd.f32 %v2187_v0, %v4758_v54  ;;  %v1941_v8 = vpop.f32.mrb[110].mxu0  ;;  %v3293_v14 = vpop.f32.mrb[142].mxu1  ;;  %v4945_v0 = vld [vmem:[#allocation14_spill] sm:$0xff] }
 0x22f   :  { %v1942_v11 = vadd.f32 %v1941_v8, %v1653_v61  ;;  %v2199_v31 = vadd.f32 %v3293_v14, %v4783_v15  ;;  %v1943_v21 = vpop.f32.mrb[111].mxu0  ;;  %v2190_v40 = vpop.f32.mrb[143].mxu1  ;;  %v2312_v48 = vmax.f32 %v2196_v20, 0.0 }
 0x230   :  { %v2191_v29 = vadd.f32 %v2190_v40, %v4765_v34  ;;  %v2310_v32 = vmax.f32 %v2188_v47, 0.0  ;;  %v1674_v47 = vadd.f32 %v4535_v30, %v4945_v0 }
 0x231   :  { %v2313_v10 = vmax.f32 %v2199_v31, 0.0 }
 0x232   :  { %v2311_v58 = vmax.f32 %v2191_v29, 0.0 }
 0x233   :  { %v3129_v43 = vpack.c.bf16 %v2313_v10, %v2312_v48 }
 0x234   :  { %v3124_v41 = vpack.c.bf16 %v2311_v58, %v2310_v32  ;;  %v1946_v4 = vpop.f32.mrb[112].mxu0  ;;  %v3296_v54 = vpop.f32.mrb[144].mxu1 }
 0x235   :  { %3193 = vst [vmem:[%s4910_s3 + $0xb8] sm:$0xff] %v3129_v43   ;;  %v1947_v15 = vadd.f32 %v1946_v4, %v1658_v17  ;;  %v2212_v34 = vadd.f32 %v3296_v54, %v4812_v13  ;;  %v1948_v49 = vpop.f32.mrb[113].mxu0  ;;  %v2203_v38 = vpop.f32.mrb[145].mxu1 }
 0x236   :  { %3192 = vst [vmem:[%s4910_s3 + $0xb0] sm:$0xff] %v3124_v41   ;;  %v2204_v56 = vadd.f32 %v2203_v38, %v4794_v44  ;;  %v1949_v62 = vpop.f32.mrb[114].mxu0  ;;  %v3297_v24 = vpop.f32.mrb[146].mxu1  ;;  %v4947_v49 = vld [vmem:[#allocation18_spill] sm:$0xff] }
 0x237   :  { %v1950_v52 = vadd.f32 %v1949_v62, %v1661_v39  ;;  %v2215_v60 = vadd.f32 %v3297_v24, %v4819_v12  ;;  %v1951_v16 = vpop.f32.mrb[115].mxu0  ;;  %v2206_v6 = vpop.f32.mrb[147].mxu1  ;;  %v2316_v3 = vmax.f32 %v2212_v34, 0.0  ;;  %v1682_v38 = vadd.f32 %v4535_v30, %v4947_v49 }
 0x238   :  { %v2207_v50 = vadd.f32 %v2206_v6, %v4801_v22  ;;  %v2314_v13 = vmax.f32 %v2204_v56, 0.0  ;;  %v4948_v16 = vld [vmem:[#allocation19_spill] sm:$0xff] }
 0x239   :  { %v2317_v1 = vmax.f32 %v2215_v60, 0.0 }
 0x23a   :  { %v2315_v25 = vmax.f32 %v2207_v50, 0.0 }
 0x23b   :  { %v3139_v23 = vpack.c.bf16 %v2317_v1, %v2316_v3 }
 0x23c   :  { %v3134_v35 = vpack.c.bf16 %v2315_v25, %v2314_v13  ;;  %v1954_v51 = vpop.f32.mrb[116].mxu0  ;;  %v3300_v44 = vpop.f32.mrb[148].mxu1 }
 0x23d   :  { %3195 = vst [vmem:[%s4910_s3 + $0xc8] sm:$0xff] %v3139_v23   ;;  %v1955_v12 = vadd.f32 %v1954_v51, %v1666_v19  ;;  %v2228_v22 = vadd.f32 %v3300_v44, %v1939_v42  ;;  %v1956_v46 = vpop.f32.mrb[117].mxu0  ;;  %v2219_v2 = vpop.f32.mrb[149].mxu1 }
 0x23e   :  { %3194 = vst [vmem:[%s4910_s3 + $0xc0] sm:$0xff] %v3134_v35   ;;  %v2220_v55 = vadd.f32 %v2219_v2, %v4830_v18  ;;  %v1957_v33 = vpop.f32.mrb[118].mxu0  ;;  %v3301_v37 = vpop.f32.mrb[150].mxu1  ;;  %v4946_v18 = vld [vmem:[#allocation16_spill] sm:$0xff] }
 0x23f   :  { %v1958_v28 = vadd.f32 %v1957_v33, %v1669_v63  ;;  %v2231_v36 = vadd.f32 %v3301_v37, %v1942_v11  ;;  %v1959_v59 = vpop.f32.mrb[119].mxu0  ;;  %v2222_v9 = vpop.f32.mrb[151].mxu1  ;;  %v2320_v61 = vmax.f32 %v2228_v22, 0.0  ;;  %v1677_v40 = vadd.f32 %v4535_v30, %v4946_v18 }
 0x240   :  { %v2223_v45 = vadd.f32 %v2222_v9, %v4837_v27  ;;  %v2318_v26 = vmax.f32 %v2220_v55, 0.0 }
 0x241   :  { %v2321_v20 = vmax.f32 %v2231_v36, 0.0 }
 0x242   :  { %v2319_v42 = vmax.f32 %v2223_v45, 0.0 }
 0x243   :  { %v3149_v8 = vpack.c.bf16 %v2321_v20, %v2320_v61 }
 0x244   :  { %v3144_v14 = vpack.c.bf16 %v2319_v42, %v2318_v26  ;;  %v1962_v31 = vpop.f32.mrb[120].mxu0  ;;  %v3304_v21 = vpop.f32.mrb[152].mxu1 }
 0x245   :  { %3197 = vst [vmem:[%s4910_s3 + $0xd8] sm:$0xff] %v3149_v8   ;;  %v1963_v11 = vadd.f32 %v1962_v31, %v1674_v47  ;;  %v2244_v27 = vadd.f32 %v3304_v21, %v1955_v12  ;;  %v1964_v29 = vpop.f32.mrb[121].mxu0  ;;  %v2235_v48 = vpop.f32.mrb[153].mxu1 }
 0x246   :  { %3196 = vst [vmem:[%s4910_s3 + $0xd0] sm:$0xff] %v3144_v14   ;;  %v2236_v10 = vadd.f32 %v2235_v48, %v1947_v15  ;;  %v1965_v32 = vpop.f32.mrb[122].mxu0  ;;  %v3305_v58 = vpop.f32.mrb[154].mxu1  ;;  %v1685_v15 = vadd.f32 %v4535_v30, %v4948_v16 }
 0x247   :  { %v1966_v7 = vadd.f32 %v1965_v32, %v1677_v40  ;;  %v2247_v17 = vadd.f32 %v3305_v58, %v1958_v28  ;;  %v1967_v43 = vpop.f32.mrb[123].mxu0  ;;  %v2238_v41 = vpop.f32.mrb[155].mxu1  ;;  %v2324_v54 = vmax.f32 %v2244_v27, 0.0 }
 0x248   :  { %v2239_v4 = vadd.f32 %v2238_v41, %v1950_v52  ;;  %v2322_v39 = vmax.f32 %v2236_v10, 0.0 }
 0x249   :  { %v2325_v5 = vmax.f32 %v2247_v17, 0.0 }
 0x24a   :  { %v2323_v34 = vmax.f32 %v2239_v4, 0.0 }
 0x24b   :  { %v3159_v56 = vpack.c.bf16 %v2325_v5, %v2324_v54 }
 0x24c   :  { %v3154_v62 = vpack.c.bf16 %v2323_v34, %v2322_v39  ;;  %v1970_v24 = vpop.f32.mrb[124].mxu0  ;;  %v3308_v60 = vpop.f32.mrb[156].mxu1 }
 0x24d   :  { %3199 = vst [vmem:[%s4910_s3 + $0xe8] sm:$0xff] %v3159_v56   ;;  %v1971_v6 = vadd.f32 %v1970_v24, %v1682_v38  ;;  %v1972_v52 = vpop.f32.mrb[125].mxu0  ;;  %v2251_v50 = vpop.f32.mrb[157].mxu1 }
 0x24e   :  { %3198 = vst [vmem:[%s4910_s3 + $0xe0] sm:$0xff] %v3154_v62   ;;  %v2252_v3 = vadd.f32 %v2251_v50, %v1963_v11  ;;  %v1973_v1 = vpop.f32.mrb[126].mxu0  ;;  %v3309_v13 = vpop.f32.mrb[158].mxu1 }
 0x24f   :  { %v2260_v25 = vadd.f32 %v3308_v60, %v1971_v6  ;;  %v1974_v53 = vadd.f32 %v1973_v1, %v1685_v15  ;;  %v1975_v19 = vpop.f32.mrb[127].mxu0  ;;  %v2254_v23 = vpop.f32.mrb[159].mxu1 }
 0x250   :  { %v2255_v35 = vadd.f32 %v2254_v23, %v1966_v7  ;;  %v2326_v51 = vmax.f32 %v2252_v3, 0.0 }
 0x251   :  { %v2263_v30 = vadd.f32 %v3309_v13, %v1974_v53  ;;  %v2328_v57 = vmax.f32 %v2260_v25, 0.0 }
 0x252   :  { %v2327_v44 = vmax.f32 %v2255_v35, 0.0 }
 0x253   :  { %v2329_v63 = vmax.f32 %v2263_v30, 0.0 }
 0x254   :  { %v3164_v12 = vpack.c.bf16 %v2327_v44, %v2326_v51 }
 0x255   :  { %v3169_v22 = vpack.c.bf16 %v2329_v63, %v2328_v57 }
 0x256   :  { %3200 = vst [vmem:[%s4910_s3 + $0xf0] sm:$0xff] %v3164_v12  }
 0x257   :  { %3201 = vst [vmem:[%s4910_s3 + $0xf8] sm:$0xff] %v3169_v22  }

</bundles_post_ra>
